<compile_context>
chip_gen: v7x
topology: tpu7x:2x2x1
jax: 0.10.0
libtpu: 0.0.40
codegen_flags: <defaults>
</compile_context>

<pallas_src>
import functools

import jax
import jax.numpy as jnp
from jax.experimental import pallas as pl
from jax.experimental.pallas import tpu as pltpu

NEG_SLOPE = 0.01  # PyTorch nn.LeakyReLU default negative_slope

ENC_SPECS = [(512, 512), (512, 512), (512, 256), (256, 256), (256, 256),
             (256, 128), (128, 64), (64, 32), (32, 32), (32, 32),
             (32, 16), (16, 16)]
DEC_SPECS = [(16, 16), (16, 32), (32, 32), (32, 32), (32, 64), (64, 128),
             (128, 256), (256, 256), (256, 256), (256, 512), (512, 512),
             (512, 512)]

# (is_deconv, apply_leaky_relu) per layer, encoder first then decoder.
LAYER_FLAGS = tuple(
    [(False, i < len(ENC_SPECS) - 1) for i in range(len(ENC_SPECS))]
    + [(True, i < len(DEC_SPECS) - 1) for i in range(len(DEC_SPECS))]
)


# ---------------------------------------------------------------------------
# Fused Pallas kernel: the whole 24-layer network for one batch element.
# refs = (x_ref, w_0..w_23, b_0..b_23, o_ref, pad_scratch)
# ---------------------------------------------------------------------------
def _fused_conv1dnet_kernel(*refs, layer_flags):
    n_layers = len(layer_flags)
    x_ref = refs[0]
    w_refs = refs[1:1 + n_layers]                    # (2*Cin, Cout) bf16 each
    b_refs = refs[1 + n_layers:1 + 2 * n_layers]     # (1, Cout) f32 each
    o_ref = refs[1 + 2 * n_layers]
    pad_ref = refs[2 + 2 * n_layers]                 # VMEM scratch for deconv pad

    a = x_ref[0]                                     # (L0, C0) f32, one batch elem

    for w_ref, b_ref, (is_deconv, apply_act) in zip(w_refs, b_refs, layer_flags):
        cin = w_ref.shape[0] // 2

        if is_deconv:
            # ConvTranspose1d(k=2, s=1) == Conv1d(k=2) on a zero-padded input with
            # swapped taps (taps already swapped in the packed weight).  Build the
            # padded activation in VMEM scratch instead of jnp.pad.
            lin0 = a.shape[0]
            zero_row = jnp.zeros((1, cin), jnp.float32)
            pad_ref[0:1, :cin] = zero_row
            pad_ref[lin0 + 1:lin0 + 2, :cin] = zero_row
            pad_ref[1:lin0 + 1, :cin] = a
            a = pad_ref[0:lin0 + 2, :cin]

        lin = a.shape[0]
        lout = lin - 1
        xa = a[:lout, :]       # rows t
        xb = a[1:lin, :]       # rows t + 1

        if cin % 128 == 0:
            # Lane-aligned concat of both taps -> single MXU matmul with K=2*Cin.
            xcat = jnp.concatenate([xa, xb], axis=-1).astype(jnp.bfloat16)
            y = jnp.dot(xcat, w_ref[...], preferred_element_type=jnp.float32)
        else:
            # Narrow middle layers: avoid unaligned lane concat, use two tiny dots.
            y = (jnp.dot(xa.astype(jnp.bfloat16), w_ref[:cin, :],
                         preferred_element_type=jnp.float32)
                 + jnp.dot(xb.astype(jnp.bfloat16), w_ref[cin:, :],
                           preferred_element_type=jnp.float32))

        y = y + b_ref[...]                           # bias add in f32, broadcasts
        if apply_act:
            y = jnp.where(y > 0, y, NEG_SLOPE * y)   # LeakyReLU in f32
        a = y

    o_ref[0] = a.astype(o_ref.dtype)


# ---------------------------------------------------------------------------
# Wrapper: one pallas_call for the whole forward pass.
# ---------------------------------------------------------------------------
def conv1dnet_forward(x_ncl, ws, bs):
    """x_ncl: (N, 512, L) PyTorch layout; ws/bs: packed params (pack_params)."""
    n, c0, l0 = x_ncl.shape
    x = jnp.transpose(x_ncl, (0, 2, 1))              # NCL -> NLC (channels on lanes)

    max_dec_cin = max(c for c, _ in DEC_SPECS)
    kernel = functools.partial(_fused_conv1dnet_kernel, layer_flags=LAYER_FLAGS)

    in_specs = [pl.BlockSpec((1, l0, c0), lambda i: (i, 0, 0))]
    in_specs += [pl.BlockSpec(w.shape, lambda i: (0, 0)) for w in ws]
    in_specs += [pl.BlockSpec(b.shape, lambda i: (0, 0)) for b in bs]

    out_nlc = pl.pallas_call(
        kernel,
        out_shape=jax.ShapeDtypeStruct((n, l0, c0), x.dtype),
        grid_spec=pltpu.PrefetchScalarGridSpec(
            num_scalar_prefetch=0,
            grid=(n,),
            in_specs=in_specs,
            out_specs=pl.BlockSpec((1, l0, c0), lambda i: (i, 0, 0)),
            scratch_shapes=[pltpu.VMEM((l0 + 2, max_dec_cin), jnp.float32)],
        ),
        compiler_params=pltpu.CompilerParams(
            dimension_semantics=("parallel",),
            vmem_limit_bytes=40 * 1024 * 1024,
        ),
    )(x, *ws, *bs)

    return jnp.transpose(out_nlc, (0, 2, 1))         # NLC -> NCL


# ---------------------------------------------------------------------------
# Parameters: deterministic PyTorch-layout init + one-time packing.
# ---------------------------------------------------------------------------
def init_params(key):
    """PyTorch-like uniform(-1/sqrt(fan_in*K), +...) init, f32, PyTorch layout."""
    enc, dec = [], []
    for cin, cout in ENC_SPECS:
        key, k1, k2 = jax.random.split(key, 3)
        bound = 1.0 / float(jnp.sqrt(cin * 2.0))
        w = jax.random.uniform(k1, (cout, cin, 2), jnp.float32, -bound, bound)
        b = jax.random.uniform(k2, (cout,), jnp.float32, -bound, bound)
        enc.append((w, b))
    for cin, cout in DEC_SPECS:
        key, k1, k2 = jax.random.split(key, 3)
        bound = 1.0 / float(jnp.sqrt(cin * 2.0))
        w = jax.random.uniform(k1, (cin, cout, 2), jnp.float32, -bound, bound)
        b = jax.random.uniform(k2, (cout,), jnp.float32, -bound, bound)
        dec.append((w, b))
    return enc, dec


def pack_params(enc, dec):
    """One-time packing: transpose / swap taps, concat taps into (2*Cin, Cout)
    bf16 weights, biases to (1, Cout) f32."""
    ws, bs = [], []
    for w, b in enc:
        # Conv1d weight (Cout, Cin, 2): y[t] = x[t] @ W[:,:,0].T + x[t+1] @ W[:,:,1].T + b
        w_cat = jnp.concatenate([w[:, :, 0].T, w[:, :, 1].T], axis=0)
        ws.append(w_cat.astype(jnp.bfloat16))
        bs.append(b.reshape(1, -1).astype(jnp.float32))
    for w, b in dec:
        # ConvTranspose1d weight (Cin, Cout, 2) realized as conv of zero-padded input
        # with swapped taps: y[t] = x_pad[t] @ W[:,:,1] + x_pad[t+1] @ W[:,:,0] + b
        w_cat = jnp.concatenate([w[:, :, 1], w[:, :, 0]], axis=0)
        ws.append(w_cat.astype(jnp.bfloat16))
        bs.append(b.reshape(1, -1).astype(jnp.float32))
    return ws, bs


# ---------------------------------------------------------------------------
# Pure-jnp references for correctness checks.
# ---------------------------------------------------------------------------
def conv1dnet_reference_packed(x_ncl, ws, bs):
    """Same math as the kernel (bf16 matmul inputs, f32 accumulation), pure jnp."""
    x = jnp.transpose(x_ncl, (0, 2, 1))
    for w_cat, b, (is_deconv, apply_act) in zip(ws, bs, LAYER_FLAGS):
        if is_deconv:
            x = jnp.pad(x, ((0, 0), (1, 1), (0, 0)))
        xcat = jnp.concatenate([x[:, :-1, :], x[:, 1:, :]], axis=-1).astype(jnp.bfloat16)
        y = jnp.einsum('nlc,cd->nld', xcat, w_cat,
                       preferred_element_type=jnp.float32) + b[None]
        x = jnp.where(y > 0, y, NEG_SLOPE * y) if apply_act else y
    return jnp.transpose(x, (0, 2, 1))


def conv1dnet_reference_f32(x_ncl, enc, dec):
    """Full-precision reference in the original (unpacked) parametrization."""
    def layer(x, w0, w1, b, apply_act):
        y = (jnp.einsum('nlc,cd->nld', x[:, :-1, :], w0)
             + jnp.einsum('nlc,cd->nld', x[:, 1:, :], w1) + b[None, None, :])
        return jnp.where(y > 0, y, NEG_SLOPE * y) if apply_act else y

    x = jnp.transpose(x_ncl, (0, 2, 1))
    for i, (w, b) in enumerate(enc):
        x = layer(x, w[:, :, 0].T, w[:, :, 1].T, b, i < len(enc) - 1)
    for i, (w, b) in enumerate(dec):
        x = jnp.pad(x, ((0, 0), (1, 1), (0, 0)))
        x = layer(x, w[:, :, 1], w[:, :, 0], b, i < len(dec) - 1)
    return jnp.transpose(x, (0, 2, 1))


if __name__ == "__main__":
    key = jax.random.PRNGKey(0)
    key, pkey, xkey = jax.random.split(key, 3)
    enc_params, dec_params = init_params(pkey)
    ws, bs = pack_params(enc_params, dec_params)

    # PyTorch layout (N, C=512, L=16); L must be >= 13 so the 12 length-reducing
    # encoder convs leave a non-empty latent.
    x = jax.random.normal(xkey, (2, 512, 16), jnp.float32)

    fwd = jax.jit(conv1dnet_forward)
    out = jax.block_until_ready(fwd(x, ws, bs))
    assert out.shape == x.shape, (out.shape, x.shape)

    # 1) Strict check vs a pure-jnp reference using the SAME bf16 packed weights
    #    (differences are accumulation-order only).
    ref_q = conv1dnet_reference_packed(x, ws, bs)
    scale_q = float(jnp.max(jnp.abs(ref_q))) + 1e-30
    err_q = float(jnp.max(jnp.abs(out - ref_q))) / scale_q
    assert err_q < 5e-3, f"kernel mismatch vs bf16-consistent reference: {err_q}"

    # 2) Quantization-level check vs the full-f32 reference of the module math.
    ref_f = conv1dnet_reference_f32(x, enc_params, dec_params)
    scale_f = float(jnp.max(jnp.abs(ref_f))) + 1e-30
    err_f = float(jnp.max(jnp.abs(out - ref_f))) / scale_f
    assert err_f < 0.2, f"bf16 kernel deviates too much from f32 reference: {err_f}"

    print("KERNEL_OK")
</pallas_src>

<mosaic_0001>
module attributes {stable_mosaic.version = 11 : i64} {
  func.func @_fused_conv1dnet_kernel(%arg0: i32, %arg1: memref<1x16x512xf32, #tpu.memory_space<vmem>>, %arg2: memref<1024x512xbf16, #tpu.memory_space<vmem>>, %arg3: memref<1024x512xbf16, #tpu.memory_space<vmem>>, %arg4: memref<1024x256xbf16, #tpu.memory_space<vmem>>, %arg5: memref<512x256xbf16, #tpu.memory_space<vmem>>, %arg6: memref<512x256xbf16, #tpu.memory_space<vmem>>, %arg7: memref<512x128xbf16, #tpu.memory_space<vmem>>, %arg8: memref<256x64xbf16, #tpu.memory_space<vmem>>, %arg9: memref<128x32xbf16, #tpu.memory_space<vmem>>, %arg10: memref<64x32xbf16, #tpu.memory_space<vmem>>, %arg11: memref<64x32xbf16, #tpu.memory_space<vmem>>, %arg12: memref<64x16xbf16, #tpu.memory_space<vmem>>, %arg13: memref<32x16xbf16, #tpu.memory_space<vmem>>, %arg14: memref<32x16xbf16, #tpu.memory_space<vmem>>, %arg15: memref<32x32xbf16, #tpu.memory_space<vmem>>, %arg16: memref<64x32xbf16, #tpu.memory_space<vmem>>, %arg17: memref<64x32xbf16, #tpu.memory_space<vmem>>, %arg18: memref<64x64xbf16, #tpu.memory_space<vmem>>, %arg19: memref<128x128xbf16, #tpu.memory_space<vmem>>, %arg20: memref<256x256xbf16, #tpu.memory_space<vmem>>, %arg21: memref<512x256xbf16, #tpu.memory_space<vmem>>, %arg22: memref<512x256xbf16, #tpu.memory_space<vmem>>, %arg23: memref<512x512xbf16, #tpu.memory_space<vmem>>, %arg24: memref<1024x512xbf16, #tpu.memory_space<vmem>>, %arg25: memref<1024x512xbf16, #tpu.memory_space<vmem>>, %arg26: memref<1x512xf32, #tpu.memory_space<vmem>>, %arg27: memref<1x512xf32, #tpu.memory_space<vmem>>, %arg28: memref<1x256xf32, #tpu.memory_space<vmem>>, %arg29: memref<1x256xf32, #tpu.memory_space<vmem>>, %arg30: memref<1x256xf32, #tpu.memory_space<vmem>>, %arg31: memref<1x128xf32, #tpu.memory_space<vmem>>, %arg32: memref<1x64xf32, #tpu.memory_space<vmem>>, %arg33: memref<1x32xf32, #tpu.memory_space<vmem>>, %arg34: memref<1x32xf32, #tpu.memory_space<vmem>>, %arg35: memref<1x32xf32, #tpu.memory_space<vmem>>, %arg36: memref<1x16xf32, #tpu.memory_space<vmem>>, %arg37: memref<1x16xf32, #tpu.memory_space<vmem>>, %arg38: memref<1x16xf32, #tpu.memory_space<vmem>>, %arg39: memref<1x32xf32, #tpu.memory_space<vmem>>, %arg40: memref<1x32xf32, #tpu.memory_space<vmem>>, %arg41: memref<1x32xf32, #tpu.memory_space<vmem>>, %arg42: memref<1x64xf32, #tpu.memory_space<vmem>>, %arg43: memref<1x128xf32, #tpu.memory_space<vmem>>, %arg44: memref<1x256xf32, #tpu.memory_space<vmem>>, %arg45: memref<1x256xf32, #tpu.memory_space<vmem>>, %arg46: memref<1x256xf32, #tpu.memory_space<vmem>>, %arg47: memref<1x512xf32, #tpu.memory_space<vmem>>, %arg48: memref<1x512xf32, #tpu.memory_space<vmem>>, %arg49: memref<1x512xf32, #tpu.memory_space<vmem>>, %arg50: memref<1x16x512xf32, #tpu.memory_space<vmem>>, %arg51: memref<18x512xf32, #tpu.memory_space<vmem>>) attributes {dimension_semantics = [#tpu.dimension_semantics<parallel>], iteration_bounds = array<i64: 2>, scalar_prefetch = 0 : i64, scratch_operands = 1 : i64, tpu.core_type = #tpu.core_type<tc>, window_params = [{transform_indices = @transform_0, window_bounds = array<i64: 1, 16, 512>}, {pipeline_mode = #tpu.pipeline_mode<synchronous>, transform_indices = @transform_1, window_bounds = array<i64: 1024, 512>}, {pipeline_mode = #tpu.pipeline_mode<synchronous>, transform_indices = @transform_2, window_bounds = array<i64: 1024, 512>}, {pipeline_mode = #tpu.pipeline_mode<synchronous>, transform_indices = @transform_3, window_bounds = array<i64: 1024, 256>}, {pipeline_mode = #tpu.pipeline_mode<synchronous>, transform_indices = @transform_4, window_bounds = array<i64: 512, 256>}, {pipeline_mode = #tpu.pipeline_mode<synchronous>, transform_indices = @transform_5, window_bounds = array<i64: 512, 256>}, {pipeline_mode = #tpu.pipeline_mode<synchronous>, transform_indices = @transform_6, window_bounds = array<i64: 512, 128>}, {pipeline_mode = #tpu.pipeline_mode<synchronous>, transform_indices = @transform_7, window_bounds = array<i64: 256, 64>}, {pipeline_mode = #tpu.pipeline_mode<synchronous>, transform_indices = @transform_8, window_bounds = array<i64: 128, 32>}, {pipeline_mode = #tpu.pipeline_mode<synchronous>, transform_indices = @transform_9, window_bounds = array<i64: 64, 32>}, {pipeline_mode = #tpu.pipeline_mode<synchronous>, transform_indices = @transform_10, window_bounds = array<i64: 64, 32>}, {pipeline_mode = #tpu.pipeline_mode<synchronous>, transform_indices = @transform_11, window_bounds = array<i64: 64, 16>}, {pipeline_mode = #tpu.pipeline_mode<synchronous>, transform_indices = @transform_12, window_bounds = array<i64: 32, 16>}, {pipeline_mode = #tpu.pipeline_mode<synchronous>, transform_indices = @transform_13, window_bounds = array<i64: 32, 16>}, {pipeline_mode = #tpu.pipeline_mode<synchronous>, transform_indices = @transform_14, window_bounds = array<i64: 32, 32>}, {pipeline_mode = #tpu.pipeline_mode<synchronous>, transform_indices = @transform_15, window_bounds = array<i64: 64, 32>}, {pipeline_mode = #tpu.pipeline_mode<synchronous>, transform_indices = @transform_16, window_bounds = array<i64: 64, 32>}, {pipeline_mode = #tpu.pipeline_mode<synchronous>, transform_indices = @transform_17, window_bounds = array<i64: 64, 64>}, {pipeline_mode = #tpu.pipeline_mode<synchronous>, transform_indices = @transform_18, window_bounds = array<i64: 128, 128>}, {pipeline_mode = #tpu.pipeline_mode<synchronous>, transform_indices = @transform_19, window_bounds = array<i64: 256, 256>}, {pipeline_mode = #tpu.pipeline_mode<synchronous>, transform_indices = @transform_20, window_bounds = array<i64: 512, 256>}, {pipeline_mode = #tpu.pipeline_mode<synchronous>, transform_indices = @transform_21, window_bounds = array<i64: 512, 256>}, {pipeline_mode = #tpu.pipeline_mode<synchronous>, transform_indices = @transform_22, window_bounds = array<i64: 512, 512>}, {pipeline_mode = #tpu.pipeline_mode<synchronous>, transform_indices = @transform_23, window_bounds = array<i64: 1024, 512>}, {pipeline_mode = #tpu.pipeline_mode<synchronous>, transform_indices = @transform_24, window_bounds = array<i64: 1024, 512>}, {pipeline_mode = #tpu.pipeline_mode<synchronous>, transform_indices = @transform_25, window_bounds = array<i64: 1, 512>}, {pipeline_mode = #tpu.pipeline_mode<synchronous>, transform_indices = @transform_26, window_bounds = array<i64: 1, 512>}, {pipeline_mode = #tpu.pipeline_mode<synchronous>, transform_indices = @transform_27, window_bounds = array<i64: 1, 256>}, {pipeline_mode = #tpu.pipeline_mode<synchronous>, transform_indices = @transform_28, window_bounds = array<i64: 1, 256>}, {pipeline_mode = #tpu.pipeline_mode<synchronous>, transform_indices = @transform_29, window_bounds = array<i64: 1, 256>}, {pipeline_mode = #tpu.pipeline_mode<synchronous>, transform_indices = @transform_30, window_bounds = array<i64: 1, 128>}, {pipeline_mode = #tpu.pipeline_mode<synchronous>, transform_indices = @transform_31, window_bounds = array<i64: 1, 64>}, {pipeline_mode = #tpu.pipeline_mode<synchronous>, transform_indices = @transform_32, window_bounds = array<i64: 1, 32>}, {pipeline_mode = #tpu.pipeline_mode<synchronous>, transform_indices = @transform_33, window_bounds = array<i64: 1, 32>}, {pipeline_mode = #tpu.pipeline_mode<synchronous>, transform_indices = @transform_34, window_bounds = array<i64: 1, 32>}, {pipeline_mode = #tpu.pipeline_mode<synchronous>, transform_indices = @transform_35, window_bounds = array<i64: 1, 16>}, {pipeline_mode = #tpu.pipeline_mode<synchronous>, transform_indices = @transform_36, window_bounds = array<i64: 1, 16>}, {pipeline_mode = #tpu.pipeline_mode<synchronous>, transform_indices = @transform_37, window_bounds = array<i64: 1, 16>}, {pipeline_mode = #tpu.pipeline_mode<synchronous>, transform_indices = @transform_38, window_bounds = array<i64: 1, 32>}, {pipeline_mode = #tpu.pipeline_mode<synchronous>, transform_indices = @transform_39, window_bounds = array<i64: 1, 32>}, {pipeline_mode = #tpu.pipeline_mode<synchronous>, transform_indices = @transform_40, window_bounds = array<i64: 1, 32>}, {pipeline_mode = #tpu.pipeline_mode<synchronous>, transform_indices = @transform_41, window_bounds = array<i64: 1, 64>}, {pipeline_mode = #tpu.pipeline_mode<synchronous>, transform_indices = @transform_42, window_bounds = array<i64: 1, 128>}, {pipeline_mode = #tpu.pipeline_mode<synchronous>, transform_indices = @transform_43, window_bounds = array<i64: 1, 256>}, {pipeline_mode = #tpu.pipeline_mode<synchronous>, transform_indices = @transform_44, window_bounds = array<i64: 1, 256>}, {pipeline_mode = #tpu.pipeline_mode<synchronous>, transform_indices = @transform_45, window_bounds = array<i64: 1, 256>}, {pipeline_mode = #tpu.pipeline_mode<synchronous>, transform_indices = @transform_46, window_bounds = array<i64: 1, 512>}, {pipeline_mode = #tpu.pipeline_mode<synchronous>, transform_indices = @transform_47, window_bounds = array<i64: 1, 512>}, {pipeline_mode = #tpu.pipeline_mode<synchronous>, transform_indices = @transform_48, window_bounds = array<i64: 1, 512>}, {transform_indices = @transform_49, window_bounds = array<i64: 1, 16, 512>}]} {
    %c0 = arith.constant 0 : index
    %c0_0 = arith.constant 0 : index
    %c0_1 = arith.constant 0 : index
    %0 = vector.load %arg1[%c0, %c0_0, %c0_1] : memref<1x16x512xf32, #tpu.memory_space<vmem>>, vector<1x16x512xf32>
    %1 = vector.shape_cast %0 : vector<1x16x512xf32> to vector<16x512xf32>
    %2 = vector.extract_strided_slice %1 {offsets = [0, 0], sizes = [15, 512], strides = [1, 1]} : vector<16x512xf32> to vector<15x512xf32>
    %3 = vector.extract_strided_slice %1 {offsets = [1, 0], sizes = [15, 512], strides = [1, 1]} : vector<16x512xf32> to vector<15x512xf32>
    %4 = tpu.concatenate %2, %3 in 1 : vector<15x512xf32>, vector<15x512xf32> -> vector<15x1024xf32>
    %5 = arith.truncf %4 : vector<15x1024xf32> to vector<15x1024xbf16>
    %c0_2 = arith.constant 0 : index
    %c0_3 = arith.constant 0 : index
    %6 = vector.load %arg2[%c0_2, %c0_3] : memref<1024x512xbf16, #tpu.memory_space<vmem>>, vector<1024x512xbf16>
    %cst = arith.constant dense<0.000000e+00> : vector<15x512xf32>
    %7 = tpu.matmul %5, %6, %cst {dimension_numbers = #tpu.dot_dimension_numbers<[1], [0], [0], [1], [0, 0, 1, 1], [], []>} : vector<15x1024xbf16>, vector<1024x512xbf16>, vector<15x512xf32> -> vector<15x512xf32>
    %c0_4 = arith.constant 0 : index
    %c0_5 = arith.constant 0 : index
    %8 = vector.load %arg26[%c0_4, %c0_5] : memref<1x512xf32, #tpu.memory_space<vmem>>, vector<1x512xf32>
    %9 = vector.broadcast %8 : vector<1x512xf32> to vector<15x512xf32>
    %10 = arith.addf %7, %9 : vector<15x512xf32>
    %cst_6 = arith.constant 0.000000e+00 : f32
    %11 = vector.broadcast %cst_6 : f32 to vector<15x512xf32>
    %12 = arith.cmpf ogt, %10, %11 : vector<15x512xf32>
    %cst_7 = arith.constant 0.00999999977 : f32
    %13 = vector.broadcast %cst_7 : f32 to vector<15x512xf32>
    %14 = arith.mulf %13, %10 : vector<15x512xf32>
    %15 = arith.select %12, %10, %14 : vector<15x512xi1>, vector<15x512xf32>
    %16 = vector.extract_strided_slice %15 {offsets = [0, 0], sizes = [14, 512], strides = [1, 1]} : vector<15x512xf32> to vector<14x512xf32>
    %17 = vector.extract_strided_slice %15 {offsets = [1, 0], sizes = [14, 512], strides = [1, 1]} : vector<15x512xf32> to vector<14x512xf32>
    %18 = tpu.concatenate %16, %17 in 1 : vector<14x512xf32>, vector<14x512xf32> -> vector<14x1024xf32>
    %19 = arith.truncf %18 : vector<14x1024xf32> to vector<14x1024xbf16>
    %c0_8 = arith.constant 0 : index
    %c0_9 = arith.constant 0 : index
    %20 = vector.load %arg3[%c0_8, %c0_9] : memref<1024x512xbf16, #tpu.memory_space<vmem>>, vector<1024x512xbf16>
    %cst_10 = arith.constant dense<0.000000e+00> : vector<14x512xf32>
    %21 = tpu.matmul %19, %20, %cst_10 {dimension_numbers = #tpu.dot_dimension_numbers<[1], [0], [0], [1], [0, 0, 1, 1], [], []>} : vector<14x1024xbf16>, vector<1024x512xbf16>, vector<14x512xf32> -> vector<14x512xf32>
    %c0_11 = arith.constant 0 : index
    %c0_12 = arith.constant 0 : index
    %22 = vector.load %arg27[%c0_11, %c0_12] : memref<1x512xf32, #tpu.memory_space<vmem>>, vector<1x512xf32>
    %23 = vector.broadcast %22 : vector<1x512xf32> to vector<14x512xf32>
    %24 = arith.addf %21, %23 : vector<14x512xf32>
    %cst_13 = arith.constant 0.000000e+00 : f32
    %25 = vector.broadcast %cst_13 : f32 to vector<14x512xf32>
    %26 = arith.cmpf ogt, %24, %25 : vector<14x512xf32>
    %cst_14 = arith.constant 0.00999999977 : f32
    %27 = vector.broadcast %cst_14 : f32 to vector<14x512xf32>
    %28 = arith.mulf %27, %24 : vector<14x512xf32>
    %29 = arith.select %26, %24, %28 : vector<14x512xi1>, vector<14x512xf32>
    %30 = vector.extract_strided_slice %29 {offsets = [0, 0], sizes = [13, 512], strides = [1, 1]} : vector<14x512xf32> to vector<13x512xf32>
    %31 = vector.extract_strided_slice %29 {offsets = [1, 0], sizes = [13, 512], strides = [1, 1]} : vector<14x512xf32> to vector<13x512xf32>
    %32 = tpu.concatenate %30, %31 in 1 : vector<13x512xf32>, vector<13x512xf32> -> vector<13x1024xf32>
    %33 = arith.truncf %32 : vector<13x1024xf32> to vector<13x1024xbf16>
    %c0_15 = arith.constant 0 : index
    %c0_16 = arith.constant 0 : index
    %34 = vector.load %arg4[%c0_15, %c0_16] : memref<1024x256xbf16, #tpu.memory_space<vmem>>, vector<1024x256xbf16>
    %cst_17 = arith.constant dense<0.000000e+00> : vector<13x256xf32>
    %35 = tpu.matmul %33, %34, %cst_17 {dimension_numbers = #tpu.dot_dimension_numbers<[1], [0], [0], [1], [0, 0, 1, 1], [], []>} : vector<13x1024xbf16>, vector<1024x256xbf16>, vector<13x256xf32> -> vector<13x256xf32>
    %c0_18 = arith.constant 0 : index
    %c0_19 = arith.constant 0 : index
    %36 = vector.load %arg28[%c0_18, %c0_19] : memref<1x256xf32, #tpu.memory_space<vmem>>, vector<1x256xf32>
    %37 = vector.broadcast %36 : vector<1x256xf32> to vector<13x256xf32>
    %38 = arith.addf %35, %37 : vector<13x256xf32>
    %cst_20 = arith.constant 0.000000e+00 : f32
    %39 = vector.broadcast %cst_20 : f32 to vector<13x256xf32>
    %40 = arith.cmpf ogt, %38, %39 : vector<13x256xf32>
    %cst_21 = arith.constant 0.00999999977 : f32
    %41 = vector.broadcast %cst_21 : f32 to vector<13x256xf32>
    %42 = arith.mulf %41, %38 : vector<13x256xf32>
    %43 = arith.select %40, %38, %42 : vector<13x256xi1>, vector<13x256xf32>
    %44 = vector.extract_strided_slice %43 {offsets = [0, 0], sizes = [12, 256], strides = [1, 1]} : vector<13x256xf32> to vector<12x256xf32>
    %45 = vector.extract_strided_slice %43 {offsets = [1, 0], sizes = [12, 256], strides = [1, 1]} : vector<13x256xf32> to vector<12x256xf32>
    %46 = tpu.concatenate %44, %45 in 1 : vector<12x256xf32>, vector<12x256xf32> -> vector<12x512xf32>
    %47 = arith.truncf %46 : vector<12x512xf32> to vector<12x512xbf16>
    %c0_22 = arith.constant 0 : index
    %c0_23 = arith.constant 0 : index
    %48 = vector.load %arg5[%c0_22, %c0_23] : memref<512x256xbf16, #tpu.memory_space<vmem>>, vector<512x256xbf16>
    %cst_24 = arith.constant dense<0.000000e+00> : vector<12x256xf32>
    %49 = tpu.matmul %47, %48, %cst_24 {dimension_numbers = #tpu.dot_dimension_numbers<[1], [0], [0], [1], [0, 0, 1, 1], [], []>} : vector<12x512xbf16>, vector<512x256xbf16>, vector<12x256xf32> -> vector<12x256xf32>
    %c0_25 = arith.constant 0 : index
    %c0_26 = arith.constant 0 : index
    %50 = vector.load %arg29[%c0_25, %c0_26] : memref<1x256xf32, #tpu.memory_space<vmem>>, vector<1x256xf32>
    %51 = vector.broadcast %50 : vector<1x256xf32> to vector<12x256xf32>
    %52 = arith.addf %49, %51 : vector<12x256xf32>
    %cst_27 = arith.constant 0.000000e+00 : f32
    %53 = vector.broadcast %cst_27 : f32 to vector<12x256xf32>
    %54 = arith.cmpf ogt, %52, %53 : vector<12x256xf32>
    %cst_28 = arith.constant 0.00999999977 : f32
    %55 = vector.broadcast %cst_28 : f32 to vector<12x256xf32>
    %56 = arith.mulf %55, %52 : vector<12x256xf32>
    %57 = arith.select %54, %52, %56 : vector<12x256xi1>, vector<12x256xf32>
    %58 = vector.extract_strided_slice %57 {offsets = [0, 0], sizes = [11, 256], strides = [1, 1]} : vector<12x256xf32> to vector<11x256xf32>
    %59 = vector.extract_strided_slice %57 {offsets = [1, 0], sizes = [11, 256], strides = [1, 1]} : vector<12x256xf32> to vector<11x256xf32>
    %60 = tpu.concatenate %58, %59 in 1 : vector<11x256xf32>, vector<11x256xf32> -> vector<11x512xf32>
    %61 = arith.truncf %60 : vector<11x512xf32> to vector<11x512xbf16>
    %c0_29 = arith.constant 0 : index
    %c0_30 = arith.constant 0 : index
    %62 = vector.load %arg6[%c0_29, %c0_30] : memref<512x256xbf16, #tpu.memory_space<vmem>>, vector<512x256xbf16>
    %cst_31 = arith.constant dense<0.000000e+00> : vector<11x256xf32>
    %63 = tpu.matmul %61, %62, %cst_31 {dimension_numbers = #tpu.dot_dimension_numbers<[1], [0], [0], [1], [0, 0, 1, 1], [], []>} : vector<11x512xbf16>, vector<512x256xbf16>, vector<11x256xf32> -> vector<11x256xf32>
    %c0_32 = arith.constant 0 : index
    %c0_33 = arith.constant 0 : index
    %64 = vector.load %arg30[%c0_32, %c0_33] : memref<1x256xf32, #tpu.memory_space<vmem>>, vector<1x256xf32>
    %65 = vector.broadcast %64 : vector<1x256xf32> to vector<11x256xf32>
    %66 = arith.addf %63, %65 : vector<11x256xf32>
    %cst_34 = arith.constant 0.000000e+00 : f32
    %67 = vector.broadcast %cst_34 : f32 to vector<11x256xf32>
    %68 = arith.cmpf ogt, %66, %67 : vector<11x256xf32>
    %cst_35 = arith.constant 0.00999999977 : f32
    %69 = vector.broadcast %cst_35 : f32 to vector<11x256xf32>
    %70 = arith.mulf %69, %66 : vector<11x256xf32>
    %71 = arith.select %68, %66, %70 : vector<11x256xi1>, vector<11x256xf32>
    %72 = vector.extract_strided_slice %71 {offsets = [0, 0], sizes = [10, 256], strides = [1, 1]} : vector<11x256xf32> to vector<10x256xf32>
    %73 = vector.extract_strided_slice %71 {offsets = [1, 0], sizes = [10, 256], strides = [1, 1]} : vector<11x256xf32> to vector<10x256xf32>
    %74 = tpu.concatenate %72, %73 in 1 : vector<10x256xf32>, vector<10x256xf32> -> vector<10x512xf32>
    %75 = arith.truncf %74 : vector<10x512xf32> to vector<10x512xbf16>
    %c0_36 = arith.constant 0 : index
    %c0_37 = arith.constant 0 : index
    %76 = vector.load %arg7[%c0_36, %c0_37] : memref<512x128xbf16, #tpu.memory_space<vmem>>, vector<512x128xbf16>
    %cst_38 = arith.constant dense<0.000000e+00> : vector<10x128xf32>
    %77 = tpu.matmul %75, %76, %cst_38 {dimension_numbers = #tpu.dot_dimension_numbers<[1], [0], [0], [1], [0, 0, 1, 1], [], []>} : vector<10x512xbf16>, vector<512x128xbf16>, vector<10x128xf32> -> vector<10x128xf32>
    %c0_39 = arith.constant 0 : index
    %c0_40 = arith.constant 0 : index
    %78 = vector.load %arg31[%c0_39, %c0_40] : memref<1x128xf32, #tpu.memory_space<vmem>>, vector<1x128xf32>
    %79 = vector.broadcast %78 : vector<1x128xf32> to vector<10x128xf32>
    %80 = arith.addf %77, %79 : vector<10x128xf32>
    %cst_41 = arith.constant 0.000000e+00 : f32
    %81 = vector.broadcast %cst_41 : f32 to vector<10x128xf32>
    %82 = arith.cmpf ogt, %80, %81 : vector<10x128xf32>
    %cst_42 = arith.constant 0.00999999977 : f32
    %83 = vector.broadcast %cst_42 : f32 to vector<10x128xf32>
    %84 = arith.mulf %83, %80 : vector<10x128xf32>
    %85 = arith.select %82, %80, %84 : vector<10x128xi1>, vector<10x128xf32>
    %86 = vector.extract_strided_slice %85 {offsets = [0, 0], sizes = [9, 128], strides = [1, 1]} : vector<10x128xf32> to vector<9x128xf32>
    %87 = vector.extract_strided_slice %85 {offsets = [1, 0], sizes = [9, 128], strides = [1, 1]} : vector<10x128xf32> to vector<9x128xf32>
    %88 = tpu.concatenate %86, %87 in 1 : vector<9x128xf32>, vector<9x128xf32> -> vector<9x256xf32>
    %89 = arith.truncf %88 : vector<9x256xf32> to vector<9x256xbf16>
    %c0_43 = arith.constant 0 : index
    %c0_44 = arith.constant 0 : index
    %90 = vector.load %arg8[%c0_43, %c0_44] : memref<256x64xbf16, #tpu.memory_space<vmem>>, vector<256x64xbf16>
    %cst_45 = arith.constant dense<0.000000e+00> : vector<9x64xf32>
    %91 = tpu.matmul %89, %90, %cst_45 {dimension_numbers = #tpu.dot_dimension_numbers<[1], [0], [0], [1], [0, 0, 1, 1], [], []>} : vector<9x256xbf16>, vector<256x64xbf16>, vector<9x64xf32> -> vector<9x64xf32>
    %c0_46 = arith.constant 0 : index
    %c0_47 = arith.constant 0 : index
    %92 = vector.load %arg32[%c0_46, %c0_47] : memref<1x64xf32, #tpu.memory_space<vmem>>, vector<1x64xf32>
    %93 = vector.broadcast %92 : vector<1x64xf32> to vector<9x64xf32>
    %94 = arith.addf %91, %93 : vector<9x64xf32>
    %cst_48 = arith.constant 0.000000e+00 : f32
    %95 = vector.broadcast %cst_48 : f32 to vector<9x64xf32>
    %96 = arith.cmpf ogt, %94, %95 : vector<9x64xf32>
    %cst_49 = arith.constant 0.00999999977 : f32
    %97 = vector.broadcast %cst_49 : f32 to vector<9x64xf32>
    %98 = arith.mulf %97, %94 : vector<9x64xf32>
    %99 = arith.select %96, %94, %98 : vector<9x64xi1>, vector<9x64xf32>
    %100 = vector.extract_strided_slice %99 {offsets = [0, 0], sizes = [8, 64], strides = [1, 1]} : vector<9x64xf32> to vector<8x64xf32>
    %101 = vector.extract_strided_slice %99 {offsets = [1, 0], sizes = [8, 64], strides = [1, 1]} : vector<9x64xf32> to vector<8x64xf32>
    %102 = arith.truncf %100 : vector<8x64xf32> to vector<8x64xbf16>
    %c0_50 = arith.constant 0 : index
    %c0_51 = arith.constant 0 : index
    %103 = vector.load %arg9[%c0_50, %c0_51] : memref<128x32xbf16, #tpu.memory_space<vmem>>, vector<64x32xbf16>
    %cst_52 = arith.constant dense<0.000000e+00> : vector<8x32xf32>
    %104 = tpu.matmul %102, %103, %cst_52 {dimension_numbers = #tpu.dot_dimension_numbers<[1], [0], [0], [1], [0, 0, 1, 1], [], []>} : vector<8x64xbf16>, vector<64x32xbf16>, vector<8x32xf32> -> vector<8x32xf32>
    %105 = arith.truncf %101 : vector<8x64xf32> to vector<8x64xbf16>
    %c64 = arith.constant 64 : index
    %c0_53 = arith.constant 0 : index
    %106 = vector.load %arg9[%c64, %c0_53] : memref<128x32xbf16, #tpu.memory_space<vmem>>, vector<64x32xbf16>
    %cst_54 = arith.constant dense<0.000000e+00> : vector<8x32xf32>
    %107 = tpu.matmul %105, %106, %cst_54 {dimension_numbers = #tpu.dot_dimension_numbers<[1], [0], [0], [1], [0, 0, 1, 1], [], []>} : vector<8x64xbf16>, vector<64x32xbf16>, vector<8x32xf32> -> vector<8x32xf32>
    %108 = arith.addf %104, %107 : vector<8x32xf32>
    %c0_55 = arith.constant 0 : index
    %c0_56 = arith.constant 0 : index
    %109 = vector.load %arg33[%c0_55, %c0_56] : memref<1x32xf32, #tpu.memory_space<vmem>>, vector<1x32xf32>
    %110 = vector.broadcast %109 : vector<1x32xf32> to vector<8x32xf32>
    %111 = arith.addf %108, %110 : vector<8x32xf32>
    %cst_57 = arith.constant 0.000000e+00 : f32
    %112 = vector.broadcast %cst_57 : f32 to vector<8x32xf32>
    %113 = arith.cmpf ogt, %111, %112 : vector<8x32xf32>
    %cst_58 = arith.constant 0.00999999977 : f32
    %114 = vector.broadcast %cst_58 : f32 to vector<8x32xf32>
    %115 = arith.mulf %114, %111 : vector<8x32xf32>
    %116 = arith.select %113, %111, %115 : vector<8x32xi1>, vector<8x32xf32>
    %117 = vector.extract_strided_slice %116 {offsets = [0, 0], sizes = [7, 32], strides = [1, 1]} : vector<8x32xf32> to vector<7x32xf32>
    %118 = vector.extract_strided_slice %116 {offsets = [1, 0], sizes = [7, 32], strides = [1, 1]} : vector<8x32xf32> to vector<7x32xf32>
    %119 = arith.truncf %117 : vector<7x32xf32> to vector<7x32xbf16>
    %c0_59 = arith.constant 0 : index
    %c0_60 = arith.constant 0 : index
    %120 = vector.load %arg10[%c0_59, %c0_60] : memref<64x32xbf16, #tpu.memory_space<vmem>>, vector<32x32xbf16>
    %cst_61 = arith.constant dense<0.000000e+00> : vector<7x32xf32>
    %121 = tpu.matmul %119, %120, %cst_61 {dimension_numbers = #tpu.dot_dimension_numbers<[1], [0], [0], [1], [0, 0, 1, 1], [], []>} : vector<7x32xbf16>, vector<32x32xbf16>, vector<7x32xf32> -> vector<7x32xf32>
    %122 = arith.truncf %118 : vector<7x32xf32> to vector<7x32xbf16>
    %c32 = arith.constant 32 : index
    %c0_62 = arith.constant 0 : index
    %123 = vector.load %arg10[%c32, %c0_62] : memref<64x32xbf16, #tpu.memory_space<vmem>>, vector<32x32xbf16>
    %cst_63 = arith.constant dense<0.000000e+00> : vector<7x32xf32>
    %124 = tpu.matmul %122, %123, %cst_63 {dimension_numbers = #tpu.dot_dimension_numbers<[1], [0], [0], [1], [0, 0, 1, 1], [], []>} : vector<7x32xbf16>, vector<32x32xbf16>, vector<7x32xf32> -> vector<7x32xf32>
    %125 = arith.addf %121, %124 : vector<7x32xf32>
    %c0_64 = arith.constant 0 : index
    %c0_65 = arith.constant 0 : index
    %126 = vector.load %arg34[%c0_64, %c0_65] : memref<1x32xf32, #tpu.memory_space<vmem>>, vector<1x32xf32>
    %127 = vector.broadcast %126 : vector<1x32xf32> to vector<7x32xf32>
    %128 = arith.addf %125, %127 : vector<7x32xf32>
    %cst_66 = arith.constant 0.000000e+00 : f32
    %129 = vector.broadcast %cst_66 : f32 to vector<7x32xf32>
    %130 = arith.cmpf ogt, %128, %129 : vector<7x32xf32>
    %cst_67 = arith.constant 0.00999999977 : f32
    %131 = vector.broadcast %cst_67 : f32 to vector<7x32xf32>
    %132 = arith.mulf %131, %128 : vector<7x32xf32>
    %133 = arith.select %130, %128, %132 : vector<7x32xi1>, vector<7x32xf32>
    %134 = vector.extract_strided_slice %133 {offsets = [0, 0], sizes = [6, 32], strides = [1, 1]} : vector<7x32xf32> to vector<6x32xf32>
    %135 = vector.extract_strided_slice %133 {offsets = [1, 0], sizes = [6, 32], strides = [1, 1]} : vector<7x32xf32> to vector<6x32xf32>
    %136 = arith.truncf %134 : vector<6x32xf32> to vector<6x32xbf16>
    %c0_68 = arith.constant 0 : index
    %c0_69 = arith.constant 0 : index
    %137 = vector.load %arg11[%c0_68, %c0_69] : memref<64x32xbf16, #tpu.memory_space<vmem>>, vector<32x32xbf16>
    %cst_70 = arith.constant dense<0.000000e+00> : vector<6x32xf32>
    %138 = tpu.matmul %136, %137, %cst_70 {dimension_numbers = #tpu.dot_dimension_numbers<[1], [0], [0], [1], [0, 0, 1, 1], [], []>} : vector<6x32xbf16>, vector<32x32xbf16>, vector<6x32xf32> -> vector<6x32xf32>
    %139 = arith.truncf %135 : vector<6x32xf32> to vector<6x32xbf16>
    %c32_71 = arith.constant 32 : index
    %c0_72 = arith.constant 0 : index
    %140 = vector.load %arg11[%c32_71, %c0_72] : memref<64x32xbf16, #tpu.memory_space<vmem>>, vector<32x32xbf16>
    %cst_73 = arith.constant dense<0.000000e+00> : vector<6x32xf32>
    %141 = tpu.matmul %139, %140, %cst_73 {dimension_numbers = #tpu.dot_dimension_numbers<[1], [0], [0], [1], [0, 0, 1, 1], [], []>} : vector<6x32xbf16>, vector<32x32xbf16>, vector<6x32xf32> -> vector<6x32xf32>
    %142 = arith.addf %138, %141 : vector<6x32xf32>
    %c0_74 = arith.constant 0 : index
    %c0_75 = arith.constant 0 : index
    %143 = vector.load %arg35[%c0_74, %c0_75] : memref<1x32xf32, #tpu.memory_space<vmem>>, vector<1x32xf32>
    %144 = vector.broadcast %143 : vector<1x32xf32> to vector<6x32xf32>
    %145 = arith.addf %142, %144 : vector<6x32xf32>
    %cst_76 = arith.constant 0.000000e+00 : f32
    %146 = vector.broadcast %cst_76 : f32 to vector<6x32xf32>
    %147 = arith.cmpf ogt, %145, %146 : vector<6x32xf32>
    %cst_77 = arith.constant 0.00999999977 : f32
    %148 = vector.broadcast %cst_77 : f32 to vector<6x32xf32>
    %149 = arith.mulf %148, %145 : vector<6x32xf32>
    %150 = arith.select %147, %145, %149 : vector<6x32xi1>, vector<6x32xf32>
    %151 = vector.extract_strided_slice %150 {offsets = [0, 0], sizes = [5, 32], strides = [1, 1]} : vector<6x32xf32> to vector<5x32xf32>
    %152 = vector.extract_strided_slice %150 {offsets = [1, 0], sizes = [5, 32], strides = [1, 1]} : vector<6x32xf32> to vector<5x32xf32>
    %153 = arith.truncf %151 : vector<5x32xf32> to vector<5x32xbf16>
    %c0_78 = arith.constant 0 : index
    %c0_79 = arith.constant 0 : index
    %154 = vector.load %arg12[%c0_78, %c0_79] : memref<64x16xbf16, #tpu.memory_space<vmem>>, vector<32x16xbf16>
    %cst_80 = arith.constant dense<0.000000e+00> : vector<5x16xf32>
    %155 = tpu.matmul %153, %154, %cst_80 {dimension_numbers = #tpu.dot_dimension_numbers<[1], [0], [0], [1], [0, 0, 1, 1], [], []>} : vector<5x32xbf16>, vector<32x16xbf16>, vector<5x16xf32> -> vector<5x16xf32>
    %156 = arith.truncf %152 : vector<5x32xf32> to vector<5x32xbf16>
    %c32_81 = arith.constant 32 : index
    %c0_82 = arith.constant 0 : index
    %157 = vector.load %arg12[%c32_81, %c0_82] : memref<64x16xbf16, #tpu.memory_space<vmem>>, vector<32x16xbf16>
    %cst_83 = arith.constant dense<0.000000e+00> : vector<5x16xf32>
    %158 = tpu.matmul %156, %157, %cst_83 {dimension_numbers = #tpu.dot_dimension_numbers<[1], [0], [0], [1], [0, 0, 1, 1], [], []>} : vector<5x32xbf16>, vector<32x16xbf16>, vector<5x16xf32> -> vector<5x16xf32>
    %159 = arith.addf %155, %158 : vector<5x16xf32>
    %c0_84 = arith.constant 0 : index
    %c0_85 = arith.constant 0 : index
    %160 = vector.load %arg36[%c0_84, %c0_85] : memref<1x16xf32, #tpu.memory_space<vmem>>, vector<1x16xf32>
    %161 = vector.broadcast %160 : vector<1x16xf32> to vector<5x16xf32>
    %162 = arith.addf %159, %161 : vector<5x16xf32>
    %cst_86 = arith.constant 0.000000e+00 : f32
    %163 = vector.broadcast %cst_86 : f32 to vector<5x16xf32>
    %164 = arith.cmpf ogt, %162, %163 : vector<5x16xf32>
    %cst_87 = arith.constant 0.00999999977 : f32
    %165 = vector.broadcast %cst_87 : f32 to vector<5x16xf32>
    %166 = arith.mulf %165, %162 : vector<5x16xf32>
    %167 = arith.select %164, %162, %166 : vector<5x16xi1>, vector<5x16xf32>
    %168 = vector.extract_strided_slice %167 {offsets = [0, 0], sizes = [4, 16], strides = [1, 1]} : vector<5x16xf32> to vector<4x16xf32>
    %169 = vector.extract_strided_slice %167 {offsets = [1, 0], sizes = [4, 16], strides = [1, 1]} : vector<5x16xf32> to vector<4x16xf32>
    %170 = arith.truncf %168 : vector<4x16xf32> to vector<4x16xbf16>
    %c0_88 = arith.constant 0 : index
    %c0_89 = arith.constant 0 : index
    %171 = vector.load %arg13[%c0_88, %c0_89] : memref<32x16xbf16, #tpu.memory_space<vmem>>, vector<16x16xbf16>
    %cst_90 = arith.constant dense<0.000000e+00> : vector<4x16xf32>
    %172 = tpu.matmul %170, %171, %cst_90 {dimension_numbers = #tpu.dot_dimension_numbers<[1], [0], [0], [1], [0, 0, 1, 1], [], []>} : vector<4x16xbf16>, vector<16x16xbf16>, vector<4x16xf32> -> vector<4x16xf32>
    %173 = arith.truncf %169 : vector<4x16xf32> to vector<4x16xbf16>
    %c16 = arith.constant 16 : index
    %c0_91 = arith.constant 0 : index
    %174 = vector.load %arg13[%c16, %c0_91] : memref<32x16xbf16, #tpu.memory_space<vmem>>, vector<16x16xbf16>
    %cst_92 = arith.constant dense<0.000000e+00> : vector<4x16xf32>
    %175 = tpu.matmul %173, %174, %cst_92 {dimension_numbers = #tpu.dot_dimension_numbers<[1], [0], [0], [1], [0, 0, 1, 1], [], []>} : vector<4x16xbf16>, vector<16x16xbf16>, vector<4x16xf32> -> vector<4x16xf32>
    %176 = arith.addf %172, %175 : vector<4x16xf32>
    %c0_93 = arith.constant 0 : index
    %c0_94 = arith.constant 0 : index
    %177 = vector.load %arg37[%c0_93, %c0_94] : memref<1x16xf32, #tpu.memory_space<vmem>>, vector<1x16xf32>
    %178 = vector.broadcast %177 : vector<1x16xf32> to vector<4x16xf32>
    %179 = arith.addf %176, %178 : vector<4x16xf32>
    %cst_95 = arith.constant 0.000000e+00 : f32
    %180 = vector.broadcast %cst_95 : f32 to vector<1x16xf32>
    %c0_96 = arith.constant 0 : index
    %c0_97 = arith.constant 0 : index
    %181 = vector.load %arg51[%c0_96, %c0_97] : memref<18x512xf32, #tpu.memory_space<vmem>>, vector<1x16xf32>
    tpu.vector_store %arg51[%c0_96, %c0_97], %180 {strides = array<i32>} : memref<18x512xf32, #tpu.memory_space<vmem>>, vector<1x16xf32>,
    %c5 = arith.constant 5 : index
    %c0_98 = arith.constant 0 : index
    %182 = vector.load %arg51[%c5, %c0_98] : memref<18x512xf32, #tpu.memory_space<vmem>>, vector<1x16xf32>
    tpu.vector_store %arg51[%c5, %c0_98], %180 {strides = array<i32>} : memref<18x512xf32, #tpu.memory_space<vmem>>, vector<1x16xf32>,
    %c1 = arith.constant 1 : index
    %c0_99 = arith.constant 0 : index
    %183 = vector.load %arg51[%c1, %c0_99] : memref<18x512xf32, #tpu.memory_space<vmem>>, vector<4x16xf32>
    tpu.vector_store %arg51[%c1, %c0_99], %179 {strides = array<i32>} : memref<18x512xf32, #tpu.memory_space<vmem>>, vector<4x16xf32>,
    %c0_100 = arith.constant 0 : index
    %c0_101 = arith.constant 0 : index
    %184 = vector.load %arg51[%c0_100, %c0_101] : memref<18x512xf32, #tpu.memory_space<vmem>>, vector<6x16xf32>
    %185 = vector.extract_strided_slice %184 {offsets = [0, 0], sizes = [5, 16], strides = [1, 1]} : vector<6x16xf32> to vector<5x16xf32>
    %186 = vector.extract_strided_slice %184 {offsets = [1, 0], sizes = [5, 16], strides = [1, 1]} : vector<6x16xf32> to vector<5x16xf32>
    %187 = arith.truncf %185 : vector<5x16xf32> to vector<5x16xbf16>
    %c0_102 = arith.constant 0 : index
    %c0_103 = arith.constant 0 : index
    %188 = vector.load %arg14[%c0_102, %c0_103] : memref<32x16xbf16, #tpu.memory_space<vmem>>, vector<16x16xbf16>
    %cst_104 = arith.constant dense<0.000000e+00> : vector<5x16xf32>
    %189 = tpu.matmul %187, %188, %cst_104 {dimension_numbers = #tpu.dot_dimension_numbers<[1], [0], [0], [1], [0, 0, 1, 1], [], []>} : vector<5x16xbf16>, vector<16x16xbf16>, vector<5x16xf32> -> vector<5x16xf32>
    %190 = arith.truncf %186 : vector<5x16xf32> to vector<5x16xbf16>
    %c16_105 = arith.constant 16 : index
    %c0_106 = arith.constant 0 : index
    %191 = vector.load %arg14[%c16_105, %c0_106] : memref<32x16xbf16, #tpu.memory_space<vmem>>, vector<16x16xbf16>
    %cst_107 = arith.constant dense<0.000000e+00> : vector<5x16xf32>
    %192 = tpu.matmul %190, %191, %cst_107 {dimension_numbers = #tpu.dot_dimension_numbers<[1], [0], [0], [1], [0, 0, 1, 1], [], []>} : vector<5x16xbf16>, vector<16x16xbf16>, vector<5x16xf32> -> vector<5x16xf32>
    %193 = arith.addf %189, %192 : vector<5x16xf32>
    %c0_108 = arith.constant 0 : index
    %c0_109 = arith.constant 0 : index
    %194 = vector.load %arg38[%c0_108, %c0_109] : memref<1x16xf32, #tpu.memory_space<vmem>>, vector<1x16xf32>
    %195 = vector.broadcast %194 : vector<1x16xf32> to vector<5x16xf32>
    %196 = arith.addf %193, %195 : vector<5x16xf32>
    %cst_110 = arith.constant 0.000000e+00 : f32
    %197 = vector.broadcast %cst_110 : f32 to vector<5x16xf32>
    %198 = arith.cmpf ogt, %196, %197 : vector<5x16xf32>
    %cst_111 = arith.constant 0.00999999977 : f32
    %199 = vector.broadcast %cst_111 : f32 to vector<5x16xf32>
    %200 = arith.mulf %199, %196 : vector<5x16xf32>
    %201 = arith.select %198, %196, %200 : vector<5x16xi1>, vector<5x16xf32>
    %cst_112 = arith.constant 0.000000e+00 : f32
    %202 = vector.broadcast %cst_112 : f32 to vector<1x16xf32>
    %c0_113 = arith.constant 0 : index
    %c0_114 = arith.constant 0 : index
    %203 = vector.load %arg51[%c0_113, %c0_114] : memref<18x512xf32, #tpu.memory_space<vmem>>, vector<1x16xf32>
    tpu.vector_store %arg51[%c0_113, %c0_114], %202 {strides = array<i32>} : memref<18x512xf32, #tpu.memory_space<vmem>>, vector<1x16xf32>,
    %c6 = arith.constant 6 : index
    %c0_115 = arith.constant 0 : index
    %204 = vector.load %arg51[%c6, %c0_115] : memref<18x512xf32, #tpu.memory_space<vmem>>, vector<1x16xf32>
    tpu.vector_store %arg51[%c6, %c0_115], %202 {strides = array<i32>} : memref<18x512xf32, #tpu.memory_space<vmem>>, vector<1x16xf32>,
    %c1_116 = arith.constant 1 : index
    %c0_117 = arith.constant 0 : index
    %205 = vector.load %arg51[%c1_116, %c0_117] : memref<18x512xf32, #tpu.memory_space<vmem>>, vector<5x16xf32>
    tpu.vector_store %arg51[%c1_116, %c0_117], %201 {strides = array<i32>} : memref<18x512xf32, #tpu.memory_space<vmem>>, vector<5x16xf32>,
    %c0_118 = arith.constant 0 : index
    %c0_119 = arith.constant 0 : index
    %206 = vector.load %arg51[%c0_118, %c0_119] : memref<18x512xf32, #tpu.memory_space<vmem>>, vector<7x16xf32>
    %207 = vector.extract_strided_slice %206 {offsets = [0, 0], sizes = [6, 16], strides = [1, 1]} : vector<7x16xf32> to vector<6x16xf32>
    %208 = vector.extract_strided_slice %206 {offsets = [1, 0], sizes = [6, 16], strides = [1, 1]} : vector<7x16xf32> to vector<6x16xf32>
    %209 = arith.truncf %207 : vector<6x16xf32> to vector<6x16xbf16>
    %c0_120 = arith.constant 0 : index
    %c0_121 = arith.constant 0 : index
    %210 = vector.load %arg15[%c0_120, %c0_121] : memref<32x32xbf16, #tpu.memory_space<vmem>>, vector<16x32xbf16>
    %cst_122 = arith.constant dense<0.000000e+00> : vector<6x32xf32>
    %211 = tpu.matmul %209, %210, %cst_122 {dimension_numbers = #tpu.dot_dimension_numbers<[1], [0], [0], [1], [0, 0, 1, 1], [], []>} : vector<6x16xbf16>, vector<16x32xbf16>, vector<6x32xf32> -> vector<6x32xf32>
    %212 = arith.truncf %208 : vector<6x16xf32> to vector<6x16xbf16>
    %c16_123 = arith.constant 16 : index
    %c0_124 = arith.constant 0 : index
    %213 = vector.load %arg15[%c16_123, %c0_124] : memref<32x32xbf16, #tpu.memory_space<vmem>>, vector<16x32xbf16>
    %cst_125 = arith.constant dense<0.000000e+00> : vector<6x32xf32>
    %214 = tpu.matmul %212, %213, %cst_125 {dimension_numbers = #tpu.dot_dimension_numbers<[1], [0], [0], [1], [0, 0, 1, 1], [], []>} : vector<6x16xbf16>, vector<16x32xbf16>, vector<6x32xf32> -> vector<6x32xf32>
    %215 = arith.addf %211, %214 : vector<6x32xf32>
    %c0_126 = arith.constant 0 : index
    %c0_127 = arith.constant 0 : index
    %216 = vector.load %arg39[%c0_126, %c0_127] : memref<1x32xf32, #tpu.memory_space<vmem>>, vector<1x32xf32>
    %217 = vector.broadcast %216 : vector<1x32xf32> to vector<6x32xf32>
    %218 = arith.addf %215, %217 : vector<6x32xf32>
    %cst_128 = arith.constant 0.000000e+00 : f32
    %219 = vector.broadcast %cst_128 : f32 to vector<6x32xf32>
    %220 = arith.cmpf ogt, %218, %219 : vector<6x32xf32>
    %cst_129 = arith.constant 0.00999999977 : f32
    %221 = vector.broadcast %cst_129 : f32 to vector<6x32xf32>
    %222 = arith.mulf %221, %218 : vector<6x32xf32>
    %223 = arith.select %220, %218, %222 : vector<6x32xi1>, vector<6x32xf32>
    %cst_130 = arith.constant 0.000000e+00 : f32
    %224 = vector.broadcast %cst_130 : f32 to vector<1x32xf32>
    %c0_131 = arith.constant 0 : index
    %c0_132 = arith.constant 0 : index
    %225 = vector.load %arg51[%c0_131, %c0_132] : memref<18x512xf32, #tpu.memory_space<vmem>>, vector<1x32xf32>
    tpu.vector_store %arg51[%c0_131, %c0_132], %224 {strides = array<i32>} : memref<18x512xf32, #tpu.memory_space<vmem>>, vector<1x32xf32>,
    %c7 = arith.constant 7 : index
    %c0_133 = arith.constant 0 : index
    %226 = vector.load %arg51[%c7, %c0_133] : memref<18x512xf32, #tpu.memory_space<vmem>>, vector<1x32xf32>
    tpu.vector_store %arg51[%c7, %c0_133], %224 {strides = array<i32>} : memref<18x512xf32, #tpu.memory_space<vmem>>, vector<1x32xf32>,
    %c1_134 = arith.constant 1 : index
    %c0_135 = arith.constant 0 : index
    %227 = vector.load %arg51[%c1_134, %c0_135] : memref<18x512xf32, #tpu.memory_space<vmem>>, vector<6x32xf32>
    tpu.vector_store %arg51[%c1_134, %c0_135], %223 {strides = array<i32>} : memref<18x512xf32, #tpu.memory_space<vmem>>, vector<6x32xf32>,
    %c0_136 = arith.constant 0 : index
    %c0_137 = arith.constant 0 : index
    %228 = vector.load %arg51[%c0_136, %c0_137] : memref<18x512xf32, #tpu.memory_space<vmem>>, vector<8x32xf32>
    %229 = vector.extract_strided_slice %228 {offsets = [0, 0], sizes = [7, 32], strides = [1, 1]} : vector<8x32xf32> to vector<7x32xf32>
    %230 = vector.extract_strided_slice %228 {offsets = [1, 0], sizes = [7, 32], strides = [1, 1]} : vector<8x32xf32> to vector<7x32xf32>
    %231 = arith.truncf %229 : vector<7x32xf32> to vector<7x32xbf16>
    %c0_138 = arith.constant 0 : index
    %c0_139 = arith.constant 0 : index
    %232 = vector.load %arg16[%c0_138, %c0_139] : memref<64x32xbf16, #tpu.memory_space<vmem>>, vector<32x32xbf16>
    %cst_140 = arith.constant dense<0.000000e+00> : vector<7x32xf32>
    %233 = tpu.matmul %231, %232, %cst_140 {dimension_numbers = #tpu.dot_dimension_numbers<[1], [0], [0], [1], [0, 0, 1, 1], [], []>} : vector<7x32xbf16>, vector<32x32xbf16>, vector<7x32xf32> -> vector<7x32xf32>
    %234 = arith.truncf %230 : vector<7x32xf32> to vector<7x32xbf16>
    %c32_141 = arith.constant 32 : index
    %c0_142 = arith.constant 0 : index
    %235 = vector.load %arg16[%c32_141, %c0_142] : memref<64x32xbf16, #tpu.memory_space<vmem>>, vector<32x32xbf16>
    %cst_143 = arith.constant dense<0.000000e+00> : vector<7x32xf32>
    %236 = tpu.matmul %234, %235, %cst_143 {dimension_numbers = #tpu.dot_dimension_numbers<[1], [0], [0], [1], [0, 0, 1, 1], [], []>} : vector<7x32xbf16>, vector<32x32xbf16>, vector<7x32xf32> -> vector<7x32xf32>
    %237 = arith.addf %233, %236 : vector<7x32xf32>
    %c0_144 = arith.constant 0 : index
    %c0_145 = arith.constant 0 : index
    %238 = vector.load %arg40[%c0_144, %c0_145] : memref<1x32xf32, #tpu.memory_space<vmem>>, vector<1x32xf32>
    %239 = vector.broadcast %238 : vector<1x32xf32> to vector<7x32xf32>
    %240 = arith.addf %237, %239 : vector<7x32xf32>
    %cst_146 = arith.constant 0.000000e+00 : f32
    %241 = vector.broadcast %cst_146 : f32 to vector<7x32xf32>
    %242 = arith.cmpf ogt, %240, %241 : vector<7x32xf32>
    %cst_147 = arith.constant 0.00999999977 : f32
    %243 = vector.broadcast %cst_147 : f32 to vector<7x32xf32>
    %244 = arith.mulf %243, %240 : vector<7x32xf32>
    %245 = arith.select %242, %240, %244 : vector<7x32xi1>, vector<7x32xf32>
    %cst_148 = arith.constant 0.000000e+00 : f32
    %246 = vector.broadcast %cst_148 : f32 to vector<1x32xf32>
    %c0_149 = arith.constant 0 : index
    %c0_150 = arith.constant 0 : index
    %247 = vector.load %arg51[%c0_149, %c0_150] : memref<18x512xf32, #tpu.memory_space<vmem>>, vector<1x32xf32>
    tpu.vector_store %arg51[%c0_149, %c0_150], %246 {strides = array<i32>} : memref<18x512xf32, #tpu.memory_space<vmem>>, vector<1x32xf32>,
    %c8 = arith.constant 8 : index
    %c0_151 = arith.constant 0 : index
    %248 = vector.load %arg51[%c8, %c0_151] : memref<18x512xf32, #tpu.memory_space<vmem>>, vector<1x32xf32>
    tpu.vector_store %arg51[%c8, %c0_151], %246 {strides = array<i32>} : memref<18x512xf32, #tpu.memory_space<vmem>>, vector<1x32xf32>,
    %c1_152 = arith.constant 1 : index
    %c0_153 = arith.constant 0 : index
    %249 = vector.load %arg51[%c1_152, %c0_153] : memref<18x512xf32, #tpu.memory_space<vmem>>, vector<7x32xf32>
    tpu.vector_store %arg51[%c1_152, %c0_153], %245 {strides = array<i32>} : memref<18x512xf32, #tpu.memory_space<vmem>>, vector<7x32xf32>,
    %c0_154 = arith.constant 0 : index
    %c0_155 = arith.constant 0 : index
    %250 = vector.load %arg51[%c0_154, %c0_155] : memref<18x512xf32, #tpu.memory_space<vmem>>, vector<9x32xf32>
    %251 = vector.extract_strided_slice %250 {offsets = [0, 0], sizes = [8, 32], strides = [1, 1]} : vector<9x32xf32> to vector<8x32xf32>
    %252 = vector.extract_strided_slice %250 {offsets = [1, 0], sizes = [8, 32], strides = [1, 1]} : vector<9x32xf32> to vector<8x32xf32>
    %253 = arith.truncf %251 : vector<8x32xf32> to vector<8x32xbf16>
    %c0_156 = arith.constant 0 : index
    %c0_157 = arith.constant 0 : index
    %254 = vector.load %arg17[%c0_156, %c0_157] : memref<64x32xbf16, #tpu.memory_space<vmem>>, vector<32x32xbf16>
    %cst_158 = arith.constant dense<0.000000e+00> : vector<8x32xf32>
    %255 = tpu.matmul %253, %254, %cst_158 {dimension_numbers = #tpu.dot_dimension_numbers<[1], [0], [0], [1], [0, 0, 1, 1], [], []>} : vector<8x32xbf16>, vector<32x32xbf16>, vector<8x32xf32> -> vector<8x32xf32>
    %256 = arith.truncf %252 : vector<8x32xf32> to vector<8x32xbf16>
    %c32_159 = arith.constant 32 : index
    %c0_160 = arith.constant 0 : index
    %257 = vector.load %arg17[%c32_159, %c0_160] : memref<64x32xbf16, #tpu.memory_space<vmem>>, vector<32x32xbf16>
    %cst_161 = arith.constant dense<0.000000e+00> : vector<8x32xf32>
    %258 = tpu.matmul %256, %257, %cst_161 {dimension_numbers = #tpu.dot_dimension_numbers<[1], [0], [0], [1], [0, 0, 1, 1], [], []>} : vector<8x32xbf16>, vector<32x32xbf16>, vector<8x32xf32> -> vector<8x32xf32>
    %259 = arith.addf %255, %258 : vector<8x32xf32>
    %c0_162 = arith.constant 0 : index
    %c0_163 = arith.constant 0 : index
    %260 = vector.load %arg41[%c0_162, %c0_163] : memref<1x32xf32, #tpu.memory_space<vmem>>, vector<1x32xf32>
    %261 = vector.broadcast %260 : vector<1x32xf32> to vector<8x32xf32>
    %262 = arith.addf %259, %261 : vector<8x32xf32>
    %cst_164 = arith.constant 0.000000e+00 : f32
    %263 = vector.broadcast %cst_164 : f32 to vector<8x32xf32>
    %264 = arith.cmpf ogt, %262, %263 : vector<8x32xf32>
    %cst_165 = arith.constant 0.00999999977 : f32
    %265 = vector.broadcast %cst_165 : f32 to vector<8x32xf32>
    %266 = arith.mulf %265, %262 : vector<8x32xf32>
    %267 = arith.select %264, %262, %266 : vector<8x32xi1>, vector<8x32xf32>
    %cst_166 = arith.constant 0.000000e+00 : f32
    %268 = vector.broadcast %cst_166 : f32 to vector<1x32xf32>
    %c0_167 = arith.constant 0 : index
    %c0_168 = arith.constant 0 : index
    %269 = vector.load %arg51[%c0_167, %c0_168] : memref<18x512xf32, #tpu.memory_space<vmem>>, vector<1x32xf32>
    tpu.vector_store %arg51[%c0_167, %c0_168], %268 {strides = array<i32>} : memref<18x512xf32, #tpu.memory_space<vmem>>, vector<1x32xf32>,
    %c9 = arith.constant 9 : index
    %c0_169 = arith.constant 0 : index
    %270 = vector.load %arg51[%c9, %c0_169] : memref<18x512xf32, #tpu.memory_space<vmem>>, vector<1x32xf32>
    tpu.vector_store %arg51[%c9, %c0_169], %268 {strides = array<i32>} : memref<18x512xf32, #tpu.memory_space<vmem>>, vector<1x32xf32>,
    %c1_170 = arith.constant 1 : index
    %c0_171 = arith.constant 0 : index
    %271 = vector.load %arg51[%c1_170, %c0_171] : memref<18x512xf32, #tpu.memory_space<vmem>>, vector<8x32xf32>
    tpu.vector_store %arg51[%c1_170, %c0_171], %267 {strides = array<i32>} : memref<18x512xf32, #tpu.memory_space<vmem>>, vector<8x32xf32>,
    %c0_172 = arith.constant 0 : index
    %c0_173 = arith.constant 0 : index
    %272 = vector.load %arg51[%c0_172, %c0_173] : memref<18x512xf32, #tpu.memory_space<vmem>>, vector<10x32xf32>
    %273 = vector.extract_strided_slice %272 {offsets = [0, 0], sizes = [9, 32], strides = [1, 1]} : vector<10x32xf32> to vector<9x32xf32>
    %274 = vector.extract_strided_slice %272 {offsets = [1, 0], sizes = [9, 32], strides = [1, 1]} : vector<10x32xf32> to vector<9x32xf32>
    %275 = arith.truncf %273 : vector<9x32xf32> to vector<9x32xbf16>
    %c0_174 = arith.constant 0 : index
    %c0_175 = arith.constant 0 : index
    %276 = vector.load %arg18[%c0_174, %c0_175] : memref<64x64xbf16, #tpu.memory_space<vmem>>, vector<32x64xbf16>
    %cst_176 = arith.constant dense<0.000000e+00> : vector<9x64xf32>
    %277 = tpu.matmul %275, %276, %cst_176 {dimension_numbers = #tpu.dot_dimension_numbers<[1], [0], [0], [1], [0, 0, 1, 1], [], []>} : vector<9x32xbf16>, vector<32x64xbf16>, vector<9x64xf32> -> vector<9x64xf32>
    %278 = arith.truncf %274 : vector<9x32xf32> to vector<9x32xbf16>
    %c32_177 = arith.constant 32 : index
    %c0_178 = arith.constant 0 : index
    %279 = vector.load %arg18[%c32_177, %c0_178] : memref<64x64xbf16, #tpu.memory_space<vmem>>, vector<32x64xbf16>
    %cst_179 = arith.constant dense<0.000000e+00> : vector<9x64xf32>
    %280 = tpu.matmul %278, %279, %cst_179 {dimension_numbers = #tpu.dot_dimension_numbers<[1], [0], [0], [1], [0, 0, 1, 1], [], []>} : vector<9x32xbf16>, vector<32x64xbf16>, vector<9x64xf32> -> vector<9x64xf32>
    %281 = arith.addf %277, %280 : vector<9x64xf32>
    %c0_180 = arith.constant 0 : index
    %c0_181 = arith.constant 0 : index
    %282 = vector.load %arg42[%c0_180, %c0_181] : memref<1x64xf32, #tpu.memory_space<vmem>>, vector<1x64xf32>
    %283 = vector.broadcast %282 : vector<1x64xf32> to vector<9x64xf32>
    %284 = arith.addf %281, %283 : vector<9x64xf32>
    %cst_182 = arith.constant 0.000000e+00 : f32
    %285 = vector.broadcast %cst_182 : f32 to vector<9x64xf32>
    %286 = arith.cmpf ogt, %284, %285 : vector<9x64xf32>
    %cst_183 = arith.constant 0.00999999977 : f32
    %287 = vector.broadcast %cst_183 : f32 to vector<9x64xf32>
    %288 = arith.mulf %287, %284 : vector<9x64xf32>
    %289 = arith.select %286, %284, %288 : vector<9x64xi1>, vector<9x64xf32>
    %cst_184 = arith.constant 0.000000e+00 : f32
    %290 = vector.broadcast %cst_184 : f32 to vector<1x64xf32>
    %c0_185 = arith.constant 0 : index
    %c0_186 = arith.constant 0 : index
    %291 = vector.load %arg51[%c0_185, %c0_186] : memref<18x512xf32, #tpu.memory_space<vmem>>, vector<1x64xf32>
    tpu.vector_store %arg51[%c0_185, %c0_186], %290 {strides = array<i32>} : memref<18x512xf32, #tpu.memory_space<vmem>>, vector<1x64xf32>,
    %c10 = arith.constant 10 : index
    %c0_187 = arith.constant 0 : index
    %292 = vector.load %arg51[%c10, %c0_187] : memref<18x512xf32, #tpu.memory_space<vmem>>, vector<1x64xf32>
    tpu.vector_store %arg51[%c10, %c0_187], %290 {strides = array<i32>} : memref<18x512xf32, #tpu.memory_space<vmem>>, vector<1x64xf32>,
    %c1_188 = arith.constant 1 : index
    %c0_189 = arith.constant 0 : index
    %293 = vector.load %arg51[%c1_188, %c0_189] : memref<18x512xf32, #tpu.memory_space<vmem>>, vector<9x64xf32>
    tpu.vector_store %arg51[%c1_188, %c0_189], %289 {strides = array<i32>} : memref<18x512xf32, #tpu.memory_space<vmem>>, vector<9x64xf32>,
    %c0_190 = arith.constant 0 : index
    %c0_191 = arith.constant 0 : index
    %294 = vector.load %arg51[%c0_190, %c0_191] : memref<18x512xf32, #tpu.memory_space<vmem>>, vector<11x64xf32>
    %295 = vector.extract_strided_slice %294 {offsets = [0, 0], sizes = [10, 64], strides = [1, 1]} : vector<11x64xf32> to vector<10x64xf32>
    %296 = vector.extract_strided_slice %294 {offsets = [1, 0], sizes = [10, 64], strides = [1, 1]} : vector<11x64xf32> to vector<10x64xf32>
    %297 = arith.truncf %295 : vector<10x64xf32> to vector<10x64xbf16>
    %c0_192 = arith.constant 0 : index
    %c0_193 = arith.constant 0 : index
    %298 = vector.load %arg19[%c0_192, %c0_193] : memref<128x128xbf16, #tpu.memory_space<vmem>>, vector<64x128xbf16>
    %cst_194 = arith.constant dense<0.000000e+00> : vector<10x128xf32>
    %299 = tpu.matmul %297, %298, %cst_194 {dimension_numbers = #tpu.dot_dimension_numbers<[1], [0], [0], [1], [0, 0, 1, 1], [], []>} : vector<10x64xbf16>, vector<64x128xbf16>, vector<10x128xf32> -> vector<10x128xf32>
    %300 = arith.truncf %296 : vector<10x64xf32> to vector<10x64xbf16>
    %c64_195 = arith.constant 64 : index
    %c0_196 = arith.constant 0 : index
    %301 = vector.load %arg19[%c64_195, %c0_196] : memref<128x128xbf16, #tpu.memory_space<vmem>>, vector<64x128xbf16>
    %cst_197 = arith.constant dense<0.000000e+00> : vector<10x128xf32>
    %302 = tpu.matmul %300, %301, %cst_197 {dimension_numbers = #tpu.dot_dimension_numbers<[1], [0], [0], [1], [0, 0, 1, 1], [], []>} : vector<10x64xbf16>, vector<64x128xbf16>, vector<10x128xf32> -> vector<10x128xf32>
    %303 = arith.addf %299, %302 : vector<10x128xf32>
    %c0_198 = arith.constant 0 : index
    %c0_199 = arith.constant 0 : index
    %304 = vector.load %arg43[%c0_198, %c0_199] : memref<1x128xf32, #tpu.memory_space<vmem>>, vector<1x128xf32>
    %305 = vector.broadcast %304 : vector<1x128xf32> to vector<10x128xf32>
    %306 = arith.addf %303, %305 : vector<10x128xf32>
    %cst_200 = arith.constant 0.000000e+00 : f32
    %307 = vector.broadcast %cst_200 : f32 to vector<10x128xf32>
    %308 = arith.cmpf ogt, %306, %307 : vector<10x128xf32>
    %cst_201 = arith.constant 0.00999999977 : f32
    %309 = vector.broadcast %cst_201 : f32 to vector<10x128xf32>
    %310 = arith.mulf %309, %306 : vector<10x128xf32>
    %311 = arith.select %308, %306, %310 : vector<10x128xi1>, vector<10x128xf32>
    %cst_202 = arith.constant 0.000000e+00 : f32
    %312 = vector.broadcast %cst_202 : f32 to vector<1x128xf32>
    %c0_203 = arith.constant 0 : index
    %c0_204 = arith.constant 0 : index
    %313 = vector.load %arg51[%c0_203, %c0_204] : memref<18x512xf32, #tpu.memory_space<vmem>>, vector<1x128xf32>
    tpu.vector_store %arg51[%c0_203, %c0_204], %312 {strides = array<i32>} : memref<18x512xf32, #tpu.memory_space<vmem>>, vector<1x128xf32>,
    %c11 = arith.constant 11 : index
    %c0_205 = arith.constant 0 : index
    %314 = vector.load %arg51[%c11, %c0_205] : memref<18x512xf32, #tpu.memory_space<vmem>>, vector<1x128xf32>
    tpu.vector_store %arg51[%c11, %c0_205], %312 {strides = array<i32>} : memref<18x512xf32, #tpu.memory_space<vmem>>, vector<1x128xf32>,
    %c1_206 = arith.constant 1 : index
    %c0_207 = arith.constant 0 : index
    %315 = vector.load %arg51[%c1_206, %c0_207] : memref<18x512xf32, #tpu.memory_space<vmem>>, vector<10x128xf32>
    tpu.vector_store %arg51[%c1_206, %c0_207], %311 {strides = array<i32>} : memref<18x512xf32, #tpu.memory_space<vmem>>, vector<10x128xf32>,
    %c0_208 = arith.constant 0 : index
    %c0_209 = arith.constant 0 : index
    %316 = vector.load %arg51[%c0_208, %c0_209] : memref<18x512xf32, #tpu.memory_space<vmem>>, vector<12x128xf32>
    %317 = vector.extract_strided_slice %316 {offsets = [0, 0], sizes = [11, 128], strides = [1, 1]} : vector<12x128xf32> to vector<11x128xf32>
    %318 = vector.extract_strided_slice %316 {offsets = [1, 0], sizes = [11, 128], strides = [1, 1]} : vector<12x128xf32> to vector<11x128xf32>
    %319 = tpu.concatenate %317, %318 in 1 : vector<11x128xf32>, vector<11x128xf32> -> vector<11x256xf32>
    %320 = arith.truncf %319 : vector<11x256xf32> to vector<11x256xbf16>
    %c0_210 = arith.constant 0 : index
    %c0_211 = arith.constant 0 : index
    %321 = vector.load %arg20[%c0_210, %c0_211] : memref<256x256xbf16, #tpu.memory_space<vmem>>, vector<256x256xbf16>
    %cst_212 = arith.constant dense<0.000000e+00> : vector<11x256xf32>
    %322 = tpu.matmul %320, %321, %cst_212 {dimension_numbers = #tpu.dot_dimension_numbers<[1], [0], [0], [1], [0, 0, 1, 1], [], []>} : vector<11x256xbf16>, vector<256x256xbf16>, vector<11x256xf32> -> vector<11x256xf32>
    %c0_213 = arith.constant 0 : index
    %c0_214 = arith.constant 0 : index
    %323 = vector.load %arg44[%c0_213, %c0_214] : memref<1x256xf32, #tpu.memory_space<vmem>>, vector<1x256xf32>
    %324 = vector.broadcast %323 : vector<1x256xf32> to vector<11x256xf32>
    %325 = arith.addf %322, %324 : vector<11x256xf32>
    %cst_215 = arith.constant 0.000000e+00 : f32
    %326 = vector.broadcast %cst_215 : f32 to vector<11x256xf32>
    %327 = arith.cmpf ogt, %325, %326 : vector<11x256xf32>
    %cst_216 = arith.constant 0.00999999977 : f32
    %328 = vector.broadcast %cst_216 : f32 to vector<11x256xf32>
    %329 = arith.mulf %328, %325 : vector<11x256xf32>
    %330 = arith.select %327, %325, %329 : vector<11x256xi1>, vector<11x256xf32>
    %cst_217 = arith.constant 0.000000e+00 : f32
    %331 = vector.broadcast %cst_217 : f32 to vector<1x256xf32>
    %c0_218 = arith.constant 0 : index
    %c0_219 = arith.constant 0 : index
    %332 = vector.load %arg51[%c0_218, %c0_219] : memref<18x512xf32, #tpu.memory_space<vmem>>, vector<1x256xf32>
    tpu.vector_store %arg51[%c0_218, %c0_219], %331 {strides = array<i32>} : memref<18x512xf32, #tpu.memory_space<vmem>>, vector<1x256xf32>,
    %c12 = arith.constant 12 : index
    %c0_220 = arith.constant 0 : index
    %333 = vector.load %arg51[%c12, %c0_220] : memref<18x512xf32, #tpu.memory_space<vmem>>, vector<1x256xf32>
    tpu.vector_store %arg51[%c12, %c0_220], %331 {strides = array<i32>} : memref<18x512xf32, #tpu.memory_space<vmem>>, vector<1x256xf32>,
    %c1_221 = arith.constant 1 : index
    %c0_222 = arith.constant 0 : index
    %334 = vector.load %arg51[%c1_221, %c0_222] : memref<18x512xf32, #tpu.memory_space<vmem>>, vector<11x256xf32>
    tpu.vector_store %arg51[%c1_221, %c0_222], %330 {strides = array<i32>} : memref<18x512xf32, #tpu.memory_space<vmem>>, vector<11x256xf32>,
    %c0_223 = arith.constant 0 : index
    %c0_224 = arith.constant 0 : index
    %335 = vector.load %arg51[%c0_223, %c0_224] : memref<18x512xf32, #tpu.memory_space<vmem>>, vector<13x256xf32>
    %336 = vector.extract_strided_slice %335 {offsets = [0, 0], sizes = [12, 256], strides = [1, 1]} : vector<13x256xf32> to vector<12x256xf32>
    %337 = vector.extract_strided_slice %335 {offsets = [1, 0], sizes = [12, 256], strides = [1, 1]} : vector<13x256xf32> to vector<12x256xf32>
    %338 = tpu.concatenate %336, %337 in 1 : vector<12x256xf32>, vector<12x256xf32> -> vector<12x512xf32>
    %339 = arith.truncf %338 : vector<12x512xf32> to vector<12x512xbf16>
    %c0_225 = arith.constant 0 : index
    %c0_226 = arith.constant 0 : index
    %340 = vector.load %arg21[%c0_225, %c0_226] : memref<512x256xbf16, #tpu.memory_space<vmem>>, vector<512x256xbf16>
    %cst_227 = arith.constant dense<0.000000e+00> : vector<12x256xf32>
    %341 = tpu.matmul %339, %340, %cst_227 {dimension_numbers = #tpu.dot_dimension_numbers<[1], [0], [0], [1], [0, 0, 1, 1], [], []>} : vector<12x512xbf16>, vector<512x256xbf16>, vector<12x256xf32> -> vector<12x256xf32>
    %c0_228 = arith.constant 0 : index
    %c0_229 = arith.constant 0 : index
    %342 = vector.load %arg45[%c0_228, %c0_229] : memref<1x256xf32, #tpu.memory_space<vmem>>, vector<1x256xf32>
    %343 = vector.broadcast %342 : vector<1x256xf32> to vector<12x256xf32>
    %344 = arith.addf %341, %343 : vector<12x256xf32>
    %cst_230 = arith.constant 0.000000e+00 : f32
    %345 = vector.broadcast %cst_230 : f32 to vector<12x256xf32>
    %346 = arith.cmpf ogt, %344, %345 : vector<12x256xf32>
    %cst_231 = arith.constant 0.00999999977 : f32
    %347 = vector.broadcast %cst_231 : f32 to vector<12x256xf32>
    %348 = arith.mulf %347, %344 : vector<12x256xf32>
    %349 = arith.select %346, %344, %348 : vector<12x256xi1>, vector<12x256xf32>
    %cst_232 = arith.constant 0.000000e+00 : f32
    %350 = vector.broadcast %cst_232 : f32 to vector<1x256xf32>
    %c0_233 = arith.constant 0 : index
    %c0_234 = arith.constant 0 : index
    %351 = vector.load %arg51[%c0_233, %c0_234] : memref<18x512xf32, #tpu.memory_space<vmem>>, vector<1x256xf32>
    tpu.vector_store %arg51[%c0_233, %c0_234], %350 {strides = array<i32>} : memref<18x512xf32, #tpu.memory_space<vmem>>, vector<1x256xf32>,
    %c13 = arith.constant 13 : index
    %c0_235 = arith.constant 0 : index
    %352 = vector.load %arg51[%c13, %c0_235] : memref<18x512xf32, #tpu.memory_space<vmem>>, vector<1x256xf32>
    tpu.vector_store %arg51[%c13, %c0_235], %350 {strides = array<i32>} : memref<18x512xf32, #tpu.memory_space<vmem>>, vector<1x256xf32>,
    %c1_236 = arith.constant 1 : index
    %c0_237 = arith.constant 0 : index
    %353 = vector.load %arg51[%c1_236, %c0_237] : memref<18x512xf32, #tpu.memory_space<vmem>>, vector<12x256xf32>
    tpu.vector_store %arg51[%c1_236, %c0_237], %349 {strides = array<i32>} : memref<18x512xf32, #tpu.memory_space<vmem>>, vector<12x256xf32>,
    %c0_238 = arith.constant 0 : index
    %c0_239 = arith.constant 0 : index
    %354 = vector.load %arg51[%c0_238, %c0_239] : memref<18x512xf32, #tpu.memory_space<vmem>>, vector<14x256xf32>
    %355 = vector.extract_strided_slice %354 {offsets = [0, 0], sizes = [13, 256], strides = [1, 1]} : vector<14x256xf32> to vector<13x256xf32>
    %356 = vector.extract_strided_slice %354 {offsets = [1, 0], sizes = [13, 256], strides = [1, 1]} : vector<14x256xf32> to vector<13x256xf32>
    %357 = tpu.concatenate %355, %356 in 1 : vector<13x256xf32>, vector<13x256xf32> -> vector<13x512xf32>
    %358 = arith.truncf %357 : vector<13x512xf32> to vector<13x512xbf16>
    %c0_240 = arith.constant 0 : index
    %c0_241 = arith.constant 0 : index
    %359 = vector.load %arg22[%c0_240, %c0_241] : memref<512x256xbf16, #tpu.memory_space<vmem>>, vector<512x256xbf16>
    %cst_242 = arith.constant dense<0.000000e+00> : vector<13x256xf32>
    %360 = tpu.matmul %358, %359, %cst_242 {dimension_numbers = #tpu.dot_dimension_numbers<[1], [0], [0], [1], [0, 0, 1, 1], [], []>} : vector<13x512xbf16>, vector<512x256xbf16>, vector<13x256xf32> -> vector<13x256xf32>
    %c0_243 = arith.constant 0 : index
    %c0_244 = arith.constant 0 : index
    %361 = vector.load %arg46[%c0_243, %c0_244] : memref<1x256xf32, #tpu.memory_space<vmem>>, vector<1x256xf32>
    %362 = vector.broadcast %361 : vector<1x256xf32> to vector<13x256xf32>
    %363 = arith.addf %360, %362 : vector<13x256xf32>
    %cst_245 = arith.constant 0.000000e+00 : f32
    %364 = vector.broadcast %cst_245 : f32 to vector<13x256xf32>
    %365 = arith.cmpf ogt, %363, %364 : vector<13x256xf32>
    %cst_246 = arith.constant 0.00999999977 : f32
    %366 = vector.broadcast %cst_246 : f32 to vector<13x256xf32>
    %367 = arith.mulf %366, %363 : vector<13x256xf32>
    %368 = arith.select %365, %363, %367 : vector<13x256xi1>, vector<13x256xf32>
    %cst_247 = arith.constant 0.000000e+00 : f32
    %369 = vector.broadcast %cst_247 : f32 to vector<1x256xf32>
    %c0_248 = arith.constant 0 : index
    %c0_249 = arith.constant 0 : index
    %370 = vector.load %arg51[%c0_248, %c0_249] : memref<18x512xf32, #tpu.memory_space<vmem>>, vector<1x256xf32>
    tpu.vector_store %arg51[%c0_248, %c0_249], %369 {strides = array<i32>} : memref<18x512xf32, #tpu.memory_space<vmem>>, vector<1x256xf32>,
    %c14 = arith.constant 14 : index
    %c0_250 = arith.constant 0 : index
    %371 = vector.load %arg51[%c14, %c0_250] : memref<18x512xf32, #tpu.memory_space<vmem>>, vector<1x256xf32>
    tpu.vector_store %arg51[%c14, %c0_250], %369 {strides = array<i32>} : memref<18x512xf32, #tpu.memory_space<vmem>>, vector<1x256xf32>,
    %c1_251 = arith.constant 1 : index
    %c0_252 = arith.constant 0 : index
    %372 = vector.load %arg51[%c1_251, %c0_252] : memref<18x512xf32, #tpu.memory_space<vmem>>, vector<13x256xf32>
    tpu.vector_store %arg51[%c1_251, %c0_252], %368 {strides = array<i32>} : memref<18x512xf32, #tpu.memory_space<vmem>>, vector<13x256xf32>,
    %c0_253 = arith.constant 0 : index
    %c0_254 = arith.constant 0 : index
    %373 = vector.load %arg51[%c0_253, %c0_254] : memref<18x512xf32, #tpu.memory_space<vmem>>, vector<15x256xf32>
    %374 = vector.extract_strided_slice %373 {offsets = [0, 0], sizes = [14, 256], strides = [1, 1]} : vector<15x256xf32> to vector<14x256xf32>
    %375 = vector.extract_strided_slice %373 {offsets = [1, 0], sizes = [14, 256], strides = [1, 1]} : vector<15x256xf32> to vector<14x256xf32>
    %376 = tpu.concatenate %374, %375 in 1 : vector<14x256xf32>, vector<14x256xf32> -> vector<14x512xf32>
    %377 = arith.truncf %376 : vector<14x512xf32> to vector<14x512xbf16>
    %c0_255 = arith.constant 0 : index
    %c0_256 = arith.constant 0 : index
    %378 = vector.load %arg23[%c0_255, %c0_256] : memref<512x512xbf16, #tpu.memory_space<vmem>>, vector<512x512xbf16>
    %cst_257 = arith.constant dense<0.000000e+00> : vector<14x512xf32>
    %379 = tpu.matmul %377, %378, %cst_257 {dimension_numbers = #tpu.dot_dimension_numbers<[1], [0], [0], [1], [0, 0, 1, 1], [], []>} : vector<14x512xbf16>, vector<512x512xbf16>, vector<14x512xf32> -> vector<14x512xf32>
    %c0_258 = arith.constant 0 : index
    %c0_259 = arith.constant 0 : index
    %380 = vector.load %arg47[%c0_258, %c0_259] : memref<1x512xf32, #tpu.memory_space<vmem>>, vector<1x512xf32>
    %381 = vector.broadcast %380 : vector<1x512xf32> to vector<14x512xf32>
    %382 = arith.addf %379, %381 : vector<14x512xf32>
    %cst_260 = arith.constant 0.000000e+00 : f32
    %383 = vector.broadcast %cst_260 : f32 to vector<14x512xf32>
    %384 = arith.cmpf ogt, %382, %383 : vector<14x512xf32>
    %cst_261 = arith.constant 0.00999999977 : f32
    %385 = vector.broadcast %cst_261 : f32 to vector<14x512xf32>
    %386 = arith.mulf %385, %382 : vector<14x512xf32>
    %387 = arith.select %384, %382, %386 : vector<14x512xi1>, vector<14x512xf32>
    %cst_262 = arith.constant 0.000000e+00 : f32
    %388 = vector.broadcast %cst_262 : f32 to vector<1x512xf32>
    %c0_263 = arith.constant 0 : index
    %c0_264 = arith.constant 0 : index
    %389 = vector.load %arg51[%c0_263, %c0_264] : memref<18x512xf32, #tpu.memory_space<vmem>>, vector<1x512xf32>
    tpu.vector_store %arg51[%c0_263, %c0_264], %388 {strides = array<i32>} : memref<18x512xf32, #tpu.memory_space<vmem>>, vector<1x512xf32>,
    %c15 = arith.constant 15 : index
    %c0_265 = arith.constant 0 : index
    %390 = vector.load %arg51[%c15, %c0_265] : memref<18x512xf32, #tpu.memory_space<vmem>>, vector<1x512xf32>
    tpu.vector_store %arg51[%c15, %c0_265], %388 {strides = array<i32>} : memref<18x512xf32, #tpu.memory_space<vmem>>, vector<1x512xf32>,
    %c1_266 = arith.constant 1 : index
    %c0_267 = arith.constant 0 : index
    %391 = vector.load %arg51[%c1_266, %c0_267] : memref<18x512xf32, #tpu.memory_space<vmem>>, vector<14x512xf32>
    tpu.vector_store %arg51[%c1_266, %c0_267], %387 {strides = array<i32>} : memref<18x512xf32, #tpu.memory_space<vmem>>, vector<14x512xf32>,
    %c0_268 = arith.constant 0 : index
    %c0_269 = arith.constant 0 : index
    %392 = vector.load %arg51[%c0_268, %c0_269] : memref<18x512xf32, #tpu.memory_space<vmem>>, vector<16x512xf32>
    %393 = vector.extract_strided_slice %392 {offsets = [0, 0], sizes = [15, 512], strides = [1, 1]} : vector<16x512xf32> to vector<15x512xf32>
    %394 = vector.extract_strided_slice %392 {offsets = [1, 0], sizes = [15, 512], strides = [1, 1]} : vector<16x512xf32> to vector<15x512xf32>
    %395 = tpu.concatenate %393, %394 in 1 : vector<15x512xf32>, vector<15x512xf32> -> vector<15x1024xf32>
    %396 = arith.truncf %395 : vector<15x1024xf32> to vector<15x1024xbf16>
    %c0_270 = arith.constant 0 : index
    %c0_271 = arith.constant 0 : index
    %397 = vector.load %arg24[%c0_270, %c0_271] : memref<1024x512xbf16, #tpu.memory_space<vmem>>, vector<1024x512xbf16>
    %cst_272 = arith.constant dense<0.000000e+00> : vector<15x512xf32>
    %398 = tpu.matmul %396, %397, %cst_272 {dimension_numbers = #tpu.dot_dimension_numbers<[1], [0], [0], [1], [0, 0, 1, 1], [], []>} : vector<15x1024xbf16>, vector<1024x512xbf16>, vector<15x512xf32> -> vector<15x512xf32>
    %c0_273 = arith.constant 0 : index
    %c0_274 = arith.constant 0 : index
    %399 = vector.load %arg48[%c0_273, %c0_274] : memref<1x512xf32, #tpu.memory_space<vmem>>, vector<1x512xf32>
    %400 = vector.broadcast %399 : vector<1x512xf32> to vector<15x512xf32>
    %401 = arith.addf %398, %400 : vector<15x512xf32>
    %cst_275 = arith.constant 0.000000e+00 : f32
    %402 = vector.broadcast %cst_275 : f32 to vector<15x512xf32>
    %403 = arith.cmpf ogt, %401, %402 : vector<15x512xf32>
    %cst_276 = arith.constant 0.00999999977 : f32
    %404 = vector.broadcast %cst_276 : f32 to vector<15x512xf32>
    %405 = arith.mulf %404, %401 : vector<15x512xf32>
    %406 = arith.select %403, %401, %405 : vector<15x512xi1>, vector<15x512xf32>
    %cst_277 = arith.constant 0.000000e+00 : f32
    %407 = vector.broadcast %cst_277 : f32 to vector<1x512xf32>
    %c0_278 = arith.constant 0 : index
    %c0_279 = arith.constant 0 : index
    %408 = vector.load %arg51[%c0_278, %c0_279] : memref<18x512xf32, #tpu.memory_space<vmem>>, vector<1x512xf32>
    tpu.vector_store %arg51[%c0_278, %c0_279], %407 {strides = array<i32>} : memref<18x512xf32, #tpu.memory_space<vmem>>, vector<1x512xf32>,
    %c16_280 = arith.constant 16 : index
    %c0_281 = arith.constant 0 : index
    %409 = vector.load %arg51[%c16_280, %c0_281] : memref<18x512xf32, #tpu.memory_space<vmem>>, vector<1x512xf32>
    tpu.vector_store %arg51[%c16_280, %c0_281], %407 {strides = array<i32>} : memref<18x512xf32, #tpu.memory_space<vmem>>, vector<1x512xf32>,
    %c1_282 = arith.constant 1 : index
    %c0_283 = arith.constant 0 : index
    %410 = vector.load %arg51[%c1_282, %c0_283] : memref<18x512xf32, #tpu.memory_space<vmem>>, vector<15x512xf32>
    tpu.vector_store %arg51[%c1_282, %c0_283], %406 {strides = array<i32>} : memref<18x512xf32, #tpu.memory_space<vmem>>, vector<15x512xf32>,
    %c0_284 = arith.constant 0 : index
    %c0_285 = arith.constant 0 : index
    %411 = vector.load %arg51[%c0_284, %c0_285] : memref<18x512xf32, #tpu.memory_space<vmem>>, vector<17x512xf32>
    %412 = vector.extract_strided_slice %411 {offsets = [0, 0], sizes = [16, 512], strides = [1, 1]} : vector<17x512xf32> to vector<16x512xf32>
    %413 = vector.extract_strided_slice %411 {offsets = [1, 0], sizes = [16, 512], strides = [1, 1]} : vector<17x512xf32> to vector<16x512xf32>
    %414 = tpu.concatenate %412, %413 in 1 : vector<16x512xf32>, vector<16x512xf32> -> vector<16x1024xf32>
    %415 = arith.truncf %414 : vector<16x1024xf32> to vector<16x1024xbf16>
    %c0_286 = arith.constant 0 : index
    %c0_287 = arith.constant 0 : index
    %416 = vector.load %arg25[%c0_286, %c0_287] : memref<1024x512xbf16, #tpu.memory_space<vmem>>, vector<1024x512xbf16>
    %cst_288 = arith.constant dense<0.000000e+00> : vector<16x512xf32>
    %417 = tpu.matmul %415, %416, %cst_288 {dimension_numbers = #tpu.dot_dimension_numbers<[1], [0], [0], [1], [0, 0, 1, 1], [], []>} : vector<16x1024xbf16>, vector<1024x512xbf16>, vector<16x512xf32> -> vector<16x512xf32>
    %c0_289 = arith.constant 0 : index
    %c0_290 = arith.constant 0 : index
    %418 = vector.load %arg49[%c0_289, %c0_290] : memref<1x512xf32, #tpu.memory_space<vmem>>, vector<1x512xf32>
    %419 = vector.broadcast %418 : vector<1x512xf32> to vector<16x512xf32>
    %420 = arith.addf %417, %419 : vector<16x512xf32>
    %c0_291 = arith.constant 0 : index
    %c0_292 = arith.constant 0 : index
    %c0_293 = arith.constant 0 : index
    %421 = vector.load %arg50[%c0_291, %c0_292, %c0_293] : memref<1x16x512xf32, #tpu.memory_space<vmem>>, vector<1x16x512xf32>
    %422 = vector.shape_cast %421 : vector<1x16x512xf32> to vector<16x512xf32>
    %423 = vector.shape_cast %420 : vector<16x512xf32> to vector<1x16x512xf32>
    tpu.vector_store %arg50[%c0_291, %c0_292, %c0_293], %423 {strides = array<i32>} : memref<1x16x512xf32, #tpu.memory_space<vmem>>, vector<1x16x512xf32>,
    return
  }
  func.func @transform_0(%arg0: i32) -> (i32, i32, i32) {
    %c0_i32 = arith.constant 0 : i32
    %c0_i32_0 = arith.constant 0 : i32
    %c0_i32_1 = arith.constant 0 : i32
    return %arg0, %c0_i32, %c0_i32_0 : i32, i32, i32
  }
  func.func @transform_1(%arg0: i32) -> (i32, i32) {
    %c0_i32 = arith.constant 0 : i32
    %c0_i32_0 = arith.constant 0 : i32
    %c0_i32_1 = arith.constant 0 : i32
    return %c0_i32, %c0_i32_0 : i32, i32
  }
  func.func @transform_2(%arg0: i32) -> (i32, i32) {
    %c0_i32 = arith.constant 0 : i32
    %c0_i32_0 = arith.constant 0 : i32
    %c0_i32_1 = arith.constant 0 : i32
    return %c0_i32, %c0_i32_0 : i32, i32
  }
  func.func @transform_3(%arg0: i32) -> (i32, i32) {
    %c0_i32 = arith.constant 0 : i32
    %c0_i32_0 = arith.constant 0 : i32
    %c0_i32_1 = arith.constant 0 : i32
    return %c0_i32, %c0_i32_0 : i32, i32
  }
  func.func @transform_4(%arg0: i32) -> (i32, i32) {
    %c0_i32 = arith.constant 0 : i32
    %c0_i32_0 = arith.constant 0 : i32
    %c0_i32_1 = arith.constant 0 : i32
    return %c0_i32, %c0_i32_0 : i32, i32
  }
  func.func @transform_5(%arg0: i32) -> (i32, i32) {
    %c0_i32 = arith.constant 0 : i32
    %c0_i32_0 = arith.constant 0 : i32
    %c0_i32_1 = arith.constant 0 : i32
    return %c0_i32, %c0_i32_0 : i32, i32
  }
  func.func @transform_6(%arg0: i32) -> (i32, i32) {
    %c0_i32 = arith.constant 0 : i32
    %c0_i32_0 = arith.constant 0 : i32
    %c0_i32_1 = arith.constant 0 : i32
    return %c0_i32, %c0_i32_0 : i32, i32
  }
  func.func @transform_7(%arg0: i32) -> (i32, i32) {
    %c0_i32 = arith.constant 0 : i32
    %c0_i32_0 = arith.constant 0 : i32
    %c0_i32_1 = arith.constant 0 : i32
    return %c0_i32, %c0_i32_0 : i32, i32
  }
  func.func @transform_8(%arg0: i32) -> (i32, i32) {
    %c0_i32 = arith.constant 0 : i32
    %c0_i32_0 = arith.constant 0 : i32
    %c0_i32_1 = arith.constant 0 : i32
    return %c0_i32, %c0_i32_0 : i32, i32
  }
  func.func @transform_9(%arg0: i32) -> (i32, i32) {
    %c0_i32 = arith.constant 0 : i32
    %c0_i32_0 = arith.constant 0 : i32
    %c0_i32_1 = arith.constant 0 : i32
    return %c0_i32, %c0_i32_0 : i32, i32
  }
  func.func @transform_10(%arg0: i32) -> (i32, i32) {
    %c0_i32 = arith.constant 0 : i32
    %c0_i32_0 = arith.constant 0 : i32
    %c0_i32_1 = arith.constant 0 : i32
    return %c0_i32, %c0_i32_0 : i32, i32
  }
  func.func @transform_11(%arg0: i32) -> (i32, i32) {
    %c0_i32 = arith.constant 0 : i32
    %c0_i32_0 = arith.constant 0 : i32
    %c0_i32_1 = arith.constant 0 : i32
    return %c0_i32, %c0_i32_0 : i32, i32
  }
  func.func @transform_12(%arg0: i32) -> (i32, i32) {
    %c0_i32 = arith.constant 0 : i32
    %c0_i32_0 = arith.constant 0 : i32
    %c0_i32_1 = arith.constant 0 : i32
    return %c0_i32, %c0_i32_0 : i32, i32
  }
  func.func @transform_13(%arg0: i32) -> (i32, i32) {
    %c0_i32 = arith.constant 0 : i32
    %c0_i32_0 = arith.constant 0 : i32
    %c0_i32_1 = arith.constant 0 : i32
    return %c0_i32, %c0_i32_0 : i32, i32
  }
  func.func @transform_14(%arg0: i32) -> (i32, i32) {
    %c0_i32 = arith.constant 0 : i32
    %c0_i32_0 = arith.constant 0 : i32
    %c0_i32_1 = arith.constant 0 : i32
    return %c0_i32, %c0_i32_0 : i32, i32
  }
  func.func @transform_15(%arg0: i32) -> (i32, i32) {
    %c0_i32 = arith.constant 0 : i32
    %c0_i32_0 = arith.constant 0 : i32
    %c0_i32_1 = arith.constant 0 : i32
    return %c0_i32, %c0_i32_0 : i32, i32
  }
  func.func @transform_16(%arg0: i32) -> (i32, i32) {
    %c0_i32 = arith.constant 0 : i32
    %c0_i32_0 = arith.constant 0 : i32
    %c0_i32_1 = arith.constant 0 : i32
    return %c0_i32, %c0_i32_0 : i32, i32
  }
  func.func @transform_17(%arg0: i32) -> (i32, i32) {
    %c0_i32 = arith.constant 0 : i32
    %c0_i32_0 = arith.constant 0 : i32
    %c0_i32_1 = arith.constant 0 : i32
    return %c0_i32, %c0_i32_0 : i32, i32
  }
  func.func @transform_18(%arg0: i32) -> (i32, i32) {
    %c0_i32 = arith.constant 0 : i32
    %c0_i32_0 = arith.constant 0 : i32
    %c0_i32_1 = arith.constant 0 : i32
    return %c0_i32, %c0_i32_0 : i32, i32
  }
  func.func @transform_19(%arg0: i32) -> (i32, i32) {
    %c0_i32 = arith.constant 0 : i32
    %c0_i32_0 = arith.constant 0 : i32
    %c0_i32_1 = arith.constant 0 : i32
    return %c0_i32, %c0_i32_0 : i32, i32
  }
  func.func @transform_20(%arg0: i32) -> (i32, i32) {
    %c0_i32 = arith.constant 0 : i32
    %c0_i32_0 = arith.constant 0 : i32
    %c0_i32_1 = arith.constant 0 : i32
    return %c0_i32, %c0_i32_0 : i32, i32
  }
  func.func @transform_21(%arg0: i32) -> (i32, i32) {
    %c0_i32 = arith.constant 0 : i32
    %c0_i32_0 = arith.constant 0 : i32
    %c0_i32_1 = arith.constant 0 : i32
    return %c0_i32, %c0_i32_0 : i32, i32
  }
  func.func @transform_22(%arg0: i32) -> (i32, i32) {
    %c0_i32 = arith.constant 0 : i32
    %c0_i32_0 = arith.constant 0 : i32
    %c0_i32_1 = arith.constant 0 : i32
    return %c0_i32, %c0_i32_0 : i32, i32
  }
  func.func @transform_23(%arg0: i32) -> (i32, i32) {
    %c0_i32 = arith.constant 0 : i32
    %c0_i32_0 = arith.constant 0 : i32
    %c0_i32_1 = arith.constant 0 : i32
    return %c0_i32, %c0_i32_0 : i32, i32
  }
  func.func @transform_24(%arg0: i32) -> (i32, i32) {
    %c0_i32 = arith.constant 0 : i32
    %c0_i32_0 = arith.constant 0 : i32
    %c0_i32_1 = arith.constant 0 : i32
    return %c0_i32, %c0_i32_0 : i32, i32
  }
  func.func @transform_25(%arg0: i32) -> (i32, i32) {
    %c0_i32 = arith.constant 0 : i32
    %c0_i32_0 = arith.constant 0 : i32
    %c0_i32_1 = arith.constant 0 : i32
    return %c0_i32, %c0_i32_0 : i32, i32
  }
  func.func @transform_26(%arg0: i32) -> (i32, i32) {
    %c0_i32 = arith.constant 0 : i32
    %c0_i32_0 = arith.constant 0 : i32
    %c0_i32_1 = arith.constant 0 : i32
    return %c0_i32, %c0_i32_0 : i32, i32
  }
  func.func @transform_27(%arg0: i32) -> (i32, i32) {
    %c0_i32 = arith.constant 0 : i32
    %c0_i32_0 = arith.constant 0 : i32
    %c0_i32_1 = arith.constant 0 : i32
    return %c0_i32, %c0_i32_0 : i32, i32
  }
  func.func @transform_28(%arg0: i32) -> (i32, i32) {
    %c0_i32 = arith.constant 0 : i32
    %c0_i32_0 = arith.constant 0 : i32
    %c0_i32_1 = arith.constant 0 : i32
    return %c0_i32, %c0_i32_0 : i32, i32
  }
  func.func @transform_29(%arg0: i32) -> (i32, i32) {
    %c0_i32 = arith.constant 0 : i32
    %c0_i32_0 = arith.constant 0 : i32
    %c0_i32_1 = arith.constant 0 : i32
    return %c0_i32, %c0_i32_0 : i32, i32
  }
  func.func @transform_30(%arg0: i32) -> (i32, i32) {
    %c0_i32 = arith.constant 0 : i32
    %c0_i32_0 = arith.constant 0 : i32
    %c0_i32_1 = arith.constant 0 : i32
    return %c0_i32, %c0_i32_0 : i32, i32
  }
  func.func @transform_31(%arg0: i32) -> (i32, i32) {
    %c0_i32 = arith.constant 0 : i32
    %c0_i32_0 = arith.constant 0 : i32
    %c0_i32_1 = arith.constant 0 : i32
    return %c0_i32, %c0_i32_0 : i32, i32
  }
  func.func @transform_32(%arg0: i32) -> (i32, i32) {
    %c0_i32 = arith.constant 0 : i32
    %c0_i32_0 = arith.constant 0 : i32
    %c0_i32_1 = arith.constant 0 : i32
    return %c0_i32, %c0_i32_0 : i32, i32
  }
  func.func @transform_33(%arg0: i32) -> (i32, i32) {
    %c0_i32 = arith.constant 0 : i32
    %c0_i32_0 = arith.constant 0 : i32
    %c0_i32_1 = arith.constant 0 : i32
    return %c0_i32, %c0_i32_0 : i32, i32
  }
  func.func @transform_34(%arg0: i32) -> (i32, i32) {
    %c0_i32 = arith.constant 0 : i32
    %c0_i32_0 = arith.constant 0 : i32
    %c0_i32_1 = arith.constant 0 : i32
    return %c0_i32, %c0_i32_0 : i32, i32
  }
  func.func @transform_35(%arg0: i32) -> (i32, i32) {
    %c0_i32 = arith.constant 0 : i32
    %c0_i32_0 = arith.constant 0 : i32
    %c0_i32_1 = arith.constant 0 : i32
    return %c0_i32, %c0_i32_0 : i32, i32
  }
  func.func @transform_36(%arg0: i32) -> (i32, i32) {
    %c0_i32 = arith.constant 0 : i32
    %c0_i32_0 = arith.constant 0 : i32
    %c0_i32_1 = arith.constant 0 : i32
    return %c0_i32, %c0_i32_0 : i32, i32
  }
  func.func @transform_37(%arg0: i32) -> (i32, i32) {
    %c0_i32 = arith.constant 0 : i32
    %c0_i32_0 = arith.constant 0 : i32
    %c0_i32_1 = arith.constant 0 : i32
    return %c0_i32, %c0_i32_0 : i32, i32
  }
  func.func @transform_38(%arg0: i32) -> (i32, i32) {
    %c0_i32 = arith.constant 0 : i32
    %c0_i32_0 = arith.constant 0 : i32
    %c0_i32_1 = arith.constant 0 : i32
    return %c0_i32, %c0_i32_0 : i32, i32
  }
  func.func @transform_39(%arg0: i32) -> (i32, i32) {
    %c0_i32 = arith.constant 0 : i32
    %c0_i32_0 = arith.constant 0 : i32
    %c0_i32_1 = arith.constant 0 : i32
    return %c0_i32, %c0_i32_0 : i32, i32
  }
  func.func @transform_40(%arg0: i32) -> (i32, i32) {
    %c0_i32 = arith.constant 0 : i32
    %c0_i32_0 = arith.constant 0 : i32
    %c0_i32_1 = arith.constant 0 : i32
    return %c0_i32, %c0_i32_0 : i32, i32
  }
  func.func @transform_41(%arg0: i32) -> (i32, i32) {
    %c0_i32 = arith.constant 0 : i32
    %c0_i32_0 = arith.constant 0 : i32
    %c0_i32_1 = arith.constant 0 : i32
    return %c0_i32, %c0_i32_0 : i32, i32
  }
  func.func @transform_42(%arg0: i32) -> (i32, i32) {
    %c0_i32 = arith.constant 0 : i32
    %c0_i32_0 = arith.constant 0 : i32
    %c0_i32_1 = arith.constant 0 : i32
    return %c0_i32, %c0_i32_0 : i32, i32
  }
  func.func @transform_43(%arg0: i32) -> (i32, i32) {
    %c0_i32 = arith.constant 0 : i32
    %c0_i32_0 = arith.constant 0 : i32
    %c0_i32_1 = arith.constant 0 : i32
    return %c0_i32, %c0_i32_0 : i32, i32
  }
  func.func @transform_44(%arg0: i32) -> (i32, i32) {
    %c0_i32 = arith.constant 0 : i32
    %c0_i32_0 = arith.constant 0 : i32
    %c0_i32_1 = arith.constant 0 : i32
    return %c0_i32, %c0_i32_0 : i32, i32
  }
  func.func @transform_45(%arg0: i32) -> (i32, i32) {
    %c0_i32 = arith.constant 0 : i32
    %c0_i32_0 = arith.constant 0 : i32
    %c0_i32_1 = arith.constant 0 : i32
    return %c0_i32, %c0_i32_0 : i32, i32
  }
  func.func @transform_46(%arg0: i32) -> (i32, i32) {
    %c0_i32 = arith.constant 0 : i32
    %c0_i32_0 = arith.constant 0 : i32
    %c0_i32_1 = arith.constant 0 : i32
    return %c0_i32, %c0_i32_0 : i32, i32
  }
  func.func @transform_47(%arg0: i32) -> (i32, i32) {
    %c0_i32 = arith.constant 0 : i32
    %c0_i32_0 = arith.constant 0 : i32
    %c0_i32_1 = arith.constant 0 : i32
    return %c0_i32, %c0_i32_0 : i32, i32
  }
  func.func @transform_48(%arg0: i32) -> (i32, i32) {
    %c0_i32 = arith.constant 0 : i32
    %c0_i32_0 = arith.constant 0 : i32
    %c0_i32_1 = arith.constant 0 : i32
    return %c0_i32, %c0_i32_0 : i32, i32
  }
  func.func @transform_49(%arg0: i32) -> (i32, i32, i32) {
    %c0_i32 = arith.constant 0 : i32
    %c0_i32_0 = arith.constant 0 : i32
    %c0_i32_1 = arith.constant 0 : i32
    return %arg0, %c0_i32, %c0_i32_0 : i32, i32, i32
  }
}

</mosaic_0001>

<bundles_post_ra>
// kernel: conv1dnet_forward.1
= control target key start
LH: loop header
LB: loop body
LE: loop exit
PB: predicated region body
PF: predicated region fallthrough
CT: control target
= control target key end

     0   :  { %s21805_s6 = smov 1   ;;  %s21806_s10 = smov 2   ;;  %s23099_s0 = inlined_call_operand.smem [shape: u32[50], index: -1, kind: input, shape index: {}] }
   0x1   :  { %s21888_s5 = sld [smem:[%s23099_s0]]   ;;  %s21807_s14 = smov 3  }
   0x2   :  { %s21893_s9 = sld [smem:[%s23099_s0 + %s21805_s6]]   ;;  %s21808_s18 = smov 4  }
   0x3   :  { %s21898_s13 = sld [smem:[%s23099_s0 + %s21806_s10]]   ;;  %s21809_s22 = smov 5  }
   0x4   :  { %s21903_s17 = sld [smem:[%s23099_s0 + %s21807_s14]]   ;;  %s21810_s26 = smov 6  }
   0x5   :  { %s21908_s21 = sld [smem:[%s23099_s0 + %s21808_s18]]   ;;  %s21811_s30 = smov 7  }
   0x6   :  { %s21913_s25 = sld [smem:[%s23099_s0 + %s21809_s22]]   ;;  %s21812_s4 = smov 8  }
   0x7   :  { %23143 = sst [smem:[#allocation33_spill]] %s21888_s5  ;;  %s21813_s10 = smov 9  }
   0x8   :  { %23144 = sst [smem:[#allocation34_spill]] %s21893_s9  ;;  %s21814_s15 = smov 10  }
   0x9   :  { %23145 = sst [smem:[#allocation35_spill]] %s21898_s13  ;;  %s21815_s20 = smov 11  }
   0xa   :  { %23146 = sst [smem:[#allocation36_spill]] %s21903_s17  ;;  %s21817_s1 = smov 13  }
   0xb   :  { %23147 = sst [smem:[#allocation37_spill]] %s21908_s21  ;;  %s21818_s7 = smov 14  }
   0xc   :  { %23148 = sst [smem:[#allocation38_spill]] %s21913_s25  ;;  %s21820_s22 = smov 16  }
   0xd   :  { %s21918_s29 = sld [smem:[%s23099_s0 + %s21810_s26]]   ;;  %s21816_s26 = smov 12  }
   0xe   :  { %s21923_s3 = sld [smem:[%s23099_s0 + %s21811_s30]]   ;;  %s21821_s28 = smov 17  }
   0xf   :  { %s21928_s8 = sld [smem:[%s23099_s0 + %s21812_s4]]  }
  0x10   :  { %s21933_s14 = sld [smem:[%s23099_s0 + %s21813_s10]]  }
  0x11   :  { %s21938_s19 = sld [smem:[%s23099_s0 + %s21814_s15]]   ;;  %s21819_s15 = smov 15  }
  0x12   :  { %s21943_s24 = sld [smem:[%s23099_s0 + %s21815_s20]]  }
  0x13   :  { %s21948_s30 = sld [smem:[%s23099_s0 + %s21816_s26]]  }
  0x14   :  { %23149 = sst [smem:[#allocation39_spill]] %s21923_s3 }
  0x15   :  { %23150 = sst [smem:[#allocation40_spill]] %s21928_s8 }
  0x16   :  { %23151 = sst [smem:[#allocation41_spill]] %s21933_s14 }
  0x17   :  { %23152 = sst [smem:[#allocation42_spill]] %s21938_s19 }
  0x18   :  { %23153 = sst [smem:[#allocation43_spill]] %s21943_s24 }
  0x19   :  { %23154 = sst [smem:[#allocation44_spill]] %s21948_s30 }
  0x1a   :  { %s21953_s6 = sld [smem:[%s23099_s0 + %s21817_s1]]  }
  0x1b   :  { %s21958_s12 = sld [smem:[%s23099_s0 + %s21818_s7]]   ;;  %s21822_s7 = smov 18  }
  0x1c   :  { %s21963_s20 = sld [smem:[%s23099_s0 + %s21819_s15]]   ;;  %s21823_s15 = smov 19  }
  0x1d   :  { %s21968_s27 = sld [smem:[%s23099_s0 + %s21820_s22]]   ;;  %s21824_s22 = smov 20  }
  0x1e   :  { %s21973_s4 = sld [smem:[%s23099_s0 + %s21821_s28]]   ;;  %s21825_s28 = smov 21  }
  0x20   :  { %23155 = sst [smem:[#allocation45_spill]] %s21953_s6 }
  0x21   :  { %s21978_s6 = sld [smem:[%s23099_s0 + %s21822_s7]]   ;;  %s21826_s7 = smov 22  }
  0x22   :  { %23156 = sst [smem:[#allocation46_spill]] %s21963_s20 }
  0x23   :  { %23157 = sst [smem:[#allocation47_spill]] %s21968_s27 }
  0x24   :  { %23158 = sst [smem:[#allocation48_spill]] %s21973_s4 }
  0x25   :  { %s21983_s20 = sld [smem:[%s23099_s0 + %s21823_s15]]   ;;  %s21827_s15 = smov 23  }
  0x26   :  { %s21988_s27 = sld [smem:[%s23099_s0 + %s21824_s22]]   ;;  %s21828_s22 = smov 24  }
  0x27   :  { %23159 = sst [smem:[#allocation49_spill]] %s21978_s6 }
  0x28   :  { %s21993_s4 = sld [smem:[%s23099_s0 + %s21825_s28]]   ;;  %s21829_s28 = smov 25  }
  0x29   :  { %s21998_s6 = sld [smem:[%s23099_s0 + %s21826_s7]]   ;;  %s21830_s7 = smov 26  }
  0x2a   :  { %s22003_s30 = sld [smem:[%s23099_s0 + %s21827_s15]]   ;;  %s21831_s15 = smov 27  }
  0x2b   :  { %23160 = sst [smem:[#allocation50_spill]] %s21983_s20 }
  0x2c   :  { %s22008_s24 = sld [smem:[%s23099_s0 + %s21828_s22]]   ;;  %s21832_s22 = smov 28  }
  0x2d   :  { %s22013_s19 = sld [smem:[%s23099_s0 + %s21829_s28]]   ;;  %s21833_s28 = smov 29  }
  0x2e   :  { %23161 = sst [smem:[#allocation51_spill]] %s21993_s4 }
  0x2f   :  { %23162 = sst [smem:[#allocation52_spill]] %s21998_s6 }
  0x30   :  { %s22018_s14 = sld [smem:[%s23099_s0 + %s21830_s7]]   ;;  %s21834_s7 = smov 30  }
  0x31   :  { %s22023_s8 = sld [smem:[%s23099_s0 + %s21831_s15]]   ;;  %s21835_s15 = smov 31  }
  0x32   :  { %s22028_s3 = sld [smem:[%s23099_s0 + %s21832_s22]]   ;;  %s21836_s22 = smov 32  }
  0x33   :  { %s22033_s21 = sld [smem:[%s23099_s0 + %s21833_s28]]   ;;  %s21837_s28 = smov 33  }
  0x36   :  { %23163 = sst [smem:[#allocation53_spill]] %s22018_s14 }
  0x37   :  { %23164 = sst [smem:[#allocation54_spill]] %s22023_s8 }
  0x38   :  { %23165 = sst [smem:[#allocation55_spill]] %s22028_s3 }
  0x39   :  { %23166 = sst [smem:[#allocation56_spill]] %s22033_s21 }
  0x3a   :  { %s22038_s14 = sld [smem:[%s23099_s0 + %s21834_s7]]   ;;  %s21838_s7 = smov 34  }
  0x3b   :  { %s22043_s8 = sld [smem:[%s23099_s0 + %s21835_s15]]   ;;  %s21839_s15 = smov 35  }
  0x3c   :  { %s22048_s3 = sld [smem:[%s23099_s0 + %s21836_s22]]   ;;  %s21840_s22 = smov 36  }
  0x3d   :  { %s22053_s21 = sld [smem:[%s23099_s0 + %s21837_s28]]   ;;  %s21841_s28 = smov 37  }
  0x40   :  { %23167 = sst [smem:[#allocation57_spill]] %s22038_s14 }
  0x41   :  { %23168 = sst [smem:[#allocation58_spill]] %s22043_s8 }
  0x42   :  { %23169 = sst [smem:[#allocation59_spill]] %s22048_s3 }
  0x43   :  { %23170 = sst [smem:[#allocation60_spill]] %s22053_s21 }
  0x44   :  { %s22058_s14 = sld [smem:[%s23099_s0 + %s21838_s7]]   ;;  %s21842_s7 = smov 38  }
  0x45   :  { %s22063_s8 = sld [smem:[%s23099_s0 + %s21839_s15]]   ;;  %s21843_s15 = smov 39  }
  0x46   :  { %s22068_s3 = sld [smem:[%s23099_s0 + %s21840_s22]]   ;;  %s21844_s22 = smov 40  }
  0x47   :  { %s22073_s21 = sld [smem:[%s23099_s0 + %s21841_s28]]   ;;  %s21845_s28 = smov 41  }
  0x4a   :  { %23171 = sst [smem:[#allocation61_spill]] %s22058_s14 }
  0x4b   :  { %23172 = sst [smem:[#allocation62_spill]] %s22063_s8 }
  0x4c   :  { %23173 = sst [smem:[#allocation63_spill]] %s22068_s3 }
  0x4d   :  { %23174 = sst [smem:[#allocation64_spill]] %s22073_s21 }
  0x4e   :  { %s22078_s14 = sld [smem:[%s23099_s0 + %s21842_s7]]   ;;  %s21846_s7 = smov 42  }
  0x4f   :  { %s22083_s8 = sld [smem:[%s23099_s0 + %s21843_s15]]   ;;  %s21847_s15 = smov 43  }
  0x50   :  { %s22088_s3 = sld [smem:[%s23099_s0 + %s21844_s22]]   ;;  %s21848_s22 = smov 44  }
  0x51   :  { %s22093_s21 = sld [smem:[%s23099_s0 + %s21845_s28]]   ;;  %s21849_s28 = smov 45  }
  0x54   :  { %23175 = sst [smem:[#allocation65_spill]] %s22078_s14 }
  0x55   :  { %23176 = sst [smem:[#allocation66_spill]] %s22083_s8 }
  0x56   :  { %23177 = sst [smem:[#allocation67_spill]] %s22088_s3 }
  0x57   :  { %23178 = sst [smem:[#allocation68_spill]] %s22093_s21 }
  0x58   :  { %s22098_s14 = sld [smem:[%s23099_s0 + %s21846_s7]]   ;;  %s21850_s7 = smov 46  }
  0x59   :  { %s22103_s8 = sld [smem:[%s23099_s0 + %s21847_s15]]   ;;  %s21851_s15 = smov 47  }
  0x5a   :  { %s22108_s3 = sld [smem:[%s23099_s0 + %s21848_s22]]   ;;  %s21852_s22 = smov 48  }
  0x5b   :  { %s22113_s21 = sld [smem:[%s23099_s0 + %s21849_s28]]   ;;  %s21853_s28 = smov 49  }
  0x5e   :  { %23179 = sst [smem:[#allocation69_spill]] %s22098_s14 }
  0x5f   :  { %23180 = sst [smem:[#allocation70_spill]] %s22103_s8 }
  0x60   :  { %23181 = sst [smem:[#allocation71_spill]] %s22108_s3 }
  0x61   :  { %23182 = sst [smem:[#allocation72_spill]] %s22113_s21 }
  0x62   :  { %s22118_s14 = sld [smem:[%s23099_s0 + %s21850_s7]]  }
  0x63   :  { %s22123_s8 = sld [smem:[%s23099_s0 + %s21851_s15]]  }
  0x64   :  { %s22128_s3 = sld [smem:[%s23099_s0 + %s21852_s22]]  }
  0x65   :  { %s22133_s21 = sld [smem:[%s23099_s0 + %s21853_s28]]  }
  0x69   :  { %23183 = sst [smem:[#allocation73_spill]] %s22123_s8 }
  0x6a   :  { %23184 = sst [smem:[#allocation74_spill]] %s22128_s3 }
  0x6b   :  { %23185 = sst [smem:[#allocation75_spill]] %s22133_s21 }
  0x6c   :  { %104 = vsyncpa [#allocation4], 0 }
  0x6d   :  { %106 = vsyncpa [#allocation4 + $0x1], 0 }
  0x6e   :  { %107 = vsyncpa [#allocation7], 0 }
  0x6f   :  { %108 = vsyncpa [#allocation10], 0 }
  0x70   :  { %109 = vsyncpa [#allocation13], 0 }
  0x71   :  { %110 = vsyncpa [#allocation16], 0 }
  0x72   :  { %111 = vsyncpa [#allocation19], 0 }
  0x73   :  { %112 = vsyncpa [#allocation22], 0 }
  0x74   :  { %113 = vsyncpa [#allocation5], 0 }
  0x75   :  { %115 = vsyncpa [#allocation5 + $0x1], 0  ;;  %s22135_s7 = smov 0   ;;  %s22137_s10 = smov 0  }
  0x76   :  { %s22139_s11 = smov 0   ;;  %s22141_s15 = smov 0  }
  0x77 LB: > { %s23186_s6 = sld [smem:[#allocation52_spill]]  ;;  %s23187_s5 = sld [smem:[#allocation33_spill]]  ;;  %s21803_s15 = sphi %s22141_s15, %s23269_s15   ;;  %s21799_s11 = sphi %s22139_s11, %s23268_s11   ;;  %s21795_s10 = sphi %s22137_s10, %s23267_s10   ;;  %s21791_s7 = sphi %s22135_s7, %s23266_s7  }
  0x78   : > { %s23188_s25 = sld [smem:[#allocation38_spill]]  ;;  %s23189_s13 = sld [smem:[#allocation35_spill]] }
  0x79   : > { %s23190_s20 = sld [smem:[#allocation50_spill]]  ;;  %s23191_s4 = sld [smem:[#allocation51_spill]] }
  0x7a   : > { %s23192_s17 = sld [smem:[#allocation36_spill]]  ;;  %s23193_s9 = sld [smem:[#allocation34_spill]] }
  0x7b   : > { %s21854_s0 = smov [#allocation6]   ;;  %s22156_s18 = sadd.s32 4294967295, %s21803_s15  }
  0x7c   : > { %s1198_s16 = sshll.u32 %s21854_s0, 4  ;;  %p16431_p0 = scmp.ge.s32.totalorder %s21803_s15, 1  ;;  %s22161_s16 = int_to_ptr.vmem [resolvable:$true] %s1198_s16 }
  0x7d   : > { %p23113_p1 = scmp.eq.s32.totalorder %s22156_s18, 0  ;;  %p1186_p2 = scmp.lt.s32.totalorder %s21803_s15, 3 }
  0x7e   : > { %s21855_s23 = smov [#allocation9]   ;;  %s21856_s1 = smov [#allocation12]  }
  0x7f   : > { %p22163_p3 = pnand %p16431_p0, %p1186_p2  ;;  %s1224_s26 = sshll.u32 %s21855_s23, 4  ;;  %s22176_s26 = int_to_ptr.vmem [resolvable:$true] %s1224_s26 }
  0x80   : > { %s22178_s2 = sshll.u32 %s21856_s1, 4  ;;  %s21347_s0 = scalar_lea.hbm %s23193_s9, 32768  ;;  %s1254_s2 = int_to_ptr.vmem [resolvable:$true] %s22178_s2 }
  0x81   : > { %s23194_s22 = scalar_select %p22163_p3, 1, 0 }
  0x82   : > { %p18725_p5 = pneg %p22163_p3  ;;  %p21348_p7 = scmp.ne.s32.totalorder %s23193_s9, %s21347_s0 }
  0x83   : > { %p21354_p11 = scmp.lt.u32.totalorder %s21347_s0, %s23193_s9 }
  0x84   : > { %p22172_p6 = pnand %p18725_p5, %p23113_p1 }
  0x86   : > { %p22184_p8 = pneg %p22172_p6 }
  0x88   : > { %p21350_p9 = pnand %p22184_p8, %p21348_p7 }
  0x8a   : > { %p21351_p10 = pneg %p21350_p9 }
  0x8c   : > { %p21356_p12 = pnand %p21354_p11, %p21351_p10 }
  0x8e   : > { %21359 = shalt.err (!%p21356_p12)
}
  0x8f   : > { %s21360_s23 = scalar_lea.vmem %s22161_s16, 32768  ;;  %p21368_p5 = scmp.lt.s32.totalorder %s22161_s16, %s22161_s16 }
  0x90   : > { %p21361_p13 = scmp.ne.s32.totalorder %s22161_s16, %s21360_s23  ;;  %p21369_p4 = scmp.lt.s32.totalorder %s21360_s23, %s21360_s23 }
  0x92   : > { %p21363_p0 = pnand %p21361_p13, %p22184_p8  ;;  %p21370_p1 = por %p21369_p4, %p21368_p5 }
  0x94   : > { %p21364_p2 = pneg %p21363_p0 }
  0x96   : > { %p21371_p3 = pnand %p21370_p1, %p21364_p2 }
  0x98   : > { %21374 = shalt.err (!%p21371_p3)
}
  0x99   : > { %s23115_s1 = smov 256   ;;  %s23117_s0 = smov 16  }
  0x9a   : > { %18728 = dma.hbm_to_vmem [thread:$0]  (!%p22172_p6), %s23193_s9, 32768, %s22161_s16, [#allocation7], %s23115_s1, %s23115_s1, %s23117_s0  }
  0x9b   : > { %s21375_s3 = scalar_lea.hbm %s23192_s17, 16384 }
  0x9c   : > { %p21376_p7 = scmp.ne.s32.totalorder %s23192_s17, %s21375_s3  ;;  %p21382_p3 = scmp.lt.u32.totalorder %s21375_s3, %s23192_s17 }
  0x9e   : > { %p21378_p4 = pnand %p21376_p7, %p22184_p8 }
  0xa0   : > { %p21379_p1 = pneg %p21378_p4 }
  0xa2   : > { %p21384_p9 = pnand %p21382_p3, %p21379_p1 }
  0xa4   : > { %21387 = shalt.err (!%p21384_p9)
}
  0xa5   : > { %s21388_s23 = scalar_lea.vmem %s22176_s26, 16384  ;;  %p21396_p13 = scmp.lt.s32.totalorder %s22176_s26, %s22176_s26 }
  0xa6   : > { %p21389_p10 = scmp.ne.s32.totalorder %s22176_s26, %s21388_s23  ;;  %p21397_p0 = scmp.lt.s32.totalorder %s21388_s23, %s21388_s23 }
  0xa8   : > { %p21391_p11 = pnand %p21389_p10, %p22184_p8  ;;  %p21398_p2 = por %p21397_p0, %p21396_p13 }
  0xaa   : > { %p21392_p12 = pneg %p21391_p11 }
  0xac   : > { %p21399_p5 = pnand %p21398_p2, %p21392_p12 }
  0xae   : > { %21402 = shalt.err (!%p21399_p5)
}
  0xaf   : > { %s23119_s16 = smov 128   ;;  %s23121_s3 = smov 8  }
  0xb0   : > { %18734 = dma.hbm_to_vmem [thread:$0]  (!%p22172_p6), %s23192_s17, 16384, %s22176_s26, [#allocation10], %s23119_s16, %s23119_s16, %s23121_s3  }
  0xb1   : > { %s21403_s23 = scalar_lea.hbm %s21918_s29, 4096 }
  0xb2   : > { %p21404_p7 = scmp.ne.s32.totalorder %s21918_s29, %s21403_s23  ;;  %p21410_p3 = scmp.lt.u32.totalorder %s21403_s23, %s21918_s29 }
  0xb4   : > { %p21406_p4 = pnand %p21404_p7, %p22184_p8 }
  0xb6   : > { %p21407_p1 = pneg %p21406_p4 }
  0xb8   : > { %p21412_p9 = pnand %p21410_p3, %p21407_p1 }
  0xba   : > { %21415 = shalt.err (!%p21412_p9)
}
  0xbb   : > { %s21416_s1 = scalar_lea.vmem %s1254_s2, 4096  ;;  %p21424_p13 = scmp.lt.s32.totalorder %s1254_s2, %s1254_s2 }
  0xbc   : > { %p21417_p10 = scmp.ne.s32.totalorder %s1254_s2, %s21416_s1  ;;  %p21425_p0 = scmp.lt.s32.totalorder %s21416_s1, %s21416_s1 }
  0xbe   : > { %p21419_p11 = pnand %p21417_p10, %p22184_p8  ;;  %p21426_p2 = por %p21425_p0, %p21424_p13 }
  0xc0   : > { %p21420_p12 = pneg %p21419_p11 }
  0xc2   : > { %p21427_p5 = pnand %p21426_p2, %p21420_p12 }
  0xc4   : > { %21430 = shalt.err (!%p21427_p5)
}
  0xc5   : > { %s23125_s26 = smov 64   ;;  %s23126_s23 = smov 4  }
  0xc6   : > { %18740 = dma.hbm_to_vmem [thread:$0]  (!%p22172_p6), %s21918_s29, 4096, %s1254_s2, [#allocation13], %s23125_s26, %s23125_s26, %s23126_s23  }
  0xc7   : > { %s21863_s0 = smov [#allocation15]   ;;  %s21864_s1 = smov [#allocation18]  }
  0xc8   : > { %s1312_s16 = sshll.u32 %s21863_s0, 4  ;;  %s1338_s3 = sshll.u32 %s21864_s1, 4  ;;  %s1313_s16 = int_to_ptr.vmem [resolvable:$true] %s1312_s16  ;;  %s1339_s3 = int_to_ptr.vmem [resolvable:$true] %s1338_s3 }
  0xc9   : > { %s21431_s9 = scalar_lea.hbm %s23190_s20, 4096 }
  0xca   : > { %p21432_p7 = scmp.ne.s32.totalorder %s23190_s20, %s21431_s9  ;;  %p21438_p3 = scmp.lt.u32.totalorder %s21431_s9, %s23190_s20 }
  0xcc   : > { %p21434_p4 = pnand %p21432_p7, %p22184_p8 }
  0xce   : > { %p21435_p1 = pneg %p21434_p4 }
  0xd0   : > { %p21440_p9 = pnand %p21438_p3, %p21435_p1 }
  0xd2   : > { %21443 = shalt.err (!%p21440_p9)
}
  0xd3   : > { %s21444_s17 = scalar_lea.vmem %s1313_s16, 4096  ;;  %p21452_p13 = scmp.lt.s32.totalorder %s1313_s16, %s1313_s16 }
  0xd4   : > { %p21445_p10 = scmp.ne.s32.totalorder %s1313_s16, %s21444_s17  ;;  %p21453_p0 = scmp.lt.s32.totalorder %s21444_s17, %s21444_s17 }
  0xd6   : > { %p21447_p11 = pnand %p21445_p10, %p22184_p8  ;;  %p21454_p2 = por %p21453_p0, %p21452_p13 }
  0xd8   : > { %p21448_p12 = pneg %p21447_p11 }
  0xda   : > { %p21455_p5 = pnand %p21454_p2, %p21448_p12 }
  0xdc   : > { %21458 = shalt.err (!%p21455_p5)
}
  0xdd   : > { %s23197_s2 = smov 8   ;;  %s23198_s0 = smov 128  }
  0xde   : > { %18746 = dma.hbm_to_vmem [thread:$0]  (!%p22172_p6), %s23190_s20, 4096, %s1313_s16, [#allocation16], %s23198_s0, %s23198_s0, %s23197_s2  }
  0xdf   : > { %s21459_s9 = scalar_lea.hbm %s23191_s4, 8192 }
  0xe0   : > { %p21460_p7 = scmp.ne.s32.totalorder %s23191_s4, %s21459_s9  ;;  %p21466_p3 = scmp.lt.u32.totalorder %s21459_s9, %s23191_s4 }
  0xe2   : > { %p21462_p4 = pnand %p21460_p7, %p22184_p8 }
  0xe4   : > { %p21463_p1 = pneg %p21462_p4 }
  0xe6   : > { %p21468_p9 = pnand %p21466_p3, %p21463_p1 }
  0xe8   : > { %21471 = shalt.err (!%p21468_p9)
}
  0xe9   : > { %s21472_s17 = scalar_lea.vmem %s1339_s3, 8192  ;;  %p21480_p13 = scmp.lt.s32.totalorder %s1339_s3, %s1339_s3 }
  0xea   : > { %p21473_p10 = scmp.ne.s32.totalorder %s1339_s3, %s21472_s17  ;;  %p21481_p0 = scmp.lt.s32.totalorder %s21472_s17, %s21472_s17 }
  0xec   : > { %p21475_p11 = pnand %p21473_p10, %p22184_p8  ;;  %p21482_p2 = por %p21481_p0, %p21480_p13 }
  0xee   : > { %p21476_p12 = pneg %p21475_p11 }
  0xf0   : > { %p21483_p5 = pnand %p21482_p2, %p21476_p12 }
  0xf2   : > { %21486 = shalt.err (!%p21483_p5)
}
  0xf3   : > { %18752 = dma.hbm_to_vmem [thread:$0]  (!%p22172_p6), %s23191_s4, 8192, %s1339_s3, [#allocation19], %s23198_s0, %s23198_s0, %s23197_s2  }
  0xf4   : > { %s21865_s16 = smov [#allocation21]   ;;  %s21866_s9 = smov [#allocation8]  }
  0xf5   : > { %s1364_s1 = sshll.u32 %s21865_s16, 4  ;;  %s1211_s26 = sshll.u32 %s21866_s9, 4  ;;  %s1365_s1 = int_to_ptr.vmem [resolvable:$true] %s1364_s1  ;;  %s1212_s26 = int_to_ptr.vmem [resolvable:$true] %s1211_s26 }
  0xf6   : > { %s21487_s17 = scalar_lea.hbm %s22003_s30, 32768 }
  0xf7   : > { %p21488_p7 = scmp.ne.s32.totalorder %s22003_s30, %s21487_s17  ;;  %p21494_p3 = scmp.lt.u32.totalorder %s21487_s17, %s22003_s30 }
  0xf9   : > { %p21490_p4 = pnand %p21488_p7, %p22184_p8 }
  0xfb   : > { %p21491_p1 = pneg %p21490_p4 }
  0xfd   : > { %p21496_p9 = pnand %p21494_p3, %p21491_p1 }
  0xff   : > { %21499 = shalt.err (!%p21496_p9)
}
 0x100   : > { %s21500_s23 = scalar_lea.vmem %s1365_s1, 32768  ;;  %p21508_p13 = scmp.lt.s32.totalorder %s1365_s1, %s1365_s1 }
 0x101   : > { %p21501_p10 = scmp.ne.s32.totalorder %s1365_s1, %s21500_s23  ;;  %p21509_p0 = scmp.lt.s32.totalorder %s21500_s23, %s21500_s23 }
 0x103   : > { %p21503_p11 = pnand %p21501_p10, %p22184_p8  ;;  %p21510_p2 = por %p21509_p0, %p21508_p13 }
 0x105   : > { %p21504_p12 = pneg %p21503_p11 }
 0x107   : > { %p21511_p5 = pnand %p21510_p2, %p21504_p12 }
 0x109   : > { %21514 = shalt.err (!%p21511_p5)
}
 0x10a   : > { %s23199_s3 = smov 16   ;;  %s23200_s16 = smov 256  }
 0x10b   : > { %18758 = dma.hbm_to_vmem [thread:$0]  (!%p22172_p6), %s22003_s30, 32768, %s1365_s1, [#allocation22], %s23200_s16, %s23200_s16, %s23199_s3  }
 0x10c   : > { %s21515_s9 = scalar_lea.hbm %s23189_s13, 32768 }
 0x10d   : > { %p21516_p7 = scmp.ne.s32.totalorder %s23189_s13, %s21515_s9  ;;  %p21522_p3 = scmp.lt.u32.totalorder %s21515_s9, %s23189_s13 }
 0x10f   : > { %p21518_p4 = pnand %p21516_p7, %p22184_p8 }
 0x111   : > { %p21519_p1 = pneg %p21518_p4 }
 0x113   : > { %p21524_p9 = pnand %p21522_p3, %p21519_p1 }
 0x115   : > { %21527 = shalt.err (!%p21524_p9)
}
 0x116   : > { %s21528_s23 = scalar_lea.vmem %s1212_s26, 32768  ;;  %p21536_p13 = scmp.lt.s32.totalorder %s1212_s26, %s1212_s26 }
 0x117   : > { %p21529_p10 = scmp.ne.s32.totalorder %s1212_s26, %s21528_s23  ;;  %p21537_p0 = scmp.lt.s32.totalorder %s21528_s23, %s21528_s23 }
 0x119   : > { %p21531_p11 = pnand %p21529_p10, %p22184_p8  ;;  %p21538_p2 = por %p21537_p0, %p21536_p13 }
 0x11b   : > { %p21532_p12 = pneg %p21531_p11 }
 0x11d   : > { %p21539_p5 = pnand %p21538_p2, %p21532_p12 }
 0x11f   : > { %21542 = shalt.err (!%p21539_p5)
}
 0x120   : > { %18731 = dma.hbm_to_vmem [thread:$0]  (!%p22172_p6), %s23189_s13, 32768, %s1212_s26, [#allocation7], %s23200_s16, %s23200_s16, %s23199_s3  }
 0x121   : > { %s21867_s1 = smov [#allocation11]   ;;  %s21868_s9 = smov [#allocation14]  }
 0x122   : > { %s1240_s17 = sshll.u32 %s21867_s1, 4  ;;  %s1287_s4 = sshll.u32 %s21868_s9, 4  ;;  %s1241_s17 = int_to_ptr.vmem [resolvable:$true] %s1240_s17  ;;  %s1288_s4 = int_to_ptr.vmem [resolvable:$true] %s1287_s4 }
 0x123   : > { %s21543_s23 = scalar_lea.hbm %s23188_s25, 8192 }
 0x124   : > { %p21544_p7 = scmp.ne.s32.totalorder %s23188_s25, %s21543_s23  ;;  %p21550_p3 = scmp.lt.u32.totalorder %s21543_s23, %s23188_s25 }
 0x126   : > { %p21546_p4 = pnand %p21544_p7, %p22184_p8 }
 0x128   : > { %p21547_p1 = pneg %p21546_p4 }
 0x12a   : > { %p21552_p9 = pnand %p21550_p3, %p21547_p1 }
 0x12c   : > { %21555 = shalt.err (!%p21552_p9)
}
 0x12d   : > { %s21556_s20 = scalar_lea.vmem %s1241_s17, 8192  ;;  %p21564_p13 = scmp.lt.s32.totalorder %s1241_s17, %s1241_s17 }
 0x12e   : > { %p21557_p10 = scmp.ne.s32.totalorder %s1241_s17, %s21556_s20  ;;  %p21565_p0 = scmp.lt.s32.totalorder %s21556_s20, %s21556_s20 }
 0x130   : > { %p21559_p11 = pnand %p21557_p10, %p22184_p8  ;;  %p21566_p2 = por %p21565_p0, %p21564_p13 }
 0x132   : > { %p21560_p12 = pneg %p21559_p11 }
 0x134   : > { %p21567_p5 = pnand %p21566_p2, %p21560_p12 }
 0x136   : > { %21570 = shalt.err (!%p21567_p5)
}
 0x137   : > { %18737 = dma.hbm_to_vmem [thread:$0]  (!%p22172_p6), %s23188_s25, 8192, %s1241_s17, [#allocation10], %s23198_s0, %s23198_s0, %s23197_s2  }
 0x138   : > { %s21571_s26 = scalar_lea.hbm %s21958_s12, 256 }
 0x139   : > { %p21572_p7 = scmp.ne.s32.totalorder %s21958_s12, %s21571_s26  ;;  %p21578_p3 = scmp.lt.u32.totalorder %s21571_s26, %s21958_s12 }
 0x13b   : > { %p21574_p4 = pnand %p21572_p7, %p22184_p8 }
 0x13d   : > { %p21575_p1 = pneg %p21574_p4 }
 0x13f   : > { %p21580_p9 = pnand %p21578_p3, %p21575_p1 }
 0x141   : > { %21583 = shalt.err (!%p21580_p9)
}
 0x142   : > { %s21584_s20 = scalar_lea.vmem %s1288_s4, 256  ;;  %p21592_p13 = scmp.lt.s32.totalorder %s1288_s4, %s1288_s4 }
 0x143   : > { %p21585_p10 = scmp.ne.s32.totalorder %s1288_s4, %s21584_s20  ;;  %p21593_p0 = scmp.lt.s32.totalorder %s21584_s20, %s21584_s20 }
 0x145   : > { %p21587_p11 = pnand %p21585_p10, %p22184_p8  ;;  %p21594_p2 = por %p21593_p0, %p21592_p13 }
 0x147   : > { %p21588_p12 = pneg %p21587_p11 }
 0x149   : > { %p21595_p5 = pnand %p21594_p2, %p21588_p12 }
 0x14b   : > { %21598 = shalt.err (!%p21595_p5)
}
 0x14c   : > { %s23201_s1 = smov 4   ;;  %s23202_s17 = smov 64  }
 0x14d   : > { %18743 = dma.hbm_to_vmem [thread:$0]  (!%p22172_p6), %s21958_s12, 256, %s1288_s4, [#allocation13], %s23202_s17, %s23202_s17, %s23201_s1  }
 0x14e   : > { %s21869_s9 = smov [#allocation17]   ;;  %s21870_s26 = smov [#allocation20]  }
 0x14f   : > { %s1325_s23 = sshll.u32 %s21869_s9, 4  ;;  %s1351_s13 = sshll.u32 %s21870_s26, 4  ;;  %s1326_s23 = int_to_ptr.vmem [resolvable:$true] %s1325_s23  ;;  %s1352_s13 = int_to_ptr.vmem [resolvable:$true] %s1351_s13 }
 0x150   : > { %s21599_s20 = scalar_lea.hbm %s21988_s27, 8192 }
 0x151   : > { %p21600_p7 = scmp.ne.s32.totalorder %s21988_s27, %s21599_s20  ;;  %p21606_p3 = scmp.lt.u32.totalorder %s21599_s20, %s21988_s27 }
 0x153   : > { %p21602_p4 = pnand %p21600_p7, %p22184_p8 }
 0x155   : > { %p21603_p1 = pneg %p21602_p4 }
 0x157   : > { %p21608_p9 = pnand %p21606_p3, %p21603_p1 }
 0x159   : > { %21611 = shalt.err (!%p21608_p9)
}
 0x15a   : > { %s21612_s25 = scalar_lea.vmem %s1326_s23, 8192  ;;  %p21620_p13 = scmp.lt.s32.totalorder %s1326_s23, %s1326_s23 }
 0x15b   : > { %p21613_p10 = scmp.ne.s32.totalorder %s1326_s23, %s21612_s25  ;;  %p21621_p0 = scmp.lt.s32.totalorder %s21612_s25, %s21612_s25 }
 0x15d   : > { %p21615_p11 = pnand %p21613_p10, %p22184_p8  ;;  %p21622_p2 = por %p21621_p0, %p21620_p13 }
 0x15f   : > { %p21616_p12 = pneg %p21615_p11 }
 0x161   : > { %p21623_p5 = pnand %p21622_p2, %p21616_p12 }
 0x163   : > { %21626 = shalt.err (!%p21623_p5)
}
 0x164   : > { %18749 = dma.hbm_to_vmem [thread:$0]  (!%p22172_p6), %s21988_s27, 8192, %s1326_s23, [#allocation16], %s23198_s0, %s23198_s0, %s23197_s2  }
 0x165   : > { %s21627_s4 = scalar_lea.hbm %s23186_s6, 16384 }
 0x166   : > { %p21628_p7 = scmp.ne.s32.totalorder %s23186_s6, %s21627_s4  ;;  %p21634_p3 = scmp.lt.u32.totalorder %s21627_s4, %s23186_s6 }
 0x168   : > { %p21630_p4 = pnand %p21628_p7, %p22184_p8 }
 0x16a   : > { %p21631_p1 = pneg %p21630_p4 }
 0x16c   : > { %p21636_p9 = pnand %p21634_p3, %p21631_p1 }
 0x16e   : > { %21639 = shalt.err (!%p21636_p9)
}
 0x16f   : > { %s21640_s25 = scalar_lea.vmem %s1352_s13, 16384  ;;  %p21648_p13 = scmp.lt.s32.totalorder %s1352_s13, %s1352_s13 }
 0x170   : > { %p21641_p10 = scmp.ne.s32.totalorder %s1352_s13, %s21640_s25  ;;  %p21649_p0 = scmp.lt.s32.totalorder %s21640_s25, %s21640_s25 }
 0x172   : > { %p21643_p11 = pnand %p21641_p10, %p22184_p8  ;;  %p21650_p2 = por %p21649_p0, %p21648_p13 }
 0x174   : > { %p21644_p12 = pneg %p21643_p11 }
 0x176   : > { %p21651_p5 = pnand %p21650_p2, %p21644_p12 }
 0x178   : > { %21654 = shalt.err (!%p21651_p5)
}
 0x179   : > { %18755 = dma.hbm_to_vmem [thread:$0]  (!%p22172_p6), %s23186_s6, 16384, %s1352_s13, [#allocation19], %s23200_s16, %s23200_s16, %s23199_s3  }
 0x17a   : > { %s21871_s2 = smov [#allocation23]   ;;  %s21655_s1 = scalar_lea.hbm %s22008_s24, 32768 }
 0x17b   : > { %s1377_s0 = sshll.u32 %s21871_s2, 4  ;;  %p21656_p7 = scmp.ne.s32.totalorder %s22008_s24, %s21655_s1  ;;  %s1378_s0 = int_to_ptr.vmem [resolvable:$true] %s1377_s0 }
 0x17c   : > { %p21662_p3 = scmp.lt.u32.totalorder %s21655_s1, %s22008_s24 }
 0x17d   : > { %p21658_p4 = pnand %p21656_p7, %p22184_p8 }
 0x17f   : > { %p21659_p1 = pneg %p21658_p4 }
 0x181   : > { %p21664_p9 = pnand %p21662_p3, %p21659_p1 }
 0x183   : > { %21667 = shalt.err (!%p21664_p9)
}
 0x184   : > { %s21668_s17 = scalar_lea.vmem %s1378_s0, 32768  ;;  %p21676_p13 = scmp.lt.s32.totalorder %s1378_s0, %s1378_s0 }
 0x185   : > { %p21669_p10 = scmp.ne.s32.totalorder %s1378_s0, %s21668_s17  ;;  %p21677_p0 = scmp.lt.s32.totalorder %s21668_s17, %s21668_s17 }
 0x187   : > { %p21671_p11 = pnand %p21669_p10, %p22184_p8  ;;  %p21678_p2 = por %p21677_p0, %p21676_p13 }
 0x189   : > { %p21672_p12 = pneg %p21671_p11 }
 0x18b   : > { %p21679_p5 = pnand %p21678_p2, %p21672_p12 }
 0x18d   : > { %21682 = shalt.err (!%p21679_p5)
}
 0x18e   : > { %18761 = dma.hbm_to_vmem [thread:$0]  (!%p22172_p6), %s22008_s24, 32768, %s1378_s0, [#allocation22], %s23200_s16, %s23200_s16, %s23199_s3  }
 0x18f   : > { %s16430_s13 = sadd.s32 4294967294, %s21803_s15   ;;  %s22355_s21 = sadd.s32 1, %s21803_s15  }
 0x190   : > { %s125_s28 = ssub.s32 %s21803_s15, %s22355_s21  ;;  %s128_s9 = sadd.s32 1, %s21799_s11 }
 0x191   : > { %p126_p8 = scmp.eq.s32.totalorder %s125_s28, 0  ;;  %p135_p7 = scmp.ne.s32.totalorder %s21799_s11, %s21795_s10 }
 0x192   : > { %p136_p4 = scmp.eq.s32.totalorder %s21803_s15, 0  ;;  %p141_p1 = scmp.ne.s32.totalorder %s21795_s10, %s21791_s7 }
 0x193   : > { %s22366_s23 = scalar_select %p126_p8, %s21799_s11, %s128_s9  }
 0x194   : > { %p22368_p3 = por %p136_p4, %p135_p7  ;;  %p23204_p9 = scmp.eq.s32.totalorder %s22156_s18, 0 }
 0x195   : > { %p1173_p10 = scmp.eq.s32.totalorder %s22156_s18, 1  ;;  %p1179_p11 = scmp.eq.s32.totalorder %s16430_s13, 1 }
 0x196   : > { %p22374_p6 = por %p23204_p9, %p141_p1  ;;  %p18782_p12 = scmp.lt.s32.totalorder %s21803_s15, 2 }
 0x197   : > { %s1463_s16 = sand.u32 1, %s21799_s11   ;;  %p22381_p13 = por %p1173_p10, %p135_p7 }
 0x198   : > { %s23205_s3 = scalar_select %p22374_p6, 1, 0 }
 0x199   : > { %s23206_s20 = scalar_select %p22381_p13, 1, 0 }
 0x19a   : > { %p22385_p0 = por %p1179_p11, %p141_p1  ;;  %s16445_s25 = sshll.u32 %s1463_s16, 6 }
 0x19b   : > { %s18165_s2 = sshll.u32 %s21803_s15, 10  ;;  %s1467_s1 = scalar_lea.vmem [#allocation3], %s16445_s25 }
 0x19c   : > { %s23207_s4 = scalar_select %p22385_p0, 1, 0 }
 0x19d   : > { %s22391_s0 = scalar_lea.hbm %s23187_s5, %s18165_s2  ;;  %s1474_s17 = sshll.u32 %s1467_s1, 4  ;;  %s22393_s17 = int_to_ptr.vmem [resolvable:$true] %s1474_s17 }
 0x19e   : > { %p22397_p2 = pnand %p18782_p12, %p22368_p3  ;;  %s22401_s28 = scalar_lea.sflag [#allocation4], %s1463_s16 }
 0x19f   : > { %s21683_s9 = scalar_lea.hbm %s22391_s0, 1024  ;;  %s21688_s25 = scalar_lea.hbm %s23187_s5, 2048 }
 0x1a0   : > { %p21684_p5 = scmp.ne.s32.totalorder %s22391_s0, %s21683_s9  ;;  %p21685_p8 = pneg %p22397_p2 }
 0x1a1   : > { %p21689_p1 = scmp.lt.u32.totalorder %s22391_s0, %s23187_s5  ;;  %p21690_p9 = scmp.lt.u32.totalorder %s21688_s25, %s21683_s9 }
 0x1a2   : > { %p21686_p7 = pnand %p21685_p8, %p21684_p5  ;;  %p21692_p3 = scmp.lt.u32.totalorder %s21683_s9, %s22391_s0 }
 0x1a3   : > { %p21691_p10 = por %p21690_p9, %p21689_p1 }
 0x1a4   : > { %p21687_p4 = pneg %p21686_p7 }
 0x1a5   : > { %p21693_p11 = por %p21692_p3, %p21691_p10 }
 0x1a7   : > { %p21694_p12 = pnand %p21693_p11, %p21687_p4 }
 0x1a9   : > { %21697 = shalt.err (!%p21694_p12)
}
 0x1aa   : > { %s21698_s26 = scalar_lea.vmem %s22393_s17, 1024  ;;  %s21872_s16 = smov [#allocation3]  }
 0x1ab   : > { %p21699_p0 = scmp.ne.s32.totalorder %s22393_s17, %s21698_s26  ;;  %s21703_s2 = sshll.u32 %s21872_s16, 4  ;;  %s21704_s2 = int_to_ptr.vmem [resolvable:$false] %s21703_s2 }
 0x1ac   : > { %s21705_s1 = scalar_lea.vmem %s21704_s2, 2048  ;;  %p21706_p5 = scmp.lt.s32.totalorder %s22393_s17, %s21704_s2 }
 0x1ad   : > { %p21701_p13 = pnand %p21699_p0, %p21685_p8  ;;  %p21707_p7 = scmp.lt.s32.totalorder %s21705_s1, %s21698_s26 }
 0x1af   : > { %p21702_p6 = pneg %p21701_p13  ;;  %p21708_p1 = por %p21707_p7, %p21706_p5 }
 0x1b1   : > { %p21709_p9 = pnand %p21708_p1, %p21702_p6 }
 0x1b3   : > { %21712 = shalt.err (!%p21709_p9)
}
 0x1b4   : > { %s21873_s9 = smov 512   ;;  %s21874_s25 = smov 32  }
 0x1b5   : > { %18765 = dma.hbm_to_vmem [thread:$0]  (!%p22397_p2), %s22391_s0, 1024, %s22393_s17, %s22401_s28, %s21873_s9, %s21873_s9, %s21874_s25  }
 0x1b6   : > { %p23209_p0 = scmp.ne.s32.totalorder %s23194_s22, 0 }
 0x1b7   : > { %s22428_s16 = sand.u32 (!%p23209_p0), 1, %s21795_s10   ;;  %p23210_p6 = scmp.ne.s32.totalorder (!%p23209_p0), %s23205_s3, 0 }
 0x1b8   : > { %1486 = sbr.rel (%p23209_p0) target bundleno = 7412 (0x1cf4), region = 216  ;;  %s23133_s26 = sshll.u32 (!%p23209_p0), %s22428_s16, 6 }
 0x1b9   : > { %s1489_s2 = scalar_lea.sflag (!%p23209_p0), [#allocation4], %s22428_s16  ;;  %s22434_s1 = scalar_lea.vmem (!%p23209_p0), [#allocation3], %s23133_s26 }
 0x1bf   : > { %21758 = dma.done.wait (%p23210_p6), %s1489_s2, 1024  }
 0x1c0   : > { %21760 = vsyncadd (%p23210_p6), %s1489_s2, 4294966272  ;;  %p23211_p13 = scmp.eq.s32.totalorder %s22156_s18, 0 }
 0x1c2   : > { %21762 = dma.done.wait (%p23211_p13), [#allocation7], 65536   ;;  %p23212_p2 = pmov %p23211_p13 }
 0x1c4   : > { %21764 = vsyncadd (%p23212_p2), [#allocation7], 4294901760  ;;  %p23213_p8 = pmov %p23212_p2 }
 0x1c5   : > { %p23214_p4 = pmov %p23212_p2 }
 0x1c6   : > { %21766 = dma.done.wait (%p23213_p8), [#allocation10], 24576  }
 0x1c7   : > { %21768 = vsyncadd (%p23214_p4), [#allocation10], 4294942720  ;;  %p23215_p10 = pmov %p23212_p2 }
 0x1c8   : > { %p23216_p3 = pmov %p23212_p2 }
 0x1c9   : > { %21770 = dma.done.wait (%p23215_p10), [#allocation13], 4352  }
 0x1ca   : > { %21772 = vsyncadd (%p23216_p3), [#allocation13], 4294962944  ;;  %p23217_p11 = pmov %p23212_p2 }
 0x1cb   : > { %p23218_p12 = pmov %p23212_p2 }
 0x1cc   : > { %21774 = dma.done.wait (%p23217_p11), [#allocation16], 12288  }
 0x1cd   : > { %21776 = vsyncadd (%p23218_p12), [#allocation16], 4294955008  ;;  %p23219_p5 = pmov %p23212_p2 }
 0x1ce   : > { %p23220_p7 = pmov %p23212_p2 }
 0x1cf   : > { %21778 = dma.done.wait (%p23219_p5), [#allocation19], 24576  }
 0x1d0   : > { %21780 = vsyncadd (%p23220_p7), [#allocation19], 4294942720  ;;  %p23221_p1 = pmov %p23212_p2 }
 0x1d2   : > { %21782 = dma.done.wait (%p23221_p1), [#allocation22], 65536   ;;  %p23222_p9 = pmov %p23221_p1 }
 0x1d3   : > { %v18901_v0 = vld [vmem:[#allocation6 + $0x4] ss:$16 sps:$4 sm:$0xff]   ;;  %v18903_v1 = vld [vmem:[#allocation6 + $0xc] ss:$16 sps:$4 sm:$0xff]   ;;  %v18905_v2 = vld [vmem:[#allocation6] ss:$16 sps:$4 sm:$0xff]  }
 0x1d4   : > { %21784 = vsyncadd (%p23222_p9), [#allocation22], 4294901760  ;;  %3259 = vmatprep.subr.bf16.mxu0 %v18901_v0  ;;  %v18906_v3 = vld [vmem:[#allocation6 + $0x8] ss:$16 sps:$4 sm:$0xff]   ;;  %3431 = vmatprep.subr.bf16.mxu1 %v18903_v1  ;;  %v18907_v4 = vld [vmem:[#allocation6 + $0x24] ss:$16 sps:$4 sm:$0xff]  }
 0x1d5   : > { %3260 = vmatpush1.bf16.msra.mxu0 %v18905_v2  ;;  %3432 = vmatpush1.bf16.msra.mxu1 %v18906_v3  ;;  %v18909_v5 = vld [vmem:[#allocation6 + $0x2c] ss:$16 sps:$4 sm:$0xff]   ;;  %v18911_v6 = vld [vmem:[#allocation6 + $0x20] ss:$16 sps:$4 sm:$0xff]   ;;  %v18912_v7 = vld [vmem:[#allocation6 + $0x28] ss:$16 sps:$4 sm:$0xff]  }
 0x1d6   : > { %3261 = vmatprep.subr.bf16.mxu0 %v18907_v4  ;;  %3433 = vmatprep.subr.bf16.mxu1 %v18909_v5  ;;  %v18913_v8 = vld [vmem:[#allocation6 + $0x44] ss:$16 sps:$4 sm:$0xff]   ;;  %v18915_v9 = vld [vmem:[#allocation6 + $0x4c] ss:$16 sps:$4 sm:$0xff]   ;;  %v18917_v10 = vld [vmem:[#allocation6 + $0x40] ss:$16 sps:$4 sm:$0xff]  }
 0x1d7   : > { %v18918_v11 = vld [vmem:[#allocation6 + $0x48] ss:$16 sps:$4 sm:$0xff]   ;;  %v18919_v12 = vld [vmem:[#allocation6 + $0x64] ss:$16 sps:$4 sm:$0xff]   ;;  %v18921_v13 = vld [vmem:[#allocation6 + $0x6c] ss:$16 sps:$4 sm:$0xff]  }
 0x1d8   : > { %v18923_v14 = vld [vmem:[#allocation6 + $0x60] ss:$16 sps:$4 sm:$0xff]   ;;  %v18924_v15 = vld [vmem:[#allocation6 + $0x68] ss:$16 sps:$4 sm:$0xff]   ;;  %v18925_v16 = vld [vmem:[#allocation6 + $0x84] ss:$16 sps:$4 sm:$0xff]  }
 0x1d9   : > { %3262 = vmatpush1.bf16.msra.mxu0 %v18911_v6  ;;  %3434 = vmatpush1.bf16.msra.mxu1 %v18912_v7  ;;  %v18927_v17 = vld [vmem:[#allocation6 + $0x8c] ss:$16 sps:$4 sm:$0xff]   ;;  %v18929_v18 = vld [vmem:[#allocation6 + $0x80] ss:$16 sps:$4 sm:$0xff]   ;;  %v18930_v19 = vld [vmem:[#allocation6 + $0x88] ss:$16 sps:$4 sm:$0xff]  }
 0x1da   : > { %3263 = vmatprep.subr.bf16.mxu0 %v18913_v8  ;;  %3435 = vmatprep.subr.bf16.mxu1 %v18915_v9  ;;  %v18931_v20 = vld [vmem:[#allocation6 + $0xa4] ss:$16 sps:$4 sm:$0xff]   ;;  %v18933_v21 = vld [vmem:[#allocation6 + $0xac] ss:$16 sps:$4 sm:$0xff]   ;;  %v18935_v22 = vld [vmem:[#allocation6 + $0xa0] ss:$16 sps:$4 sm:$0xff]  }
 0x1db   : > { %v18936_v23 = vld [vmem:[#allocation6 + $0xa8] ss:$16 sps:$4 sm:$0xff]   ;;  %v18937_v24 = vld [vmem:[#allocation6 + $0xc4] ss:$16 sps:$4 sm:$0xff]   ;;  %v18939_v25 = vld [vmem:[#allocation6 + $0xcc] ss:$16 sps:$4 sm:$0xff]  }
 0x1dc   : > { %v18941_v26 = vld [vmem:[#allocation6 + $0xc0] ss:$16 sps:$4 sm:$0xff]   ;;  %v18942_v27 = vld [vmem:[#allocation6 + $0xc8] ss:$16 sps:$4 sm:$0xff]   ;;  %v18943_v28 = vld [vmem:[#allocation6 + $0xe4] ss:$16 sps:$4 sm:$0xff]  }
 0x1dd   : > { %3264 = vmatpush1.bf16.msra.mxu0 %v18917_v10  ;;  %3436 = vmatpush1.bf16.msra.mxu1 %v18918_v11  ;;  %v18945_v29 = vld [vmem:[#allocation6 + $0xec] ss:$16 sps:$4 sm:$0xff]   ;;  %v18947_v30 = vld [vmem:[#allocation6 + $0xe0] ss:$16 sps:$4 sm:$0xff]   ;;  %v18948_v31 = vld [vmem:[#allocation6 + $0xe8] ss:$16 sps:$4 sm:$0xff]  }
 0x1de   : > { %3265 = vmatprep.subr.bf16.mxu0 %v18919_v12  ;;  %3437 = vmatprep.subr.bf16.mxu1 %v18921_v13  ;;  %v18949_v32 = vld [vmem:[#allocation6 + $0x104] ss:$16 sps:$4 sm:$0xff]   ;;  %v18951_v33 = vld [vmem:[#allocation6 + $0x10c] ss:$16 sps:$4 sm:$0xff]   ;;  %v18953_v34 = vld [vmem:[#allocation6 + $0x100] ss:$16 sps:$4 sm:$0xff]  }
 0x1df   : > { %v18954_v35 = vld [vmem:[#allocation6 + $0x108] ss:$16 sps:$4 sm:$0xff]   ;;  %v18955_v36 = vld [vmem:[#allocation6 + $0x124] ss:$16 sps:$4 sm:$0xff]   ;;  %v18957_v37 = vld [vmem:[#allocation6 + $0x12c] ss:$16 sps:$4 sm:$0xff]  }
 0x1e0   : > { %v18959_v38 = vld [vmem:[#allocation6 + $0x120] ss:$16 sps:$4 sm:$0xff]   ;;  %v18960_v39 = vld [vmem:[#allocation6 + $0x128] ss:$16 sps:$4 sm:$0xff]   ;;  %v18961_v40 = vld [vmem:[#allocation6 + $0x144] ss:$16 sps:$4 sm:$0xff]  }
 0x1e1   : > { %3266 = vmatpush1.bf16.msra.mxu0 %v18923_v14  ;;  %3438 = vmatpush1.bf16.msra.mxu1 %v18924_v15  ;;  %v18963_v41 = vld [vmem:[#allocation6 + $0x14c] ss:$16 sps:$4 sm:$0xff]   ;;  %v18965_v42 = vld [vmem:[#allocation6 + $0x140] ss:$16 sps:$4 sm:$0xff]   ;;  %v18966_v43 = vld [vmem:[#allocation6 + $0x148] ss:$16 sps:$4 sm:$0xff]  }
 0x1e2   : > { %3267 = vmatprep.subr.bf16.mxu0 %v18925_v16  ;;  %3439 = vmatprep.subr.bf16.mxu1 %v18927_v17  ;;  %v18967_v44 = vld [vmem:[#allocation6 + $0x164] ss:$16 sps:$4 sm:$0xff]   ;;  %v18969_v45 = vld [vmem:[#allocation6 + $0x16c] ss:$16 sps:$4 sm:$0xff]   ;;  %v18971_v48 = vld [vmem:[#allocation6 + $0x160] ss:$16 sps:$4 sm:$0xff]  }
 0x1e3   : > { %v1657_v46 = vld [vmem:[%s22434_s1 + $0x8] sm:$0xff]  ;;  %v18973_v51 = vld [vmem:[#allocation6 + $0x184] ss:$16 sps:$4 sm:$0xff]   ;;  %v18977_v53 = vld [vmem:[#allocation6 + $0x180] ss:$16 sps:$4 sm:$0xff]   ;;  %vm1672_vm0 = vcmask 1046528  }
 0x1e4   : > { %v1661_v47 = vld [vmem:[%s22434_s1 + $0x28] sm:$0xff]  ;;  %v18979_v55 = vld [vmem:[#allocation6 + $0x1a4] ss:$16 sps:$4 sm:$0xff]   ;;  %v18983_v57 = vld [vmem:[#allocation6 + $0x1a0] ss:$16 sps:$4 sm:$0xff]   ;;  %v1676_v5 = vrot.slane %v1657_v46, 1 }
 0x1e5   : > { %3268 = vmatpush1.bf16.msra.mxu0 %v18929_v18  ;;  %3440 = vmatpush1.bf16.msra.mxu1 %v18930_v19  ;;  %v18972_v49 = vld [vmem:[#allocation6 + $0x168] ss:$16 sps:$4 sm:$0xff]   ;;  %v1694_v50 = vpack.c.bf16 %v1661_v47, %v1657_v46  ;;  %v18975_v52 = vld [vmem:[#allocation6 + $0x18c] ss:$16 sps:$4 sm:$0xff]   ;;  %v18985_v59 = vld [vmem:[#allocation6 + $0x1c4] ss:$16 sps:$4 sm:$0xff]  }
 0x1e6   : > { %3269 = vmatprep.subr.bf16.mxu0 %v18931_v20  ;;  %3441 = vmatprep.subr.bf16.mxu1 %v18933_v21  ;;  %v18978_v54 = vld [vmem:[#allocation6 + $0x188] ss:$16 sps:$4 sm:$0xff]   ;;  %v18981_v56 = vld [vmem:[#allocation6 + $0x1ac] ss:$16 sps:$4 sm:$0xff]   ;;  %v18989_v61 = vld [vmem:[#allocation6 + $0x1c0] ss:$16 sps:$4 sm:$0xff]  }
 0x1e7   : > { %3291 = vmatprep.mubr.bf16.mxu0 %v1694_v50  ;;  %3463 = vmatprep.mubr.bf16.mxu1 %v1694_v50  ;;  %v18984_v58 = vld [vmem:[#allocation6 + $0x1a8] ss:$16 sps:$4 sm:$0xff]   ;;  %v18987_v60 = vld [vmem:[#allocation6 + $0x1cc] ss:$16 sps:$4 sm:$0xff]   ;;  %v18991_v63 = vld [vmem:[#allocation6 + $0x1e4] ss:$16 sps:$4 sm:$0xff]  }
 0x1e8   : > { %v18990_v62 = vld [vmem:[#allocation6 + $0x1c8] ss:$16 sps:$4 sm:$0xff]   ;;  %v18993_v0 = vld [vmem:[#allocation6 + $0x1ec] ss:$16 sps:$4 sm:$0xff]   ;;  %v18995_v1 = vld [vmem:[#allocation6 + $0x1e0] ss:$16 sps:$4 sm:$0xff]  }
 0x1e9   : > { %3270 = vmatpush1.bf16.msra.mxu0 %v18935_v22  ;;  %3442 = vmatpush1.bf16.msra.mxu1 %v18936_v23  ;;  %v18996_v2 = vld [vmem:[#allocation6 + $0x1e8] ss:$16 sps:$4 sm:$0xff]   ;;  %v18999_v3 = vld [vmem:[#allocation6 + $0x204] ss:$16 sps:$4 sm:$0xff]   ;;  %v1677_v6 = vrot.slane %v1661_v47, 1  ;;  %s23227_s22 = sld [smem:[#allocation53_spill]] }
 0x1ea   : > { %3271 = vmatprep.subr.bf16.mxu0 %v18937_v24  ;;  %3443 = vmatprep.subr.bf16.mxu1 %v18939_v25  ;;  %v1656_v4 = vld [vmem:[%s22434_s1] sm:$0xff]  ;;  %v19002_v8 = vld [vmem:[#allocation6 + $0x20c] ss:$16 sps:$4 sm:$0xff]   ;;  %v19000_v12 = vld [vmem:[#allocation6 + $0x208] ss:$16 sps:$4 sm:$0xff]   ;;  %s23228_s3 = sld [smem:[#allocation37_spill]] }
 0x1eb   : > { %v1660_v7 = vld [vmem:[%s22434_s1 + $0x20] sm:$0xff]  ;;  %v1673_v9 = vrot.slane %v1656_v4, 1  ;;  %v1678_v15 = vsel %vm1672_vm0, %v1676_v5, %v1677_v6  ;;  %v19008_v16 = vld [vmem:[#allocation6 + $0x22c] ss:$16 sps:$4 sm:$0xff]   ;;  %v19006_v21 = vld [vmem:[#allocation6 + $0x228] ss:$16 sps:$4 sm:$0xff]  }
 0x1ec   : > { %v1674_v10 = vrot.slane %v1660_v7, 1  ;;  %v18997_v11 = vld [vmem:[#allocation6 + $0x200] ss:$16 sps:$4 sm:$0xff]   ;;  %v1693_v13 = vpack.c.bf16 %v1660_v7, %v1656_v4  ;;  %v19005_v14 = vld [vmem:[#allocation6 + $0x224] ss:$16 sps:$4 sm:$0xff]   ;;  %v22469_v17 = vpack.c.bf16 %v1677_v6, %v1678_v15  ;;  %s23229_s0 = sld [smem:[#allocation54_spill]] }
 0x1ed   : > { %3272 = vmatpush1.bf16.msra.mxu0 %v18941_v26  ;;  %3444 = vmatpush1.bf16.msra.mxu1 %v18942_v27  ;;  %v19003_v20 = vld [vmem:[#allocation6 + $0x220] ss:$16 sps:$4 sm:$0xff]   ;;  %v19011_v22 = vld [vmem:[#allocation6 + $0x244] ss:$16 sps:$4 sm:$0xff]   ;;  %v19014_v23 = vld [vmem:[#allocation6 + $0x24c] ss:$16 sps:$4 sm:$0xff]  }
 0x1ee   : > { %3273 = vmatprep.subr.bf16.mxu0 %v18943_v28  ;;  %3445 = vmatprep.subr.bf16.mxu1 %v18945_v29  ;;  %v1675_v18 = vsel %vm1672_vm0, %v1673_v9, %v1674_v10  ;;  %v19009_v24 = vld [vmem:[#allocation6 + $0x240] ss:$16 sps:$4 sm:$0xff]   ;;  %v19012_v25 = vld [vmem:[#allocation6 + $0x248] ss:$16 sps:$4 sm:$0xff]   ;;  %v19017_v26 = vld [vmem:[#allocation6 + $0x264] ss:$16 sps:$4 sm:$0xff]  }
 0x1ef   : > { %v22472_v19 = vpack.c.bf16 %v1674_v10, %v1675_v18  ;;  %v19020_v27 = vld [vmem:[#allocation6 + $0x26c] ss:$16 sps:$4 sm:$0xff]   ;;  %v19015_v28 = vld [vmem:[#allocation6 + $0x260] ss:$16 sps:$4 sm:$0xff]   ;;  %v19018_v29 = vld [vmem:[#allocation6 + $0x268] ss:$16 sps:$4 sm:$0xff]  }
 0x1f0   : > { %v19044_v46 = vld [vmem:[#allocation6 + $0x2ec] ss:$16 sps:$4 sm:$0xff]   ;;  %v19039_v47 = vld [vmem:[#allocation6 + $0x2e0] ss:$16 sps:$4 sm:$0xff]   ;;  %v19072_v4 = vld [vmem:[#allocation6 + $0x388] ss:$16 sps:$4 sm:$0xff]  }
 0x1f1   : > { %3274 = vmatpush1.bf16.msra.mxu0 %v18947_v30  ;;  %3446 = vmatpush1.bf16.msra.mxu1 %v18948_v31  ;;  %v19023_v30 = vld [vmem:[#allocation6 + $0x284] ss:$16 sps:$4 sm:$0xff]   ;;  %v19026_v31 = vld [vmem:[#allocation6 + $0x28c] ss:$16 sps:$4 sm:$0xff]   ;;  %v19075_v7 = vld [vmem:[#allocation6 + $0x3a0] ss:$16 sps:$4 sm:$0xff]  }
 0x1f2   : > { %3275 = vmatprep.subr.bf16.mxu0 %v18949_v32  ;;  %3447 = vmatprep.subr.bf16.mxu1 %v18951_v33  ;;  %v19021_v32 = vld [vmem:[#allocation6 + $0x280] ss:$16 sps:$4 sm:$0xff]   ;;  %v19024_v33 = vld [vmem:[#allocation6 + $0x288] ss:$16 sps:$4 sm:$0xff]   ;;  %v19050_v50 = vld [vmem:[#allocation6 + $0x30c] ss:$16 sps:$4 sm:$0xff]  }
 0x1f3   : > { %v19077_v5 = vld [vmem:[#allocation6 + $0x3a4] ss:$16 sps:$4 sm:$0xff]   ;;  %v19080_v6 = vld [vmem:[#allocation6 + $0x3ac] ss:$16 sps:$4 sm:$0xff]   ;;  %v19087_v15 = vld [vmem:[#allocation6 + $0x3e0] ss:$16 sps:$4 sm:$0xff]  }
 0x1f4   : > { %v19083_v9 = vld [vmem:[#allocation6 + $0x3c4] ss:$16 sps:$4 sm:$0xff]   ;;  %v19086_v10 = vld [vmem:[#allocation6 + $0x3cc] ss:$16 sps:$4 sm:$0xff]   ;;  %s23230_s17 = sld [smem:[#allocation55_spill]]  ;;  %s23231_s13 = sld [smem:[#allocation56_spill]] }
 0x1f5   : > { %3276 = vmatpush1.bf16.msra.mxu0 %v18953_v34  ;;  %3448 = vmatpush1.bf16.msra.mxu1 %v18954_v35  ;;  %v19029_v34 = vld [vmem:[#allocation6 + $0x2a4] ss:$16 sps:$4 sm:$0xff]   ;;  %v19032_v35 = vld [vmem:[#allocation6 + $0x2ac] ss:$16 sps:$4 sm:$0xff]   ;;  %s23232_s28 = sld [smem:[#allocation39_spill]]  ;;  %s23233_s9 = sld [smem:[#allocation57_spill]] }
 0x1f6   : > { %3277 = vmatprep.subr.bf16.mxu0 %v18955_v36  ;;  %3449 = vmatprep.subr.bf16.mxu1 %v18957_v37  ;;  %v19027_v36 = vld [vmem:[#allocation6 + $0x2a0] ss:$16 sps:$4 sm:$0xff]   ;;  %v19030_v37 = vld [vmem:[#allocation6 + $0x2a8] ss:$16 sps:$4 sm:$0xff]   ;;  %s23234_s25 = sld [smem:[#allocation40_spill]]  ;;  %s23235_s2 = sld [smem:[#allocation58_spill]] }
 0x1f7   : > { %s23249_s26 = sld [smem:[#allocation47_spill]]  ;;  %s23259_s8 = sld [smem:[#allocation73_spill]] }
 0x1f8   : > { %s23262_s5 = sld [smem:[#allocation75_spill]]  ;;  %p23263_p6 = scmp.ne.s32.totalorder %s23206_s20, 0 }
 0x1f9   : > { %3278 = vmatpush1.bf16.msra.mxu0 %v18959_v38  ;;  %3450 = vmatpush1.bf16.msra.mxu1 %v18960_v39  ;;  %v19035_v38 = vld [vmem:[#allocation6 + $0x2c4] ss:$16 sps:$4 sm:$0xff]   ;;  %v19038_v39 = vld [vmem:[#allocation6 + $0x2cc] ss:$16 sps:$4 sm:$0xff]   ;;  %s21877_s6 = smov [#allocation24]  }
 0x1fa   : > { %3279 = vmatprep.subr.bf16.mxu0 %v18961_v40  ;;  %3451 = vmatprep.subr.bf16.mxu1 %v18963_v41  ;;  %v22475_v40 = vld [vmem:[%s22434_s1 + $0x18] sm:$0xff] }
 0x1fb   : > { %v22478_v41 = vld [vmem:[%s22434_s1 + $0x38] sm:$0xff]  ;;  %v1682_v18 = vrot.slane %v22475_v40, 1 }
 0x1fd   : > { %3280 = vmatpush1.bf16.msra.mxu0 %v18965_v42  ;;  %3452 = vmatpush1.bf16.msra.mxu1 %v18966_v43  ;;  %v19033_v42 = vld [vmem:[#allocation6 + $0x2c0] ss:$16 sps:$4 sm:$0xff]   ;;  %v19036_v43 = vld [vmem:[#allocation6 + $0x2c8] ss:$16 sps:$4 sm:$0xff]  }
 0x1fe   : > { %3281 = vmatprep.subr.bf16.mxu0 %v18967_v44  ;;  %3453 = vmatprep.subr.bf16.mxu1 %v18969_v45  ;;  %v1696_v44 = vpack.c.bf16 %v22478_v41, %v22475_v40  ;;  %v19041_v45 = vld [vmem:[#allocation6 + $0x2e4] ss:$16 sps:$4 sm:$0xff]   ;;  %v19105_v40 = vld [vmem:[#allocation6 + $0x440] ss:$16 sps:$4 sm:$0xff]  }
 0x201   : > { %3282 = vmatpush1.bf16.msra.mxu0 %v18971_v48  ;;  %3454 = vmatpush1.bf16.msra.mxu1 %v18972_v49  ;;  %v19042_v48 = vld [vmem:[#allocation6 + $0x2e8] ss:$16 sps:$4 sm:$0xff]   ;;  %v19047_v49 = vld [vmem:[#allocation6 + $0x304] ss:$16 sps:$4 sm:$0xff]  }
 0x202   : > { %3283 = vmatprep.subr.bf16.mxu0 %v18973_v51  ;;  %3455 = vmatprep.subr.bf16.mxu1 %v18975_v52  ;;  %v19045_v51 = vld [vmem:[#allocation6 + $0x300] ss:$16 sps:$4 sm:$0xff]   ;;  %v19048_v52 = vld [vmem:[#allocation6 + $0x308] ss:$16 sps:$4 sm:$0xff]  }
 0x205   : > { %3284 = vmatpush1.bf16.msra.mxu0 %v18977_v53  ;;  %3456 = vmatpush1.bf16.msra.mxu1 %v18978_v54  ;;  %v19053_v53 = vld [vmem:[#allocation6 + $0x324] ss:$16 sps:$4 sm:$0xff]   ;;  %v19056_v54 = vld [vmem:[#allocation6 + $0x32c] ss:$16 sps:$4 sm:$0xff]  }
 0x206   : > { %3285 = vmatprep.subr.bf16.mxu0 %v18979_v55  ;;  %3457 = vmatprep.subr.bf16.mxu1 %v18981_v56  ;;  %v19051_v55 = vld [vmem:[#allocation6 + $0x320] ss:$16 sps:$4 sm:$0xff]   ;;  %v19054_v56 = vld [vmem:[#allocation6 + $0x328] ss:$16 sps:$4 sm:$0xff]  }
 0x209   : > { %3286 = vmatpush1.bf16.msra.mxu0 %v18983_v57  ;;  %3458 = vmatpush1.bf16.msra.mxu1 %v18984_v58  ;;  %v19059_v57 = vld [vmem:[#allocation6 + $0x344] ss:$16 sps:$4 sm:$0xff]   ;;  %v19062_v58 = vld [vmem:[#allocation6 + $0x34c] ss:$16 sps:$4 sm:$0xff]  }
 0x20a   : > { %3287 = vmatprep.subr.bf16.mxu0 %v18985_v59  ;;  %3459 = vmatprep.subr.bf16.mxu1 %v18987_v60  ;;  %v19057_v59 = vld [vmem:[#allocation6 + $0x340] ss:$16 sps:$4 sm:$0xff]   ;;  %v19060_v60 = vld [vmem:[#allocation6 + $0x348] ss:$16 sps:$4 sm:$0xff]  }
 0x20d   : > { %3288 = vmatpush1.bf16.msra.mxu0 %v18989_v61  ;;  %3460 = vmatpush1.bf16.msra.mxu1 %v18990_v62  ;;  %v19065_v61 = vld [vmem:[#allocation6 + $0x364] ss:$16 sps:$4 sm:$0xff]   ;;  %v19068_v62 = vld [vmem:[#allocation6 + $0x36c] ss:$16 sps:$4 sm:$0xff]  }
 0x20e   : > { %3289 = vmatprep.subr.bf16.mxu0 %v18991_v63  ;;  %3461 = vmatprep.subr.bf16.mxu1 %v18993_v0  ;;  %v19063_v63 = vld [vmem:[#allocation6 + $0x360] ss:$16 sps:$4 sm:$0xff]   ;;  %v19066_v0 = vld [vmem:[#allocation6 + $0x368] ss:$16 sps:$4 sm:$0xff]  }
 0x211   : > { %3290 = vmatpush1.bf16.msra.mxu0 %v18995_v1  ;;  %3462 = vmatpush1.bf16.msra.mxu1 %v18996_v2  ;;  %v19071_v1 = vld [vmem:[#allocation6 + $0x384] ss:$16 sps:$4 sm:$0xff]   ;;  %v19074_v2 = vld [vmem:[#allocation6 + $0x38c] ss:$16 sps:$4 sm:$0xff]  }
 0x212   : > { %3302 = vmatprep.subr.bf16.mxu0 %v18999_v3  ;;  %3474 = vmatprep.subr.bf16.mxu1 %v19002_v8  ;;  %v19069_v3 = vld [vmem:[#allocation6 + $0x380] ss:$16 sps:$4 sm:$0xff]   ;;  %v19078_v8 = vld [vmem:[#allocation6 + $0x3a8] ss:$16 sps:$4 sm:$0xff]  }
 0x214   : > { %3292 = vmatmul.mubr.bf16.vlgmr.msra.gmra.mrb[0].mxu0 %v1693_v13  ;;  %3464 = vmatmul.mubr.bf16.vlgmr.msra.gmra.mrb[0].mxu1 %v1693_v13  ;;  %v19089_v13 = vld [vmem:[#allocation6 + $0x3e4] ss:$16 sps:$4 sm:$0xff]  }
 0x215   : > { %3303 = vmatpush1.bf16.msra.mxu0 %v18997_v11  ;;  %3475 = vmatpush1.bf16.msra.mxu1 %v19000_v12  ;;  %v19081_v11 = vld [vmem:[#allocation6 + $0x3c0] ss:$16 sps:$4 sm:$0xff]   ;;  %v19084_v12 = vld [vmem:[#allocation6 + $0x3c8] ss:$16 sps:$4 sm:$0xff]  }
 0x216   : > { %3304 = vmatprep.subr.bf16.mxu0 %v19005_v14  ;;  %3476 = vmatprep.subr.bf16.mxu1 %v19008_v16  ;;  %v19092_v14 = vld [vmem:[#allocation6 + $0x3ec] ss:$16 sps:$4 sm:$0xff]   ;;  %v19090_v16 = vld [vmem:[#allocation6 + $0x3e8] ss:$16 sps:$4 sm:$0xff]  }
 0x217   : > { %3334 = vmatprep.mubr.bf16.mxu0 %v1696_v44  ;;  %3506 = vmatprep.mubr.bf16.mxu1 %v1696_v44  ;;  %v19111_v44 = vld [vmem:[#allocation6 + $0x460] ss:$16 sps:$4 sm:$0xff]  }
 0x219   : > { %3305 = vmatpush1.bf16.msra.mxu0 %v19003_v20  ;;  %3477 = vmatpush1.bf16.msra.mxu1 %v19006_v21  ;;  %v19095_v20 = vld [vmem:[#allocation6 + $0x404] ss:$16 sps:$4 sm:$0xff]  }
 0x21a   : > { %3306 = vmatprep.subr.bf16.mxu0 %v19011_v22  ;;  %3478 = vmatprep.subr.bf16.mxu1 %v19014_v23  ;;  %v1658_v21 = vld [vmem:[%s22434_s1 + $0x10] sm:$0xff] }
 0x21b   : > { %v1662_v22 = vld [vmem:[%s22434_s1 + $0x30] sm:$0xff]  ;;  %v1679_v23 = vrot.slane %v1658_v21, 1  ;;  %s23236_s1 = sld [smem:[#allocation41_spill]] }
 0x21d   : > { %3307 = vmatpush1.bf16.msra.mxu0 %v19009_v24  ;;  %3479 = vmatpush1.bf16.msra.mxu1 %v19012_v25  ;;  %v19098_v24 = vld [vmem:[#allocation6 + $0x40c] ss:$16 sps:$4 sm:$0xff]   ;;  %v1683_v25 = vrot.slane %v22478_v41, 1  ;;  %v19108_v41 = vld [vmem:[#allocation6 + $0x448] ss:$16 sps:$4 sm:$0xff]  }
 0x21e   : > { %3308 = vmatprep.subr.bf16.mxu0 %v19017_v26  ;;  %3480 = vmatprep.subr.bf16.mxu1 %v19020_v27  ;;  %v1680_v26 = vrot.slane %v1662_v22, 1  ;;  %v19093_v27 = vld [vmem:[#allocation6 + $0x400] ss:$16 sps:$4 sm:$0xff]  }
 0x221   : > { %3309 = vmatpush1.bf16.msra.mxu0 %v19015_v28  ;;  %3481 = vmatpush1.bf16.msra.mxu1 %v19018_v29  ;;  %v19096_v28 = vld [vmem:[#allocation6 + $0x408] ss:$16 sps:$4 sm:$0xff]   ;;  %v1695_v29 = vpack.c.bf16 %v1662_v22, %v1658_v21  ;;  %v19171_v21 = vld [vmem:[#allocation6 + $0x5a0] ss:$16 sps:$4 sm:$0xff]  }
 0x222   : > { %3310 = vmatprep.subr.bf16.mxu0 %v19023_v30  ;;  %3482 = vmatprep.subr.bf16.mxu1 %v19026_v31  ;;  %v1684_v30 = vsel %vm1672_vm0, %v1682_v18, %v1683_v25  ;;  %v19101_v31 = vld [vmem:[#allocation6 + $0x424] ss:$16 sps:$4 sm:$0xff]   ;;  %v19174_v22 = vld [vmem:[#allocation6 + $0x5a8] ss:$16 sps:$4 sm:$0xff]  }
 0x223   : > { %v19173_v18 = vld [vmem:[#allocation6 + $0x5a4] ss:$16 sps:$4 sm:$0xff]  }
 0x225   : > { %3311 = vmatpush1.bf16.msra.mxu0 %v19021_v32  ;;  %3483 = vmatpush1.bf16.msra.mxu1 %v19024_v33  ;;  %v22487_v32 = vpack.c.bf16 %v1683_v25, %v1684_v30  ;;  %v1681_v33 = vsel %vm1672_vm0, %v1679_v23, %v1680_v26  ;;  %v19179_v23 = vld [vmem:[#allocation6 + $0x5c4] ss:$16 sps:$4 sm:$0xff]   ;;  %v19177_v25 = vld [vmem:[#allocation6 + $0x5c0] ss:$16 sps:$4 sm:$0xff]   ;;  %v19186_v30 = vld [vmem:[#allocation6 + $0x5e8] ss:$16 sps:$4 sm:$0xff]  }
 0x226   : > { %3312 = vmatprep.subr.bf16.mxu0 %v19029_v34  ;;  %3484 = vmatprep.subr.bf16.mxu1 %v19032_v35  ;;  %v19104_v34 = vld [vmem:[#allocation6 + $0x42c] ss:$16 sps:$4 sm:$0xff]   ;;  %v22490_v35 = vpack.c.bf16 %v1680_v26, %v1681_v33  ;;  %v19180_v26 = vld [vmem:[#allocation6 + $0x5c8] ss:$16 sps:$4 sm:$0xff]  }
 0x227   : > { %v19194_v33 = vld [vmem:[#allocation6 + $0x60c] ss:$16 sps:$4 sm:$0xff]  }
 0x229   : > { %3313 = vmatpush1.bf16.msra.mxu0 %v19027_v36  ;;  %3485 = vmatpush1.bf16.msra.mxu1 %v19030_v37  ;;  %v19099_v36 = vld [vmem:[#allocation6 + $0x420] ss:$16 sps:$4 sm:$0xff]   ;;  %v19102_v37 = vld [vmem:[#allocation6 + $0x428] ss:$16 sps:$4 sm:$0xff]  }
 0x22a   : > { %3314 = vmatprep.subr.bf16.mxu0 %v19035_v38  ;;  %3486 = vmatprep.subr.bf16.mxu1 %v19038_v39  ;;  %v19107_v38 = vld [vmem:[#allocation6 + $0x444] ss:$16 sps:$4 sm:$0xff]   ;;  %v19110_v39 = vld [vmem:[#allocation6 + $0x44c] ss:$16 sps:$4 sm:$0xff]  }
 0x22d   : > { %3315 = vmatpush1.bf16.msra.mxu0 %v19033_v42  ;;  %3487 = vmatpush1.bf16.msra.mxu1 %v19036_v43  ;;  %v19113_v42 = vld [vmem:[#allocation6 + $0x464] ss:$16 sps:$4 sm:$0xff]   ;;  %v19116_v43 = vld [vmem:[#allocation6 + $0x46c] ss:$16 sps:$4 sm:$0xff]  }
 0x22e   : > { %3316 = vmatprep.subr.bf16.mxu0 %v19041_v45  ;;  %3488 = vmatprep.subr.bf16.mxu1 %v19044_v46  ;;  %v19114_v45 = vld [vmem:[#allocation6 + $0x468] ss:$16 sps:$4 sm:$0xff]   ;;  %v19119_v46 = vld [vmem:[#allocation6 + $0x484] ss:$16 sps:$4 sm:$0xff]  }
 0x231   : > { %3317 = vmatpush1.bf16.msra.mxu0 %v19039_v47  ;;  %3489 = vmatpush1.bf16.msra.mxu1 %v19042_v48  ;;  %v19122_v47 = vld [vmem:[#allocation6 + $0x48c] ss:$16 sps:$4 sm:$0xff]   ;;  %v19117_v48 = vld [vmem:[#allocation6 + $0x480] ss:$16 sps:$4 sm:$0xff]  }
 0x232   : > { %3318 = vmatprep.subr.bf16.mxu0 %v19047_v49  ;;  %3490 = vmatprep.subr.bf16.mxu1 %v19050_v50  ;;  %v19120_v49 = vld [vmem:[#allocation6 + $0x488] ss:$16 sps:$4 sm:$0xff]   ;;  %v19128_v50 = vld [vmem:[#allocation6 + $0x4ac] ss:$16 sps:$4 sm:$0xff]  }
 0x235   : > { %3319 = vmatpush1.bf16.msra.mxu0 %v19045_v51  ;;  %3491 = vmatpush1.bf16.msra.mxu1 %v19048_v52  ;;  %v19123_v51 = vld [vmem:[#allocation6 + $0x4a0] ss:$16 sps:$4 sm:$0xff]   ;;  %v19126_v52 = vld [vmem:[#allocation6 + $0x4a8] ss:$16 sps:$4 sm:$0xff]  }
 0x236   : > { %3320 = vmatprep.subr.bf16.mxu0 %v19053_v53  ;;  %3492 = vmatprep.subr.bf16.mxu1 %v19056_v54  ;;  %v19131_v53 = vld [vmem:[#allocation6 + $0x4c4] ss:$16 sps:$4 sm:$0xff]   ;;  %v19134_v54 = vld [vmem:[#allocation6 + $0x4cc] ss:$16 sps:$4 sm:$0xff]  }
 0x239   : > { %3321 = vmatpush1.bf16.msra.mxu0 %v19051_v55  ;;  %3493 = vmatpush1.bf16.msra.mxu1 %v19054_v56  ;;  %v19129_v55 = vld [vmem:[#allocation6 + $0x4c0] ss:$16 sps:$4 sm:$0xff]   ;;  %v19132_v56 = vld [vmem:[#allocation6 + $0x4c8] ss:$16 sps:$4 sm:$0xff]  }
 0x23a   : > { %3322 = vmatprep.subr.bf16.mxu0 %v19059_v57  ;;  %3494 = vmatprep.subr.bf16.mxu1 %v19062_v58  ;;  %v19137_v57 = vld [vmem:[#allocation6 + $0x4e4] ss:$16 sps:$4 sm:$0xff]   ;;  %v19140_v58 = vld [vmem:[#allocation6 + $0x4ec] ss:$16 sps:$4 sm:$0xff]  }
 0x23d   : > { %3323 = vmatpush1.bf16.msra.mxu0 %v19057_v59  ;;  %3495 = vmatpush1.bf16.msra.mxu1 %v19060_v60  ;;  %v19135_v59 = vld [vmem:[#allocation6 + $0x4e0] ss:$16 sps:$4 sm:$0xff]   ;;  %v19138_v60 = vld [vmem:[#allocation6 + $0x4e8] ss:$16 sps:$4 sm:$0xff]  }
 0x23e   : > { %3324 = vmatprep.subr.bf16.mxu0 %v19065_v61  ;;  %3496 = vmatprep.subr.bf16.mxu1 %v19068_v62  ;;  %v19143_v61 = vld [vmem:[#allocation6 + $0x504] ss:$16 sps:$4 sm:$0xff]   ;;  %v19146_v62 = vld [vmem:[#allocation6 + $0x50c] ss:$16 sps:$4 sm:$0xff]  }
 0x241   : > { %3325 = vmatpush1.bf16.msra.mxu0 %v19063_v63  ;;  %3497 = vmatpush1.bf16.msra.mxu1 %v19066_v0  ;;  %v19141_v63 = vld [vmem:[#allocation6 + $0x500] ss:$16 sps:$4 sm:$0xff]   ;;  %v19144_v0 = vld [vmem:[#allocation6 + $0x508] ss:$16 sps:$4 sm:$0xff]  }
 0x242   : > { %3326 = vmatprep.subr.bf16.mxu0 %v19071_v1  ;;  %3498 = vmatprep.subr.bf16.mxu1 %v19074_v2  ;;  %v19149_v1 = vld [vmem:[#allocation6 + $0x524] ss:$16 sps:$4 sm:$0xff]   ;;  %v19152_v2 = vld [vmem:[#allocation6 + $0x52c] ss:$16 sps:$4 sm:$0xff]  }
 0x245   : > { %3327 = vmatpush1.bf16.msra.mxu0 %v19069_v3  ;;  %3499 = vmatpush1.bf16.msra.mxu1 %v19072_v4  ;;  %v19147_v3 = vld [vmem:[#allocation6 + $0x520] ss:$16 sps:$4 sm:$0xff]   ;;  %v19150_v4 = vld [vmem:[#allocation6 + $0x528] ss:$16 sps:$4 sm:$0xff]  }
 0x246   : > { %3328 = vmatprep.subr.bf16.mxu0 %v19077_v5  ;;  %3500 = vmatprep.subr.bf16.mxu1 %v19080_v6  ;;  %v19155_v5 = vld [vmem:[#allocation6 + $0x544] ss:$16 sps:$4 sm:$0xff]   ;;  %v19158_v6 = vld [vmem:[#allocation6 + $0x54c] ss:$16 sps:$4 sm:$0xff]  }
 0x249   : > { %3329 = vmatpush1.bf16.msra.mxu0 %v19075_v7  ;;  %3501 = vmatpush1.bf16.msra.mxu1 %v19078_v8  ;;  %v19153_v7 = vld [vmem:[#allocation6 + $0x540] ss:$16 sps:$4 sm:$0xff]   ;;  %v19156_v8 = vld [vmem:[#allocation6 + $0x548] ss:$16 sps:$4 sm:$0xff]  }
 0x24a   : > { %3330 = vmatprep.subr.bf16.mxu0 %v19083_v9  ;;  %3502 = vmatprep.subr.bf16.mxu1 %v19086_v10  ;;  %v19161_v9 = vld [vmem:[#allocation6 + $0x564] ss:$16 sps:$4 sm:$0xff]   ;;  %v19164_v10 = vld [vmem:[#allocation6 + $0x56c] ss:$16 sps:$4 sm:$0xff]  }
 0x24d   : > { %3331 = vmatpush1.bf16.msra.mxu0 %v19081_v11  ;;  %3503 = vmatpush1.bf16.msra.mxu1 %v19084_v12  ;;  %v19159_v11 = vld [vmem:[#allocation6 + $0x560] ss:$16 sps:$4 sm:$0xff]   ;;  %v19162_v12 = vld [vmem:[#allocation6 + $0x568] ss:$16 sps:$4 sm:$0xff]  }
 0x24e   : > { %3332 = vmatprep.subr.bf16.mxu0 %v19089_v13  ;;  %3504 = vmatprep.subr.bf16.mxu1 %v19092_v14  ;;  %v19167_v13 = vld [vmem:[#allocation6 + $0x584] ss:$16 sps:$4 sm:$0xff]   ;;  %v19170_v14 = vld [vmem:[#allocation6 + $0x58c] ss:$16 sps:$4 sm:$0xff]  }
 0x251   : > { %3333 = vmatpush1.bf16.msra.mxu0 %v19087_v15  ;;  %3505 = vmatpush1.bf16.msra.mxu1 %v19090_v16  ;;  %v19165_v15 = vld [vmem:[#allocation6 + $0x580] ss:$16 sps:$4 sm:$0xff]   ;;  %v19168_v16 = vld [vmem:[#allocation6 + $0x588] ss:$16 sps:$4 sm:$0xff]  }
 0x252   : > { %3345 = vmatprep.subr.bf16.mxu0 %v19095_v20  ;;  %3517 = vmatprep.subr.bf16.mxu1 %v19098_v24  ;;  %v19176_v20 = vld [vmem:[#allocation6 + $0x5ac] ss:$16 sps:$4 sm:$0xff]  }
 0x253   : > { %v19182_v24 = vld [vmem:[#allocation6 + $0x5cc] ss:$16 sps:$4 sm:$0xff]  }
 0x254   : > { %3335 = vmatmul.mubr.bf16.vlgmr.msra.gmra.mrb[0].mxu0 %v1695_v29  ;;  %3507 = vmatmul.mubr.bf16.vlgmr.msra.gmra.mrb[0].mxu1 %v1695_v29  ;;  %v19183_v29 = vld [vmem:[#allocation6 + $0x5e0] ss:$16 sps:$4 sm:$0xff]  }
 0x255   : > { %3346 = vmatpush1.bf16.msra.mxu0 %v19093_v27  ;;  %3518 = vmatpush1.bf16.msra.mxu1 %v19096_v28  ;;  %v19185_v27 = vld [vmem:[#allocation6 + $0x5e4] ss:$16 sps:$4 sm:$0xff]   ;;  %v19188_v28 = vld [vmem:[#allocation6 + $0x5ec] ss:$16 sps:$4 sm:$0xff]  }
 0x256   : > { %3347 = vmatprep.subr.bf16.mxu0 %v19101_v31  ;;  %3519 = vmatprep.subr.bf16.mxu1 %v19104_v34  ;;  %v19191_v31 = vld [vmem:[#allocation6 + $0x604] ss:$16 sps:$4 sm:$0xff]   ;;  %v19189_v34 = vld [vmem:[#allocation6 + $0x600] ss:$16 sps:$4 sm:$0xff]  }
 0x257   : > { %3377 = vmatprep.mubr.bf16.mxu0 %v22469_v17  ;;  %3549 = vmatprep.mubr.bf16.mxu1 %v22469_v17  ;;  %v19125_v17 = vld [vmem:[#allocation6 + $0x4a4] ss:$16 sps:$4 sm:$0xff]  }
 0x259   : > { %3348 = vmatpush1.bf16.msra.mxu0 %v19099_v36  ;;  %3520 = vmatpush1.bf16.msra.mxu1 %v19102_v37  ;;  %v19192_v36 = vld [vmem:[#allocation6 + $0x608] ss:$16 sps:$4 sm:$0xff]   ;;  %v19197_v37 = vld [vmem:[#allocation6 + $0x624] ss:$16 sps:$4 sm:$0xff]  }
 0x25a   : > { %3349 = vmatprep.subr.bf16.mxu0 %v19107_v38  ;;  %3521 = vmatprep.subr.bf16.mxu1 %v19110_v39  ;;  %v19200_v38 = vld [vmem:[#allocation6 + $0x62c] ss:$16 sps:$4 sm:$0xff]   ;;  %v19195_v39 = vld [vmem:[#allocation6 + $0x620] ss:$16 sps:$4 sm:$0xff]  }
 0x25d   : > { %3350 = vmatpush1.bf16.msra.mxu0 %v19105_v40  ;;  %3522 = vmatpush1.bf16.msra.mxu1 %v19108_v41  ;;  %v19198_v40 = vld [vmem:[#allocation6 + $0x628] ss:$16 sps:$4 sm:$0xff]   ;;  %v19203_v41 = vld [vmem:[#allocation6 + $0x644] ss:$16 sps:$4 sm:$0xff]  }
 0x25e   : > { %3351 = vmatprep.subr.bf16.mxu0 %v19113_v42  ;;  %3523 = vmatprep.subr.bf16.mxu1 %v19116_v43  ;;  %v19206_v42 = vld [vmem:[#allocation6 + $0x64c] ss:$16 sps:$4 sm:$0xff]   ;;  %v19201_v43 = vld [vmem:[#allocation6 + $0x640] ss:$16 sps:$4 sm:$0xff]  }
 0x261   : > { %3352 = vmatpush1.bf16.msra.mxu0 %v19111_v44  ;;  %3524 = vmatpush1.bf16.msra.mxu1 %v19114_v45  ;;  %v19204_v44 = vld [vmem:[#allocation6 + $0x648] ss:$16 sps:$4 sm:$0xff]   ;;  %v19209_v45 = vld [vmem:[#allocation6 + $0x664] ss:$16 sps:$4 sm:$0xff]  }
 0x262   : > { %3353 = vmatprep.subr.bf16.mxu0 %v19119_v46  ;;  %3525 = vmatprep.subr.bf16.mxu1 %v19122_v47  ;;  %v19207_v46 = vld [vmem:[#allocation6 + $0x660] ss:$16 sps:$4 sm:$0xff]   ;;  %v19210_v47 = vld [vmem:[#allocation6 + $0x668] ss:$16 sps:$4 sm:$0xff]  }
 0x265   : > { %3354 = vmatpush1.bf16.msra.mxu0 %v19117_v48  ;;  %3526 = vmatpush1.bf16.msra.mxu1 %v19120_v49  ;;  %v19215_v48 = vld [vmem:[#allocation6 + $0x684] ss:$16 sps:$4 sm:$0xff]   ;;  %v19218_v49 = vld [vmem:[#allocation6 + $0x68c] ss:$16 sps:$4 sm:$0xff]  }
 0x266   : > { %3355 = vmatprep.subr.bf16.mxu0 %v19125_v17  ;;  %3527 = vmatprep.subr.bf16.mxu1 %v19128_v50  ;;  %v19213_v17 = vld [vmem:[#allocation6 + $0x680] ss:$16 sps:$4 sm:$0xff]   ;;  %v19216_v50 = vld [vmem:[#allocation6 + $0x688] ss:$16 sps:$4 sm:$0xff]  }
 0x269   : > { %3356 = vmatpush1.bf16.msra.mxu0 %v19123_v51  ;;  %3528 = vmatpush1.bf16.msra.mxu1 %v19126_v52  ;;  %v19224_v51 = vld [vmem:[#allocation6 + $0x6ac] ss:$16 sps:$4 sm:$0xff]   ;;  %v19219_v52 = vld [vmem:[#allocation6 + $0x6a0] ss:$16 sps:$4 sm:$0xff]  }
 0x26a   : > { %3357 = vmatprep.subr.bf16.mxu0 %v19131_v53  ;;  %3529 = vmatprep.subr.bf16.mxu1 %v19134_v54  ;;  %v19222_v53 = vld [vmem:[#allocation6 + $0x6a8] ss:$16 sps:$4 sm:$0xff]   ;;  %v19227_v54 = vld [vmem:[#allocation6 + $0x6c4] ss:$16 sps:$4 sm:$0xff]  }
 0x26d   : > { %3358 = vmatpush1.bf16.msra.mxu0 %v19129_v55  ;;  %3530 = vmatpush1.bf16.msra.mxu1 %v19132_v56  ;;  %v19230_v55 = vld [vmem:[#allocation6 + $0x6cc] ss:$16 sps:$4 sm:$0xff]   ;;  %v19225_v56 = vld [vmem:[#allocation6 + $0x6c0] ss:$16 sps:$4 sm:$0xff]  }
 0x26e   : > { %3359 = vmatprep.subr.bf16.mxu0 %v19137_v57  ;;  %3531 = vmatprep.subr.bf16.mxu1 %v19140_v58  ;;  %v19228_v57 = vld [vmem:[#allocation6 + $0x6c8] ss:$16 sps:$4 sm:$0xff]   ;;  %v19233_v58 = vld [vmem:[#allocation6 + $0x6e4] ss:$16 sps:$4 sm:$0xff]  }
 0x271   : > { %3360 = vmatpush1.bf16.msra.mxu0 %v19135_v59  ;;  %3532 = vmatpush1.bf16.msra.mxu1 %v19138_v60  ;;  %v19236_v59 = vld [vmem:[#allocation6 + $0x6ec] ss:$16 sps:$4 sm:$0xff]   ;;  %v19231_v60 = vld [vmem:[#allocation6 + $0x6e0] ss:$16 sps:$4 sm:$0xff]  }
 0x272   : > { %3361 = vmatprep.subr.bf16.mxu0 %v19143_v61  ;;  %3533 = vmatprep.subr.bf16.mxu1 %v19146_v62  ;;  %v19234_v61 = vld [vmem:[#allocation6 + $0x6e8] ss:$16 sps:$4 sm:$0xff]   ;;  %v19239_v62 = vld [vmem:[#allocation6 + $0x704] ss:$16 sps:$4 sm:$0xff]  }
 0x275   : > { %3362 = vmatpush1.bf16.msra.mxu0 %v19141_v63  ;;  %3534 = vmatpush1.bf16.msra.mxu1 %v19144_v0  ;;  %v19242_v63 = vld [vmem:[#allocation6 + $0x70c] ss:$16 sps:$4 sm:$0xff]   ;;  %v19237_v0 = vld [vmem:[#allocation6 + $0x700] ss:$16 sps:$4 sm:$0xff]  }
 0x276   : > { %3363 = vmatprep.subr.bf16.mxu0 %v19149_v1  ;;  %3535 = vmatprep.subr.bf16.mxu1 %v19152_v2  ;;  %v19240_v1 = vld [vmem:[#allocation6 + $0x708] ss:$16 sps:$4 sm:$0xff]   ;;  %v19245_v2 = vld [vmem:[#allocation6 + $0x724] ss:$16 sps:$4 sm:$0xff]  }
 0x279   : > { %3364 = vmatpush1.bf16.msra.mxu0 %v19147_v3  ;;  %3536 = vmatpush1.bf16.msra.mxu1 %v19150_v4  ;;  %v19248_v3 = vld [vmem:[#allocation6 + $0x72c] ss:$16 sps:$4 sm:$0xff]   ;;  %v19243_v4 = vld [vmem:[#allocation6 + $0x720] ss:$16 sps:$4 sm:$0xff]  }
 0x27a   : > { %3365 = vmatprep.subr.bf16.mxu0 %v19155_v5  ;;  %3537 = vmatprep.subr.bf16.mxu1 %v19158_v6  ;;  %v19246_v5 = vld [vmem:[#allocation6 + $0x728] ss:$16 sps:$4 sm:$0xff]   ;;  %v19251_v6 = vld [vmem:[#allocation6 + $0x744] ss:$16 sps:$4 sm:$0xff]  }
 0x27d   : > { %3366 = vmatpush1.bf16.msra.mxu0 %v19153_v7  ;;  %3538 = vmatpush1.bf16.msra.mxu1 %v19156_v8  ;;  %v19254_v7 = vld [vmem:[#allocation6 + $0x74c] ss:$16 sps:$4 sm:$0xff]   ;;  %v19249_v8 = vld [vmem:[#allocation6 + $0x740] ss:$16 sps:$4 sm:$0xff]  }
 0x27e   : > { %3367 = vmatprep.subr.bf16.mxu0 %v19161_v9  ;;  %3539 = vmatprep.subr.bf16.mxu1 %v19164_v10  ;;  %v19252_v9 = vld [vmem:[#allocation6 + $0x748] ss:$16 sps:$4 sm:$0xff]   ;;  %v19257_v10 = vld [vmem:[#allocation6 + $0x764] ss:$16 sps:$4 sm:$0xff]  }
 0x281   : > { %3368 = vmatpush1.bf16.msra.mxu0 %v19159_v11  ;;  %3540 = vmatpush1.bf16.msra.mxu1 %v19162_v12  ;;  %v19260_v11 = vld [vmem:[#allocation6 + $0x76c] ss:$16 sps:$4 sm:$0xff]   ;;  %v19255_v12 = vld [vmem:[#allocation6 + $0x760] ss:$16 sps:$4 sm:$0xff]  }
 0x282   : > { %3369 = vmatprep.subr.bf16.mxu0 %v19167_v13  ;;  %3541 = vmatprep.subr.bf16.mxu1 %v19170_v14  ;;  %v19258_v13 = vld [vmem:[#allocation6 + $0x768] ss:$16 sps:$4 sm:$0xff]   ;;  %v19263_v14 = vld [vmem:[#allocation6 + $0x784] ss:$16 sps:$4 sm:$0xff]  }
 0x285   : > { %3370 = vmatpush1.bf16.msra.mxu0 %v19165_v15  ;;  %3542 = vmatpush1.bf16.msra.mxu1 %v19168_v16  ;;  %v19266_v15 = vld [vmem:[#allocation6 + $0x78c] ss:$16 sps:$4 sm:$0xff]   ;;  %v19261_v16 = vld [vmem:[#allocation6 + $0x780] ss:$16 sps:$4 sm:$0xff]  }
 0x286   : > { %3371 = vmatprep.subr.bf16.mxu0 %v19173_v18  ;;  %3543 = vmatprep.subr.bf16.mxu1 %v19176_v20  ;;  %v19264_v18 = vld [vmem:[#allocation6 + $0x788] ss:$16 sps:$4 sm:$0xff]   ;;  %v19269_v20 = vld [vmem:[#allocation6 + $0x7a4] ss:$16 sps:$4 sm:$0xff]  }
 0x289   : > { %3372 = vmatpush1.bf16.msra.mxu0 %v19171_v21  ;;  %3544 = vmatpush1.bf16.msra.mxu1 %v19174_v22  ;;  %v19272_v21 = vld [vmem:[#allocation6 + $0x7ac] ss:$16 sps:$4 sm:$0xff]   ;;  %v19267_v22 = vld [vmem:[#allocation6 + $0x7a0] ss:$16 sps:$4 sm:$0xff]  }
 0x28a   : > { %3373 = vmatprep.subr.bf16.mxu0 %v19179_v23  ;;  %3545 = vmatprep.subr.bf16.mxu1 %v19182_v24  ;;  %v19270_v23 = vld [vmem:[#allocation6 + $0x7a8] ss:$16 sps:$4 sm:$0xff]   ;;  %v19275_v24 = vld [vmem:[#allocation6 + $0x7c4] ss:$16 sps:$4 sm:$0xff]  }
 0x28d   : > { %3374 = vmatpush1.bf16.msra.mxu0 %v19177_v25  ;;  %3546 = vmatpush1.bf16.msra.mxu1 %v19180_v26  ;;  %v19278_v25 = vld [vmem:[#allocation6 + $0x7cc] ss:$16 sps:$4 sm:$0xff]   ;;  %v19273_v26 = vld [vmem:[#allocation6 + $0x7c0] ss:$16 sps:$4 sm:$0xff]  }
 0x28e   : > { %3375 = vmatprep.subr.bf16.mxu0 %v19185_v27  ;;  %3547 = vmatprep.subr.bf16.mxu1 %v19188_v28  ;;  %v19276_v27 = vld [vmem:[#allocation6 + $0x7c8] ss:$16 sps:$4 sm:$0xff]   ;;  %v19281_v28 = vld [vmem:[#allocation6 + $0x7e4] ss:$16 sps:$4 sm:$0xff]  }
 0x291   : > { %3376 = vmatpush1.bf16.msra.mxu0 %v19183_v29  ;;  %3548 = vmatpush1.bf16.msra.mxu1 %v19186_v30  ;;  %v19284_v29 = vld [vmem:[#allocation6 + $0x7ec] ss:$16 sps:$4 sm:$0xff]   ;;  %v19279_v30 = vld [vmem:[#allocation6 + $0x7e0] ss:$16 sps:$4 sm:$0xff]  }
 0x292   : > { %3388 = vmatprep.subr.bf16.mxu0 %v19191_v31  ;;  %3560 = vmatprep.subr.bf16.mxu1 %v19194_v33  ;;  %v19282_v31 = vld [vmem:[#allocation6 + $0x7e8] ss:$16 sps:$4 sm:$0xff]   ;;  %v19287_v33 = vld [vmem:[#allocation8 + $0x4] ss:$16 sps:$4 sm:$0xff]  }
 0x294   : > { %3378 = vmatmul.mubr.bf16.vlgmr.msra.gmra.mrb[0].mxu0 %v22472_v19  ;;  %3550 = vmatmul.mubr.bf16.vlgmr.msra.gmra.mrb[0].mxu1 %v22472_v19  ;;  %v19212_v19 = vld [vmem:[#allocation6 + $0x66c] ss:$16 sps:$4 sm:$0xff]  }
 0x295   : > { %3389 = vmatpush1.bf16.msra.mxu0 %v19189_v34  ;;  %3561 = vmatpush1.bf16.msra.mxu1 %v19192_v36  ;;  %v19290_v34 = vld [vmem:[#allocation8 + $0xc] ss:$16 sps:$4 sm:$0xff]   ;;  %v19285_v36 = vld [vmem:[#allocation8] ss:$16 sps:$4 sm:$0xff]  }
 0x296   : > { %3390 = vmatprep.subr.bf16.mxu0 %v19197_v37  ;;  %3562 = vmatprep.subr.bf16.mxu1 %v19200_v38  ;;  %v19288_v37 = vld [vmem:[#allocation8 + $0x8] ss:$16 sps:$4 sm:$0xff]   ;;  %v19293_v38 = vld [vmem:[#allocation8 + $0x24] ss:$16 sps:$4 sm:$0xff]  }
 0x297   : > { %3420 = vmatprep.mubr.bf16.mxu0 %v22487_v32  ;;  %3592 = vmatprep.mubr.bf16.mxu1 %v22487_v32  ;;  %v19221_v32 = vld [vmem:[#allocation6 + $0x6a4] ss:$16 sps:$4 sm:$0xff]  }
 0x299   : > { %3391 = vmatpush1.bf16.msra.mxu0 %v19195_v39  ;;  %3563 = vmatpush1.bf16.msra.mxu1 %v19198_v40  ;;  %v19296_v39 = vld [vmem:[#allocation8 + $0x2c] ss:$16 sps:$4 sm:$0xff]   ;;  %v19291_v40 = vld [vmem:[#allocation8 + $0x20] ss:$16 sps:$4 sm:$0xff]  }
 0x29a   : > { %3392 = vmatprep.subr.bf16.mxu0 %v19203_v41  ;;  %3564 = vmatprep.subr.bf16.mxu1 %v19206_v42  ;;  %v19294_v41 = vld [vmem:[#allocation8 + $0x28] ss:$16 sps:$4 sm:$0xff]   ;;  %v19299_v42 = vld [vmem:[#allocation8 + $0x44] ss:$16 sps:$4 sm:$0xff]  }
 0x29d   : > { %3393 = vmatpush1.bf16.msra.mxu0 %v19201_v43  ;;  %3565 = vmatpush1.bf16.msra.mxu1 %v19204_v44  ;;  %v19302_v43 = vld [vmem:[#allocation8 + $0x4c] ss:$16 sps:$4 sm:$0xff]   ;;  %v19297_v44 = vld [vmem:[#allocation8 + $0x40] ss:$16 sps:$4 sm:$0xff]  }
 0x29e   : > { %3394 = vmatprep.subr.bf16.mxu0 %v19209_v45  ;;  %3566 = vmatprep.subr.bf16.mxu1 %v19212_v19  ;;  %v19300_v45 = vld [vmem:[#allocation8 + $0x48] ss:$16 sps:$4 sm:$0xff]   ;;  %v19305_v19 = vld [vmem:[#allocation8 + $0x64] ss:$16 sps:$4 sm:$0xff]  }
 0x2a1   : > { %3395 = vmatpush1.bf16.msra.mxu0 %v19207_v46  ;;  %3567 = vmatpush1.bf16.msra.mxu1 %v19210_v47  ;;  %v19308_v46 = vld [vmem:[#allocation8 + $0x6c] ss:$16 sps:$4 sm:$0xff]   ;;  %v19303_v47 = vld [vmem:[#allocation8 + $0x60] ss:$16 sps:$4 sm:$0xff]  }
 0x2a2   : > { %3396 = vmatprep.subr.bf16.mxu0 %v19215_v48  ;;  %3568 = vmatprep.subr.bf16.mxu1 %v19218_v49  ;;  %v19306_v48 = vld [vmem:[#allocation8 + $0x68] ss:$16 sps:$4 sm:$0xff]   ;;  %v19311_v49 = vld [vmem:[#allocation8 + $0x84] ss:$16 sps:$4 sm:$0xff]  }
 0x2a5   : > { %3397 = vmatpush1.bf16.msra.mxu0 %v19213_v17  ;;  %3569 = vmatpush1.bf16.msra.mxu1 %v19216_v50  ;;  %v19314_v17 = vld [vmem:[#allocation8 + $0x8c] ss:$16 sps:$4 sm:$0xff]   ;;  %v19312_v50 = vld [vmem:[#allocation8 + $0x88] ss:$16 sps:$4 sm:$0xff]  }
 0x2a6   : > { %3398 = vmatprep.subr.bf16.mxu0 %v19221_v32  ;;  %3570 = vmatprep.subr.bf16.mxu1 %v19224_v51  ;;  %v19317_v32 = vld [vmem:[#allocation8 + $0xa4] ss:$16 sps:$4 sm:$0xff]   ;;  %v19320_v51 = vld [vmem:[#allocation8 + $0xac] ss:$16 sps:$4 sm:$0xff]  }
 0x2a9   : > { %3399 = vmatpush1.bf16.msra.mxu0 %v19219_v52  ;;  %3571 = vmatpush1.bf16.msra.mxu1 %v19222_v53  ;;  %v19315_v52 = vld [vmem:[#allocation8 + $0xa0] ss:$16 sps:$4 sm:$0xff]   ;;  %v19318_v53 = vld [vmem:[#allocation8 + $0xa8] ss:$16 sps:$4 sm:$0xff]  }
 0x2aa   : > { %3400 = vmatprep.subr.bf16.mxu0 %v19227_v54  ;;  %3572 = vmatprep.subr.bf16.mxu1 %v19230_v55  ;;  %v19323_v54 = vld [vmem:[#allocation8 + $0xc4] ss:$16 sps:$4 sm:$0xff]   ;;  %v19326_v55 = vld [vmem:[#allocation8 + $0xcc] ss:$16 sps:$4 sm:$0xff]  }
 0x2ad   : > { %3401 = vmatpush1.bf16.msra.mxu0 %v19225_v56  ;;  %3573 = vmatpush1.bf16.msra.mxu1 %v19228_v57  ;;  %v19321_v56 = vld [vmem:[#allocation8 + $0xc0] ss:$16 sps:$4 sm:$0xff]   ;;  %v19324_v57 = vld [vmem:[#allocation8 + $0xc8] ss:$16 sps:$4 sm:$0xff]  }
 0x2ae   : > { %3402 = vmatprep.subr.bf16.mxu0 %v19233_v58  ;;  %3574 = vmatprep.subr.bf16.mxu1 %v19236_v59  ;;  %v19329_v58 = vld [vmem:[#allocation8 + $0xe4] ss:$16 sps:$4 sm:$0xff]   ;;  %v19332_v59 = vld [vmem:[#allocation8 + $0xec] ss:$16 sps:$4 sm:$0xff]  }
 0x2b1   : > { %3403 = vmatpush1.bf16.msra.mxu0 %v19231_v60  ;;  %3575 = vmatpush1.bf16.msra.mxu1 %v19234_v61  ;;  %v19327_v60 = vld [vmem:[#allocation8 + $0xe0] ss:$16 sps:$4 sm:$0xff]   ;;  %v19330_v61 = vld [vmem:[#allocation8 + $0xe8] ss:$16 sps:$4 sm:$0xff]  }
 0x2b2   : > { %3404 = vmatprep.subr.bf16.mxu0 %v19239_v62  ;;  %3576 = vmatprep.subr.bf16.mxu1 %v19242_v63  ;;  %v19335_v62 = vld [vmem:[#allocation8 + $0x104] ss:$16 sps:$4 sm:$0xff]   ;;  %v19338_v63 = vld [vmem:[#allocation8 + $0x10c] ss:$16 sps:$4 sm:$0xff]  }
 0x2b5   : > { %3405 = vmatpush1.bf16.msra.mxu0 %v19237_v0  ;;  %3577 = vmatpush1.bf16.msra.mxu1 %v19240_v1  ;;  %v19333_v0 = vld [vmem:[#allocation8 + $0x100] ss:$16 sps:$4 sm:$0xff]   ;;  %v19336_v1 = vld [vmem:[#allocation8 + $0x108] ss:$16 sps:$4 sm:$0xff]  }
 0x2b6   : > { %3406 = vmatprep.subr.bf16.mxu0 %v19245_v2  ;;  %3578 = vmatprep.subr.bf16.mxu1 %v19248_v3  ;;  %v19341_v2 = vld [vmem:[#allocation8 + $0x124] ss:$16 sps:$4 sm:$0xff]   ;;  %v19344_v3 = vld [vmem:[#allocation8 + $0x12c] ss:$16 sps:$4 sm:$0xff]  }
 0x2b9   : > { %3407 = vmatpush1.bf16.msra.mxu0 %v19243_v4  ;;  %3579 = vmatpush1.bf16.msra.mxu1 %v19246_v5  ;;  %v19339_v4 = vld [vmem:[#allocation8 + $0x120] ss:$16 sps:$4 sm:$0xff]   ;;  %v19342_v5 = vld [vmem:[#allocation8 + $0x128] ss:$16 sps:$4 sm:$0xff]  }
 0x2ba   : > { %3408 = vmatprep.subr.bf16.mxu0 %v19251_v6  ;;  %3580 = vmatprep.subr.bf16.mxu1 %v19254_v7  ;;  %v19347_v6 = vld [vmem:[#allocation8 + $0x144] ss:$16 sps:$4 sm:$0xff]   ;;  %v19350_v7 = vld [vmem:[#allocation8 + $0x14c] ss:$16 sps:$4 sm:$0xff]  }
 0x2bd   : > { %3409 = vmatpush1.bf16.msra.mxu0 %v19249_v8  ;;  %3581 = vmatpush1.bf16.msra.mxu1 %v19252_v9  ;;  %v19345_v8 = vld [vmem:[#allocation8 + $0x140] ss:$16 sps:$4 sm:$0xff]   ;;  %v19348_v9 = vld [vmem:[#allocation8 + $0x148] ss:$16 sps:$4 sm:$0xff]  }
 0x2be   : > { %3410 = vmatprep.subr.bf16.mxu0 %v19257_v10  ;;  %3582 = vmatprep.subr.bf16.mxu1 %v19260_v11  ;;  %v19353_v10 = vld [vmem:[#allocation8 + $0x164] ss:$16 sps:$4 sm:$0xff]   ;;  %v19356_v11 = vld [vmem:[#allocation8 + $0x16c] ss:$16 sps:$4 sm:$0xff]  }
 0x2c1   : > { %3411 = vmatpush1.bf16.msra.mxu0 %v19255_v12  ;;  %3583 = vmatpush1.bf16.msra.mxu1 %v19258_v13  ;;  %v19351_v12 = vld [vmem:[#allocation8 + $0x160] ss:$16 sps:$4 sm:$0xff]   ;;  %v19354_v13 = vld [vmem:[#allocation8 + $0x168] ss:$16 sps:$4 sm:$0xff]  }
 0x2c2   : > { %3412 = vmatprep.subr.bf16.mxu0 %v19263_v14  ;;  %3584 = vmatprep.subr.bf16.mxu1 %v19266_v15  ;;  %v19359_v14 = vld [vmem:[#allocation8 + $0x184] ss:$16 sps:$4 sm:$0xff]   ;;  %v19362_v15 = vld [vmem:[#allocation8 + $0x18c] ss:$16 sps:$4 sm:$0xff]  }
 0x2c5   : > { %3413 = vmatpush1.bf16.msra.mxu0 %v19261_v16  ;;  %3585 = vmatpush1.bf16.msra.mxu1 %v19264_v18  ;;  %v19357_v16 = vld [vmem:[#allocation8 + $0x180] ss:$16 sps:$4 sm:$0xff]   ;;  %v19360_v18 = vld [vmem:[#allocation8 + $0x188] ss:$16 sps:$4 sm:$0xff]  }
 0x2c6   : > { %3414 = vmatprep.subr.bf16.mxu0 %v19269_v20  ;;  %3586 = vmatprep.subr.bf16.mxu1 %v19272_v21  ;;  %v19365_v20 = vld [vmem:[#allocation8 + $0x1a4] ss:$16 sps:$4 sm:$0xff]   ;;  %v19368_v21 = vld [vmem:[#allocation8 + $0x1ac] ss:$16 sps:$4 sm:$0xff]  }
 0x2c9   : > { %3415 = vmatpush1.bf16.msra.mxu0 %v19267_v22  ;;  %3587 = vmatpush1.bf16.msra.mxu1 %v19270_v23  ;;  %v19363_v22 = vld [vmem:[#allocation8 + $0x1a0] ss:$16 sps:$4 sm:$0xff]   ;;  %v19366_v23 = vld [vmem:[#allocation8 + $0x1a8] ss:$16 sps:$4 sm:$0xff]  }
 0x2ca   : > { %3416 = vmatprep.subr.bf16.mxu0 %v19275_v24  ;;  %3588 = vmatprep.subr.bf16.mxu1 %v19278_v25  ;;  %v19371_v24 = vld [vmem:[#allocation8 + $0x1c4] ss:$16 sps:$4 sm:$0xff]   ;;  %v19374_v25 = vld [vmem:[#allocation8 + $0x1cc] ss:$16 sps:$4 sm:$0xff]  }
 0x2cd   : > { %3417 = vmatpush1.bf16.msra.mxu0 %v19273_v26  ;;  %3589 = vmatpush1.bf16.msra.mxu1 %v19276_v27  ;;  %v1959_v26 = vlaneseq  ;;  %v19369_v27 = vld [vmem:[#allocation8 + $0x1c0] ss:$16 sps:$4 sm:$0xff]  }
 0x2ce   : > { %3418 = vmatprep.subr.bf16.mxu0 %v19281_v28  ;;  %3590 = vmatprep.subr.bf16.mxu1 %v19284_v29  ;;  %v19372_v28 = vld [vmem:[#allocation8 + $0x1c8] ss:$16 sps:$4 sm:$0xff]   ;;  %v20347_v29 = vld [vmem:[#allocation18 + $0x124] ss:$8 sps:$4 sm:$0xff]  }
 0x2cf   : > { %vm22500_vm1 = vcmp.lt.s32.totalorder %v1959_v26, 256  ;;  %vm22504_vm2 = vcmp.lt.s32.totalorder %v1959_v26, 512 }
 0x2d1   : > { %3419 = vmatpush1.bf16.msra.mxu0 %v19279_v30  ;;  %3591 = vmatpush1.bf16.msra.mxu1 %v19282_v31  ;;  %v21875_v31 = vmov 0.0  }
 0x2d2   : > { %5221 = vmatprep.subr.bf16.mxu0 %v19287_v33  ;;  %5393 = vmatprep.subr.bf16.mxu1 %v19290_v34  ;;  %10050 = vst.msk [vmem:[#allocation2 + $0x24] ss:$8 sm:$0x3] %vm22500_vm1, %v21875_v31  ;;  %10589 = vst.msk [vmem:[#allocation2 + $0x25] ss:$8 sm:$0x3] %vm22500_vm1, %v21875_v31 }
 0x2d3   : > { %12161 = vst.msk [vmem:[#allocation2 + $0x27] ss:$8 sm:$0xf] %vm22504_vm2, %v21875_v31  ;;  %14172 = vst.msk [vmem:[#allocation2 + $0x40] ss:$8 sm:$0xf] %vm22504_vm2, %v21875_v31 }
 0x2d4   : > { %3421 = vmatmul.mubr.bf16.vlgmr.msra.gmra.mrb[0].mxu0 %v22490_v35  ;;  %3593 = vmatmul.mubr.bf16.vlgmr.msra.gmra.mrb[0].mxu1 %v22490_v35  ;;  %v19309_v35 = vld [vmem:[#allocation8 + $0x80] ss:$16 sps:$4 sm:$0xff]   ;;  %9763 = vst [vmem:[#allocation2 + $0x23] sm:$0x1] %v21875_v31  ;;  %v19377_v33 = vld [vmem:[#allocation8 + $0x1e4] ss:$16 sps:$4 sm:$0xff]  }
 0x2d5   : > { %5222 = vmatpush1.bf16.msra.mxu0 %v19285_v36  ;;  %5394 = vmatpush1.bf16.msra.mxu1 %v19288_v37  ;;  %11128 = vst.msk [vmem:[#allocation2 + $0x26] ss:$8 sm:$0x3] %vm22500_vm1, %v21875_v31  ;;  %v19380_v34 = vld [vmem:[#allocation8 + $0x1ec] ss:$16 sps:$4 sm:$0xff]  }
 0x2d6   : > { %5223 = vmatprep.subr.bf16.mxu0 %v19293_v38  ;;  %5395 = vmatprep.subr.bf16.mxu1 %v19296_v39  ;;  %v19375_v36 = vld [vmem:[#allocation8 + $0x1e0] ss:$16 sps:$4 sm:$0xff]   ;;  %v19378_v37 = vld [vmem:[#allocation8 + $0x1e8] ss:$16 sps:$4 sm:$0xff]   ;;  %v19383_v38 = vld [vmem:[#allocation8 + $0x204] ss:$16 sps:$4 sm:$0xff]  }
 0x2d7   : > { %v19386_v39 = vld [vmem:[#allocation8 + $0x20c] ss:$16 sps:$4 sm:$0xff]  }
 0x2d9   : > { %5224 = vmatpush1.bf16.msra.mxu0 %v19291_v40  ;;  %5396 = vmatpush1.bf16.msra.mxu1 %v19294_v41  ;;  %v1960_v40 = vshrl.u32 %v1959_v26, 7  ;;  %v1957_v41 = vld [vmem:[%s22013_s19] sm:$0xf] }
 0x2da   : > { %5225 = vmatprep.subr.bf16.mxu0 %v19299_v42  ;;  %5397 = vmatprep.subr.bf16.mxu1 %v19302_v43 }
 0x2db   : > { %v22525_v42 = vsub.s32 0, %v1960_v40  ;;  %v22527_v43 = vsub.s32 2, %v1960_v40 }
 0x2dd   : > { %5226 = vmatpush1.bf16.msra.mxu0 %v19297_v44  ;;  %5398 = vmatpush1.bf16.msra.mxu1 %v19300_v45  ;;  %v22529_v44 = vsub.s32 1, %v1960_v40  ;;  %v22531_v45 = vsub.s32 3, %v1960_v40  ;;  %v19390_v40 = vld [vmem:[#allocation8 + $0x228] ss:$16 sps:$4 sm:$0xff]  }
 0x2de   : > { %5227 = vmatprep.subr.bf16.mxu0 %v19305_v19  ;;  %5399 = vmatprep.subr.bf16.mxu1 %v19308_v46  ;;  %v1962_v19 = vrot.slane %v1957_v41, %v22525_v42  ;;  %v1970_v46 = vrot.slane %v1957_v41, %v22527_v43 }
 0x2e1   : > { %5228 = vmatpush1.bf16.msra.mxu0 %v19303_v47  ;;  %5400 = vmatpush1.bf16.msra.mxu1 %v19306_v48  ;;  %v1966_v47 = vrot.slane %v1957_v41, %v22529_v44  ;;  %v1974_v48 = vrot.slane %v1957_v41, %v22531_v45  ;;  %v19392_v41 = vld [vmem:[#allocation8 + $0x22c] ss:$16 sps:$4 sm:$0xff]  }
 0x2e2   : > { %5229 = vmatprep.subr.bf16.mxu0 %v19311_v49  ;;  %5401 = vmatprep.subr.bf16.mxu1 %v19314_v17 }
 0x2e5   : > { %5230 = vmatpush1.bf16.msra.mxu0 %v19309_v35  ;;  %5402 = vmatpush1.bf16.msra.mxu1 %v19312_v50 }
 0x2e6   : > { %5231 = vmatprep.subr.bf16.mxu0 %v19317_v32  ;;  %5403 = vmatprep.subr.bf16.mxu1 %v19320_v51 }
 0x2e9   : > { %5232 = vmatpush1.bf16.msra.mxu0 %v19315_v52  ;;  %5404 = vmatpush1.bf16.msra.mxu1 %v19318_v53 }
 0x2ea   : > { %5233 = vmatprep.subr.bf16.mxu0 %v19323_v54  ;;  %5405 = vmatprep.subr.bf16.mxu1 %v19326_v55 }
 0x2ed   : > { %5234 = vmatpush1.bf16.msra.mxu0 %v19321_v56  ;;  %5406 = vmatpush1.bf16.msra.mxu1 %v19324_v57 }
 0x2ee   : > { %5235 = vmatprep.subr.bf16.mxu0 %v19329_v58  ;;  %5407 = vmatprep.subr.bf16.mxu1 %v19332_v59 }
 0x2f1   : > { %5236 = vmatpush1.bf16.msra.mxu0 %v19327_v60  ;;  %5408 = vmatpush1.bf16.msra.mxu1 %v19330_v61 }
 0x2f2   : > { %5237 = vmatprep.subr.bf16.mxu0 %v19335_v62  ;;  %5409 = vmatprep.subr.bf16.mxu1 %v19338_v63 }
 0x2f5   : > { %5238 = vmatpush1.bf16.msra.mxu0 %v19333_v0  ;;  %5410 = vmatpush1.bf16.msra.mxu1 %v19336_v1 }
 0x2f6   : > { %5239 = vmatprep.subr.bf16.mxu0 %v19341_v2  ;;  %5411 = vmatprep.subr.bf16.mxu1 %v19344_v3 }
 0x2f9   : > { %5240 = vmatpush1.bf16.msra.mxu0 %v19339_v4  ;;  %5412 = vmatpush1.bf16.msra.mxu1 %v19342_v5 }
 0x2fa   : > { %5241 = vmatprep.subr.bf16.mxu0 %v19347_v6  ;;  %5413 = vmatprep.subr.bf16.mxu1 %v19350_v7 }
 0x2fd   : > { %5242 = vmatpush1.bf16.msra.mxu0 %v19345_v8  ;;  %5414 = vmatpush1.bf16.msra.mxu1 %v19348_v9 }
 0x2fe   : > { %5243 = vmatprep.subr.bf16.mxu0 %v19353_v10  ;;  %5415 = vmatprep.subr.bf16.mxu1 %v19356_v11 }
 0x301   : > { %5244 = vmatpush1.bf16.msra.mxu0 %v19351_v12  ;;  %5416 = vmatpush1.bf16.msra.mxu1 %v19354_v13 }
 0x302   : > { %5245 = vmatprep.subr.bf16.mxu0 %v19359_v14  ;;  %5417 = vmatprep.subr.bf16.mxu1 %v19362_v15 }
 0x305   : > { %5246 = vmatpush1.bf16.msra.mxu0 %v19357_v16  ;;  %5418 = vmatpush1.bf16.msra.mxu1 %v19360_v18  ;;  %v19381_v18 = vld [vmem:[#allocation8 + $0x200] ss:$16 sps:$4 sm:$0xff]  }
 0x306   : > { %5247 = vmatprep.subr.bf16.mxu0 %v19365_v20  ;;  %5419 = vmatprep.subr.bf16.mxu1 %v19368_v21  ;;  %v19384_v20 = vld [vmem:[#allocation8 + $0x208] ss:$16 sps:$4 sm:$0xff]  }
 0x309   : > { %5248 = vmatpush1.bf16.msra.mxu0 %v19363_v22  ;;  %5420 = vmatpush1.bf16.msra.mxu1 %v19366_v23 }
 0x30a   : > { %5249 = vmatprep.subr.bf16.mxu0 %v19371_v24  ;;  %5421 = vmatprep.subr.bf16.mxu1 %v19374_v25 }
 0x30d   : > { %5250 = vmatpush1.bf16.msra.mxu0 %v19369_v27  ;;  %5422 = vmatpush1.bf16.msra.mxu1 %v19372_v28  ;;  %v19389_v27 = vld [vmem:[#allocation8 + $0x224] ss:$16 sps:$4 sm:$0xff]  }
 0x30e   : > { %5251 = vmatprep.subr.bf16.mxu0 %v19377_v33  ;;  %5423 = vmatprep.subr.bf16.mxu1 %v19380_v34 }
 0x311   : > { %5252 = vmatpush1.bf16.msra.mxu0 %v19375_v36  ;;  %5424 = vmatpush1.bf16.msra.mxu1 %v19378_v37 }
 0x312   : > { %5264 = vmatprep.subr.bf16.mxu0 %v19383_v38  ;;  %5436 = vmatprep.subr.bf16.mxu1 %v19386_v39  ;;  %v19387_v39 = vld [vmem:[#allocation8 + $0x220] ss:$16 sps:$4 sm:$0xff]  }
 0x3a7   : > { %v3422_v49 = vpop.f32.mrb[0].mxu0  ;;  %v3594_v17 = vpop.f32.mrb[0].mxu1 }
 0x3a8   : > { %v18481_v35 = vadd.f32 %v3422_v49, %v1962_v19  ;;  %v18485_v50 = vadd.f32 %v3594_v17, %v1970_v46  ;;  %v3424_v32 = vpop.f32.mrb[1].mxu0  ;;  %v3596_v51 = vpop.f32.mrb[1].mxu1 }
 0x3a9   : > { %v18482_v52 = vadd.f32 %v3424_v32, %v1966_v47  ;;  %v18486_v53 = vadd.f32 %v3596_v51, %v1974_v48  ;;  %v3426_v54 = vpop.f32.mrb[2].mxu0  ;;  %v3598_v55 = vpop.f32.mrb[2].mxu1  ;;  %v19396_v32 = vld [vmem:[#allocation8 + $0x248] ss:$16 sps:$4 sm:$0xff]   ;;  %v19401_v51 = vld [vmem:[#allocation8 + $0x264] ss:$16 sps:$4 sm:$0xff]  }
 0x3aa   : > { %vm3603_vm3 = vcmp.gt.f32.partialorder %v18481_v35, 0.0  ;;  %v3611_v56 = vmul.f32 0.01, %v18481_v35  ;;  %vm3605_vm4 = vcmp.gt.f32.partialorder %v18485_v50, 0.0  ;;  %v3613_v57 = vmul.f32 0.01, %v18485_v50 }
 0x3ab   : > { %vm3604_vm5 = vcmp.gt.f32.partialorder %v18482_v52, 0.0  ;;  %v3612_v58 = vmul.f32 0.01, %v18482_v52  ;;  %vm3606_vm6 = vcmp.gt.f32.partialorder %v18486_v53, 0.0  ;;  %v3614_v60 = vmul.f32 0.01, %v18486_v53 }
 0x3ac   : > { %v3619_v59 = vsel %vm3603_vm3, %v18481_v35, %v3611_v56  ;;  %v18483_v61 = vadd.f32 %v3426_v54, %v1962_v19  ;;  %v18487_v62 = vadd.f32 %v3598_v55, %v1970_v46  ;;  %v3428_v63 = vpop.f32.mrb[3].mxu0  ;;  %v3600_v0 = vpop.f32.mrb[3].mxu1  ;;  %v3621_v2 = vsel %vm3605_vm4, %v18485_v50, %v3613_v57  ;;  %v19393_v50 = vld [vmem:[#allocation8 + $0x240] ss:$16 sps:$4 sm:$0xff]   ;;  %v19402_v54 = vld [vmem:[#allocation8 + $0x268] ss:$16 sps:$4 sm:$0xff]  }
 0x3ad   : > { %v3635_v1 = vrot.slane %v3619_v59, 1  ;;  %v18484_v3 = vadd.f32 %v3428_v63, %v1966_v47  ;;  %v18488_v4 = vadd.f32 %v3600_v0, %v1974_v48  ;;  %v3620_v11 = vsel %vm3604_vm5, %v18482_v52, %v3612_v58  ;;  %v19395_v47 = vld [vmem:[#allocation8 + $0x244] ss:$16 sps:$4 sm:$0xff]   ;;  %v19398_v48 = vld [vmem:[#allocation8 + $0x24c] ss:$16 sps:$4 sm:$0xff]  }
 0x3ae   : > { %vm3607_vm7 = vcmp.gt.f32.partialorder %v18483_v61, 0.0  ;;  %v3615_v5 = vmul.f32 0.01, %v18483_v61  ;;  %vm3609_vm8 = vcmp.gt.f32.partialorder %v18487_v62, 0.0  ;;  %v3617_v6 = vmul.f32 0.01, %v18487_v62 }
 0x3af   : > { %vm3608_vm9 = vcmp.gt.f32.partialorder %v18484_v3, 0.0  ;;  %v3616_v7 = vmul.f32 0.01, %v18484_v3  ;;  %vm3610_vm10 = vcmp.gt.f32.partialorder %v18488_v4, 0.0  ;;  %v3618_v8 = vmul.f32 0.01, %v18488_v4 }
 0x3b0   : > { %v3623_v9 = vsel %vm3607_vm7, %v18483_v61, %v3615_v5  ;;  %v3625_v10 = vsel %vm3609_vm8, %v18487_v62, %v3617_v6  ;;  %v3622_v12 = vsel %vm3606_vm6, %v18486_v53, %v3614_v60  ;;  %v3641_v21 = vrot.slane %v3621_v2, 1  ;;  %v19404_v52 = vld [vmem:[#allocation8 + $0x26c] ss:$16 sps:$4 sm:$0xff]   ;;  %v19399_v53 = vld [vmem:[#allocation8 + $0x260] ss:$16 sps:$4 sm:$0xff]  }
 0x3b1   : > { %v3636_v13 = vrot.slane %v3623_v9, 1  ;;  %v3655_v14 = vpack.c.bf16 %v3623_v9, %v3619_v59  ;;  %v3642_v15 = vrot.slane %v3625_v10, 1  ;;  %v22539_v16 = vpack.c.bf16 %v3625_v10, %v3621_v2  ;;  %v19407_v55 = vld [vmem:[#allocation8 + $0x284] ss:$16 sps:$4 sm:$0xff]   ;;  %v19410_v56 = vld [vmem:[#allocation8 + $0x28c] ss:$16 sps:$4 sm:$0xff]  }
 0x3b2   : > { %v3624_v22 = vsel %vm3608_vm9, %v18484_v3, %v3616_v7  ;;  %v3638_v23 = vrot.slane %v3620_v11, 1  ;;  %v3626_v24 = vsel %vm3610_vm10, %v18488_v4, %v3618_v8  ;;  %v3644_v34 = vrot.slane %v3622_v12, 1  ;;  %v19405_v57 = vld [vmem:[#allocation8 + $0x280] ss:$16 sps:$4 sm:$0xff]   ;;  %v19408_v58 = vld [vmem:[#allocation8 + $0x288] ss:$16 sps:$4 sm:$0xff]  }
 0x3b3   : > { %v3656_v25 = vpack.c.bf16 %v3624_v22, %v3620_v11  ;;  %v3658_v26 = vpack.c.bf16 %v3626_v24, %v3622_v12  ;;  %v3639_v28 = vrot.slane %v3624_v22, 1  ;;  %v3637_v33 = vsel %vm1672_vm0, %v3635_v1, %v3636_v13  ;;  %v19413_v59 = vld [vmem:[#allocation8 + $0x2a4] ss:$16 sps:$4 sm:$0xff]   ;;  %v19416_v60 = vld [vmem:[#allocation8 + $0x2ac] ss:$16 sps:$4 sm:$0xff]  }
 0x3b4   : > { %v22542_v36 = vpack.c.bf16 %v3636_v13, %v3637_v33  ;;  %v3645_v37 = vrot.slane %v3626_v24, 1  ;;  %v3643_v38 = vsel %vm1672_vm0, %v3641_v21, %v3642_v15  ;;  %v19411_v61 = vld [vmem:[#allocation8 + $0x2a0] ss:$16 sps:$4 sm:$0xff]   ;;  %v19414_v62 = vld [vmem:[#allocation8 + $0x2a8] ss:$16 sps:$4 sm:$0xff]  }
 0x3b5   : > { %5253 = vmatprep.mubr.bf16.mxu0 %v3656_v25  ;;  %5425 = vmatprep.mubr.bf16.mxu1 %v3656_v25  ;;  %v3640_v19 = vsel %vm1672_vm0, %v3638_v23, %v3639_v28  ;;  %v22546_v46 = vpack.c.bf16 %v3642_v15, %v3643_v38  ;;  %v19419_v63 = vld [vmem:[#allocation8 + $0x2c4] ss:$16 sps:$4 sm:$0xff]   ;;  %v19422_v0 = vld [vmem:[#allocation8 + $0x2cc] ss:$16 sps:$4 sm:$0xff]   ;;  %v19417_v1 = vld [vmem:[#allocation8 + $0x2c0] ss:$16 sps:$4 sm:$0xff]  }
 0x3b6   : > { %5254 = vmatmul.mubr.bf16.vlgmr.msra.gmra.mrb[4].mxu0 %v3655_v14  ;;  %5426 = vmatmul.mubr.bf16.vlgmr.msra.gmra.mrb[4].mxu1 %v3655_v14  ;;  %v22548_v49 = vpack.c.bf16 %v3639_v28, %v3640_v19  ;;  %v3646_v17 = vsel %vm1672_vm0, %v3644_v34, %v3645_v37  ;;  %v19420_v2 = vld [vmem:[#allocation8 + $0x2c8] ss:$16 sps:$4 sm:$0xff]   ;;  %v19425_v3 = vld [vmem:[#allocation8 + $0x2e4] ss:$16 sps:$4 sm:$0xff]   ;;  %v19428_v4 = vld [vmem:[#allocation8 + $0x2ec] ss:$16 sps:$4 sm:$0xff]  }
 0x3b7   : > { %5265 = vmatpush1.bf16.msra.mxu0 %v19381_v18  ;;  %5437 = vmatpush1.bf16.msra.mxu1 %v19384_v20  ;;  %v22551_v35 = vpack.c.bf16 %v3645_v37, %v3646_v17  ;;  %v19423_v5 = vld [vmem:[#allocation8 + $0x2e0] ss:$16 sps:$4 sm:$0xff]   ;;  %v19426_v6 = vld [vmem:[#allocation8 + $0x2e8] ss:$16 sps:$4 sm:$0xff]   ;;  %v19431_v7 = vld [vmem:[#allocation8 + $0x304] ss:$16 sps:$4 sm:$0xff]  }
 0x3b8   : > { %5296 = vmatprep.mubr.bf16.mxu0 %v3658_v26  ;;  %5468 = vmatprep.mubr.bf16.mxu1 %v3658_v26  ;;  %v19434_v8 = vld [vmem:[#allocation8 + $0x30c] ss:$16 sps:$4 sm:$0xff]   ;;  %v19429_v9 = vld [vmem:[#allocation8 + $0x300] ss:$16 sps:$4 sm:$0xff]   ;;  %v19432_v10 = vld [vmem:[#allocation8 + $0x308] ss:$16 sps:$4 sm:$0xff]  }
 0x3b9   : > { %5266 = vmatprep.subr.bf16.mxu0 %v19389_v27  ;;  %5438 = vmatprep.subr.bf16.mxu1 %v19392_v41  ;;  %v19437_v11 = vld [vmem:[#allocation8 + $0x324] ss:$16 sps:$4 sm:$0xff]   ;;  %v19440_v12 = vld [vmem:[#allocation8 + $0x32c] ss:$16 sps:$4 sm:$0xff]   ;;  %v19435_v13 = vld [vmem:[#allocation8 + $0x320] ss:$16 sps:$4 sm:$0xff]  }
 0x3ba   : > { %v19438_v14 = vld [vmem:[#allocation8 + $0x328] ss:$16 sps:$4 sm:$0xff]   ;;  %v19443_v15 = vld [vmem:[#allocation8 + $0x344] ss:$16 sps:$4 sm:$0xff]   ;;  %v19446_v18 = vld [vmem:[#allocation8 + $0x34c] ss:$16 sps:$4 sm:$0xff]  }
 0x3bb   : > { %5267 = vmatpush1.bf16.msra.mxu0 %v19387_v39  ;;  %5439 = vmatpush1.bf16.msra.mxu1 %v19390_v40  ;;  %v19441_v20 = vld [vmem:[#allocation8 + $0x340] ss:$16 sps:$4 sm:$0xff]   ;;  %v19444_v21 = vld [vmem:[#allocation8 + $0x348] ss:$16 sps:$4 sm:$0xff]   ;;  %v19449_v22 = vld [vmem:[#allocation8 + $0x364] ss:$16 sps:$4 sm:$0xff]  }
 0x3bc   : > { %5268 = vmatprep.subr.bf16.mxu0 %v19395_v47  ;;  %5440 = vmatprep.subr.bf16.mxu1 %v19398_v48  ;;  %v19452_v23 = vld [vmem:[#allocation8 + $0x36c] ss:$16 sps:$4 sm:$0xff]   ;;  %v19447_v24 = vld [vmem:[#allocation8 + $0x360] ss:$16 sps:$4 sm:$0xff]   ;;  %v19450_v25 = vld [vmem:[#allocation8 + $0x368] ss:$16 sps:$4 sm:$0xff]  }
 0x3bd   : > { %v19455_v26 = vld [vmem:[#allocation8 + $0x384] ss:$16 sps:$4 sm:$0xff]   ;;  %v19458_v27 = vld [vmem:[#allocation8 + $0x38c] ss:$16 sps:$4 sm:$0xff]   ;;  %v19453_v28 = vld [vmem:[#allocation8 + $0x380] ss:$16 sps:$4 sm:$0xff]  }
 0x3be   : > { %v19456_v33 = vld [vmem:[#allocation8 + $0x388] ss:$16 sps:$4 sm:$0xff]   ;;  %v19461_v34 = vld [vmem:[#allocation8 + $0x3a4] ss:$16 sps:$4 sm:$0xff]   ;;  %v19464_v37 = vld [vmem:[#allocation8 + $0x3ac] ss:$16 sps:$4 sm:$0xff]  }
 0x3bf   : > { %5269 = vmatpush1.bf16.msra.mxu0 %v19393_v50  ;;  %5441 = vmatpush1.bf16.msra.mxu1 %v19396_v32  ;;  %v19459_v38 = vld [vmem:[#allocation8 + $0x3a0] ss:$16 sps:$4 sm:$0xff]   ;;  %v19462_v39 = vld [vmem:[#allocation8 + $0x3a8] ss:$16 sps:$4 sm:$0xff]   ;;  %v19467_v40 = vld [vmem:[#allocation8 + $0x3c4] ss:$16 sps:$4 sm:$0xff]  }
 0x3c0   : > { %5270 = vmatprep.subr.bf16.mxu0 %v19401_v51  ;;  %5442 = vmatprep.subr.bf16.mxu1 %v19404_v52  ;;  %v19470_v41 = vld [vmem:[#allocation8 + $0x3cc] ss:$16 sps:$4 sm:$0xff]   ;;  %v19465_v19 = vld [vmem:[#allocation8 + $0x3c0] ss:$16 sps:$4 sm:$0xff]   ;;  %v19468_v47 = vld [vmem:[#allocation8 + $0x3c8] ss:$16 sps:$4 sm:$0xff]  }
 0x3c1   : > { %v19473_v48 = vld [vmem:[#allocation8 + $0x3e4] ss:$16 sps:$4 sm:$0xff]   ;;  %v19476_v17 = vld [vmem:[#allocation8 + $0x3ec] ss:$16 sps:$4 sm:$0xff]   ;;  %v19471_v50 = vld [vmem:[#allocation8 + $0x3e0] ss:$16 sps:$4 sm:$0xff]  }
 0x3c2   : > { %v19474_v32 = vld [vmem:[#allocation8 + $0x3e8] ss:$16 sps:$4 sm:$0xff]   ;;  %v19479_v51 = vld [vmem:[#allocation8 + $0x404] ss:$16 sps:$4 sm:$0xff]   ;;  %v19482_v52 = vld [vmem:[#allocation8 + $0x40c] ss:$16 sps:$4 sm:$0xff]  }
 0x3c3   : > { %5271 = vmatpush1.bf16.msra.mxu0 %v19399_v53  ;;  %5443 = vmatpush1.bf16.msra.mxu1 %v19402_v54  ;;  %v19477_v53 = vld [vmem:[#allocation8 + $0x400] ss:$16 sps:$4 sm:$0xff]   ;;  %v19480_v54 = vld [vmem:[#allocation8 + $0x408] ss:$16 sps:$4 sm:$0xff]  }
 0x3c4   : > { %5272 = vmatprep.subr.bf16.mxu0 %v19407_v55  ;;  %5444 = vmatprep.subr.bf16.mxu1 %v19410_v56  ;;  %v19485_v55 = vld [vmem:[#allocation8 + $0x424] ss:$16 sps:$4 sm:$0xff]   ;;  %v19488_v56 = vld [vmem:[#allocation8 + $0x42c] ss:$16 sps:$4 sm:$0xff]  }
 0x3c7   : > { %5273 = vmatpush1.bf16.msra.mxu0 %v19405_v57  ;;  %5445 = vmatpush1.bf16.msra.mxu1 %v19408_v58  ;;  %v19483_v57 = vld [vmem:[#allocation8 + $0x420] ss:$16 sps:$4 sm:$0xff]   ;;  %v19486_v58 = vld [vmem:[#allocation8 + $0x428] ss:$16 sps:$4 sm:$0xff]  }
 0x3c8   : > { %5274 = vmatprep.subr.bf16.mxu0 %v19413_v59  ;;  %5446 = vmatprep.subr.bf16.mxu1 %v19416_v60  ;;  %v19491_v59 = vld [vmem:[#allocation8 + $0x444] ss:$16 sps:$4 sm:$0xff]   ;;  %v19494_v60 = vld [vmem:[#allocation8 + $0x44c] ss:$16 sps:$4 sm:$0xff]  }
 0x3cb   : > { %5275 = vmatpush1.bf16.msra.mxu0 %v19411_v61  ;;  %5447 = vmatpush1.bf16.msra.mxu1 %v19414_v62  ;;  %v19489_v61 = vld [vmem:[#allocation8 + $0x440] ss:$16 sps:$4 sm:$0xff]   ;;  %v19492_v62 = vld [vmem:[#allocation8 + $0x448] ss:$16 sps:$4 sm:$0xff]  }
 0x3cc   : > { %5276 = vmatprep.subr.bf16.mxu0 %v19419_v63  ;;  %5448 = vmatprep.subr.bf16.mxu1 %v19422_v0  ;;  %v19497_v63 = vld [vmem:[#allocation8 + $0x464] ss:$16 sps:$4 sm:$0xff]   ;;  %v19500_v0 = vld [vmem:[#allocation8 + $0x46c] ss:$16 sps:$4 sm:$0xff]  }
 0x3cf   : > { %5277 = vmatpush1.bf16.msra.mxu0 %v19417_v1  ;;  %5449 = vmatpush1.bf16.msra.mxu1 %v19420_v2  ;;  %v19498_v1 = vld [vmem:[#allocation8 + $0x468] ss:$16 sps:$4 sm:$0xff]   ;;  %v19503_v2 = vld [vmem:[#allocation8 + $0x484] ss:$16 sps:$4 sm:$0xff]  }
 0x3d0   : > { %5278 = vmatprep.subr.bf16.mxu0 %v19425_v3  ;;  %5450 = vmatprep.subr.bf16.mxu1 %v19428_v4  ;;  %v19506_v3 = vld [vmem:[#allocation8 + $0x48c] ss:$16 sps:$4 sm:$0xff]   ;;  %v19504_v4 = vld [vmem:[#allocation8 + $0x488] ss:$16 sps:$4 sm:$0xff]  }
 0x3d3   : > { %5279 = vmatpush1.bf16.msra.mxu0 %v19423_v5  ;;  %5451 = vmatpush1.bf16.msra.mxu1 %v19426_v6  ;;  %v19509_v5 = vld [vmem:[#allocation8 + $0x4a4] ss:$16 sps:$4 sm:$0xff]   ;;  %v19512_v6 = vld [vmem:[#allocation8 + $0x4ac] ss:$16 sps:$4 sm:$0xff]  }
 0x3d4   : > { %5280 = vmatprep.subr.bf16.mxu0 %v19431_v7  ;;  %5452 = vmatprep.subr.bf16.mxu1 %v19434_v8  ;;  %v19507_v7 = vld [vmem:[#allocation8 + $0x4a0] ss:$16 sps:$4 sm:$0xff]   ;;  %v19510_v8 = vld [vmem:[#allocation8 + $0x4a8] ss:$16 sps:$4 sm:$0xff]  }
 0x3d7   : > { %5281 = vmatpush1.bf16.msra.mxu0 %v19429_v9  ;;  %5453 = vmatpush1.bf16.msra.mxu1 %v19432_v10  ;;  %v19515_v9 = vld [vmem:[#allocation8 + $0x4c4] ss:$16 sps:$4 sm:$0xff]   ;;  %v19518_v10 = vld [vmem:[#allocation8 + $0x4cc] ss:$16 sps:$4 sm:$0xff]  }
 0x3d8   : > { %5282 = vmatprep.subr.bf16.mxu0 %v19437_v11  ;;  %5454 = vmatprep.subr.bf16.mxu1 %v19440_v12  ;;  %v19513_v11 = vld [vmem:[#allocation8 + $0x4c0] ss:$16 sps:$4 sm:$0xff]   ;;  %v19516_v12 = vld [vmem:[#allocation8 + $0x4c8] ss:$16 sps:$4 sm:$0xff]  }
 0x3db   : > { %5283 = vmatpush1.bf16.msra.mxu0 %v19435_v13  ;;  %5455 = vmatpush1.bf16.msra.mxu1 %v19438_v14  ;;  %v19521_v13 = vld [vmem:[#allocation8 + $0x4e4] ss:$16 sps:$4 sm:$0xff]   ;;  %v19524_v14 = vld [vmem:[#allocation8 + $0x4ec] ss:$16 sps:$4 sm:$0xff]  }
 0x3dc   : > { %5284 = vmatprep.subr.bf16.mxu0 %v19443_v15  ;;  %5456 = vmatprep.subr.bf16.mxu1 %v19446_v18  ;;  %v19519_v15 = vld [vmem:[#allocation8 + $0x4e0] ss:$16 sps:$4 sm:$0xff]   ;;  %v19522_v18 = vld [vmem:[#allocation8 + $0x4e8] ss:$16 sps:$4 sm:$0xff]  }
 0x3df   : > { %5285 = vmatpush1.bf16.msra.mxu0 %v19441_v20  ;;  %5457 = vmatpush1.bf16.msra.mxu1 %v19444_v21  ;;  %v19527_v20 = vld [vmem:[#allocation8 + $0x504] ss:$16 sps:$4 sm:$0xff]   ;;  %v19530_v21 = vld [vmem:[#allocation8 + $0x50c] ss:$16 sps:$4 sm:$0xff]  }
 0x3e0   : > { %5286 = vmatprep.subr.bf16.mxu0 %v19449_v22  ;;  %5458 = vmatprep.subr.bf16.mxu1 %v19452_v23  ;;  %v19525_v22 = vld [vmem:[#allocation8 + $0x500] ss:$16 sps:$4 sm:$0xff]   ;;  %v19528_v23 = vld [vmem:[#allocation8 + $0x508] ss:$16 sps:$4 sm:$0xff]  }
 0x3e3   : > { %5287 = vmatpush1.bf16.msra.mxu0 %v19447_v24  ;;  %5459 = vmatpush1.bf16.msra.mxu1 %v19450_v25  ;;  %v19533_v24 = vld [vmem:[#allocation8 + $0x524] ss:$16 sps:$4 sm:$0xff]   ;;  %v19536_v25 = vld [vmem:[#allocation8 + $0x52c] ss:$16 sps:$4 sm:$0xff]  }
 0x3e4   : > { %5288 = vmatprep.subr.bf16.mxu0 %v19455_v26  ;;  %5460 = vmatprep.subr.bf16.mxu1 %v19458_v27  ;;  %v19531_v26 = vld [vmem:[#allocation8 + $0x520] ss:$16 sps:$4 sm:$0xff]   ;;  %v19534_v27 = vld [vmem:[#allocation8 + $0x528] ss:$16 sps:$4 sm:$0xff]  }
 0x3e7   : > { %5289 = vmatpush1.bf16.msra.mxu0 %v19453_v28  ;;  %5461 = vmatpush1.bf16.msra.mxu1 %v19456_v33  ;;  %v19539_v28 = vld [vmem:[#allocation8 + $0x544] ss:$16 sps:$4 sm:$0xff]   ;;  %v19542_v33 = vld [vmem:[#allocation8 + $0x54c] ss:$16 sps:$4 sm:$0xff]  }
 0x3e8   : > { %5290 = vmatprep.subr.bf16.mxu0 %v19461_v34  ;;  %5462 = vmatprep.subr.bf16.mxu1 %v19464_v37  ;;  %v19537_v34 = vld [vmem:[#allocation8 + $0x540] ss:$16 sps:$4 sm:$0xff]   ;;  %v19540_v37 = vld [vmem:[#allocation8 + $0x548] ss:$16 sps:$4 sm:$0xff]  }
 0x3eb   : > { %5291 = vmatpush1.bf16.msra.mxu0 %v19459_v38  ;;  %5463 = vmatpush1.bf16.msra.mxu1 %v19462_v39  ;;  %v19545_v38 = vld [vmem:[#allocation8 + $0x564] ss:$16 sps:$4 sm:$0xff]   ;;  %v19548_v39 = vld [vmem:[#allocation8 + $0x56c] ss:$16 sps:$4 sm:$0xff]  }
 0x3ec   : > { %5292 = vmatprep.subr.bf16.mxu0 %v19467_v40  ;;  %5464 = vmatprep.subr.bf16.mxu1 %v19470_v41  ;;  %v19543_v40 = vld [vmem:[#allocation8 + $0x560] ss:$16 sps:$4 sm:$0xff]   ;;  %v19546_v41 = vld [vmem:[#allocation8 + $0x568] ss:$16 sps:$4 sm:$0xff]  }
 0x3ef   : > { %5293 = vmatpush1.bf16.msra.mxu0 %v19465_v19  ;;  %5465 = vmatpush1.bf16.msra.mxu1 %v19468_v47  ;;  %v19551_v19 = vld [vmem:[#allocation8 + $0x584] ss:$16 sps:$4 sm:$0xff]   ;;  %v19554_v47 = vld [vmem:[#allocation8 + $0x58c] ss:$16 sps:$4 sm:$0xff]  }
 0x3f0   : > { %5294 = vmatprep.subr.bf16.mxu0 %v19473_v48  ;;  %5466 = vmatprep.subr.bf16.mxu1 %v19476_v17  ;;  %v19549_v48 = vld [vmem:[#allocation8 + $0x580] ss:$16 sps:$4 sm:$0xff]   ;;  %v19552_v17 = vld [vmem:[#allocation8 + $0x588] ss:$16 sps:$4 sm:$0xff]  }
 0x3f3   : > { %5295 = vmatpush1.bf16.msra.mxu0 %v19471_v50  ;;  %5467 = vmatpush1.bf16.msra.mxu1 %v19474_v32  ;;  %v19557_v50 = vld [vmem:[#allocation8 + $0x5a4] ss:$16 sps:$4 sm:$0xff]   ;;  %v19560_v32 = vld [vmem:[#allocation8 + $0x5ac] ss:$16 sps:$4 sm:$0xff]  }
 0x3f4   : > { %5307 = vmatprep.subr.bf16.mxu0 %v19479_v51  ;;  %5479 = vmatprep.subr.bf16.mxu1 %v19482_v52  ;;  %v19555_v51 = vld [vmem:[#allocation8 + $0x5a0] ss:$16 sps:$4 sm:$0xff]   ;;  %v19558_v52 = vld [vmem:[#allocation8 + $0x5a8] ss:$16 sps:$4 sm:$0xff]  }
 0x3f6   : > { %5297 = vmatmul.mubr.bf16.vlgmr.msra.gmra.mrb[4].mxu0 %v22539_v16  ;;  %5469 = vmatmul.mubr.bf16.vlgmr.msra.gmra.mrb[4].mxu1 %v22539_v16  ;;  %v19495_v16 = vld [vmem:[#allocation8 + $0x460] ss:$16 sps:$4 sm:$0xff]  }
 0x3f7   : > { %5308 = vmatpush1.bf16.msra.mxu0 %v19477_v53  ;;  %5339 = vmatprep.mubr.bf16.mxu0 %v22548_v49  ;;  %v19563_v53 = vld [vmem:[#allocation8 + $0x5c4] ss:$16 sps:$4 sm:$0xff]  }
 0x3f8   : > { %5480 = vmatpush1.bf16.msra.mxu1 %v19480_v54  ;;  %5511 = vmatprep.mubr.bf16.mxu1 %v22548_v49  ;;  %v19501_v49 = vld [vmem:[#allocation8 + $0x480] ss:$16 sps:$4 sm:$0xff]   ;;  %v19566_v54 = vld [vmem:[#allocation8 + $0x5cc] ss:$16 sps:$4 sm:$0xff]  }
 0x3f9   : > { %5309 = vmatprep.subr.bf16.mxu0 %v19485_v55  ;;  %5481 = vmatprep.subr.bf16.mxu1 %v19488_v56  ;;  %v19561_v55 = vld [vmem:[#allocation8 + $0x5c0] ss:$16 sps:$4 sm:$0xff]   ;;  %v19564_v56 = vld [vmem:[#allocation8 + $0x5c8] ss:$16 sps:$4 sm:$0xff]  }
 0x3fb   : > { %5310 = vmatpush1.bf16.msra.mxu0 %v19483_v57  ;;  %v19569_v57 = vld [vmem:[#allocation8 + $0x5e4] ss:$16 sps:$4 sm:$0xff]  }
 0x3fc   : > { %5482 = vmatpush1.bf16.msra.mxu1 %v19486_v58  ;;  %5311 = vmatprep.subr.bf16.mxu0 %v19491_v59  ;;  %v19572_v58 = vld [vmem:[#allocation8 + $0x5ec] ss:$16 sps:$4 sm:$0xff]   ;;  %v19567_v59 = vld [vmem:[#allocation8 + $0x5e0] ss:$16 sps:$4 sm:$0xff]  }
 0x3fd   : > { %5483 = vmatprep.subr.bf16.mxu1 %v19494_v60  ;;  %v19570_v60 = vld [vmem:[#allocation8 + $0x5e8] ss:$16 sps:$4 sm:$0xff]  }
 0x3ff   : > { %5312 = vmatpush1.bf16.msra.mxu0 %v19489_v61  ;;  %v19575_v61 = vld [vmem:[#allocation8 + $0x604] ss:$16 sps:$4 sm:$0xff]  }
 0x400   : > { %5484 = vmatpush1.bf16.msra.mxu1 %v19492_v62  ;;  %5313 = vmatprep.subr.bf16.mxu0 %v19497_v63  ;;  %v19578_v62 = vld [vmem:[#allocation8 + $0x60c] ss:$16 sps:$4 sm:$0xff]   ;;  %v19573_v63 = vld [vmem:[#allocation8 + $0x600] ss:$16 sps:$4 sm:$0xff]  }
 0x401   : > { %5485 = vmatprep.subr.bf16.mxu1 %v19500_v0  ;;  %v19576_v0 = vld [vmem:[#allocation8 + $0x608] ss:$16 sps:$4 sm:$0xff]  }
 0x403   : > { %5314 = vmatpush1.bf16.msra.mxu0 %v19495_v16  ;;  %v19581_v16 = vld [vmem:[#allocation8 + $0x624] ss:$16 sps:$4 sm:$0xff]  }
 0x404   : > { %5486 = vmatpush1.bf16.msra.mxu1 %v19498_v1  ;;  %5315 = vmatprep.subr.bf16.mxu0 %v19503_v2  ;;  %v19584_v1 = vld [vmem:[#allocation8 + $0x62c] ss:$16 sps:$4 sm:$0xff]   ;;  %v19579_v2 = vld [vmem:[#allocation8 + $0x620] ss:$16 sps:$4 sm:$0xff]  }
 0x405   : > { %5487 = vmatprep.subr.bf16.mxu1 %v19506_v3  ;;  %v19582_v3 = vld [vmem:[#allocation8 + $0x628] ss:$16 sps:$4 sm:$0xff]  }
 0x407   : > { %5316 = vmatpush1.bf16.msra.mxu0 %v19501_v49  ;;  %v19587_v49 = vld [vmem:[#allocation8 + $0x644] ss:$16 sps:$4 sm:$0xff]  }
 0x408   : > { %5488 = vmatpush1.bf16.msra.mxu1 %v19504_v4  ;;  %5317 = vmatprep.subr.bf16.mxu0 %v19509_v5  ;;  %v19590_v4 = vld [vmem:[#allocation8 + $0x64c] ss:$16 sps:$4 sm:$0xff]   ;;  %v19585_v5 = vld [vmem:[#allocation8 + $0x640] ss:$16 sps:$4 sm:$0xff]  }
 0x409   : > { %5489 = vmatprep.subr.bf16.mxu1 %v19512_v6  ;;  %v19588_v6 = vld [vmem:[#allocation8 + $0x648] ss:$16 sps:$4 sm:$0xff]  }
 0x40b   : > { %5318 = vmatpush1.bf16.msra.mxu0 %v19507_v7  ;;  %v19593_v7 = vld [vmem:[#allocation8 + $0x664] ss:$16 sps:$4 sm:$0xff]  }
 0x40c   : > { %5490 = vmatpush1.bf16.msra.mxu1 %v19510_v8  ;;  %5319 = vmatprep.subr.bf16.mxu0 %v19515_v9  ;;  %v19596_v8 = vld [vmem:[#allocation8 + $0x66c] ss:$16 sps:$4 sm:$0xff]   ;;  %v19591_v9 = vld [vmem:[#allocation8 + $0x660] ss:$16 sps:$4 sm:$0xff]  }
 0x40d   : > { %5491 = vmatprep.subr.bf16.mxu1 %v19518_v10  ;;  %v19594_v10 = vld [vmem:[#allocation8 + $0x668] ss:$16 sps:$4 sm:$0xff]  }
 0x40f   : > { %5320 = vmatpush1.bf16.msra.mxu0 %v19513_v11  ;;  %v19602_v11 = vld [vmem:[#allocation8 + $0x68c] ss:$16 sps:$4 sm:$0xff]  }
 0x410   : > { %5492 = vmatpush1.bf16.msra.mxu1 %v19516_v12  ;;  %5321 = vmatprep.subr.bf16.mxu0 %v19521_v13  ;;  %v19597_v12 = vld [vmem:[#allocation8 + $0x680] ss:$16 sps:$4 sm:$0xff]   ;;  %v19605_v13 = vld [vmem:[#allocation8 + $0x6a4] ss:$16 sps:$4 sm:$0xff]  }
 0x411   : > { %5493 = vmatprep.subr.bf16.mxu1 %v19524_v14  ;;  %v19608_v14 = vld [vmem:[#allocation8 + $0x6ac] ss:$16 sps:$4 sm:$0xff]  }
 0x413   : > { %5322 = vmatpush1.bf16.msra.mxu0 %v19519_v15  ;;  %v19603_v15 = vld [vmem:[#allocation8 + $0x6a0] ss:$16 sps:$4 sm:$0xff]  }
 0x414   : > { %5494 = vmatpush1.bf16.msra.mxu1 %v19522_v18  ;;  %5323 = vmatprep.subr.bf16.mxu0 %v19527_v20  ;;  %v19606_v18 = vld [vmem:[#allocation8 + $0x6a8] ss:$16 sps:$4 sm:$0xff]   ;;  %v19611_v20 = vld [vmem:[#allocation8 + $0x6c4] ss:$16 sps:$4 sm:$0xff]  }
 0x415   : > { %5495 = vmatprep.subr.bf16.mxu1 %v19530_v21  ;;  %v19614_v21 = vld [vmem:[#allocation8 + $0x6cc] ss:$16 sps:$4 sm:$0xff]  }
 0x417   : > { %5324 = vmatpush1.bf16.msra.mxu0 %v19525_v22  ;;  %v19609_v22 = vld [vmem:[#allocation8 + $0x6c0] ss:$16 sps:$4 sm:$0xff]  }
 0x418   : > { %5496 = vmatpush1.bf16.msra.mxu1 %v19528_v23  ;;  %5325 = vmatprep.subr.bf16.mxu0 %v19533_v24  ;;  %v19612_v23 = vld [vmem:[#allocation8 + $0x6c8] ss:$16 sps:$4 sm:$0xff]   ;;  %v19617_v24 = vld [vmem:[#allocation8 + $0x6e4] ss:$16 sps:$4 sm:$0xff]  }
 0x419   : > { %5497 = vmatprep.subr.bf16.mxu1 %v19536_v25  ;;  %v19620_v25 = vld [vmem:[#allocation8 + $0x6ec] ss:$16 sps:$4 sm:$0xff]  }
 0x41b   : > { %5326 = vmatpush1.bf16.msra.mxu0 %v19531_v26  ;;  %v19615_v26 = vld [vmem:[#allocation8 + $0x6e0] ss:$16 sps:$4 sm:$0xff]  }
 0x41c   : > { %5498 = vmatpush1.bf16.msra.mxu1 %v19534_v27  ;;  %5327 = vmatprep.subr.bf16.mxu0 %v19539_v28  ;;  %v19618_v27 = vld [vmem:[#allocation8 + $0x6e8] ss:$16 sps:$4 sm:$0xff]   ;;  %v19623_v28 = vld [vmem:[#allocation8 + $0x704] ss:$16 sps:$4 sm:$0xff]  }
 0x41d   : > { %5499 = vmatprep.subr.bf16.mxu1 %v19542_v33  ;;  %v19626_v33 = vld [vmem:[#allocation8 + $0x70c] ss:$16 sps:$4 sm:$0xff]  }
 0x41f   : > { %5328 = vmatpush1.bf16.msra.mxu0 %v19537_v34  ;;  %v19621_v34 = vld [vmem:[#allocation8 + $0x700] ss:$16 sps:$4 sm:$0xff]  }
 0x420   : > { %5500 = vmatpush1.bf16.msra.mxu1 %v19540_v37  ;;  %5329 = vmatprep.subr.bf16.mxu0 %v19545_v38  ;;  %v19624_v37 = vld [vmem:[#allocation8 + $0x708] ss:$16 sps:$4 sm:$0xff]   ;;  %v19629_v38 = vld [vmem:[#allocation8 + $0x724] ss:$16 sps:$4 sm:$0xff]  }
 0x421   : > { %5501 = vmatprep.subr.bf16.mxu1 %v19548_v39  ;;  %v19632_v39 = vld [vmem:[#allocation8 + $0x72c] ss:$16 sps:$4 sm:$0xff]  }
 0x423   : > { %5330 = vmatpush1.bf16.msra.mxu0 %v19543_v40  ;;  %v19627_v40 = vld [vmem:[#allocation8 + $0x720] ss:$16 sps:$4 sm:$0xff]  }
 0x424   : > { %5502 = vmatpush1.bf16.msra.mxu1 %v19546_v41  ;;  %5331 = vmatprep.subr.bf16.mxu0 %v19551_v19  ;;  %v19630_v41 = vld [vmem:[#allocation8 + $0x728] ss:$16 sps:$4 sm:$0xff]   ;;  %v19635_v19 = vld [vmem:[#allocation8 + $0x744] ss:$16 sps:$4 sm:$0xff]  }
 0x425   : > { %5503 = vmatprep.subr.bf16.mxu1 %v19554_v47  ;;  %v19638_v47 = vld [vmem:[#allocation8 + $0x74c] ss:$16 sps:$4 sm:$0xff]  }
 0x427   : > { %5332 = vmatpush1.bf16.msra.mxu0 %v19549_v48  ;;  %v19633_v48 = vld [vmem:[#allocation8 + $0x740] ss:$16 sps:$4 sm:$0xff]  }
 0x428   : > { %5504 = vmatpush1.bf16.msra.mxu1 %v19552_v17  ;;  %5333 = vmatprep.subr.bf16.mxu0 %v19557_v50  ;;  %v19636_v17 = vld [vmem:[#allocation8 + $0x748] ss:$16 sps:$4 sm:$0xff]   ;;  %v19641_v50 = vld [vmem:[#allocation8 + $0x764] ss:$16 sps:$4 sm:$0xff]  }
 0x429   : > { %5505 = vmatprep.subr.bf16.mxu1 %v19560_v32  ;;  %v19644_v32 = vld [vmem:[#allocation8 + $0x76c] ss:$16 sps:$4 sm:$0xff]  }
 0x42b   : > { %5334 = vmatpush1.bf16.msra.mxu0 %v19555_v51  ;;  %v19639_v51 = vld [vmem:[#allocation8 + $0x760] ss:$16 sps:$4 sm:$0xff]  }
 0x42c   : > { %5506 = vmatpush1.bf16.msra.mxu1 %v19558_v52  ;;  %5335 = vmatprep.subr.bf16.mxu0 %v19563_v53  ;;  %v19642_v52 = vld [vmem:[#allocation8 + $0x768] ss:$16 sps:$4 sm:$0xff]   ;;  %v19647_v53 = vld [vmem:[#allocation8 + $0x784] ss:$16 sps:$4 sm:$0xff]  }
 0x42d   : > { %5507 = vmatprep.subr.bf16.mxu1 %v19566_v54  ;;  %v19650_v54 = vld [vmem:[#allocation8 + $0x78c] ss:$16 sps:$4 sm:$0xff]  }
 0x42f   : > { %5336 = vmatpush1.bf16.msra.mxu0 %v19561_v55  ;;  %v19645_v55 = vld [vmem:[#allocation8 + $0x780] ss:$16 sps:$4 sm:$0xff]  }
 0x430   : > { %5508 = vmatpush1.bf16.msra.mxu1 %v19564_v56  ;;  %5337 = vmatprep.subr.bf16.mxu0 %v19569_v57  ;;  %v19648_v56 = vld [vmem:[#allocation8 + $0x788] ss:$16 sps:$4 sm:$0xff]   ;;  %v19653_v57 = vld [vmem:[#allocation8 + $0x7a4] ss:$16 sps:$4 sm:$0xff]  }
 0x431   : > { %5509 = vmatprep.subr.bf16.mxu1 %v19572_v58  ;;  %v19656_v58 = vld [vmem:[#allocation8 + $0x7ac] ss:$16 sps:$4 sm:$0xff]  }
 0x433   : > { %5338 = vmatpush1.bf16.msra.mxu0 %v19567_v59  ;;  %v19651_v59 = vld [vmem:[#allocation8 + $0x7a0] ss:$16 sps:$4 sm:$0xff]  }
 0x434   : > { %5510 = vmatpush1.bf16.msra.mxu1 %v19570_v60  ;;  %5350 = vmatprep.subr.bf16.mxu0 %v19575_v61  ;;  %v19654_v60 = vld [vmem:[#allocation8 + $0x7a8] ss:$16 sps:$4 sm:$0xff]   ;;  %v19659_v61 = vld [vmem:[#allocation8 + $0x7c4] ss:$16 sps:$4 sm:$0xff]  }
 0x435   : > { %5522 = vmatprep.subr.bf16.mxu1 %v19578_v62  ;;  %v19662_v62 = vld [vmem:[#allocation8 + $0x7cc] ss:$16 sps:$4 sm:$0xff]  }
 0x436   : > { %5340 = vmatmul.mubr.bf16.vlgmr.msra.gmra.mrb[4].mxu0 %v22542_v36 }
 0x437   : > { %5512 = vmatmul.mubr.bf16.vlgmr.msra.gmra.mrb[4].mxu1 %v22542_v36  ;;  %5351 = vmatpush1.bf16.msra.mxu0 %v19573_v63  ;;  %v19599_v36 = vld [vmem:[#allocation8 + $0x684] ss:$16 sps:$4 sm:$0xff]   ;;  %v19657_v63 = vld [vmem:[#allocation8 + $0x7c0] ss:$16 sps:$4 sm:$0xff]  }
 0x438   : > { %5382 = vmatprep.mubr.bf16.mxu0 %v22551_v35  ;;  %5523 = vmatpush1.bf16.msra.mxu1 %v19576_v0  ;;  %v19660_v0 = vld [vmem:[#allocation8 + $0x7c8] ss:$16 sps:$4 sm:$0xff]  }
 0x439   : > { %5554 = vmatprep.mubr.bf16.mxu1 %v22551_v35  ;;  %5352 = vmatprep.subr.bf16.mxu0 %v19581_v16  ;;  %v19600_v35 = vld [vmem:[#allocation8 + $0x688] ss:$16 sps:$4 sm:$0xff]   ;;  %v19665_v16 = vld [vmem:[#allocation8 + $0x7e4] ss:$16 sps:$4 sm:$0xff]  }
 0x43a   : > { %5524 = vmatprep.subr.bf16.mxu1 %v19584_v1  ;;  %v19668_v1 = vld [vmem:[#allocation8 + $0x7ec] ss:$16 sps:$4 sm:$0xff]  }
 0x43b   : > { %5353 = vmatpush1.bf16.msra.mxu0 %v19579_v2  ;;  %v19663_v2 = vld [vmem:[#allocation8 + $0x7e0] ss:$16 sps:$4 sm:$0xff]  }
 0x43c   : > { %5525 = vmatpush1.bf16.msra.mxu1 %v19582_v3  ;;  %5354 = vmatprep.subr.bf16.mxu0 %v19587_v49  ;;  %v19666_v3 = vld [vmem:[#allocation8 + $0x7e8] ss:$16 sps:$4 sm:$0xff]   ;;  %v19671_v49 = vld [vmem:[#allocation9 + $0x4] ss:$8 sps:$4 sm:$0xff]  }
 0x43d   : > { %5526 = vmatprep.subr.bf16.mxu1 %v19590_v4  ;;  %v19669_v4 = vld [vmem:[#allocation9] ss:$8 sps:$4 sm:$0xff]  }
 0x43f   : > { %5355 = vmatpush1.bf16.msra.mxu0 %v19585_v5  ;;  %v19674_v5 = vld [vmem:[#allocation9 + $0x14] ss:$8 sps:$4 sm:$0xff]  }
 0x440   : > { %5527 = vmatpush1.bf16.msra.mxu1 %v19588_v6  ;;  %5356 = vmatprep.subr.bf16.mxu0 %v19593_v7  ;;  %v19672_v6 = vld [vmem:[#allocation9 + $0x10] ss:$8 sps:$4 sm:$0xff]   ;;  %v19677_v7 = vld [vmem:[#allocation9 + $0x24] ss:$8 sps:$4 sm:$0xff]  }
 0x441   : > { %5528 = vmatprep.subr.bf16.mxu1 %v19596_v8  ;;  %v19675_v8 = vld [vmem:[#allocation9 + $0x20] ss:$8 sps:$4 sm:$0xff]  }
 0x443   : > { %5357 = vmatpush1.bf16.msra.mxu0 %v19591_v9  ;;  %v19680_v9 = vld [vmem:[#allocation9 + $0x34] ss:$8 sps:$4 sm:$0xff]  }
 0x444   : > { %5529 = vmatpush1.bf16.msra.mxu1 %v19594_v10  ;;  %5358 = vmatprep.subr.bf16.mxu0 %v19599_v36  ;;  %v19678_v10 = vld [vmem:[#allocation9 + $0x30] ss:$8 sps:$4 sm:$0xff]   ;;  %v19683_v36 = vld [vmem:[#allocation9 + $0x44] ss:$8 sps:$4 sm:$0xff]  }
 0x445   : > { %5530 = vmatprep.subr.bf16.mxu1 %v19602_v11  ;;  %v19681_v11 = vld [vmem:[#allocation9 + $0x40] ss:$8 sps:$4 sm:$0xff]  }
 0x447   : > { %5359 = vmatpush1.bf16.msra.mxu0 %v19597_v12  ;;  %v19686_v12 = vld [vmem:[#allocation9 + $0x54] ss:$8 sps:$4 sm:$0xff]  }
 0x448   : > { %5531 = vmatpush1.bf16.msra.mxu1 %v19600_v35  ;;  %5360 = vmatprep.subr.bf16.mxu0 %v19605_v13  ;;  %v19684_v35 = vld [vmem:[#allocation9 + $0x50] ss:$8 sps:$4 sm:$0xff]   ;;  %v19689_v13 = vld [vmem:[#allocation9 + $0x64] ss:$8 sps:$4 sm:$0xff]  }
 0x449   : > { %5532 = vmatprep.subr.bf16.mxu1 %v19608_v14  ;;  %v19687_v14 = vld [vmem:[#allocation9 + $0x60] ss:$8 sps:$4 sm:$0xff]  }
 0x44b   : > { %5361 = vmatpush1.bf16.msra.mxu0 %v19603_v15  ;;  %v19690_v15 = vld [vmem:[#allocation9 + $0x70] ss:$8 sps:$4 sm:$0xff]  }
 0x44c   : > { %5533 = vmatpush1.bf16.msra.mxu1 %v19606_v18  ;;  %5362 = vmatprep.subr.bf16.mxu0 %v19611_v20  ;;  %v19695_v18 = vld [vmem:[#allocation9 + $0x84] ss:$8 sps:$4 sm:$0xff]   ;;  %v19693_v20 = vld [vmem:[#allocation9 + $0x80] ss:$8 sps:$4 sm:$0xff]  }
 0x44d   : > { %5534 = vmatprep.subr.bf16.mxu1 %v19614_v21  ;;  %v19698_v21 = vld [vmem:[#allocation9 + $0x94] ss:$8 sps:$4 sm:$0xff]  }
 0x44f   : > { %5363 = vmatpush1.bf16.msra.mxu0 %v19609_v22  ;;  %v19696_v22 = vld [vmem:[#allocation9 + $0x90] ss:$8 sps:$4 sm:$0xff]  }
 0x450   : > { %5535 = vmatpush1.bf16.msra.mxu1 %v19612_v23  ;;  %5364 = vmatprep.subr.bf16.mxu0 %v19617_v24  ;;  %v19701_v23 = vld [vmem:[#allocation9 + $0xa4] ss:$8 sps:$4 sm:$0xff]   ;;  %v19699_v24 = vld [vmem:[#allocation9 + $0xa0] ss:$8 sps:$4 sm:$0xff]  }
 0x451   : > { %5536 = vmatprep.subr.bf16.mxu1 %v19620_v25  ;;  %v19704_v25 = vld [vmem:[#allocation9 + $0xb4] ss:$8 sps:$4 sm:$0xff]  }
 0x453   : > { %5365 = vmatpush1.bf16.msra.mxu0 %v19615_v26  ;;  %v19702_v26 = vld [vmem:[#allocation9 + $0xb0] ss:$8 sps:$4 sm:$0xff]  }
 0x454   : > { %5537 = vmatpush1.bf16.msra.mxu1 %v19618_v27  ;;  %5366 = vmatprep.subr.bf16.mxu0 %v19623_v28  ;;  %v19707_v27 = vld [vmem:[#allocation9 + $0xc4] ss:$8 sps:$4 sm:$0xff]   ;;  %v19705_v28 = vld [vmem:[#allocation9 + $0xc0] ss:$8 sps:$4 sm:$0xff]  }
 0x455   : > { %5538 = vmatprep.subr.bf16.mxu1 %v19626_v33  ;;  %v19710_v33 = vld [vmem:[#allocation9 + $0xd4] ss:$8 sps:$4 sm:$0xff]  }
 0x457   : > { %5367 = vmatpush1.bf16.msra.mxu0 %v19621_v34  ;;  %v19708_v34 = vld [vmem:[#allocation9 + $0xd0] ss:$8 sps:$4 sm:$0xff]  }
 0x458   : > { %5539 = vmatpush1.bf16.msra.mxu1 %v19624_v37  ;;  %5368 = vmatprep.subr.bf16.mxu0 %v19629_v38  ;;  %v19713_v37 = vld [vmem:[#allocation9 + $0xe4] ss:$8 sps:$4 sm:$0xff]   ;;  %v19711_v38 = vld [vmem:[#allocation9 + $0xe0] ss:$8 sps:$4 sm:$0xff]  }
 0x459   : > { %5540 = vmatprep.subr.bf16.mxu1 %v19632_v39  ;;  %v19716_v39 = vld [vmem:[#allocation9 + $0xf4] ss:$8 sps:$4 sm:$0xff]  }
 0x45b   : > { %5369 = vmatpush1.bf16.msra.mxu0 %v19627_v40  ;;  %v19714_v40 = vld [vmem:[#allocation9 + $0xf0] ss:$8 sps:$4 sm:$0xff]  }
 0x45c   : > { %5541 = vmatpush1.bf16.msra.mxu1 %v19630_v41  ;;  %5370 = vmatprep.subr.bf16.mxu0 %v19635_v19  ;;  %v19719_v41 = vld [vmem:[#allocation9 + $0x104] ss:$8 sps:$4 sm:$0xff]   ;;  %v3919_v19 = vld [vmem:[%s23227_s22] sm:$0xf]  ;;  %s23237_s22 = sld [smem:[#allocation59_spill]] }
 0x45d   : > { %5542 = vmatprep.subr.bf16.mxu1 %v19638_v47  ;;  %v3924_v47 = vrot.slane %v3919_v19, %v22525_v42 }
 0x45f   : > { %5371 = vmatpush1.bf16.msra.mxu0 %v19633_v48  ;;  %v3932_v48 = vrot.slane %v3919_v19, %v22527_v43 }
 0x460   : > { %5543 = vmatpush1.bf16.msra.mxu1 %v19636_v17  ;;  %5372 = vmatprep.subr.bf16.mxu0 %v19641_v50  ;;  %v3928_v17 = vrot.slane %v3919_v19, %v22529_v44  ;;  %v3936_v50 = vrot.slane %v3919_v19, %v22531_v45 }
 0x461   : > { %5544 = vmatprep.subr.bf16.mxu1 %v19644_v32 }
 0x463   : > { %5373 = vmatpush1.bf16.msra.mxu0 %v19639_v51 }
 0x464   : > { %5545 = vmatpush1.bf16.msra.mxu1 %v19642_v52  ;;  %5374 = vmatprep.subr.bf16.mxu0 %v19647_v53 }
 0x465   : > { %5546 = vmatprep.subr.bf16.mxu1 %v19650_v54 }
 0x467   : > { %5375 = vmatpush1.bf16.msra.mxu0 %v19645_v55 }
 0x468   : > { %5547 = vmatpush1.bf16.msra.mxu1 %v19648_v56  ;;  %5376 = vmatprep.subr.bf16.mxu0 %v19653_v57 }
 0x469   : > { %5548 = vmatprep.subr.bf16.mxu1 %v19656_v58 }
 0x46b   : > { %5377 = vmatpush1.bf16.msra.mxu0 %v19651_v59 }
 0x46c   : > { %5549 = vmatpush1.bf16.msra.mxu1 %v19654_v60  ;;  %5378 = vmatprep.subr.bf16.mxu0 %v19659_v61 }
 0x46d   : > { %5550 = vmatprep.subr.bf16.mxu1 %v19662_v62 }
 0x46f   : > { %5379 = vmatpush1.bf16.msra.mxu0 %v19657_v63 }
 0x470   : > { %5551 = vmatpush1.bf16.msra.mxu1 %v19660_v0  ;;  %5380 = vmatprep.subr.bf16.mxu0 %v19665_v16 }
 0x471   : > { %5552 = vmatprep.subr.bf16.mxu1 %v19668_v1 }
 0x473   : > { %5381 = vmatpush1.bf16.msra.mxu0 %v19663_v2 }
 0x474   : > { %5553 = vmatpush1.bf16.msra.mxu1 %v19666_v3  ;;  %6405 = vmatprep.subr.bf16.mxu0 %v19671_v49 }
 0x476   : > { %5383 = vmatmul.mubr.bf16.vlgmr.msra.gmra.mrb[4].mxu0 %v22546_v46 }
 0x477   : > { %5555 = vmatmul.mubr.bf16.vlgmr.msra.gmra.mrb[4].mxu1 %v22546_v46  ;;  %6406 = vmatpush1.bf16.msra.mxu0 %v19669_v4  ;;  %v19692_v46 = vld [vmem:[#allocation9 + $0x74] ss:$8 sps:$4 sm:$0xff]  }
 0x478   : > { %6407 = vmatprep.subr.bf16.mxu0 %v19674_v5 }
 0x47b   : > { %6408 = vmatpush1.bf16.msra.mxu0 %v19672_v6 }
 0x47c   : > { %6409 = vmatprep.subr.bf16.mxu0 %v19677_v7 }
 0x47f   : > { %6410 = vmatpush1.bf16.msra.mxu0 %v19675_v8 }
 0x480   : > { %6411 = vmatprep.subr.bf16.mxu0 %v19680_v9 }
 0x483   : > { %6412 = vmatpush1.bf16.msra.mxu0 %v19678_v10 }
 0x484   : > { %6413 = vmatprep.subr.bf16.mxu0 %v19683_v36 }
 0x487   : > { %6414 = vmatpush1.bf16.msra.mxu0 %v19681_v11 }
 0x488   : > { %6415 = vmatprep.subr.bf16.mxu0 %v19686_v12 }
 0x48b   : > { %6416 = vmatpush1.bf16.msra.mxu0 %v19684_v35 }
 0x48c   : > { %6417 = vmatprep.subr.bf16.mxu0 %v19689_v13 }
 0x48f   : > { %6418 = vmatpush1.bf16.msra.mxu0 %v19687_v14 }
 0x490   : > { %6419 = vmatprep.subr.bf16.mxu0 %v19692_v46 }
 0x493   : > { %6420 = vmatpush1.bf16.msra.mxu0 %v19690_v15 }
 0x494   : > { %6421 = vmatprep.subr.bf16.mxu0 %v19695_v18 }
 0x497   : > { %6422 = vmatpush1.bf16.msra.mxu0 %v19693_v20 }
 0x498   : > { %6423 = vmatprep.subr.bf16.mxu0 %v19698_v21 }
 0x49b   : > { %6424 = vmatpush1.bf16.msra.mxu0 %v19696_v22 }
 0x49c   : > { %6425 = vmatprep.subr.bf16.mxu0 %v19701_v23 }
 0x49f   : > { %6426 = vmatpush1.bf16.msra.mxu0 %v19699_v24  ;;  %v19717_v24 = vld [vmem:[#allocation9 + $0x100] ss:$8 sps:$4 sm:$0xff]  }
 0x4a0   : > { %6427 = vmatprep.subr.bf16.mxu0 %v19704_v25 }
 0x4a3   : > { %6428 = vmatpush1.bf16.msra.mxu0 %v19702_v26 }
 0x4a4   : > { %6429 = vmatprep.subr.bf16.mxu0 %v19707_v27 }
 0x4a7   : > { %6430 = vmatpush1.bf16.msra.mxu0 %v19705_v28 }
 0x4a8   : > { %6431 = vmatprep.subr.bf16.mxu0 %v19710_v33  ;;  %v19722_v33 = vld [vmem:[#allocation9 + $0x114] ss:$8 sps:$4 sm:$0xff]  }
 0x4ab   : > { %6432 = vmatpush1.bf16.msra.mxu0 %v19708_v34 }
 0x4ac   : > { %6433 = vmatprep.subr.bf16.mxu0 %v19713_v37 }
 0x4af   : > { %6434 = vmatpush1.bf16.msra.mxu0 %v19711_v38 }
 0x4b0   : > { %6435 = vmatprep.subr.bf16.mxu0 %v19716_v39 }
 0x4b3   : > { %6436 = vmatpush1.bf16.msra.mxu0 %v19714_v40 }
 0x4b4   : > { %6448 = vmatprep.subr.bf16.mxu0 %v19719_v41 }
 0x549   : > { %v5384_v32 = vpop.f32.mrb[4].mxu0 }
 0x54a   : > { %v18489_v51 = vadd.f32 %v5384_v32, %v3924_v47  ;;  %v5556_v52 = vpop.f32.mrb[4].mxu1  ;;  %v5386_v53 = vpop.f32.mrb[5].mxu0  ;;  %v19728_v32 = vld [vmem:[#allocation9 + $0x134] ss:$8 sps:$4 sm:$0xff]  }
 0x54b   : > { %v18493_v54 = vadd.f32 %v5556_v52, %v3932_v48  ;;  %v18490_v55 = vadd.f32 %v5386_v53, %v3928_v17  ;;  %v5558_v56 = vpop.f32.mrb[5].mxu1  ;;  %v5388_v57 = vpop.f32.mrb[6].mxu0  ;;  %v19731_v52 = vld [vmem:[#allocation9 + $0x144] ss:$8 sps:$4 sm:$0xff]   ;;  %v19729_v53 = vld [vmem:[#allocation9 + $0x140] ss:$8 sps:$4 sm:$0xff]  }
 0x54c   : > { %vm5565_vm11 = vcmp.gt.f32.partialorder %v18489_v51, 0.0  ;;  %v5573_v58 = vmul.f32 0.01, %v18489_v51  ;;  %v18494_v59 = vadd.f32 %v5558_v56, %v3936_v50  ;;  %v18491_v60 = vadd.f32 %v5388_v57, %v3924_v47  ;;  %v5560_v61 = vpop.f32.mrb[6].mxu1  ;;  %v5390_v62 = vpop.f32.mrb[7].mxu0 }
 0x54d   : > { %vm5567_vm12 = vcmp.gt.f32.partialorder %v18493_v54, 0.0  ;;  %v5575_v63 = vmul.f32 0.01, %v18493_v54  ;;  %vm5566_vm13 = vcmp.gt.f32.partialorder %v18490_v55, 0.0  ;;  %v5574_v0 = vmul.f32 0.01, %v18490_v55 }
 0x54e   : > { %v5581_v16 = vsel %vm5565_vm11, %v18489_v51, %v5573_v58  ;;  %vm5568_vm14 = vcmp.gt.f32.partialorder %v18494_v59, 0.0  ;;  %v5576_v1 = vmul.f32 0.01, %v18494_v59  ;;  %vm5569_vm15 = vcmp.gt.f32.partialorder %v18491_v60, 0.0  ;;  %v5562_v2 = vpop.f32.mrb[7].mxu1 }
 0x54f   : > { %v5597_v3 = vrot.slane %v5581_v16, 1  ;;  %v22568_v49 = vsel %vm5567_vm12, %v18493_v54, %v5575_v63  ;;  %v5577_v4 = vmul.f32 0.01, %v18491_v60  ;;  %v18495_v5 = vadd.f32 %v5560_v61, %v3932_v48  ;;  %v19720_v47 = vld [vmem:[#allocation9 + $0x110] ss:$8 sps:$4 sm:$0xff]  }
 0x550   : > { %v5603_v6 = vrot.slane %v22568_v49, 1  ;;  %v18492_v7 = vadd.f32 %v5390_v62, %v3928_v17  ;;  %v18496_v8 = vadd.f32 %v5562_v2, %v3936_v50  ;;  %v5582_v9 = vsel %vm5566_vm13, %v18490_v55, %v5574_v0  ;;  %v19725_v17 = vld [vmem:[#allocation9 + $0x124] ss:$8 sps:$4 sm:$0xff]   ;;  %v19723_v50 = vld [vmem:[#allocation9 + $0x120] ss:$8 sps:$4 sm:$0xff]  }
 0x551   : > { %v5585_v10 = vsel %vm5569_vm15, %v18491_v60, %v5577_v4  ;;  %vm5571_vm3 = vcmp.gt.f32.partialorder %v18495_v5, 0.0  ;;  %v5579_v36 = vmul.f32 0.01, %v18495_v5  ;;  %v5600_v11 = vrot.slane %v5582_v9, 1  ;;  %v19726_v51 = vld [vmem:[#allocation9 + $0x130] ss:$8 sps:$4 sm:$0xff]  }
 0x552   : > { %v5598_v12 = vrot.slane %v5585_v10, 1  ;;  %v5617_v35 = vpack.c.bf16 %v5585_v10, %v5581_v16  ;;  %vm5570_vm4 = vcmp.gt.f32.partialorder %v18492_v7, 0.0  ;;  %v5578_v13 = vmul.f32 0.01, %v18492_v7  ;;  %v19734_v54 = vld [vmem:[#allocation9 + $0x154] ss:$8 sps:$4 sm:$0xff]  }
 0x553   : > { %v22571_v14 = vsel %vm5571_vm3, %v18495_v5, %v5579_v36  ;;  %vm5572_vm5 = vcmp.gt.f32.partialorder %v18496_v8, 0.0  ;;  %v5580_v46 = vmul.f32 0.01, %v18496_v8  ;;  %v5584_v15 = vsel %vm5568_vm14, %v18494_v59, %v5576_v1  ;;  %v19732_v55 = vld [vmem:[#allocation9 + $0x150] ss:$8 sps:$4 sm:$0xff]  }
 0x554   : > { %v5604_v18 = vrot.slane %v22571_v14, 1  ;;  %v5619_v20 = vpack.c.bf16 %v22571_v14, %v22568_v49  ;;  %v5586_v21 = vsel %vm5570_vm4, %v18492_v7, %v5578_v13  ;;  %v5606_v22 = vrot.slane %v5584_v15, 1  ;;  %v19737_v56 = vld [vmem:[#allocation9 + $0x164] ss:$8 sps:$4 sm:$0xff]   ;;  %v19735_v57 = vld [vmem:[#allocation9 + $0x160] ss:$8 sps:$4 sm:$0xff]  }
 0x555   : > { %v5618_v23 = vpack.c.bf16 %v5586_v21, %v5582_v9  ;;  %v5588_v25 = vsel %vm5572_vm5, %v18496_v8, %v5580_v46  ;;  %v5601_v26 = vrot.slane %v5586_v21, 1  ;;  %v5599_v27 = vsel %vm1672_vm0, %v5597_v3, %v5598_v12  ;;  %v19740_v58 = vld [vmem:[#allocation9 + $0x174] ss:$8 sps:$4 sm:$0xff]   ;;  %v19738_v59 = vld [vmem:[#allocation9 + $0x170] ss:$8 sps:$4 sm:$0xff]  }
 0x556   : > { %v5620_v28 = vpack.c.bf16 %v5588_v25, %v5584_v15  ;;  %v22578_v34 = vpack.c.bf16 %v5598_v12, %v5599_v27  ;;  %v5607_v37 = vrot.slane %v5588_v25, 1  ;;  %v5605_v38 = vsel %vm1672_vm0, %v5603_v6, %v5604_v18  ;;  %v19743_v60 = vld [vmem:[#allocation9 + $0x184] ss:$8 sps:$4 sm:$0xff]   ;;  %v19741_v61 = vld [vmem:[#allocation9 + $0x180] ss:$8 sps:$4 sm:$0xff]  }
 0x557   : > { %6437 = vmatprep.mubr.bf16.mxu0 %v5618_v23  ;;  %v5602_v39 = vsel %vm1672_vm0, %v5600_v11, %v5601_v26  ;;  %v22582_v40 = vpack.c.bf16 %v5604_v18, %v5605_v38  ;;  %v19746_v62 = vld [vmem:[#allocation9 + $0x194] ss:$8 sps:$4 sm:$0xff]   ;;  %v19744_v63 = vld [vmem:[#allocation9 + $0x190] ss:$8 sps:$4 sm:$0xff]   ;;  %v19749_v0 = vld [vmem:[#allocation9 + $0x1a4] ss:$8 sps:$4 sm:$0xff]  }
 0x558   : > { %6438 = vmatmul.mubr.bf16.vlgmr.msra.gmra.mrb[8].mxu0 %v5617_v35  ;;  %v22584_v41 = vpack.c.bf16 %v5601_v26, %v5602_v39  ;;  %v5608_v19 = vsel %vm1672_vm0, %v5606_v22, %v5607_v37  ;;  %v19747_v16 = vld [vmem:[#allocation9 + $0x1a0] ss:$8 sps:$4 sm:$0xff]   ;;  %v19752_v1 = vld [vmem:[#allocation9 + $0x1b4] ss:$8 sps:$4 sm:$0xff]   ;;  %v19750_v2 = vld [vmem:[#allocation9 + $0x1b0] ss:$8 sps:$4 sm:$0xff]  }
 0x559   : > { %6449 = vmatpush1.bf16.msra.mxu0 %v19717_v24  ;;  %6480 = vmatprep.mubr.bf16.mxu0 %v5620_v28  ;;  %v22587_v48 = vpack.c.bf16 %v5607_v37, %v5608_v19  ;;  %v19755_v3 = vld [vmem:[#allocation9 + $0x1c4] ss:$8 sps:$4 sm:$0xff]   ;;  %v19753_v4 = vld [vmem:[#allocation9 + $0x1c0] ss:$8 sps:$4 sm:$0xff]   ;;  %v19758_v5 = vld [vmem:[#allocation9 + $0x1d4] ss:$8 sps:$4 sm:$0xff]  }
 0x55a   : > { %6450 = vmatprep.subr.bf16.mxu0 %v19722_v33  ;;  %v19756_v6 = vld [vmem:[#allocation9 + $0x1d0] ss:$8 sps:$4 sm:$0xff]   ;;  %v19761_v7 = vld [vmem:[#allocation9 + $0x1e4] ss:$8 sps:$4 sm:$0xff]   ;;  %v19759_v8 = vld [vmem:[#allocation9 + $0x1e0] ss:$8 sps:$4 sm:$0xff]  }
 0x55b   : > { %v19764_v9 = vld [vmem:[#allocation9 + $0x1f4] ss:$8 sps:$4 sm:$0xff]   ;;  %v19762_v10 = vld [vmem:[#allocation9 + $0x1f0] ss:$8 sps:$4 sm:$0xff]   ;;  %v19767_v36 = vld [vmem:[#allocation9 + $0x204] ss:$8 sps:$4 sm:$0xff]  }
 0x55c   : > { %v19765_v11 = vld [vmem:[#allocation9 + $0x200] ss:$8 sps:$4 sm:$0xff]   ;;  %v19770_v12 = vld [vmem:[#allocation9 + $0x214] ss:$8 sps:$4 sm:$0xff]   ;;  %v19863_v13 = vld [vmem:[%s23228_s3 + $0x4] ss:$8 sps:$4 sm:$0xff]  }
 0x55d   : > { %6451 = vmatpush1.bf16.msra.mxu0 %v19720_v47  ;;  %v19861_v35 = vld [vmem:[%s23228_s3] ss:$8 sps:$4 sm:$0xff]   ;;  %v19768_v46 = vld [vmem:[#allocation9 + $0x210] ss:$8 sps:$4 sm:$0xff]   ;;  %v19866_v15 = vld [vmem:[%s23228_s3 + $0x14] ss:$8 sps:$4 sm:$0xff]   ;;  %7003 = vmatprep.subr.bf16.mxu1 %v19863_v13 }
 0x55e   : > { %6452 = vmatprep.subr.bf16.mxu0 %v19725_v17  ;;  %v19773_v18 = vld [vmem:[#allocation9 + $0x224] ss:$8 sps:$4 sm:$0xff]   ;;  %7004 = vmatpush1.bf16.msra.mxu1 %v19861_v35  ;;  %v19864_v21 = vld [vmem:[%s23228_s3 + $0x10] ss:$8 sps:$4 sm:$0xff]   ;;  %v19771_v49 = vld [vmem:[#allocation9 + $0x220] ss:$8 sps:$4 sm:$0xff]  }
 0x55f   : > { %7005 = vmatprep.subr.bf16.mxu1 %v19866_v15  ;;  %v19869_v22 = vld [vmem:[%s23228_s3 + $0x24] ss:$8 sps:$4 sm:$0xff]   ;;  %v19776_v14 = vld [vmem:[#allocation9 + $0x234] ss:$8 sps:$4 sm:$0xff]   ;;  %v19774_v24 = vld [vmem:[#allocation9 + $0x230] ss:$8 sps:$4 sm:$0xff]  }
 0x560   : > { %v19872_v23 = vld [vmem:[%s23228_s3 + $0x34] ss:$8 sps:$4 sm:$0xff]   ;;  %v19779_v25 = vld [vmem:[#allocation9 + $0x244] ss:$8 sps:$4 sm:$0xff]   ;;  %v19870_v26 = vld [vmem:[%s23228_s3 + $0x30] ss:$8 sps:$4 sm:$0xff]  }
 0x561   : > { %6453 = vmatpush1.bf16.msra.mxu0 %v19723_v50  ;;  %v19875_v27 = vld [vmem:[%s23228_s3 + $0x44] ss:$8 sps:$4 sm:$0xff]   ;;  %v19777_v28 = vld [vmem:[#allocation9 + $0x240] ss:$8 sps:$4 sm:$0xff]   ;;  %v19782_v33 = vld [vmem:[#allocation9 + $0x254] ss:$8 sps:$4 sm:$0xff]  }
 0x562   : > { %6454 = vmatprep.subr.bf16.mxu0 %v19728_v32  ;;  %7006 = vmatpush1.bf16.msra.mxu1 %v19864_v21  ;;  %v19873_v37 = vld [vmem:[%s23228_s3 + $0x40] ss:$8 sps:$4 sm:$0xff]   ;;  %v19878_v38 = vld [vmem:[%s23228_s3 + $0x54] ss:$8 sps:$4 sm:$0xff]   ;;  %v19780_v39 = vld [vmem:[#allocation9 + $0x250] ss:$8 sps:$4 sm:$0xff]  }
 0x563   : > { %7007 = vmatprep.subr.bf16.mxu1 %v19869_v22  ;;  %v19876_v19 = vld [vmem:[%s23228_s3 + $0x50] ss:$8 sps:$4 sm:$0xff]   ;;  %v19881_v47 = vld [vmem:[%s23228_s3 + $0x64] ss:$8 sps:$4 sm:$0xff]   ;;  %v19783_v17 = vld [vmem:[#allocation9 + $0x260] ss:$8 sps:$4 sm:$0xff]  }
 0x564   : > { %v19788_v50 = vld [vmem:[#allocation9 + $0x274] ss:$8 sps:$4 sm:$0xff]   ;;  %v19879_v32 = vld [vmem:[%s23228_s3 + $0x60] ss:$8 sps:$4 sm:$0xff]   ;;  %v19815_v15 = vld [vmem:[#allocation9 + $0x304] ss:$8 sps:$4 sm:$0xff]  }
 0x565   : > { %6455 = vmatpush1.bf16.msra.mxu0 %v19726_v51  ;;  %v19884_v51 = vld [vmem:[%s23228_s3 + $0x74] ss:$8 sps:$4 sm:$0xff]   ;;  %v19807_v35 = vld [vmem:[#allocation9 + $0x2e0] ss:$8 sps:$4 sm:$0xff]   ;;  %v19816_v22 = vld [vmem:[#allocation9 + $0x310] ss:$8 sps:$4 sm:$0xff]  }
 0x566   : > { %6456 = vmatprep.subr.bf16.mxu0 %v19731_v52  ;;  %v19786_v52 = vld [vmem:[#allocation9 + $0x270] ss:$8 sps:$4 sm:$0xff]   ;;  %v19812_v13 = vld [vmem:[#allocation9 + $0x2f4] ss:$8 sps:$4 sm:$0xff]  }
 0x567   : > { %v19818_v21 = vld [vmem:[#allocation9 + $0x314] ss:$8 sps:$4 sm:$0xff]  }
 0x569   : > { %6457 = vmatpush1.bf16.msra.mxu0 %v19729_v53  ;;  %v19791_v53 = vld [vmem:[#allocation9 + $0x284] ss:$8 sps:$4 sm:$0xff]  }
 0x56a   : > { %6458 = vmatprep.subr.bf16.mxu0 %v19734_v54  ;;  %v19882_v54 = vld [vmem:[%s23228_s3 + $0x70] ss:$8 sps:$4 sm:$0xff]  }
 0x56d   : > { %6459 = vmatpush1.bf16.msra.mxu0 %v19732_v55  ;;  %v19887_v55 = vld [vmem:[%s23228_s3 + $0x84] ss:$8 sps:$4 sm:$0xff]  }
 0x56e   : > { %6460 = vmatprep.subr.bf16.mxu0 %v19737_v56  ;;  %v19789_v56 = vld [vmem:[#allocation9 + $0x280] ss:$8 sps:$4 sm:$0xff]  }
 0x571   : > { %6461 = vmatpush1.bf16.msra.mxu0 %v19735_v57  ;;  %v19794_v57 = vld [vmem:[#allocation9 + $0x294] ss:$8 sps:$4 sm:$0xff]  }
 0x572   : > { %6462 = vmatprep.subr.bf16.mxu0 %v19740_v58  ;;  %v19885_v58 = vld [vmem:[%s23228_s3 + $0x80] ss:$8 sps:$4 sm:$0xff]  }
 0x575   : > { %6463 = vmatpush1.bf16.msra.mxu0 %v19738_v59  ;;  %v19890_v59 = vld [vmem:[%s23228_s3 + $0x94] ss:$8 sps:$4 sm:$0xff]  }
 0x576   : > { %6464 = vmatprep.subr.bf16.mxu0 %v19743_v60  ;;  %v19792_v60 = vld [vmem:[#allocation9 + $0x290] ss:$8 sps:$4 sm:$0xff]  }
 0x579   : > { %6465 = vmatpush1.bf16.msra.mxu0 %v19741_v61  ;;  %v19797_v61 = vld [vmem:[#allocation9 + $0x2a4] ss:$8 sps:$4 sm:$0xff]  }
 0x57a   : > { %6466 = vmatprep.subr.bf16.mxu0 %v19746_v62  ;;  %v19888_v62 = vld [vmem:[%s23228_s3 + $0x90] ss:$8 sps:$4 sm:$0xff]  }
 0x57d   : > { %6467 = vmatpush1.bf16.msra.mxu0 %v19744_v63  ;;  %v19893_v63 = vld [vmem:[%s23228_s3 + $0xa4] ss:$8 sps:$4 sm:$0xff]  }
 0x57e   : > { %6468 = vmatprep.subr.bf16.mxu0 %v19749_v0  ;;  %v19795_v0 = vld [vmem:[#allocation9 + $0x2a0] ss:$8 sps:$4 sm:$0xff]  }
 0x581   : > { %6469 = vmatpush1.bf16.msra.mxu0 %v19747_v16  ;;  %v19800_v16 = vld [vmem:[#allocation9 + $0x2b4] ss:$8 sps:$4 sm:$0xff]  }
 0x582   : > { %6470 = vmatprep.subr.bf16.mxu0 %v19752_v1  ;;  %v19891_v1 = vld [vmem:[%s23228_s3 + $0xa0] ss:$8 sps:$4 sm:$0xff]  }
 0x585   : > { %6471 = vmatpush1.bf16.msra.mxu0 %v19750_v2  ;;  %v19896_v2 = vld [vmem:[%s23228_s3 + $0xb4] ss:$8 sps:$4 sm:$0xff]  }
 0x586   : > { %6472 = vmatprep.subr.bf16.mxu0 %v19755_v3  ;;  %v19798_v3 = vld [vmem:[#allocation9 + $0x2b0] ss:$8 sps:$4 sm:$0xff]  }
 0x589   : > { %6473 = vmatpush1.bf16.msra.mxu0 %v19753_v4  ;;  %v19803_v4 = vld [vmem:[#allocation9 + $0x2c4] ss:$8 sps:$4 sm:$0xff]  }
 0x58a   : > { %6474 = vmatprep.subr.bf16.mxu0 %v19758_v5  ;;  %v19894_v5 = vld [vmem:[%s23228_s3 + $0xb0] ss:$8 sps:$4 sm:$0xff]  }
 0x58d   : > { %6475 = vmatpush1.bf16.msra.mxu0 %v19756_v6  ;;  %v19899_v6 = vld [vmem:[%s23228_s3 + $0xc4] ss:$8 sps:$4 sm:$0xff]  }
 0x58e   : > { %6476 = vmatprep.subr.bf16.mxu0 %v19761_v7  ;;  %v19801_v7 = vld [vmem:[#allocation9 + $0x2c0] ss:$8 sps:$4 sm:$0xff]  }
 0x591   : > { %6477 = vmatpush1.bf16.msra.mxu0 %v19759_v8  ;;  %v19806_v8 = vld [vmem:[#allocation9 + $0x2d4] ss:$8 sps:$4 sm:$0xff]  }
 0x592   : > { %6478 = vmatprep.subr.bf16.mxu0 %v19764_v9  ;;  %v19897_v9 = vld [vmem:[%s23228_s3 + $0xc0] ss:$8 sps:$4 sm:$0xff]  }
 0x595   : > { %6479 = vmatpush1.bf16.msra.mxu0 %v19762_v10  ;;  %v19902_v10 = vld [vmem:[%s23228_s3 + $0xd4] ss:$8 sps:$4 sm:$0xff]  }
 0x596   : > { %6491 = vmatprep.subr.bf16.mxu0 %v19767_v36  ;;  %v19804_v36 = vld [vmem:[#allocation9 + $0x2d0] ss:$8 sps:$4 sm:$0xff]  }
 0x598   : > { %6481 = vmatmul.mubr.bf16.vlgmr.msra.gmra.mrb[8].mxu0 %v5619_v20  ;;  %v19867_v20 = vld [vmem:[%s23228_s3 + $0x20] ss:$8 sps:$4 sm:$0xff]  }
 0x599   : > { %6492 = vmatpush1.bf16.msra.mxu0 %v19765_v11  ;;  %6523 = vmatprep.mubr.bf16.mxu0 %v22584_v41  ;;  %v19785_v41 = vld [vmem:[#allocation9 + $0x264] ss:$8 sps:$4 sm:$0xff]  }
 0x59a   : > { %6493 = vmatprep.subr.bf16.mxu0 %v19770_v12  ;;  %7008 = vmatpush1.bf16.msra.mxu1 %v19867_v20  ;;  %v19809_v11 = vld [vmem:[#allocation9 + $0x2e4] ss:$8 sps:$4 sm:$0xff]   ;;  %v19900_v12 = vld [vmem:[%s23228_s3 + $0xd0] ss:$8 sps:$4 sm:$0xff]   ;;  %v19824_v20 = vld [vmem:[#allocation9 + $0x334] ss:$8 sps:$4 sm:$0xff]  }
 0x59b   : > { %7009 = vmatprep.subr.bf16.mxu1 %v19872_v23  ;;  %v19822_v23 = vld [vmem:[#allocation9 + $0x330] ss:$8 sps:$4 sm:$0xff]  }
 0x59d   : > { %6494 = vmatpush1.bf16.msra.mxu0 %v19768_v46  ;;  %v19810_v46 = vld [vmem:[#allocation9 + $0x2f0] ss:$8 sps:$4 sm:$0xff]  }
 0x59e   : > { %6495 = vmatprep.subr.bf16.mxu0 %v19773_v18  ;;  %7010 = vmatpush1.bf16.msra.mxu1 %v19870_v26  ;;  %v19813_v18 = vld [vmem:[#allocation9 + $0x300] ss:$8 sps:$4 sm:$0xff]   ;;  %v19830_v26 = vld [vmem:[#allocation9 + $0x354] ss:$8 sps:$4 sm:$0xff]  }
 0x59f   : > { %7011 = vmatprep.subr.bf16.mxu1 %v19875_v27  ;;  %v19833_v27 = vld [vmem:[#allocation9 + $0x364] ss:$8 sps:$4 sm:$0xff]  }
 0x5a1   : > { %6496 = vmatpush1.bf16.msra.mxu0 %v19771_v49  ;;  %v19821_v49 = vld [vmem:[#allocation9 + $0x324] ss:$8 sps:$4 sm:$0xff]  }
 0x5a2   : > { %6497 = vmatprep.subr.bf16.mxu0 %v19776_v14  ;;  %7012 = vmatpush1.bf16.msra.mxu1 %v19873_v37  ;;  %v19819_v14 = vld [vmem:[#allocation9 + $0x320] ss:$8 sps:$4 sm:$0xff]   ;;  %v19839_v37 = vld [vmem:[#allocation9 + $0x384] ss:$8 sps:$4 sm:$0xff]  }
 0x5a3   : > { %7013 = vmatprep.subr.bf16.mxu1 %v19878_v38  ;;  %v19837_v38 = vld [vmem:[#allocation9 + $0x380] ss:$8 sps:$4 sm:$0xff]  }
 0x5a5   : > { %6498 = vmatpush1.bf16.msra.mxu0 %v19774_v24  ;;  %v19827_v24 = vld [vmem:[#allocation9 + $0x344] ss:$8 sps:$4 sm:$0xff]  }
 0x5a6   : > { %6499 = vmatprep.subr.bf16.mxu0 %v19779_v25  ;;  %7014 = vmatpush1.bf16.msra.mxu1 %v19876_v19  ;;  %v19825_v25 = vld [vmem:[#allocation9 + $0x340] ss:$8 sps:$4 sm:$0xff]   ;;  %v19845_v19 = vld [vmem:[#allocation9 + $0x3a4] ss:$8 sps:$4 sm:$0xff]  }
 0x5a7   : > { %7015 = vmatprep.subr.bf16.mxu1 %v19881_v47  ;;  %v19843_v47 = vld [vmem:[#allocation9 + $0x3a0] ss:$8 sps:$4 sm:$0xff]  }
 0x5a9   : > { %6500 = vmatpush1.bf16.msra.mxu0 %v19777_v28  ;;  %v19836_v28 = vld [vmem:[#allocation9 + $0x374] ss:$8 sps:$4 sm:$0xff]  }
 0x5aa   : > { %6501 = vmatprep.subr.bf16.mxu0 %v19782_v33  ;;  %7016 = vmatpush1.bf16.msra.mxu1 %v19879_v32  ;;  %v19834_v33 = vld [vmem:[#allocation9 + $0x370] ss:$8 sps:$4 sm:$0xff]   ;;  %v19851_v32 = vld [vmem:[#allocation9 + $0x3c4] ss:$8 sps:$4 sm:$0xff]  }
 0x5ab   : > { %7017 = vmatprep.subr.bf16.mxu1 %v19884_v51  ;;  %v19849_v51 = vld [vmem:[#allocation9 + $0x3c0] ss:$8 sps:$4 sm:$0xff]  }
 0x5ad   : > { %6502 = vmatpush1.bf16.msra.mxu0 %v19780_v39  ;;  %v19842_v39 = vld [vmem:[#allocation9 + $0x394] ss:$8 sps:$4 sm:$0xff]  }
 0x5ae   : > { %6503 = vmatprep.subr.bf16.mxu0 %v19785_v41  ;;  %7018 = vmatpush1.bf16.msra.mxu1 %v19882_v54  ;;  %v19840_v41 = vld [vmem:[#allocation9 + $0x390] ss:$8 sps:$4 sm:$0xff]   ;;  %v19857_v54 = vld [vmem:[#allocation9 + $0x3e4] ss:$8 sps:$4 sm:$0xff]  }
 0x5af   : > { %7019 = vmatprep.subr.bf16.mxu1 %v19887_v55  ;;  %v19855_v55 = vld [vmem:[#allocation9 + $0x3e0] ss:$8 sps:$4 sm:$0xff]  }
 0x5b1   : > { %6504 = vmatpush1.bf16.msra.mxu0 %v19783_v17  ;;  %v19848_v17 = vld [vmem:[#allocation9 + $0x3b4] ss:$8 sps:$4 sm:$0xff]  }
 0x5b2   : > { %6505 = vmatprep.subr.bf16.mxu0 %v19788_v50  ;;  %7020 = vmatpush1.bf16.msra.mxu1 %v19885_v58  ;;  %v19846_v50 = vld [vmem:[#allocation9 + $0x3b0] ss:$8 sps:$4 sm:$0xff]   ;;  %v19905_v58 = vld [vmem:[%s23228_s3 + $0xe4] ss:$8 sps:$4 sm:$0xff]  }
 0x5b3   : > { %7021 = vmatprep.subr.bf16.mxu1 %v19890_v59  ;;  %v19903_v59 = vld [vmem:[%s23228_s3 + $0xe0] ss:$8 sps:$4 sm:$0xff]  }
 0x5b5   : > { %6506 = vmatpush1.bf16.msra.mxu0 %v19786_v52  ;;  %v19854_v52 = vld [vmem:[#allocation9 + $0x3d4] ss:$8 sps:$4 sm:$0xff]  }
 0x5b6   : > { %6507 = vmatprep.subr.bf16.mxu0 %v19791_v53  ;;  %7022 = vmatpush1.bf16.msra.mxu1 %v19888_v62  ;;  %v19852_v53 = vld [vmem:[#allocation9 + $0x3d0] ss:$8 sps:$4 sm:$0xff]   ;;  %v19911_v62 = vld [vmem:[%s23228_s3 + $0x104] ss:$8 sps:$4 sm:$0xff]  }
 0x5b7   : > { %7023 = vmatprep.subr.bf16.mxu1 %v19893_v63  ;;  %v5753_v63 = vld [vmem:[%s23229_s0] sm:$0x3]  ;;  %s23238_s0 = sld [smem:[#allocation42_spill]] }
 0x5b9   : > { %6508 = vmatpush1.bf16.msra.mxu0 %v19789_v56  ;;  %v19860_v56 = vld [vmem:[#allocation9 + $0x3f4] ss:$8 sps:$4 sm:$0xff]  }
 0x5ba   : > { %6509 = vmatprep.subr.bf16.mxu0 %v19794_v57  ;;  %7024 = vmatpush1.bf16.msra.mxu1 %v19891_v1  ;;  %v19858_v57 = vld [vmem:[#allocation9 + $0x3f0] ss:$8 sps:$4 sm:$0xff]  }
 0x5bb   : > { %7025 = vmatprep.subr.bf16.mxu1 %v19896_v2 }
 0x5bd   : > { %6510 = vmatpush1.bf16.msra.mxu0 %v19792_v60  ;;  %v19908_v60 = vld [vmem:[%s23228_s3 + $0xf4] ss:$8 sps:$4 sm:$0xff]  }
 0x5be   : > { %6511 = vmatprep.subr.bf16.mxu0 %v19797_v61  ;;  %7026 = vmatpush1.bf16.msra.mxu1 %v19894_v5  ;;  %v19906_v61 = vld [vmem:[%s23228_s3 + $0xf0] ss:$8 sps:$4 sm:$0xff]  }
 0x5bf   : > { %7027 = vmatprep.subr.bf16.mxu1 %v19899_v6 }
 0x5c1   : > { %6512 = vmatpush1.bf16.msra.mxu0 %v19795_v0  ;;  %v5758_v0 = vrot.slane %v5753_v63, %v22525_v42 }
 0x5c2   : > { %6513 = vmatprep.subr.bf16.mxu0 %v19800_v16  ;;  %7028 = vmatpush1.bf16.msra.mxu1 %v19897_v9  ;;  %v5762_v16 = vrot.slane %v5753_v63, %v22529_v44  ;;  %v19951_v63 = vld [vmem:[%s23228_s3 + $0x1e0] ss:$8 sps:$4 sm:$0xff]  }
 0x5c3   : > { %7029 = vmatprep.subr.bf16.mxu1 %v19902_v10 }
 0x5c5   : > { %6514 = vmatpush1.bf16.msra.mxu0 %v19798_v3 }
 0x5c6   : > { %6515 = vmatprep.subr.bf16.mxu0 %v19803_v4  ;;  %7030 = vmatpush1.bf16.msra.mxu1 %v19900_v12 }
 0x5c7   : > { %7031 = vmatprep.subr.bf16.mxu1 %v19905_v58  ;;  %v19947_v58 = vld [vmem:[%s23228_s3 + $0x1c4] ss:$8 sps:$4 sm:$0xff]  }
 0x5c9   : > { %6516 = vmatpush1.bf16.msra.mxu0 %v19801_v7 }
 0x5ca   : > { %6517 = vmatprep.subr.bf16.mxu0 %v19806_v8  ;;  %7032 = vmatpush1.bf16.msra.mxu1 %v19903_v59  ;;  %v19945_v59 = vld [vmem:[%s23228_s3 + $0x1c0] ss:$8 sps:$4 sm:$0xff]  }
 0x5cb   : > { %7033 = vmatprep.subr.bf16.mxu1 %v19908_v60  ;;  %v19950_v60 = vld [vmem:[%s23228_s3 + $0x1d4] ss:$8 sps:$4 sm:$0xff]  }
 0x5cd   : > { %6518 = vmatpush1.bf16.msra.mxu0 %v19804_v36 }
 0x5ce   : > { %6519 = vmatprep.subr.bf16.mxu0 %v19809_v11  ;;  %7034 = vmatpush1.bf16.msra.mxu1 %v19906_v61  ;;  %v19948_v61 = vld [vmem:[%s23228_s3 + $0x1d0] ss:$8 sps:$4 sm:$0xff]  }
 0x5cf   : > { %7046 = vmatprep.subr.bf16.mxu1 %v19911_v62  ;;  %v19953_v62 = vld [vmem:[%s23228_s3 + $0x1e4] ss:$8 sps:$4 sm:$0xff]  }
 0x5d1   : > { %6520 = vmatpush1.bf16.msra.mxu0 %v19807_v35 }
 0x5d2   : > { %6521 = vmatprep.subr.bf16.mxu0 %v19812_v13 }
 0x5d5   : > { %6522 = vmatpush1.bf16.msra.mxu0 %v19810_v46 }
 0x5d6   : > { %6534 = vmatprep.subr.bf16.mxu0 %v19815_v15 }
 0x5d8   : > { %6524 = vmatmul.mubr.bf16.vlgmr.msra.gmra.mrb[8].mxu0 %v22578_v34  ;;  %v19828_v34 = vld [vmem:[#allocation9 + $0x350] ss:$8 sps:$4 sm:$0xff]  }
 0x5d9   : > { %6535 = vmatpush1.bf16.msra.mxu0 %v19813_v18  ;;  %6566 = vmatprep.mubr.bf16.mxu0 %v22587_v48  ;;  %v19831_v48 = vld [vmem:[#allocation9 + $0x360] ss:$8 sps:$4 sm:$0xff]  }
 0x5da   : > { %6536 = vmatprep.subr.bf16.mxu0 %v19818_v21 }
 0x5dd   : > { %6537 = vmatpush1.bf16.msra.mxu0 %v19816_v22 }
 0x5de   : > { %6538 = vmatprep.subr.bf16.mxu0 %v19821_v49  ;;  %v19909_v49 = vld [vmem:[%s23228_s3 + $0x100] ss:$8 sps:$4 sm:$0xff]  }
 0x5e1   : > { %6539 = vmatpush1.bf16.msra.mxu0 %v19819_v14 }
 0x5e2   : > { %6540 = vmatprep.subr.bf16.mxu0 %v19824_v20  ;;  %v19914_v20 = vld [vmem:[%s23228_s3 + $0x114] ss:$8 sps:$4 sm:$0xff]  }
 0x5e5   : > { %6541 = vmatpush1.bf16.msra.mxu0 %v19822_v23 }
 0x5e6   : > { %6542 = vmatprep.subr.bf16.mxu0 %v19827_v24 }
 0x5e9   : > { %6543 = vmatpush1.bf16.msra.mxu0 %v19825_v25 }
 0x5ea   : > { %6544 = vmatprep.subr.bf16.mxu0 %v19830_v26 }
 0x5ed   : > { %6545 = vmatpush1.bf16.msra.mxu0 %v19828_v34  ;;  %v19912_v34 = vld [vmem:[%s23228_s3 + $0x110] ss:$8 sps:$4 sm:$0xff]  }
 0x5ee   : > { %6546 = vmatprep.subr.bf16.mxu0 %v19833_v27  ;;  %v19917_v27 = vld [vmem:[%s23228_s3 + $0x124] ss:$8 sps:$4 sm:$0xff]  }
 0x5f1   : > { %6547 = vmatpush1.bf16.msra.mxu0 %v19831_v48  ;;  %v19915_v48 = vld [vmem:[%s23228_s3 + $0x120] ss:$8 sps:$4 sm:$0xff]  }
 0x5f2   : > { %6548 = vmatprep.subr.bf16.mxu0 %v19836_v28  ;;  %v19920_v28 = vld [vmem:[%s23228_s3 + $0x134] ss:$8 sps:$4 sm:$0xff]  }
 0x5f5   : > { %6549 = vmatpush1.bf16.msra.mxu0 %v19834_v33  ;;  %v19918_v33 = vld [vmem:[%s23228_s3 + $0x130] ss:$8 sps:$4 sm:$0xff]  }
 0x5f6   : > { %6550 = vmatprep.subr.bf16.mxu0 %v19839_v37  ;;  %v19923_v37 = vld [vmem:[%s23228_s3 + $0x144] ss:$8 sps:$4 sm:$0xff]  }
 0x5f9   : > { %6551 = vmatpush1.bf16.msra.mxu0 %v19837_v38  ;;  %v19921_v38 = vld [vmem:[%s23228_s3 + $0x140] ss:$8 sps:$4 sm:$0xff]  }
 0x5fa   : > { %6552 = vmatprep.subr.bf16.mxu0 %v19842_v39  ;;  %v19926_v39 = vld [vmem:[%s23228_s3 + $0x154] ss:$8 sps:$4 sm:$0xff]  }
 0x5fd   : > { %6553 = vmatpush1.bf16.msra.mxu0 %v19840_v41  ;;  %v19924_v41 = vld [vmem:[%s23228_s3 + $0x150] ss:$8 sps:$4 sm:$0xff]  }
 0x5fe   : > { %6554 = vmatprep.subr.bf16.mxu0 %v19845_v19  ;;  %v19929_v19 = vld [vmem:[%s23228_s3 + $0x164] ss:$8 sps:$4 sm:$0xff]  }
 0x601   : > { %6555 = vmatpush1.bf16.msra.mxu0 %v19843_v47  ;;  %v19927_v47 = vld [vmem:[%s23228_s3 + $0x160] ss:$8 sps:$4 sm:$0xff]  }
 0x602   : > { %6556 = vmatprep.subr.bf16.mxu0 %v19848_v17  ;;  %v19932_v17 = vld [vmem:[%s23228_s3 + $0x174] ss:$8 sps:$4 sm:$0xff]  }
 0x605   : > { %6557 = vmatpush1.bf16.msra.mxu0 %v19846_v50  ;;  %v19930_v50 = vld [vmem:[%s23228_s3 + $0x170] ss:$8 sps:$4 sm:$0xff]  }
 0x606   : > { %6558 = vmatprep.subr.bf16.mxu0 %v19851_v32  ;;  %v19935_v32 = vld [vmem:[%s23228_s3 + $0x184] ss:$8 sps:$4 sm:$0xff]  }
 0x609   : > { %6559 = vmatpush1.bf16.msra.mxu0 %v19849_v51  ;;  %v19933_v51 = vld [vmem:[%s23228_s3 + $0x180] ss:$8 sps:$4 sm:$0xff]  }
 0x60a   : > { %6560 = vmatprep.subr.bf16.mxu0 %v19854_v52  ;;  %v19938_v52 = vld [vmem:[%s23228_s3 + $0x194] ss:$8 sps:$4 sm:$0xff]  }
 0x60d   : > { %6561 = vmatpush1.bf16.msra.mxu0 %v19852_v53  ;;  %v19936_v53 = vld [vmem:[%s23228_s3 + $0x190] ss:$8 sps:$4 sm:$0xff]  }
 0x60e   : > { %6562 = vmatprep.subr.bf16.mxu0 %v19857_v54  ;;  %v19941_v54 = vld [vmem:[%s23228_s3 + $0x1a4] ss:$8 sps:$4 sm:$0xff]  }
 0x611   : > { %6563 = vmatpush1.bf16.msra.mxu0 %v19855_v55  ;;  %v19939_v55 = vld [vmem:[%s23228_s3 + $0x1a0] ss:$8 sps:$4 sm:$0xff]  }
 0x612   : > { %6564 = vmatprep.subr.bf16.mxu0 %v19860_v56  ;;  %v19944_v56 = vld [vmem:[%s23228_s3 + $0x1b4] ss:$8 sps:$4 sm:$0xff]  }
 0x615   : > { %6565 = vmatpush1.bf16.msra.mxu0 %v19858_v57  ;;  %v19942_v57 = vld [vmem:[%s23228_s3 + $0x1b0] ss:$8 sps:$4 sm:$0xff]  }
 0x618   : > { %6567 = vmatmul.mubr.bf16.vlgmr.msra.gmra.mrb[8].mxu0 %v22582_v40 }
 0x6eb   : > { %v6568_v1 = vpop.f32.mrb[8].mxu0 }
 0x6ec   : > { %v18497_v2 = vadd.f32 %v6568_v1, %v5758_v0  ;;  %v6570_v3 = vpop.f32.mrb[9].mxu0  ;;  %v19959_v1 = vld [vmem:[#allocation11 + $0x4] ss:$8 sps:$4 sm:$0xff]  }
 0x6ed   : > { %v18498_v4 = vadd.f32 %v6570_v3, %v5762_v16  ;;  %v6572_v40 = vpop.f32.mrb[10].mxu0  ;;  %v19962_v3 = vld [vmem:[#allocation11 + $0x14] ss:$8 sps:$4 sm:$0xff]  }
 0x6ee   : > { %vm6577_vm6 = vcmp.gt.f32.partialorder %v18497_v2, 0.0  ;;  %v6581_v5 = vmul.f32 0.01, %v18497_v2  ;;  %v18499_v6 = vadd.f32 %v6572_v40, %v5758_v0  ;;  %v6574_v7 = vpop.f32.mrb[11].mxu0  ;;  %v19956_v0 = vld [vmem:[%s23228_s3 + $0x1f4] ss:$8 sps:$4 sm:$0xff]  }
 0x6ef   : > { %vm6578_vm7 = vcmp.gt.f32.partialorder %v18498_v4, 0.0  ;;  %v6582_v8 = vmul.f32 0.01, %v18498_v4  ;;  %v18500_v9 = vadd.f32 %v6574_v7, %v5762_v16  ;;  %v19954_v16 = vld [vmem:[%s23228_s3 + $0x1f0] ss:$8 sps:$4 sm:$0xff]   ;;  %s18166_s3 = sshll.u32 %s22156_s18, 10 }
 0x6f0   : > { %v6585_v10 = vsel %vm6577_vm6, %v18497_v2, %v6581_v5  ;;  %vm6579_vm8 = vcmp.gt.f32.partialorder %v18499_v6, 0.0  ;;  %v6583_v36 = vmul.f32 0.01, %v18499_v6  ;;  %v19957_v2 = vld [vmem:[#allocation11] ss:$8 sps:$4 sm:$0xff]   ;;  %s23059_s18 = scalar_lea.hbm %s23262_s5, %s18166_s3 }
 0x6f1   : > { %vm6580_vm9 = vcmp.gt.f32.partialorder %v18500_v9, 0.0  ;;  %v6584_v11 = vmul.f32 0.01, %v18500_v9  ;;  %v6586_v12 = vsel %vm6578_vm7, %v18498_v4, %v6582_v8  ;;  %v6593_v13 = vrot.slane %v6585_v10, 1  ;;  %v19960_v4 = vld [vmem:[#allocation11 + $0x10] ss:$8 sps:$4 sm:$0xff]  }
 0x6f2   : > { %v6587_v35 = vsel %vm6579_vm8, %v18499_v6, %v6583_v36  ;;  %v6596_v21 = vrot.slane %v6586_v12, 1  ;;  %v19965_v40 = vld [vmem:[#allocation11 + $0x24] ss:$8 sps:$4 sm:$0xff]   ;;  %v19963_v5 = vld [vmem:[#allocation11 + $0x20] ss:$8 sps:$4 sm:$0xff]   ;;  %vm21876_vm7 = vmmov 0  }
 0x6f3   : > { %v6594_v46 = vrot.slane %v6587_v35, 1  ;;  %v6603_v15 = vpack.c.bf16 %v6587_v35, %v6585_v10  ;;  %v6588_v18 = vsel %vm6580_vm9, %v18500_v9, %v6584_v11  ;;  %v19968_v6 = vld [vmem:[#allocation11 + $0x34] ss:$8 sps:$4 sm:$0xff]   ;;  %v19966_v7 = vld [vmem:[#allocation11 + $0x30] ss:$8 sps:$4 sm:$0xff]  }
 0x6f4   : > { %v6604_v22 = vpack.c.bf16 %v6588_v18, %v6586_v12  ;;  %v6597_v14 = vrot.slane %v6588_v18, 1  ;;  %v19971_v8 = vld [vmem:[#allocation11 + $0x44] ss:$8 sps:$4 sm:$0xff]   ;;  %v19969_v9 = vld [vmem:[#allocation11 + $0x40] ss:$8 sps:$4 sm:$0xff]  }
 0x6f5   : > { %v6595_v23 = vsel %vm1672_vm0, %v6593_v13, %v6594_v46  ;;  %v19974_v10 = vld [vmem:[#allocation11 + $0x54] ss:$8 sps:$4 sm:$0xff]   ;;  %v19972_v36 = vld [vmem:[#allocation11 + $0x50] ss:$8 sps:$4 sm:$0xff]   ;;  %v19977_v11 = vld [vmem:[#allocation11 + $0x64] ss:$8 sps:$4 sm:$0xff]  }
 0x6f6   : > { %7035 = vmatprep.mubr.bf16.mxu1 %v6604_v22  ;;  %v6598_v24 = vsel %vm1672_vm0, %v6596_v21, %v6597_v14  ;;  %v22636_v25 = vpack.c.bf16 %v6594_v46, %v6595_v23  ;;  %v19975_v12 = vld [vmem:[#allocation11 + $0x60] ss:$8 sps:$4 sm:$0xff]   ;;  %v19980_v35 = vld [vmem:[#allocation11 + $0x74] ss:$8 sps:$4 sm:$0xff]   ;;  %v19978_v13 = vld [vmem:[#allocation11 + $0x70] ss:$8 sps:$4 sm:$0xff]  }
 0x6f7   : > { %7036 = vmatmul.mubr.bf16.vlgmr.msra.gmra.mrb[8].mxu1 %v6603_v15  ;;  %v6606_v26 = vpack.c.bf16 %v6597_v14, %v6598_v24  ;;  %v19983_v46 = vld [vmem:[#allocation11 + $0x84] ss:$8 sps:$4 sm:$0xff]   ;;  %v19981_v15 = vld [vmem:[#allocation11 + $0x80] ss:$8 sps:$4 sm:$0xff]   ;;  %v19986_v18 = vld [vmem:[#allocation11 + $0x94] ss:$8 sps:$4 sm:$0xff]  }
 0x6f8   : > { %7047 = vmatpush1.bf16.msra.mxu1 %v19909_v49  ;;  %v19984_v21 = vld [vmem:[#allocation11 + $0x90] ss:$8 sps:$4 sm:$0xff]   ;;  %v19989_v22 = vld [vmem:[#allocation11 + $0xa4] ss:$8 sps:$4 sm:$0xff]   ;;  %v19987_v49 = vld [vmem:[#allocation11 + $0xa0] ss:$8 sps:$4 sm:$0xff]  }
 0x6f9   : > { %7078 = vmatprep.mubr.bf16.mxu1 %v6606_v26  ;;  %7048 = vmatprep.subr.bf16.mxu1 %v19914_v20  ;;  %v19992_v14 = vld [vmem:[#allocation11 + $0xb4] ss:$8 sps:$4 sm:$0xff]   ;;  %v19990_v20 = vld [vmem:[#allocation11 + $0xb0] ss:$8 sps:$4 sm:$0xff]   ;;  %v19995_v23 = vld [vmem:[#allocation11 + $0xc4] ss:$8 sps:$4 sm:$0xff]  }
 0x6fa   : > { %v19993_v24 = vld [vmem:[#allocation11 + $0xc0] ss:$8 sps:$4 sm:$0xff]   ;;  %v19996_v26 = vld [vmem:[#allocation11 + $0xd0] ss:$8 sps:$4 sm:$0xff]  }
 0x6fc   : > { %7049 = vmatpush1.bf16.msra.mxu1 %v19912_v34  ;;  %v20001_v34 = vld [vmem:[#allocation11 + $0xe4] ss:$8 sps:$4 sm:$0xff]  }
 0x6fd   : > { %7050 = vmatprep.subr.bf16.mxu1 %v19917_v27  ;;  %v19999_v27 = vld [vmem:[#allocation11 + $0xe0] ss:$8 sps:$4 sm:$0xff]  }
 0x700   : > { %7051 = vmatpush1.bf16.msra.mxu1 %v19915_v48  ;;  %v20004_v48 = vld [vmem:[#allocation11 + $0xf4] ss:$8 sps:$4 sm:$0xff]  }
 0x701   : > { %7052 = vmatprep.subr.bf16.mxu1 %v19920_v28  ;;  %v20002_v28 = vld [vmem:[#allocation11 + $0xf0] ss:$8 sps:$4 sm:$0xff]  }
 0x704   : > { %7053 = vmatpush1.bf16.msra.mxu1 %v19918_v33  ;;  %v20007_v33 = vld [vmem:[#allocation11 + $0x104] ss:$8 sps:$4 sm:$0xff]  }
 0x705   : > { %7054 = vmatprep.subr.bf16.mxu1 %v19923_v37  ;;  %v6671_v37 = vld [vmem:[%s23230_s17] sm:$0x3]  ;;  %s23239_s17 = sld [smem:[#allocation60_spill]] }
 0x708   : > { %7055 = vmatpush1.bf16.msra.mxu1 %v19921_v38  ;;  %v6676_v38 = vrot.slane %v6671_v37, %v22525_v42 }
 0x709   : > { %7056 = vmatprep.subr.bf16.mxu1 %v19926_v39  ;;  %v6680_v39 = vrot.slane %v6671_v37, %v22529_v44  ;;  %v20047_v37 = vld [vmem:[#allocation11 + $0x1e0] ss:$8 sps:$4 sm:$0xff]  }
 0x70c   : > { %7057 = vmatpush1.bf16.msra.mxu1 %v19924_v41 }
 0x70d   : > { %7058 = vmatprep.subr.bf16.mxu1 %v19929_v19 }
 0x710   : > { %7059 = vmatpush1.bf16.msra.mxu1 %v19927_v47 }
 0x711   : > { %7060 = vmatprep.subr.bf16.mxu1 %v19932_v17 }
 0x714   : > { %7061 = vmatpush1.bf16.msra.mxu1 %v19930_v50 }
 0x715   : > { %7062 = vmatprep.subr.bf16.mxu1 %v19935_v32 }
 0x718   : > { %7063 = vmatpush1.bf16.msra.mxu1 %v19933_v51 }
 0x719   : > { %7064 = vmatprep.subr.bf16.mxu1 %v19938_v52 }
 0x71c   : > { %7065 = vmatpush1.bf16.msra.mxu1 %v19936_v53 }
 0x71d   : > { %7066 = vmatprep.subr.bf16.mxu1 %v19941_v54 }
 0x720   : > { %7067 = vmatpush1.bf16.msra.mxu1 %v19939_v55 }
 0x721   : > { %7068 = vmatprep.subr.bf16.mxu1 %v19944_v56 }
 0x724   : > { %7069 = vmatpush1.bf16.msra.mxu1 %v19942_v57 }
 0x725   : > { %7070 = vmatprep.subr.bf16.mxu1 %v19947_v58 }
 0x728   : > { %7071 = vmatpush1.bf16.msra.mxu1 %v19945_v59 }
 0x729   : > { %7072 = vmatprep.subr.bf16.mxu1 %v19950_v60 }
 0x72c   : > { %7073 = vmatpush1.bf16.msra.mxu1 %v19948_v61 }
 0x72d   : > { %7074 = vmatprep.subr.bf16.mxu1 %v19953_v62 }
 0x730   : > { %7075 = vmatpush1.bf16.msra.mxu1 %v19951_v63 }
 0x731   : > { %7076 = vmatprep.subr.bf16.mxu1 %v19956_v0 }
 0x734   : > { %7077 = vmatpush1.bf16.msra.mxu1 %v19954_v16 }
 0x735   : > { %7515 = vmatprep.subr.bf16.mxu1 %v19959_v1  ;;  %v20005_v1 = vld [vmem:[#allocation11 + $0x100] ss:$8 sps:$4 sm:$0xff]  }
 0x737   : > { %7079 = vmatmul.mubr.bf16.vlgmr.msra.gmra.mrb[8].mxu1 %v22636_v25  ;;  %v19998_v25 = vld [vmem:[#allocation11 + $0xd4] ss:$8 sps:$4 sm:$0xff]  }
 0x738   : > { %7516 = vmatpush1.bf16.msra.mxu1 %v19957_v2 }
 0x739   : > { %7517 = vmatprep.subr.bf16.mxu1 %v19962_v3  ;;  %v20010_v3 = vld [vmem:[#allocation11 + $0x114] ss:$8 sps:$4 sm:$0xff]  }
 0x73c   : > { %7518 = vmatpush1.bf16.msra.mxu1 %v19960_v4 }
 0x73d   : > { %7519 = vmatprep.subr.bf16.mxu1 %v19965_v40 }
 0x740   : > { %7520 = vmatpush1.bf16.msra.mxu1 %v19963_v5 }
 0x741   : > { %7521 = vmatprep.subr.bf16.mxu1 %v19968_v6 }
 0x744   : > { %7522 = vmatpush1.bf16.msra.mxu1 %v19966_v7  ;;  %v20008_v7 = vld [vmem:[#allocation11 + $0x110] ss:$8 sps:$4 sm:$0xff]  }
 0x745   : > { %7523 = vmatprep.subr.bf16.mxu1 %v19971_v8  ;;  %v20013_v8 = vld [vmem:[#allocation11 + $0x124] ss:$8 sps:$4 sm:$0xff]  }
 0x748   : > { %7524 = vmatpush1.bf16.msra.mxu1 %v19969_v9  ;;  %v20011_v9 = vld [vmem:[#allocation11 + $0x120] ss:$8 sps:$4 sm:$0xff]  }
 0x749   : > { %7525 = vmatprep.subr.bf16.mxu1 %v19974_v10  ;;  %v20016_v10 = vld [vmem:[#allocation11 + $0x134] ss:$8 sps:$4 sm:$0xff]  }
 0x74c   : > { %7526 = vmatpush1.bf16.msra.mxu1 %v19972_v36  ;;  %v20014_v36 = vld [vmem:[#allocation11 + $0x130] ss:$8 sps:$4 sm:$0xff]  }
 0x74d   : > { %7527 = vmatprep.subr.bf16.mxu1 %v19977_v11  ;;  %v20019_v11 = vld [vmem:[#allocation11 + $0x144] ss:$8 sps:$4 sm:$0xff]  }
 0x750   : > { %7528 = vmatpush1.bf16.msra.mxu1 %v19975_v12  ;;  %v20017_v12 = vld [vmem:[#allocation11 + $0x140] ss:$8 sps:$4 sm:$0xff]  }
 0x751   : > { %7529 = vmatprep.subr.bf16.mxu1 %v19980_v35  ;;  %v20022_v35 = vld [vmem:[#allocation11 + $0x154] ss:$8 sps:$4 sm:$0xff]  }
 0x754   : > { %7530 = vmatpush1.bf16.msra.mxu1 %v19978_v13  ;;  %v20020_v13 = vld [vmem:[#allocation11 + $0x150] ss:$8 sps:$4 sm:$0xff]  }
 0x755   : > { %7531 = vmatprep.subr.bf16.mxu1 %v19983_v46  ;;  %v20025_v46 = vld [vmem:[#allocation11 + $0x164] ss:$8 sps:$4 sm:$0xff]  }
 0x758   : > { %7532 = vmatpush1.bf16.msra.mxu1 %v19981_v15  ;;  %v20023_v15 = vld [vmem:[#allocation11 + $0x160] ss:$8 sps:$4 sm:$0xff]  }
 0x759   : > { %7533 = vmatprep.subr.bf16.mxu1 %v19986_v18  ;;  %v20028_v18 = vld [vmem:[#allocation11 + $0x174] ss:$8 sps:$4 sm:$0xff]  }
 0x75c   : > { %7534 = vmatpush1.bf16.msra.mxu1 %v19984_v21  ;;  %v20026_v21 = vld [vmem:[#allocation11 + $0x170] ss:$8 sps:$4 sm:$0xff]  }
 0x75d   : > { %7535 = vmatprep.subr.bf16.mxu1 %v19989_v22  ;;  %v20031_v22 = vld [vmem:[#allocation11 + $0x184] ss:$8 sps:$4 sm:$0xff]  }
 0x760   : > { %7536 = vmatpush1.bf16.msra.mxu1 %v19987_v49  ;;  %v20029_v49 = vld [vmem:[#allocation11 + $0x180] ss:$8 sps:$4 sm:$0xff]  }
 0x761   : > { %7537 = vmatprep.subr.bf16.mxu1 %v19992_v14  ;;  %v20034_v14 = vld [vmem:[#allocation11 + $0x194] ss:$8 sps:$4 sm:$0xff]  }
 0x764   : > { %7538 = vmatpush1.bf16.msra.mxu1 %v19990_v20  ;;  %v20032_v20 = vld [vmem:[#allocation11 + $0x190] ss:$8 sps:$4 sm:$0xff]  }
 0x765   : > { %7539 = vmatprep.subr.bf16.mxu1 %v19995_v23  ;;  %v20037_v23 = vld [vmem:[#allocation11 + $0x1a4] ss:$8 sps:$4 sm:$0xff]  }
 0x768   : > { %7540 = vmatpush1.bf16.msra.mxu1 %v19993_v24  ;;  %v20035_v24 = vld [vmem:[#allocation11 + $0x1a0] ss:$8 sps:$4 sm:$0xff]  }
 0x769   : > { %7541 = vmatprep.subr.bf16.mxu1 %v19998_v25  ;;  %v20040_v25 = vld [vmem:[#allocation11 + $0x1b4] ss:$8 sps:$4 sm:$0xff]  }
 0x76c   : > { %7542 = vmatpush1.bf16.msra.mxu1 %v19996_v26  ;;  %v20038_v26 = vld [vmem:[#allocation11 + $0x1b0] ss:$8 sps:$4 sm:$0xff]  }
 0x76d   : > { %7543 = vmatprep.subr.bf16.mxu1 %v20001_v34  ;;  %v20043_v34 = vld [vmem:[#allocation11 + $0x1c4] ss:$8 sps:$4 sm:$0xff]  }
 0x770   : > { %7544 = vmatpush1.bf16.msra.mxu1 %v19999_v27  ;;  %v20041_v27 = vld [vmem:[#allocation11 + $0x1c0] ss:$8 sps:$4 sm:$0xff]  }
 0x771   : > { %7545 = vmatprep.subr.bf16.mxu1 %v20004_v48  ;;  %v20046_v48 = vld [vmem:[#allocation11 + $0x1d4] ss:$8 sps:$4 sm:$0xff]  }
 0x774   : > { %7546 = vmatpush1.bf16.msra.mxu1 %v20002_v28  ;;  %v20044_v28 = vld [vmem:[#allocation11 + $0x1d0] ss:$8 sps:$4 sm:$0xff]  }
 0x775   : > { %7558 = vmatprep.subr.bf16.mxu1 %v20007_v33  ;;  %v20049_v33 = vld [vmem:[#allocation11 + $0x1e4] ss:$8 sps:$4 sm:$0xff]  }
 0x80a   : > { %v7080_v41 = vpop.f32.mrb[8].mxu1 }
 0x80b   : > { %v18501_v19 = vadd.f32 %v7080_v41, %v6676_v38  ;;  %v7082_v47 = vpop.f32.mrb[9].mxu1  ;;  %v20053_v41 = vld [vmem:[#allocation12 + $0x40] sm:$0xff]  }
 0x80c   : > { %v18502_v17 = vadd.f32 %v7082_v47, %v6680_v39  ;;  %v7084_v50 = vpop.f32.mrb[10].mxu1  ;;  %v20055_v47 = vld [vmem:[#allocation12 + $0x48] sm:$0xff]  }
 0x80d   : > { %vm7089_vm10 = vcmp.gt.f32.partialorder %v18501_v19, 0.0  ;;  %v7093_v32 = vmul.f32 0.01, %v18501_v19  ;;  %v18503_v51 = vadd.f32 %v7084_v50, %v6676_v38  ;;  %v7086_v52 = vpop.f32.mrb[11].mxu1  ;;  %v20052_v38 = vld [vmem:[#allocation11 + $0x1f4] ss:$8 sps:$4 sm:$0xff]  }
 0x80e   : > { %vm7090_vm11 = vcmp.gt.f32.partialorder %v18502_v17, 0.0  ;;  %v7094_v53 = vmul.f32 0.01, %v18502_v17  ;;  %v18504_v54 = vadd.f32 %v7086_v52, %v6680_v39  ;;  %v20050_v39 = vld [vmem:[#allocation11 + $0x1f0] ss:$8 sps:$4 sm:$0xff]  }
 0x80f   : > { %v7097_v55 = vsel %vm7089_vm10, %v18501_v19, %v7093_v32  ;;  %vm7091_vm12 = vcmp.gt.f32.partialorder %v18503_v51, 0.0  ;;  %v7095_v56 = vmul.f32 0.01, %v18503_v51  ;;  %v20054_v19 = vld [vmem:[#allocation12] sm:$0xff]   ;;  %v20057_v50 = vld [vmem:[#allocation12 + $0x50] sm:$0xff]   ;;  %v20060_v52 = vld [vmem:[#allocation12 + $0x18] sm:$0xff]  }
 0x810   : > { %vm7092_vm13 = vcmp.gt.f32.partialorder %v18504_v54, 0.0  ;;  %v7096_v57 = vmul.f32 0.01, %v18504_v54  ;;  %v7098_v58 = vsel %vm7090_vm11, %v18502_v17, %v7094_v53  ;;  %v7105_v60 = vrot.slane %v7097_v55, 1  ;;  %v20056_v17 = vld [vmem:[#allocation12 + $0x8] sm:$0xff]   ;;  %v20058_v32 = vld [vmem:[#allocation12 + $0x10] sm:$0xff]  }
 0x811   : > { %v7099_v59 = vsel %vm7091_vm12, %v18503_v51, %v7095_v56  ;;  %v7108_v0 = vrot.slane %v7098_v58, 1  ;;  %v20059_v51 = vld [vmem:[#allocation12 + $0x58] sm:$0xff]   ;;  %v20061_v53 = vld [vmem:[#allocation12 + $0x60] sm:$0xff]   ;;  %v20064_v56 = vld [vmem:[#allocation12 + $0x28] sm:$0xff]   ;;  %vm8222_vm10 = vcmask 523264   ;;  %vm8372_vm12 = vcmask 261120  }
 0x812   : > { %v7106_v61 = vrot.slane %v7099_v59, 1  ;;  %v7115_v62 = vpack.c.bf16 %v7099_v59, %v7097_v55  ;;  %v7100_v63 = vsel %vm7092_vm13, %v18504_v54, %v7096_v57  ;;  %v20062_v54 = vld [vmem:[#allocation12 + $0x20] sm:$0xff]   ;;  %v20063_v55 = vld [vmem:[#allocation12 + $0x68] sm:$0xff]   ;;  %v20065_v57 = vld [vmem:[#allocation12 + $0x70] sm:$0xff]  }
 0x813   : > { %v7116_v16 = vpack.c.bf16 %v7100_v63, %v7098_v58  ;;  %v7109_v2 = vrot.slane %v7100_v63, 1  ;;  %v20066_v58 = vld [vmem:[#allocation12 + $0x30] sm:$0xff]   ;;  %v20067_v59 = vld [vmem:[#allocation12 + $0x78] sm:$0xff]  }
 0x814   : > { %v7107_v4 = vsel %vm1672_vm0, %v7105_v60, %v7106_v61  ;;  %v20068_v60 = vld [vmem:[#allocation12 + $0x38] sm:$0xff]  }
 0x815   : > { %7547 = vmatprep.mubr.bf16.mxu1 %v7116_v16  ;;  %v7110_v40 = vsel %vm1672_vm0, %v7108_v0, %v7109_v2  ;;  %v22673_v5 = vpack.c.bf16 %v7106_v61, %v7107_v4  ;;  %v20069_v61 = vld [vmem:[#allocation12 + $0xc0] sm:$0xff]  }
 0x816   : > { %7548 = vmatmul.mubr.bf16.vlgmr.msra.gmra.mrb[12].mxu1 %v7115_v62  ;;  %v7118_v6 = vpack.c.bf16 %v7109_v2, %v7110_v40  ;;  %v7183_v62 = vld [vmem:[%s23231_s13] sm:$0x3]  ;;  %s23240_s13 = sld [smem:[#allocation43_spill]] }
 0x817   : > { %7559 = vmatpush1.bf16.msra.mxu1 %v20005_v1  ;;  %v7188_v63 = vrot.slane %v7183_v62, %v22525_v42  ;;  %v7192_v0 = vrot.slane %v7183_v62, %v22529_v44  ;;  %v20098_v62 = vld [vmem:[%s23232_s28 + $0x30] sm:$0xff]  }
 0x818   : > { %7590 = vmatprep.mubr.bf16.mxu1 %v7118_v6  ;;  %7560 = vmatprep.subr.bf16.mxu1 %v20010_v3 }
 0x81b   : > { %7561 = vmatpush1.bf16.msra.mxu1 %v20008_v7 }
 0x81c   : > { %7562 = vmatprep.subr.bf16.mxu1 %v20013_v8 }
 0x81f   : > { %7563 = vmatpush1.bf16.msra.mxu1 %v20011_v9 }
 0x820   : > { %7564 = vmatprep.subr.bf16.mxu1 %v20016_v10 }
 0x823   : > { %7565 = vmatpush1.bf16.msra.mxu1 %v20014_v36 }
 0x824   : > { %7566 = vmatprep.subr.bf16.mxu1 %v20019_v11 }
 0x827   : > { %7567 = vmatpush1.bf16.msra.mxu1 %v20017_v12 }
 0x828   : > { %7568 = vmatprep.subr.bf16.mxu1 %v20022_v35 }
 0x82b   : > { %7569 = vmatpush1.bf16.msra.mxu1 %v20020_v13 }
 0x82c   : > { %7570 = vmatprep.subr.bf16.mxu1 %v20025_v46 }
 0x82f   : > { %7571 = vmatpush1.bf16.msra.mxu1 %v20023_v15 }
 0x830   : > { %7572 = vmatprep.subr.bf16.mxu1 %v20028_v18 }
 0x833   : > { %7573 = vmatpush1.bf16.msra.mxu1 %v20026_v21 }
 0x834   : > { %7574 = vmatprep.subr.bf16.mxu1 %v20031_v22  ;;  %v20070_v22 = vld [vmem:[#allocation12 + $0x80] sm:$0xff]  }
 0x837   : > { %7575 = vmatpush1.bf16.msra.mxu1 %v20029_v49 }
 0x838   : > { %7576 = vmatprep.subr.bf16.mxu1 %v20034_v14  ;;  %v20071_v14 = vld [vmem:[#allocation12 + $0xc8] sm:$0xff]  }
 0x83b   : > { %7577 = vmatpush1.bf16.msra.mxu1 %v20032_v20 }
 0x83c   : > { %7578 = vmatprep.subr.bf16.mxu1 %v20037_v23 }
 0x83f   : > { %7579 = vmatpush1.bf16.msra.mxu1 %v20035_v24 }
 0x840   : > { %7580 = vmatprep.subr.bf16.mxu1 %v20040_v25 }
 0x843   : > { %7581 = vmatpush1.bf16.msra.mxu1 %v20038_v26  ;;  %v20072_v26 = vld [vmem:[#allocation12 + $0x88] sm:$0xff]  }
 0x844   : > { %7582 = vmatprep.subr.bf16.mxu1 %v20043_v34  ;;  %v20073_v34 = vld [vmem:[#allocation12 + $0xd0] sm:$0xff]  }
 0x847   : > { %7583 = vmatpush1.bf16.msra.mxu1 %v20041_v27  ;;  %v20074_v27 = vld [vmem:[#allocation12 + $0x90] sm:$0xff]  }
 0x848   : > { %7584 = vmatprep.subr.bf16.mxu1 %v20046_v48  ;;  %v20075_v48 = vld [vmem:[#allocation12 + $0xd8] sm:$0xff]  }
 0x84b   : > { %7585 = vmatpush1.bf16.msra.mxu1 %v20044_v28  ;;  %v20076_v28 = vld [vmem:[#allocation12 + $0x98] sm:$0xff]  }
 0x84c   : > { %7586 = vmatprep.subr.bf16.mxu1 %v20049_v33  ;;  %v20077_v33 = vld [vmem:[#allocation12 + $0xe0] sm:$0xff]  }
 0x84f   : > { %7587 = vmatpush1.bf16.msra.mxu1 %v20047_v37  ;;  %v20078_v37 = vld [vmem:[#allocation12 + $0xa0] sm:$0xff]  }
 0x850   : > { %7588 = vmatprep.subr.bf16.mxu1 %v20052_v38  ;;  %v20079_v38 = vld [vmem:[#allocation12 + $0xe8] sm:$0xff]  }
 0x853   : > { %7589 = vmatpush1.bf16.msra.mxu1 %v20050_v39  ;;  %v20080_v39 = vld [vmem:[#allocation12 + $0xa8] sm:$0xff]  }
 0x854   : > { %18167 = vmatprep.subr.bf16.mxu1 %v20053_v41  ;;  %v20081_v41 = vld [vmem:[#allocation12 + $0xf0] sm:$0xff]  }
 0x856   : > { %7591 = vmatmul.mubr.bf16.vlgmr.msra.gmra.mrb[12].mxu1 %v22673_v5 }
 0x857   : > { %18168 = vmatpush3.bf16.msra.mxu1 %v20054_v19  ;;  %v20082_v19 = vld [vmem:[#allocation12 + $0xb0] sm:$0xff]  }
 0x858   : > { %18169 = vmatprep.subr.bf16.mxu1 %v20055_v47  ;;  %v20083_v47 = vld [vmem:[#allocation12 + $0xf8] sm:$0xff]  }
 0x85b   : > { %18170 = vmatpush3.bf16.msra.mxu1 %v20056_v17  ;;  %v20084_v17 = vld [vmem:[#allocation12 + $0xb8] sm:$0xff]  }
 0x85c   : > { %18171 = vmatprep.subr.bf16.mxu1 %v20057_v50  ;;  %v20085_v50 = vld [vmem:[%s23232_s28 + $0x40] sm:$0xff]  }
 0x85d   : > { %18211 = vmatprep.subr.bf16.mxu0 %v20085_v50 }
 0x85f   : > { %18172 = vmatpush3.bf16.msra.mxu1 %v20058_v32  ;;  %v20086_v32 = vld [vmem:[%s23232_s28] sm:$0xff]  }
 0x860   : > { %18173 = vmatprep.subr.bf16.mxu1 %v20059_v51  ;;  %v20087_v51 = vld [vmem:[%s23232_s28 + $0x48] sm:$0xff]   ;;  %18212 = vmatpush3.bf16.msra.mxu0 %v20086_v32 }
 0x861   : > { %18213 = vmatprep.subr.bf16.mxu0 %v20087_v51 }
 0x863   : > { %18174 = vmatpush3.bf16.msra.mxu1 %v20060_v52  ;;  %v20088_v52 = vld [vmem:[%s23232_s28 + $0x8] sm:$0xff]  }
 0x864   : > { %18175 = vmatprep.subr.bf16.mxu1 %v20061_v53  ;;  %v20089_v53 = vld [vmem:[%s23232_s28 + $0x50] sm:$0xff]   ;;  %18214 = vmatpush3.bf16.msra.mxu0 %v20088_v52 }
 0x865   : > { %18215 = vmatprep.subr.bf16.mxu0 %v20089_v53 }
 0x867   : > { %18176 = vmatpush3.bf16.msra.mxu1 %v20062_v54  ;;  %v20090_v54 = vld [vmem:[%s23232_s28 + $0x10] sm:$0xff]  }
 0x868   : > { %18177 = vmatprep.subr.bf16.mxu1 %v20063_v55  ;;  %v20091_v55 = vld [vmem:[%s23232_s28 + $0x58] sm:$0xff]   ;;  %18216 = vmatpush3.bf16.msra.mxu0 %v20090_v54 }
 0x869   : > { %18217 = vmatprep.subr.bf16.mxu0 %v20091_v55  ;;  %v20105_v55 = vld [vmem:[%s23234_s25] sm:$0xff]  }
 0x86b   : > { %18178 = vmatpush3.bf16.msra.mxu1 %v20064_v56  ;;  %v20092_v56 = vld [vmem:[%s23232_s28 + $0x18] sm:$0xff]  }
 0x86c   : > { %18179 = vmatprep.subr.bf16.mxu1 %v20065_v57  ;;  %18218 = vmatpush3.bf16.msra.mxu0 %v20092_v56  ;;  %v20093_v57 = vld [vmem:[%s23232_s28 + $0x60] sm:$0xff]  }
 0x86d   : > { %18219 = vmatprep.subr.bf16.mxu0 %v20093_v57  ;;  %v20106_v57 = vld [vmem:[%s23234_s25 + $0x8] sm:$0xff]  }
 0x86f   : > { %18180 = vmatpush3.bf16.msra.mxu1 %v20066_v58  ;;  %v20094_v58 = vld [vmem:[%s23232_s28 + $0x20] sm:$0xff]  }
 0x870   : > { %18181 = vmatprep.subr.bf16.mxu1 %v20067_v59  ;;  %18220 = vmatpush3.bf16.msra.mxu0 %v20094_v58  ;;  %v20095_v59 = vld [vmem:[%s23232_s28 + $0x68] sm:$0xff]   ;;  %v20107_v58 = vld [vmem:[%s23234_s25 + $0x10] sm:$0xff]  }
 0x871   : > { %18221 = vmatprep.subr.bf16.mxu0 %v20095_v59  ;;  %v20108_v59 = vld [vmem:[%s23234_s25 + $0x18] sm:$0xff]  }
 0x873   : > { %18182 = vmatpush3.bf16.msra.mxu1 %v20068_v60  ;;  %v20096_v60 = vld [vmem:[%s23232_s28 + $0x28] sm:$0xff]  }
 0x874   : > { %18189 = vmatprep.subr.bf16.mxu1 %v20069_v61  ;;  %18222 = vmatpush3.bf16.msra.mxu0 %v20096_v60  ;;  %v20097_v61 = vld [vmem:[%s23232_s28 + $0x70] sm:$0xff]  }
 0x875   : > { %18223 = vmatprep.subr.bf16.mxu0 %v20097_v61  ;;  %v20109_v61 = vld [vmem:[%s23236_s1] sm:$0xff]  }
 0x878   : > { %18224 = vmatpush3.bf16.msra.mxu0 %v20098_v62  ;;  %v20110_v62 = vld [vmem:[%s23236_s1 + $0x8] sm:$0xff]  }
 0x929   : > { %v7592_v16 = vpop.f32.mrb[12].mxu1 }
 0x92a   : > { %v18505_v1 = vadd.f32 %v7592_v16, %v7188_v63  ;;  %v7594_v2 = vpop.f32.mrb[13].mxu1 }
 0x92b   : > { %v18506_v3 = vadd.f32 %v7594_v2, %v7192_v0  ;;  %v7596_v4 = vpop.f32.mrb[14].mxu1 }
 0x92c   : > { %vm7601_vm14 = vcmp.gt.f32.partialorder %v18505_v1, 0.0  ;;  %v7605_v40 = vmul.f32 0.01, %v18505_v1  ;;  %v18507_v5 = vadd.f32 %v7596_v4, %v7188_v63  ;;  %v7598_v6 = vpop.f32.mrb[15].mxu1  ;;  %v20099_v63 = vld [vmem:[%s23232_s28 + $0x78] sm:$0xff]  }
 0x92d   : > { %vm7602_vm15 = vcmp.gt.f32.partialorder %v18506_v3, 0.0  ;;  %v7606_v7 = vmul.f32 0.01, %v18506_v3  ;;  %v18508_v8 = vadd.f32 %v7598_v6, %v7192_v0  ;;  %v20100_v0 = vld [vmem:[%s23232_s28 + $0x38] sm:$0xff]   ;;  %18225 = vmatprep.subr.bf16.mxu0 %v20099_v63  ;;  %v20111_v63 = vld [vmem:[%s23236_s1 + $0x10] sm:$0xff]  }
 0x92e   : > { %v7609_v9 = vsel %vm7601_vm14, %v18505_v1, %v7605_v40  ;;  %vm7603_vm3 = vcmp.gt.f32.partialorder %v18507_v5, 0.0  ;;  %v7607_v10 = vmul.f32 0.01, %v18507_v5  ;;  %18226 = vmatpush3.bf16.msra.mxu0 %v20100_v0  ;;  %v20112_v0 = vld [vmem:[%s23236_s1 + $0x18] sm:$0xff]   ;;  %s23253_s1 = sld [smem:[#allocation49_spill]] }
 0x92f   : > { %vm7604_vm4 = vcmp.gt.f32.partialorder %v18508_v8, 0.0  ;;  %v7608_v36 = vmul.f32 0.01, %v18508_v8  ;;  %v7610_v11 = vsel %vm7602_vm15, %v18506_v3, %v7606_v7  ;;  %v7617_v35 = vrot.slane %v7609_v9, 1  ;;  %18325 = vmatprep.subr.bf16.mxu0 %v21875_v31 }
 0x930   : > { %v7611_v12 = vsel %vm7603_vm3, %v18507_v5, %v7607_v10  ;;  %v7620_v18 = vrot.slane %v7610_v11, 1  ;;  %v17231_v5 = vld [vmem:[%s23233_s9] ss:$0 sm:$0xff]  ;;  %s23241_s9 = sld [smem:[#allocation61_spill]]  ;;  %vm8771_vm3 = vcmask 130048  }
 0x931   : > { %v7618_v13 = vrot.slane %v7611_v12, 1  ;;  %v7627_v46 = vpack.c.bf16 %v7611_v12, %v7609_v9  ;;  %v7612_v15 = vsel %vm7604_vm4, %v18508_v8, %v7608_v36  ;;  %vm8871_vm4 = vcmask 122880  }
 0x932   : > { %v7628_v21 = vpack.c.bf16 %v7612_v15, %v7610_v11  ;;  %v7621_v49 = vrot.slane %v7612_v15, 1  ;;  %8872 = vst.msk [vmem:[#allocation2] sm:$0x1] %vm8871_vm4, %v21875_v31  ;;  %8873 = vst.msk [vmem:[#allocation2 + $0x5] sm:$0x1] %vm8871_vm4, %v21875_v31 }
 0x933   : > { %v7619_v20 = vsel %vm1672_vm0, %v7617_v35, %v7618_v13  ;;  %9001 = vst.msk [vmem:[#allocation2 + $0x6] sm:$0x1] %vm8871_vm4, %v21875_v31 }
 0x934   : > { %7926 = vmatprep.mubr.bf16.mxu1 %v7628_v21  ;;  %v7622_v23 = vsel %vm1672_vm0, %v7620_v18, %v7621_v49  ;;  %v7629_v24 = vpack.c.bf16 %v7618_v13, %v7619_v20 }
 0x935   : > { %7927 = vmatmul.mubr.bf16.vlgmr.msra.gmra.mrb[16].mxu1 %v7627_v46  ;;  %v7630_v25 = vpack.c.bf16 %v7621_v49, %v7622_v23 }
 0x936   : > { %18190 = vmatpush3.bf16.msra.mxu1 %v20070_v22 }
 0x937   : > { %7967 = vmatprep.mubr.bf16.mxu1 %v7630_v25  ;;  %18191 = vmatprep.subr.bf16.mxu1 %v20071_v14  ;;  %v20102_v25 = vld [vmem:[%s23234_s25 + $0x28] sm:$0xff]  }
 0x93a   : > { %18192 = vmatpush3.bf16.msra.mxu1 %v20072_v26  ;;  %v20103_v26 = vld [vmem:[%s23234_s25 + $0x30] sm:$0xff]  }
 0x93b   : > { %18193 = vmatprep.subr.bf16.mxu1 %v20073_v34  ;;  %v20104_v34 = vld [vmem:[%s23234_s25 + $0x38] sm:$0xff]  }
 0x93e   : > { %18194 = vmatpush3.bf16.msra.mxu1 %v20074_v27 }
 0x93f   : > { %18195 = vmatprep.subr.bf16.mxu1 %v20075_v48  ;;  %v17264_v48 = vld [vmem:[%s23235_s2] ss:$0 sm:$0xff]  ;;  %s23242_s2 = sld [smem:[#allocation44_spill]] }
 0x942   : > { %18196 = vmatpush3.bf16.msra.mxu1 %v20076_v28 }
 0x943   : > { %18197 = vmatprep.subr.bf16.mxu1 %v20077_v33 }
 0x946   : > { %18198 = vmatpush3.bf16.msra.mxu1 %v20078_v37 }
 0x947   : > { %18199 = vmatprep.subr.bf16.mxu1 %v20079_v38 }
 0x94a   : > { %18200 = vmatpush3.bf16.msra.mxu1 %v20080_v39 }
 0x94b   : > { %18201 = vmatprep.subr.bf16.mxu1 %v20081_v41 }
 0x94e   : > { %18202 = vmatpush3.bf16.msra.mxu1 %v20082_v19 }
 0x94f   : > { %18203 = vmatprep.subr.bf16.mxu1 %v20083_v47 }
 0x952   : > { %18204 = vmatpush3.bf16.msra.mxu1 %v20084_v17 }
 0x953   : > { %18301 = vmatprep.subr.bf16.mxu1 %v21875_v31 }
 0x955   : > { %7968 = vmatmul.mubr.bf16.vlgmr.msra.gmra.mrb[20].mxu1 %v7629_v24  ;;  %v20101_v24 = vld [vmem:[%s23234_s25 + $0x20] sm:$0xff]  }
 0x956   : > { %18302 = vmatpush3.bf16.msra.mxu1 %v20101_v24  ;;  %18309 = vmatprep.mubr.msk.bf16.mxu1 %vm21876_vm7, %v21875_v31 }
 0x957   : > { %18303 = vmatprep.subr.bf16.mxu1 %v21875_v31 }
 0x95a   : > { %18304 = vmatpush3.bf16.msra.mxu1 %v20102_v25  ;;  %v17298_v25 = vld [vmem:[%s23239_s17] ss:$0 sm:$0xff]  ;;  %s23244_s17 = sld [smem:[#allocation45_spill]] }
 0x95b   : > { %18305 = vmatprep.subr.bf16.mxu1 %v21875_v31 }
 0x95e   : > { %18306 = vmatpush3.bf16.msra.mxu1 %v20103_v26 }
 0x95f   : > { %18307 = vmatprep.subr.bf16.mxu1 %v21875_v31 }
 0x962   : > { %18308 = vmatpush3.bf16.msra.mxu1 %v20104_v34 }
 0x963   : > { %18313 = vmatprep.subr.bf16.mxu1 %v21875_v31 }
 0xa08   : > { %v18183_v16 = vpop.f32.mrb[16].mxu1 }
 0xa09   : > { %v18184_v1 = vpop.f32.mrb[17].mxu1 }
 0xa0a   : > { %v18185_v2 = vadd.f32 %v18184_v1, %v18183_v16  ;;  %v18186_v3 = vpop.f32.mrb[18].mxu1 }
 0xa0b   : > { %v18187_v4 = vpop.f32.mrb[19].mxu1 }
 0xa0c   : > { %v18188_v40 = vadd.f32 %v18187_v4, %v18186_v3  ;;  %v7929_v8 = vadd.f32 %v18185_v2, %v17231_v5 }
 0xa0e   : > { %v7932_v11 = vadd.f32 %v18188_v40, %v17231_v5  ;;  %v17291_v40 = vld [vmem:[%s23237_s22] ss:$0 sm:$0xff]  ;;  %s23243_s22 = sld [smem:[#allocation62_spill]] }
 0xa28   : > { %v18205_v6 = vpop.f32.mrb[20].mxu1 }
 0xa29   : > { %v18206_v7 = vpop.f32.mrb[21].mxu1 }
 0xa2a   : > { %v18207_v9 = vadd.f32 %v18206_v7, %v18205_v6  ;;  %v18208_v10 = vpop.f32.mrb[22].mxu1 }
 0xa2b   : > { %v18209_v36 = vpop.f32.mrb[23].mxu1 }
 0xa2c   : > { %v7970_v12 = vadd.f32 %v18207_v9, %v7929_v8  ;;  %v18210_v35 = vadd.f32 %v18209_v36, %v18208_v10 }
 0xa2e   : > { %vm7976_vm5 = vcmp.gt.f32.partialorder %v7970_v12, 0.0  ;;  %v7978_v13 = vmul.f32 0.01, %v7970_v12  ;;  %v7973_v46 = vadd.f32 %v18210_v35, %v7932_v11 }
 0xa30   : > { %v7980_v15 = vsel %vm7976_vm5, %v7970_v12, %v7978_v13  ;;  %vm7977_vm6 = vcmp.gt.f32.partialorder %v7973_v46, 0.0  ;;  %v7979_v18 = vmul.f32 0.01, %v7973_v46  ;;  %vm8877_vm5 = vcmask 126977  }
 0xa31   : > { %v7984_v22 = vrot.slane %v7980_v15, 1 }
 0xa32   : > { %v7981_v21 = vsel %vm7977_vm6, %v7973_v46, %v7979_v18  ;;  %v20114_v18 = vld [vmem:[%s23238_s0 + $0x8] sm:$0xff]  }
 0xa33   : > { %v7985_v49 = vrot.slane %v7981_v21, 1  ;;  %v7989_v14 = vpack.c.bf16 %v7981_v21, %v7980_v15  ;;  %v20113_v15 = vld [vmem:[%s23238_s0] sm:$0xff]   ;;  %v20115_v21 = vld [vmem:[%s23238_s0 + $0x10] sm:$0xff]  }
 0xa35   : > { %v7986_v20 = vsel %vm1672_vm0, %v7984_v22, %v7985_v49  ;;  %v20116_v22 = vld [vmem:[%s23238_s0 + $0x18] sm:$0xff]   ;;  %s23251_s0 = sld [smem:[#allocation48_spill]] }
 0xa36   : > { %v7990_v23 = vpack.c.bf16 %v7985_v49, %v7986_v20 }
 0xa38   : > { %8158 = vmatprep.mubr.bf16.mxu0 %v7990_v23 }
 0xa39   : > { %8159 = vmatmul.mubr.bf16.vlgmr.msra.gmra.mrb[12].mxu0 %v7989_v14 }
 0xa3a   : > { %18329 = vmatprep.mubr.msk.bf16.mxu0 %vm21876_vm7, %v21875_v31  ;;  %18326 = vmatpush3.bf16.msra.mxu0 %v20111_v63 }
 0xa3b   : > { %18327 = vmatprep.subr.bf16.mxu0 %v21875_v31 }
 0xa3e   : > { %18328 = vmatpush3.bf16.msra.mxu0 %v20112_v0 }
 0xa3f   : > { %18341 = vmatprep.subr.bf16.mxu0 %v21875_v31 }
 0xb0c   : > { %v18227_v27 = vpop.f32.mrb[12].mxu0 }
 0xb0d   : > { %v18228_v28 = vpop.f32.mrb[13].mxu0 }
 0xb0e   : > { %v18229_v33 = vadd.f32 %v18228_v28, %v18227_v27  ;;  %v18230_v37 = vpop.f32.mrb[14].mxu0 }
 0xb0f   : > { %v18231_v38 = vpop.f32.mrb[15].mxu0 }
 0xb10   : > { %v8161_v39 = vadd.f32 %v18229_v33, %v17264_v48  ;;  %v18232_v41 = vadd.f32 %v18231_v38, %v18230_v37 }
 0xb12   : > { %v8169_v19 = vmul.f32 0.01, %v8161_v39  ;;  %v8164_v47 = vadd.f32 %v18232_v41, %v17264_v48  ;;  %vm8167_vm8 = vcmp.gt.f32.partialorder %v8161_v39, 0.0 }
 0xb14   : > { %vm8168_vm9 = vcmp.gt.f32.partialorder %v8164_v47, 0.0  ;;  %v8170_v17 = vmul.f32 0.01, %v8164_v47  ;;  %v8171_v50 = vsel %vm8167_vm8, %v8161_v39, %v8169_v19  ;;  %vm9005_vm8 = vcmask 128001  }
 0xb15   : > { %v8173_v60 = vpack.c.bf16 %v8171_v50, %v8171_v50 }
 0xb16   : > { %v8172_v32 = vsel %vm8168_vm9, %v8164_v47, %v8170_v17  ;;  %v20117_v17 = vld [vmem:[%s23240_s13] sm:$0xff]   ;;  %vm9128_vm9 = vcmask 253952  }
 0xb17   : > { %v8182_v51 = vpack.c.bf16 %v8172_v32, %v8171_v50  ;;  %v20118_v50 = vld [vmem:[%s23240_s13 + $0x8] sm:$0xff]   ;;  %v20119_v32 = vld [vmem:[%s23240_s13 + $0x10] sm:$0xff]   ;;  %9130 = vst.msk [vmem:[#allocation2 + $0x7] sm:$0x1] %vm9128_vm9, %v21875_v31  ;;  %9274 = vst.msk [vmem:[#allocation2 + $0x20] sm:$0x1] %vm9128_vm9, %v21875_v31 }
 0xb18   : > { %9421 = vst.msk [vmem:[#allocation2 + $0x21] sm:$0x1] %vm9128_vm9, %v21875_v31 }
 0xb19   : > { %v8194_v52 = vshll.u32 %v8182_v51, 16  ;;  %v8192_v53 = vshrl.u32 %v8182_v51, 16  ;;  %v20120_v51 = vld [vmem:[%s23240_s13 + $0x18] sm:$0xff]  }
 0xb1b   : > { %v8196_v54 = vrot.slane %v8194_v52, 1 }
 0xb1d   : > { %v8197_v56 = vor.u32 %v8196_v54, %v8192_v53 }
 0xb1f   : > { %18310 = vmatmul.mubr.msk.bf16.vlgmr.msra.gmra.mrb[24].mxu1 %vm8222_vm10, %v8197_v56 }
 0xb20   : > { %18314 = vmatpush3.bf16.msra.mxu1 %v20105_v55  ;;  %18321 = vmatprep.mubr.msk.bf16.mxu1 %vm21876_vm7, %v21875_v31 }
 0xb21   : > { %18315 = vmatprep.subr.bf16.mxu1 %v21875_v31 }
 0xb24   : > { %18316 = vmatpush3.bf16.msra.mxu1 %v20106_v57  ;;  %v17305_v57 = vld [vmem:[%s23241_s9] ss:$0 sm:$0xff]  ;;  %s23245_s9 = sld [smem:[#allocation63_spill]] }
 0xb25   : > { %18317 = vmatprep.subr.bf16.mxu1 %v21875_v31 }
 0xb28   : > { %18318 = vmatpush3.bf16.msra.mxu1 %v20107_v58 }
 0xb29   : > { %18319 = vmatprep.subr.bf16.mxu1 %v21875_v31 }
 0xb2c   : > { %18320 = vmatpush3.bf16.msra.mxu1 %v20108_v59 }
 0xb2d   : > { %18333 = vmatprep.subr.bf16.mxu1 %v21875_v31 }
 0xb2f   : > { %18322 = vmatmul.mubr.msk.bf16.vlgmr.msra.gmra.mrb[28].mxu1 %vm8222_vm10, %v8173_v60 }
 0xb30   : > { %18337 = vmatprep.mubr.msk.bf16.mxu1 %vm21876_vm7, %v21875_v31  ;;  %18334 = vmatpush3.bf16.msra.mxu1 %v20109_v61 }
 0xb31   : > { %18335 = vmatprep.subr.bf16.mxu1 %v21875_v31 }
 0xb34   : > { %18336 = vmatpush3.bf16.msra.mxu1 %v20110_v62 }
 0xb35   : > { %18349 = vmatprep.subr.bf16.mxu1 %v21875_v31 }
 0xbf2   : > { %v8260_v16 = vpop.f32.mrb[24].mxu1 }
 0xbf3   : > { %v18311_v1 = vpop.f32.mrb[25].mxu1 }
 0xbf4   : > { %v8263_v2 = vpop.f32.mrb[26].mxu1 }
 0xbf5   : > { %v18312_v3 = vpop.f32.mrb[27].mxu1 }
 0xc02   : > { %v8327_v4 = vpop.f32.mrb[28].mxu1 }
 0xc03   : > { %v8328_v5 = vadd.f32 %v8327_v4, %v8260_v16  ;;  %v18323_v6 = vpop.f32.mrb[29].mxu1 }
 0xc04   : > { %v8330_v7 = vpop.f32.mrb[30].mxu1 }
 0xc05   : > { %v8340_v8 = vadd.f32 %v17291_v40, %v8328_v5  ;;  %v18324_v9 = vpop.f32.mrb[31].mxu1  ;;  %v20121_v40 = vld [vmem:[%s23242_s2] sm:$0xff]   ;;  %v20122_v5 = vld [vmem:[%s23242_s2 + $0x8] sm:$0xff]  }
 0xc07   : > { %vm8341_vm11 = vcmp.gt.f32.partialorder %v8340_v8, 0.0  ;;  %v8342_v10 = vmul.f32 0.01, %v8340_v8 }
 0xc09   : > { %v8343_v36 = vsel %vm8341_vm11, %v8340_v8, %v8342_v10 }
 0xc0a   : > { %v8344_v11 = vpack.c.bf16 %v8343_v36, %v8343_v36  ;;  %v17312_v36 = vld [vmem:[%s23243_s22] ss:$0 sm:$0xff]  ;;  %s23246_s22 = sld [smem:[#allocation64_spill]] }
 0xc0c   : > { %v8356_v12 = vshll.u32 %v8344_v11, 16  ;;  %18338 = vmatmul.mubr.msk.bf16.vlgmr.msra.gmra.mrb[32].mxu1 %vm8372_vm12, %v8344_v11  ;;  %v8354_v35 = vshrl.u32 %v8344_v11, 16 }
 0xc0d   : > { %18353 = vmatprep.mubr.msk.bf16.mxu1 %vm21876_vm7, %v21875_v31  ;;  %18350 = vmatpush3.bf16.msra.mxu1 %v20113_v15 }
 0xc0e   : > { %v8358_v13 = vrot.slane %v8356_v12, 1  ;;  %18351 = vmatprep.subr.bf16.mxu1 %v21875_v31 }
 0xc10   : > { %v8359_v46 = vor.u32 %v8358_v13, %v8354_v35 }
 0xc11   : > { %18352 = vmatpush3.bf16.msra.mxu1 %v20114_v18 }
 0xc12   : > { %18330 = vmatmul.mubr.msk.bf16.vlgmr.msra.gmra.mrb[16].mxu0 %vm8372_vm12, %v8359_v46  ;;  %18365 = vmatprep.subr.bf16.mxu1 %v21875_v31 }
 0xc13   : > { %18345 = vmatprep.mubr.msk.bf16.mxu0 %vm21876_vm7, %v21875_v31  ;;  %18342 = vmatpush3.bf16.msra.mxu0 %v20115_v21 }
 0xc14   : > { %18343 = vmatprep.subr.bf16.mxu0 %v21875_v31 }
 0xc17   : > { %18344 = vmatpush3.bf16.msra.mxu0 %v20116_v22 }
 0xc18   : > { %18357 = vmatprep.subr.bf16.mxu0 %v21875_v31 }
 0xcdf   : > { %v8464_v49 = vpop.f32.mrb[32].mxu1 }
 0xce0   : > { %v18339_v14 = vpop.f32.mrb[33].mxu1 }
 0xce1   : > { %v8467_v20 = vpop.f32.mrb[34].mxu1 }
 0xce2   : > { %v18340_v23 = vpop.f32.mrb[35].mxu1 }
 0xce3   : > { %v20123_v23 = vld [vmem:[%s23244_s17] sm:$0xff]  }
 0xce5   : > { %v8410_v24 = vpop.f32.mrb[16].mxu0 }
 0xce6   : > { %v8465_v26 = vadd.f32 %v8464_v49, %v8410_v24  ;;  %v18331_v34 = vpop.f32.mrb[17].mxu0  ;;  %v20124_v24 = vld [vmem:[%s23244_s17 + $0x8] sm:$0xff]  }
 0xce7   : > { %v8413_v27 = vpop.f32.mrb[18].mxu0 }
 0xce8   : > { %v8477_v48 = vadd.f32 %v17298_v25, %v8465_v26  ;;  %v18332_v28 = vpop.f32.mrb[19].mxu0 }
 0xce9   : > { %v17317_v28 = vld [vmem:[%s23245_s9] ss:$0 sm:$0xff]  ;;  %s23247_s9 = sld [smem:[#allocation46_spill]] }
 0xcea   : > { %vm8478_vm13 = vcmp.gt.f32.partialorder %v8477_v48, 0.0  ;;  %v8479_v33 = vmul.f32 0.01, %v8477_v48 }
 0xcec   : > { %v8480_v37 = vsel %vm8478_vm13, %v8477_v48, %v8479_v33  ;;  %vm9134_vm13 = vcmask 260097  }
 0xced   : > { %v8481_v38 = vpack.c.bf16 %v8480_v37, %v8480_v37 }
 0xcef   : > { %v8493_v39 = vshll.u32 %v8481_v38, 16  ;;  %18354 = vmatmul.mubr.msk.bf16.vlgmr.msra.gmra.mrb[36].mxu1 %vm8372_vm12, %v8481_v38  ;;  %v8491_v41 = vshrl.u32 %v8481_v38, 16 }
 0xcf0   : > { %18369 = vmatprep.mubr.msk.bf16.mxu1 %vm21876_vm7, %v21875_v31  ;;  %18366 = vmatpush3.bf16.msra.mxu1 %v20117_v17 }
 0xcf1   : > { %v8495_v19 = vrot.slane %v8493_v39, 1  ;;  %18367 = vmatprep.subr.bf16.mxu1 %v21875_v31 }
 0xcf3   : > { %v8496_v47 = vor.u32 %v8495_v19, %v8491_v41 }
 0xcf4   : > { %18368 = vmatpush3.bf16.msra.mxu1 %v20118_v50 }
 0xcf5   : > { %18346 = vmatmul.mubr.msk.bf16.vlgmr.msra.gmra.mrb[20].mxu0 %vm8372_vm12, %v8496_v47  ;;  %18379 = vmatprep.subr.bf16.mxu1 %v21875_v31 }
 0xcf6   : > { %18361 = vmatprep.mubr.msk.bf16.mxu0 %vm21876_vm7, %v21875_v31  ;;  %18358 = vmatpush3.bf16.msra.mxu0 %v20119_v32 }
 0xcf7   : > { %18359 = vmatprep.subr.bf16.mxu0 %v21875_v31 }
 0xcfa   : > { %18360 = vmatpush3.bf16.msra.mxu0 %v20120_v51 }
 0xcfb   : > { %18373 = vmatprep.subr.bf16.mxu0 %v21875_v31 }
 0xdc2   : > { %v8600_v52 = vpop.f32.mrb[36].mxu1 }
 0xdc3   : > { %v18355_v53 = vpop.f32.mrb[37].mxu1 }
 0xdc4   : > { %v8603_v54 = vpop.f32.mrb[38].mxu1  ;;  %v20125_v53 = vld [vmem:[#allocation14] sm:$0xff]  }
 0xdc5   : > { %v18356_v55 = vpop.f32.mrb[39].mxu1  ;;  %v20126_v54 = vld [vmem:[#allocation14 + $0x8] sm:$0xff]  }
 0xdc8   : > { %v8546_v56 = vpop.f32.mrb[20].mxu0 }
 0xdc9   : > { %v8601_v58 = vadd.f32 %v8600_v52, %v8546_v56  ;;  %v18347_v59 = vpop.f32.mrb[21].mxu0 }
 0xdca   : > { %v8549_v60 = vpop.f32.mrb[22].mxu0 }
 0xdcb   : > { %v8613_v61 = vadd.f32 %v17305_v57, %v8601_v58  ;;  %v18348_v62 = vpop.f32.mrb[23].mxu0  ;;  %v17322_v60 = vld [vmem:[%s23246_s22] ss:$0 sm:$0xff]  ;;  %s23248_s22 = sld [smem:[#allocation65_spill]] }
 0xdcd   : > { %vm8614_vm14 = vcmp.gt.f32.partialorder %v8613_v61, 0.0  ;;  %v8615_v63 = vmul.f32 0.01, %v8613_v61 }
 0xdcf   : > { %v8616_v0 = vsel %vm8614_vm14, %v8613_v61, %v8615_v63 }
 0xdd0   : > { %v8617_v16 = vpack.c.bf16 %v8616_v0, %v8616_v0 }
 0xdd2   : > { %v8629_v1 = vshll.u32 %v8617_v16, 16  ;;  %18370 = vmatmul.mubr.msk.bf16.vlgmr.msra.gmra.mrb[40].mxu1 %vm8372_vm12, %v8617_v16  ;;  %v8627_v2 = vshrl.u32 %v8617_v16, 16 }
 0xdd3   : > { %18381 = vmatprep.mubr.msk.bf16.mxu1 %vm21876_vm7, %v21875_v31  ;;  %18380 = vmatpush3.bf16.msra.mxu1 %v20121_v40 }
 0xdd4   : > { %v8631_v3 = vrot.slane %v8629_v1, 1  ;;  %18391 = vmatprep.subr.bf16.mxu1 %v21875_v31 }
 0xdd6   : > { %v8632_v4 = vor.u32 %v8631_v3, %v8627_v2 }
 0xdd8   : > { %18362 = vmatmul.mubr.msk.bf16.vlgmr.msra.gmra.mrb[24].mxu0 %vm8372_vm12, %v8632_v4 }
 0xdd9   : > { %18375 = vmatprep.mubr.msk.bf16.mxu0 %vm21876_vm7, %v21875_v31  ;;  %18374 = vmatpush3.bf16.msra.mxu0 %v20122_v5 }
 0xdda   : > { %18385 = vmatprep.subr.bf16.mxu0 %v21875_v31 }
 0xea5   : > { %v8736_v6 = vpop.f32.mrb[40].mxu1 }
 0xea6   : > { %v18371_v7 = vpop.f32.mrb[41].mxu1 }
 0xea7   : > { %v8739_v8 = vpop.f32.mrb[42].mxu1 }
 0xea8   : > { %v18372_v9 = vpop.f32.mrb[43].mxu1 }
 0xea9   : > { %v20127_v9 = vld [vmem:[%s23247_s9] sm:$0xff]  }
 0xeab   : > { %v8682_v10 = vpop.f32.mrb[24].mxu0 }
 0xeac   : > { %v8737_v11 = vadd.f32 %v8736_v6, %v8682_v10  ;;  %v18363_v12 = vpop.f32.mrb[25].mxu0  ;;  %v20128_v10 = vld [vmem:[%s23247_s9 + $0x8] sm:$0xff]  }
 0xead   : > { %v8685_v35 = vpop.f32.mrb[26].mxu0 }
 0xeae   : > { %v8749_v13 = vadd.f32 %v17312_v36, %v8737_v11  ;;  %v18364_v46 = vpop.f32.mrb[27].mxu0  ;;  %v20129_v36 = vld [vmem:[%s23247_s9 + $0x10] sm:$0xff]   ;;  %v20130_v11 = vld [vmem:[%s23247_s9 + $0x18] sm:$0xff]  }
 0xeb0   : > { %vm8750_vm15 = vcmp.gt.f32.partialorder %v8749_v13, 0.0  ;;  %v8751_v15 = vmul.f32 0.01, %v8749_v13 }
 0xeb2   : > { %v8752_v18 = vsel %vm8750_vm15, %v8749_v13, %v8751_v15  ;;  %vm9278_vm15 = vcmask 261121  }
 0xeb3   : > { %v8753_v21 = vpack.c.bf16 %v8752_v18, %v8752_v18  ;;  %v17327_v18 = vld [vmem:[%s23248_s22] ss:$0 sm:$0xff]  ;;  %s23250_s22 = sld [smem:[#allocation66_spill]] }
 0xeb5   : > { %v8761_v22 = vshll.u32 %v8753_v21, 16  ;;  %18382 = vmatmul.mubr.msk.bf16.vlgmr.msra.gmra.mrb[44].mxu1 %vm8771_vm3, %v8753_v21  ;;  %v8759_v49 = vshrl.u32 %v8753_v21, 16 }
 0xeb6   : > { %18393 = vmatprep.mubr.msk.bf16.mxu1 %vm21876_vm7, %v21875_v31  ;;  %18392 = vmatpush3.bf16.msra.mxu1 %v20123_v23 }
 0xeb7   : > { %v8763_v14 = vrot.slane %v8761_v22, 1  ;;  %18403 = vmatprep.subr.bf16.mxu1 %v21875_v31 }
 0xeb9   : > { %v8764_v20 = vor.u32 %v8763_v14, %v8759_v49 }
 0xebb   : > { %18376 = vmatmul.mubr.msk.bf16.vlgmr.msra.gmra.mrb[28].mxu0 %vm8771_vm3, %v8764_v20 }
 0xebc   : > { %18387 = vmatprep.mubr.msk.bf16.mxu0 %vm21876_vm7, %v21875_v31  ;;  %18386 = vmatpush3.bf16.msra.mxu0 %v20124_v24 }
 0xebd   : > { %18397 = vmatprep.subr.bf16.mxu0 %v21875_v31 }
 0xf88   : > { %v8857_v25 = vpop.f32.mrb[44].mxu1 }
 0xf89   : > { %v18383_v26 = vpop.f32.mrb[45].mxu1 }
 0xf8a   : > { %v8860_v34 = vpop.f32.mrb[46].mxu1 }
 0xf8b   : > { %v18384_v27 = vpop.f32.mrb[47].mxu1 }
 0xf8e   : > { %v8809_v48 = vpop.f32.mrb[28].mxu0 }
 0xf8f   : > { %v8858_v33 = vadd.f32 %v8857_v25, %v8809_v48  ;;  %v18377_v37 = vpop.f32.mrb[29].mxu0 }
 0xf90   : > { %v8812_v38 = vpop.f32.mrb[30].mxu0  ;;  %v20131_v37 = vld [vmem:[%s23249_s26] sm:$0xff]  }
 0xf91   : > { %v8870_v39 = vadd.f32 %v17317_v28, %v8858_v33  ;;  %v18378_v41 = vpop.f32.mrb[31].mxu0  ;;  %v20132_v38 = vld [vmem:[%s23249_s26 + $0x8] sm:$0xff]  }
 0xf92   : > { %v20134_v41 = vld [vmem:[%s23249_s26 + $0x18] sm:$0xff]  }
 0xf93   : > { %v8875_v19 = vrot.slane %v8870_v39, 7  ;;  %v20133_v39 = vld [vmem:[%s23249_s26 + $0x10] sm:$0xff]  }
 0xf95   : > { %8878 = vst.msk [vmem:[#allocation2] sm:$0x1e] %vm8877_vm5, %v8875_v19 }
 0xf9c   : > { %v8879_v47 = vld [vmem:[#allocation2] sm:$0x3f] }
 0xf9d   : > { %9000 = vst.msk [vmem:[#allocation2] sm:$0x1] %vm8871_vm4, %v21875_v31  ;;  %v8880_v17 = vpack.c.bf16 %v8879_v47, %v8879_v47  ;;  %vm9571_vm4 = vcmask 516096  }
 0xf9e   : > { %9573 = vst.msk [vmem:[#allocation2 + $0x22] sm:$0x1] %vm9571_vm4, %v21875_v31 }
 0xf9f   : > { %18394 = vmatmul.mubr.msk.bf16.vlgmr.msra.gmra.mrb[48].mxu1 %vm8771_vm3, %v8880_v17  ;;  %v8888_v50 = vshll.u32 %v8880_v17, 16  ;;  %v8886_v32 = vshrl.u32 %v8880_v17, 16 }
 0xfa0   : > { %18405 = vmatprep.mubr.msk.bf16.mxu1 %vm21876_vm7, %v21875_v31  ;;  %18404 = vmatpush3.bf16.msra.mxu1 %v20125_v53 }
 0xfa1   : > { %v8890_v51 = vrot.slane %v8888_v50, 1  ;;  %18417 = vmatprep.subr.bf16.mxu1 %v21875_v31 }
 0xfa3   : > { %v8891_v52 = vor.u32 %v8890_v51, %v8886_v32  ;;  %v17334_v51 = vld [vmem:[%s23250_s22] ss:$0 sm:$0xff]  ;;  %s23252_s22 = sld [smem:[#allocation67_spill]] }
 0xfa5   : > { %18388 = vmatmul.mubr.msk.bf16.vlgmr.msra.gmra.mrb[32].mxu0 %vm8771_vm3, %v8891_v52 }
 0xfa6   : > { %18399 = vmatprep.mubr.msk.bf16.mxu0 %vm21876_vm7, %v21875_v31  ;;  %18398 = vmatpush3.bf16.msra.mxu0 %v20126_v54 }
 0xfa7   : > { %18409 = vmatprep.subr.bf16.mxu0 %v21875_v31 }
0x1072   : > { %v8983_v55 = vpop.f32.mrb[48].mxu1 }
0x1073   : > { %v18395_v56 = vpop.f32.mrb[49].mxu1 }
0x1074   : > { %v8986_v57 = vpop.f32.mrb[50].mxu1 }
0x1075   : > { %v18396_v58 = vpop.f32.mrb[51].mxu1 }
0x1078   : > { %v8935_v59 = vpop.f32.mrb[32].mxu0 }
0x1079   : > { %v8984_v61 = vadd.f32 %v8983_v55, %v8935_v59  ;;  %v18389_v62 = vpop.f32.mrb[33].mxu0 }
0x107a   : > { %v8938_v63 = vpop.f32.mrb[34].mxu0 }
0x107b   : > { %v8996_v0 = vadd.f32 %v17322_v60, %v8984_v61  ;;  %v18390_v16 = vpop.f32.mrb[35].mxu0  ;;  %v9281_v60 = vld [vmem:[#allocation2 + $0x20] sm:$0x1] }
0x107d   : > { %vm8997_vm6 = vcmp.gt.f32.partialorder %v8996_v0, 0.0  ;;  %v8998_v1 = vmul.f32 0.01, %v8996_v0 }
0x107f   : > { %v8999_v2 = vsel %vm8997_vm6, %v8996_v0, %v8998_v1  ;;  %vm9576_vm6 = vcmask 1040384  }
0x1080   : > { %v9003_v3 = vrot.slane %v8999_v2, 7 }
0x1082   : > { %9006 = vst.msk [vmem:[#allocation2] sm:$0x3e] %vm9005_vm8, %v9003_v3  ;;  %v20135_v3 = vld [vmem:[%s23251_s0] sm:$0xff]   ;;  %vm9584_vm8 = vcmask 517120  }
0x1089   : > { %v9007_v4 = vld [vmem:[#allocation2] sm:$0x7f] }
0x108a   : > { %v9008_v40 = vpack.c.bf16 %v9007_v4, %v9007_v4  ;;  %9129 = vst.msk [vmem:[#allocation2] sm:$0x1] %vm9128_vm9, %v21875_v31  ;;  %v20137_v4 = vld [vmem:[%s23251_s0 + $0x10] sm:$0xff]  }
0x108c   : > { %18406 = vmatmul.mubr.msk.bf16.vlgmr.msra.gmra.mrb[52].mxu1 %vm8771_vm3, %v9008_v40  ;;  %v9016_v5 = vshll.u32 %v9008_v40, 16  ;;  %v9014_v6 = vshrl.u32 %v9008_v40, 16  ;;  %v20136_v40 = vld [vmem:[%s23251_s0 + $0x8] sm:$0xff]  }
0x108d   : > { %18421 = vmatprep.mubr.msk.bf16.mxu1 %vm21876_vm7, %v21875_v31  ;;  %18418 = vmatpush3.bf16.msra.mxu1 %v20127_v9 }
0x108e   : > { %v9018_v7 = vrot.slane %v9016_v5, 1  ;;  %18419 = vmatprep.subr.bf16.mxu1 %v21875_v31  ;;  %v20138_v5 = vld [vmem:[%s23251_s0 + $0x18] sm:$0xff]   ;;  %s23261_s0 = sshll.u32 %s22428_s16, 6 }
0x1090   : > { %v9019_v8 = vor.u32 %v9018_v7, %v9014_v6 }
0x1091   : > { %18420 = vmatpush3.bf16.msra.mxu1 %v20128_v10 }
0x1092   : > { %18400 = vmatmul.mubr.msk.bf16.vlgmr.msra.gmra.mrb[36].mxu0 %vm8771_vm3, %v9019_v8  ;;  %18433 = vmatprep.subr.bf16.mxu1 %v21875_v31 }
0x1093   : > { %18413 = vmatprep.mubr.msk.bf16.mxu0 %vm21876_vm7, %v21875_v31  ;;  %18410 = vmatpush3.bf16.msra.mxu0 %v20129_v36  ;;  %v17341_v36 = vld [vmem:[%s23252_s22] ss:$0 sm:$0xff]  ;;  %s23254_s22 = sld [smem:[#allocation68_spill]] }
0x1094   : > { %18411 = vmatprep.subr.bf16.mxu0 %v21875_v31 }
0x1097   : > { %18412 = vmatpush3.bf16.msra.mxu0 %v20130_v11 }
0x1098   : > { %18425 = vmatprep.subr.bf16.mxu0 %v21875_v31 }
0x115f   : > { %v9111_v12 = vpop.f32.mrb[52].mxu1 }
0x1160   : > { %v18407_v35 = vpop.f32.mrb[53].mxu1 }
0x1161   : > { %v9114_v13 = vpop.f32.mrb[54].mxu1 }
0x1162   : > { %v18408_v46 = vpop.f32.mrb[55].mxu1 }
0x1165   : > { %v9063_v15 = vpop.f32.mrb[36].mxu0 }
0x1166   : > { %v9112_v21 = vadd.f32 %v9111_v12, %v9063_v15  ;;  %v18401_v22 = vpop.f32.mrb[37].mxu0 }
0x1167   : > { %v9066_v49 = vpop.f32.mrb[38].mxu0 }
0x1168   : > { %v9124_v14 = vadd.f32 %v17327_v18, %v9112_v21  ;;  %v18402_v20 = vpop.f32.mrb[39].mxu0 }
0x116a   : > { %vm9125_vm11 = vcmp.gt.f32.partialorder %v9124_v14, 0.0  ;;  %v9126_v23 = vmul.f32 0.01, %v9124_v14 }
0x116c   : > { %v9127_v24 = vsel %vm9125_vm11, %v9124_v14, %v9126_v23 }
0x116d   : > { %v9132_v25 = vrot.slane %v9127_v24, 7 }
0x116f   : > { %9135 = vst.msk [vmem:[#allocation2] sm:$0x7e] %vm9134_vm13, %v9132_v25 }
0x1176   : > { %v9136_v26 = vld [vmem:[#allocation2] sm:$0xff] }
0x1177   : > { %9273 = vst.msk [vmem:[#allocation2] sm:$0x1] %vm9128_vm9, %v21875_v31  ;;  %v9137_v34 = vpack.c.bf16 %v9136_v26, %v9136_v26  ;;  %v20139_v26 = vld [vmem:[%s23253_s1] sm:$0xff]  }
0x1179   : > { %18422 = vmatmul.mubr.msk.bf16.vlgmr.msra.gmra.mrb[56].mxu1 %vm8372_vm12, %v9137_v34  ;;  %v9149_v27 = vshll.u32 %v9137_v34, 16  ;;  %v9147_v48 = vshrl.u32 %v9137_v34, 16  ;;  %v20140_v34 = vld [vmem:[%s23253_s1 + $0x8] sm:$0xff]  }
0x117a   : > { %18437 = vmatprep.mubr.msk.bf16.mxu1 %vm21876_vm7, %v21875_v31  ;;  %18434 = vmatpush3.bf16.msra.mxu1 %v20131_v37  ;;  %v20145_v37 = vld [vmem:[%s23253_s1 + $0x30] sm:$0xff]  }
0x117b   : > { %v9151_v28 = vrot.slane %v9149_v27, 1  ;;  %18435 = vmatprep.subr.bf16.mxu1 %v21875_v31  ;;  %v20141_v27 = vld [vmem:[%s23253_s1 + $0x20] sm:$0xff]  }
0x117d   : > { %v9152_v33 = vor.u32 %v9151_v28, %v9147_v48  ;;  %v20142_v48 = vld [vmem:[%s23253_s1 + $0x10] sm:$0xff]   ;;  %v20143_v28 = vld [vmem:[%s23253_s1 + $0x28] sm:$0xff]  }
0x117e   : > { %18436 = vmatpush3.bf16.msra.mxu1 %v20132_v38  ;;  %v20146_v38 = vld [vmem:[%s23253_s1 + $0x38] sm:$0xff]  }
0x117f   : > { %18414 = vmatmul.mubr.msk.bf16.vlgmr.msra.gmra.mrb[40].mxu0 %vm8372_vm12, %v9152_v33  ;;  %18449 = vmatprep.subr.bf16.mxu1 %v21875_v31  ;;  %v20144_v33 = vld [vmem:[%s23253_s1 + $0x18] sm:$0xff]   ;;  %s1654_s1 = scalar_lea.vmem [#allocation24], %s23261_s0  ;;  %s16181_s0 = scalar_lea.sflag [#allocation5], %s22428_s16 }
0x1180   : > { %18429 = vmatprep.mubr.msk.bf16.mxu0 %vm21876_vm7, %v21875_v31  ;;  %18426 = vmatpush3.bf16.msra.mxu0 %v20133_v39  ;;  %v20149_v39 = vld [vmem:[#allocation15 + $0x4] ss:$8 sps:$4 sm:$0xff]   ;;  %s16194_s2 = sshll.u32 %s1654_s1, 4  ;;  %s23056_s2 = int_to_ptr.vmem [resolvable:$true] %s16194_s2 }
0x1181   : > { %18427 = vmatprep.subr.bf16.mxu0 %v21875_v31 }
0x1184   : > { %18428 = vmatpush3.bf16.msra.mxu0 %v20134_v41 }
0x1185   : > { %18441 = vmatprep.subr.bf16.mxu0 %v21875_v31 }
0x124c   : > { %v9256_v19 = vpop.f32.mrb[56].mxu1 }
0x124d   : > { %v18423_v47 = vpop.f32.mrb[57].mxu1 }
0x124e   : > { %v9259_v17 = vpop.f32.mrb[58].mxu1 }
0x124f   : > { %v18424_v50 = vpop.f32.mrb[59].mxu1 }
0x1252   : > { %v9202_v32 = vpop.f32.mrb[40].mxu0 }
0x1253   : > { %v9257_v52 = vadd.f32 %v9256_v19, %v9202_v32  ;;  %v18415_v53 = vpop.f32.mrb[41].mxu0  ;;  %v17348_v32 = vld [vmem:[%s23254_s22] ss:$0 sm:$0xff]  ;;  %s23255_s22 = sld [smem:[#allocation69_spill]] }
0x1254   : > { %v9205_v54 = vpop.f32.mrb[42].mxu0 }
0x1255   : > { %v9269_v55 = vadd.f32 %v17334_v51, %v9257_v52  ;;  %v18416_v56 = vpop.f32.mrb[43].mxu0 }
0x1257   : > { %vm9270_vm14 = vcmp.gt.f32.partialorder %v9269_v55, 0.0  ;;  %v9271_v57 = vmul.f32 0.01, %v9269_v55 }
0x1259   : > { %v9272_v58 = vsel %vm9270_vm14, %v9269_v55, %v9271_v57 }
0x125a   : > { %v9276_v59 = vrot.slane %v9272_v58, 7 }
0x125c   : > { %9279 = vst.msk [vmem:[#allocation2] sm:$0xfe] %vm9278_vm15, %v9276_v59 }
0x1263   : > { %v9280_v61 = vld [vmem:[#allocation2] sm:$0xff] }
0x1264   : > { %9420 = vst.msk [vmem:[#allocation2] sm:$0x1] %vm9128_vm9, %v21875_v31  ;;  %v9282_v62 = vpack.c.bf16 %v9280_v61, %v9280_v61  ;;  %v9287_v63 = vpack.c.bf16 %v9281_v60, %v9280_v61 }
0x1266   : > { %18438 = vmatmul.mubr.msk.bf16.vlgmr.msra.gmra.mrb[60].mxu1 %vm8372_vm12, %v9282_v62  ;;  %v9295_v0 = vshll.u32 %v9287_v63, 16  ;;  %v9293_v16 = vshrl.u32 %v9287_v63, 16 }
0x1267   : > { %18453 = vmatprep.mubr.msk.bf16.mxu1 %vm21876_vm7, %v21875_v31  ;;  %18450 = vmatpush3.bf16.msra.mxu1 %v20135_v3 }
0x1268   : > { %v9297_v1 = vrot.slane %v9295_v0, 1  ;;  %18451 = vmatprep.subr.bf16.mxu1 %v21875_v31 }
0x126a   : > { %v9298_v2 = vor.u32 %v9297_v1, %v9293_v16 }
0x126b   : > { %18452 = vmatpush3.bf16.msra.mxu1 %v20136_v40 }
0x126c   : > { %18430 = vmatmul.mubr.msk.bf16.vlgmr.msra.gmra.mrb[44].mxu0 %vm8372_vm12, %v9298_v2  ;;  %18469 = vmatprep.subr.bf16.mxu1 %v21875_v31 }
0x126d   : > { %18445 = vmatprep.mubr.msk.bf16.mxu0 %vm21876_vm7, %v21875_v31  ;;  %18442 = vmatpush3.bf16.msra.mxu0 %v20137_v4 }
0x126e   : > { %18443 = vmatprep.subr.bf16.mxu0 %v21875_v31 }
0x1271   : > { %18444 = vmatpush3.bf16.msra.mxu0 %v20138_v5  ;;  %v20147_v5 = vld [vmem:[#allocation15] ss:$8 sps:$4 sm:$0xff]  }
0x1272   : > { %18457 = vmatprep.subr.bf16.mxu0 %v21875_v31 }
0x1339   : > { %v9403_v6 = vpop.f32.mrb[60].mxu1 }
0x133a   : > { %v18439_v7 = vpop.f32.mrb[61].mxu1 }
0x133b   : > { %v9406_v8 = vpop.f32.mrb[62].mxu1  ;;  %v20152_v7 = vld [vmem:[#allocation15 + $0x14] ss:$8 sps:$4 sm:$0xff]  }
0x133c   : > { %v18440_v9 = vpop.f32.mrb[63].mxu1  ;;  %v20150_v8 = vld [vmem:[#allocation15 + $0x10] ss:$8 sps:$4 sm:$0xff]  }
0x133d   : > { %v20155_v9 = vld [vmem:[#allocation15 + $0x24] ss:$8 sps:$4 sm:$0xff]  }
0x133f   : > { %v9348_v10 = vpop.f32.mrb[44].mxu0 }
0x1340   : > { %v9404_v11 = vadd.f32 %v9403_v6, %v9348_v10  ;;  %v18431_v12 = vpop.f32.mrb[45].mxu0  ;;  %v20153_v10 = vld [vmem:[#allocation15 + $0x20] ss:$8 sps:$4 sm:$0xff]  }
0x1341   : > { %v9351_v35 = vpop.f32.mrb[46].mxu0  ;;  %v20161_v12 = vld [vmem:[#allocation15 + $0x44] ss:$8 sps:$4 sm:$0xff]  }
0x1342   : > { %v9416_v13 = vadd.f32 %v17341_v36, %v9404_v11  ;;  %v18432_v46 = vpop.f32.mrb[47].mxu0  ;;  %v20158_v36 = vld [vmem:[#allocation15 + $0x34] ss:$8 sps:$4 sm:$0xff]   ;;  %v20156_v11 = vld [vmem:[#allocation15 + $0x30] ss:$8 sps:$4 sm:$0xff]  }
0x1343   : > { %v20159_v35 = vld [vmem:[#allocation15 + $0x40] ss:$8 sps:$4 sm:$0xff]   ;;  %v20162_v46 = vld [vmem:[#allocation15 + $0x50] ss:$8 sps:$4 sm:$0xff]  }
0x1344   : > { %vm9417_vm3 = vcmp.gt.f32.partialorder %v9416_v13, 0.0  ;;  %v9418_v15 = vmul.f32 0.01, %v9416_v13 }
0x1346   : > { %v9419_v18 = vsel %vm9417_vm3, %v9416_v13, %v9418_v15  ;;  %v20164_v13 = vld [vmem:[#allocation15 + $0x54] ss:$8 sps:$4 sm:$0xff]   ;;  %v20167_v15 = vld [vmem:[#allocation15 + $0x64] ss:$8 sps:$4 sm:$0xff]  }
0x1347   : > { %v9423_v21 = vrot.slane %v9419_v18, 7  ;;  %v20165_v18 = vld [vmem:[#allocation15 + $0x60] ss:$8 sps:$4 sm:$0xff]  }
0x1349   : > { %9425 = vst.msk [vmem:[#allocation2] sm:$0xfe] %vm9278_vm15, %v9423_v21 }
0x134a   : > { %9426 = vst.msk [vmem:[#allocation2 + $0x20] sm:$0x1] %vm9128_vm9, %v9423_v21  ;;  %v20170_v21 = vld [vmem:[#allocation15 + $0x74] ss:$8 sps:$4 sm:$0xff]  }
0x1350   : > { %v9427_v22 = vld [vmem:[#allocation2] sm:$0xff] }
0x1351   : > { %v9428_v49 = vld [vmem:[#allocation2 + $0x20] sm:$0x3]  ;;  %9572 = vst.msk [vmem:[#allocation2] sm:$0x1] %vm9571_vm4, %v21875_v31 }
0x1352   : > { %v9429_v14 = vpack.c.bf16 %v9428_v49, %v9427_v22  ;;  %v20168_v22 = vld [vmem:[#allocation15 + $0x70] ss:$8 sps:$4 sm:$0xff]   ;;  %v20173_v49 = vld [vmem:[#allocation15 + $0x84] ss:$8 sps:$4 sm:$0xff]  }
0x1354   : > { %18454 = vmatmul.mubr.msk.bf16.vlgmr.msra.gmra.mrb[64].mxu1 %vm8372_vm12, %v9429_v14  ;;  %v9441_v20 = vshll.u32 %v9429_v14, 16  ;;  %v9439_v23 = vshrl.u32 %v9429_v14, 16  ;;  %v20171_v14 = vld [vmem:[#allocation15 + $0x80] ss:$8 sps:$4 sm:$0xff]  }
0x1355   : > { %18477 = vmatprep.mubr.msk.bf16.mxu1 %vm21876_vm7, %v21875_v31  ;;  %18470 = vmatpush3.bf16.msra.mxu1 %v20139_v26  ;;  %v20182_v26 = vld [vmem:[#allocation15 + $0xb4] ss:$8 sps:$4 sm:$0xff]  }
0x1356   : > { %v9443_v24 = vrot.slane %v9441_v20, 1  ;;  %18471 = vmatprep.subr.bf16.mxu1 %v21875_v31  ;;  %v20174_v20 = vld [vmem:[#allocation15 + $0x90] ss:$8 sps:$4 sm:$0xff]  }
0x1358   : > { %v9444_v25 = vor.u32 %v9443_v24, %v9439_v23  ;;  %v20176_v23 = vld [vmem:[#allocation15 + $0x94] ss:$8 sps:$4 sm:$0xff]   ;;  %v20179_v24 = vld [vmem:[#allocation15 + $0xa4] ss:$8 sps:$4 sm:$0xff]  }
0x1359   : > { %18472 = vmatpush3.bf16.msra.mxu1 %v20140_v34  ;;  %v20180_v34 = vld [vmem:[#allocation15 + $0xb0] ss:$8 sps:$4 sm:$0xff]  }
0x135a   : > { %18446 = vmatmul.mubr.msk.bf16.vlgmr.msra.gmra.mrb[48].mxu0 %vm8372_vm12, %v9444_v25  ;;  %18473 = vmatprep.subr.bf16.mxu1 %v21875_v31  ;;  %vm9582_vm12 = vcmask 523265   ;;  %v20177_v25 = vld [vmem:[#allocation15 + $0xa0] ss:$8 sps:$4 sm:$0xff]  }
0x135b   : > { %18465 = vmatprep.mubr.msk.bf16.mxu0 %vm21876_vm7, %v21875_v31  ;;  %18458 = vmatpush3.bf16.msra.mxu0 %v20141_v27  ;;  %v20185_v27 = vld [vmem:[#allocation15 + $0xc4] ss:$8 sps:$4 sm:$0xff]  }
0x135c   : > { %18459 = vmatprep.subr.bf16.mxu0 %v21875_v31 }
0x135d   : > { %18474 = vmatpush3.bf16.msra.mxu1 %v20142_v48  ;;  %v20183_v48 = vld [vmem:[#allocation15 + $0xc0] ss:$8 sps:$4 sm:$0xff]  }
0x135e   : > { %18475 = vmatprep.subr.bf16.mxu1 %v21875_v31 }
0x135f   : > { %18460 = vmatpush3.bf16.msra.mxu0 %v20143_v28  ;;  %v20186_v28 = vld [vmem:[#allocation15 + $0xd0] ss:$8 sps:$4 sm:$0xff]  }
0x1360   : > { %18461 = vmatprep.subr.bf16.mxu0 %v21875_v31 }
0x1361   : > { %18476 = vmatpush3.bf16.msra.mxu1 %v20144_v33  ;;  %v20188_v33 = vld [vmem:[#allocation15 + $0xd4] ss:$8 sps:$4 sm:$0xff]  }
0x1363   : > { %18462 = vmatpush3.bf16.msra.mxu0 %v20145_v37  ;;  %v20191_v37 = vld [vmem:[#allocation15 + $0xe4] ss:$8 sps:$4 sm:$0xff]  }
0x1364   : > { %18463 = vmatprep.subr.bf16.mxu0 %v21875_v31 }
0x1367   : > { %18464 = vmatpush3.bf16.msra.mxu0 %v20146_v38  ;;  %v20189_v38 = vld [vmem:[#allocation15 + $0xe0] ss:$8 sps:$4 sm:$0xff]  }
0x1368   : > { %9988 = vmatprep.subr.bf16.mxu0 %v20149_v39  ;;  %v20194_v39 = vld [vmem:[#allocation15 + $0xf4] ss:$8 sps:$4 sm:$0xff]  }
0x1427   : > { %v9549_v41 = vpop.f32.mrb[64].mxu1 }
0x1428   : > { %v18455_v19 = vpop.f32.mrb[65].mxu1 }
0x1429   : > { %v9552_v47 = vpop.f32.mrb[66].mxu1  ;;  %v20195_v19 = vld [vmem:[#allocation17] ss:$8 sps:$4 sm:$0xff]  }
0x142a   : > { %v18456_v17 = vpop.f32.mrb[67].mxu1 }
0x142b   : > { %v20200_v17 = vld [vmem:[#allocation17 + $0x14] ss:$8 sps:$4 sm:$0xff]  }
0x142d   : > { %v9494_v50 = vpop.f32.mrb[48].mxu0 }
0x142e   : > { %v9550_v51 = vadd.f32 %v9549_v41, %v9494_v50  ;;  %v18447_v52 = vpop.f32.mrb[49].mxu0  ;;  %v20192_v41 = vld [vmem:[#allocation15 + $0xf0] ss:$8 sps:$4 sm:$0xff]  }
0x142f   : > { %v9497_v53 = vpop.f32.mrb[50].mxu0  ;;  %v20198_v50 = vld [vmem:[#allocation17 + $0x10] ss:$8 sps:$4 sm:$0xff]   ;;  %v20206_v52 = vld [vmem:[#allocation17 + $0x34] ss:$8 sps:$4 sm:$0xff]  }
0x1430   : > { %v9563_v54 = vadd.f32 %v17348_v32, %v9550_v51  ;;  %v9553_v55 = vadd.f32 %v9552_v47, %v9497_v53  ;;  %v18448_v56 = vpop.f32.mrb[51].mxu0  ;;  %v20197_v47 = vld [vmem:[#allocation17 + $0x4] ss:$8 sps:$4 sm:$0xff]   ;;  %v20201_v51 = vld [vmem:[#allocation17 + $0x20] ss:$8 sps:$4 sm:$0xff]  }
0x1431   : > { %10488 = vmatprep.subr.bf16.mxu1 %v20197_v47  ;;  %v20204_v53 = vld [vmem:[#allocation17 + $0x30] ss:$8 sps:$4 sm:$0xff]   ;;  %v20212_v56 = vld [vmem:[#allocation17 + $0x54] ss:$8 sps:$4 sm:$0xff]  }
0x1432   : > { %vm9565_vm7 = vcmp.gt.f32.partialorder %v9563_v54, 0.0  ;;  %v9567_v57 = vmul.f32 0.01, %v9563_v54  ;;  %v9564_v58 = vadd.f32 %v17348_v32, %v9553_v55  ;;  %v20203_v32 = vld [vmem:[#allocation17 + $0x24] ss:$8 sps:$4 sm:$0xff]  }
0x1433   : > { %v20207_v55 = vld [vmem:[#allocation17 + $0x40] ss:$8 sps:$4 sm:$0xff]   ;;  %v20240_v47 = vld [vmem:[#allocation17 + $0xf0] ss:$8 sps:$4 sm:$0xff]  }
0x1434   : > { %v9569_v59 = vsel %vm9565_vm7, %v9563_v54, %v9567_v57  ;;  %vm9566_vm5 = vcmp.gt.f32.partialorder %v9564_v58, 0.0  ;;  %v9568_v60 = vmul.f32 0.01, %v9564_v58  ;;  %v20209_v54 = vld [vmem:[#allocation17 + $0x44] ss:$8 sps:$4 sm:$0xff]  }
0x1435   : > { %v9577_v61 = vrot.slane %v9569_v59, 7  ;;  %v20210_v57 = vld [vmem:[#allocation17 + $0x50] ss:$8 sps:$4 sm:$0xff]   ;;  %v20213_v59 = vld [vmem:[#allocation17 + $0x60] ss:$8 sps:$4 sm:$0xff]  }
0x1436   : > { %v9570_v62 = vsel %vm9566_vm5, %v9564_v58, %v9568_v60  ;;  %v20215_v58 = vld [vmem:[#allocation17 + $0x64] ss:$8 sps:$4 sm:$0xff]   ;;  %v20218_v60 = vld [vmem:[#allocation17 + $0x74] ss:$8 sps:$4 sm:$0xff]  }
0x1437   : > { %9583 = vst.msk [vmem:[#allocation2] sm:$0xfe] %vm9582_vm12, %v9577_v61  ;;  %v9578_v63 = vrot.slane %v9570_v62, 7  ;;  %v20221_v62 = vld [vmem:[#allocation17 + $0x84] ss:$8 sps:$4 sm:$0xff]  }
0x1439   : > { %v9579_v0 = vsel %vm9576_vm6, %v9577_v61, %v9578_v63  ;;  %v20216_v61 = vld [vmem:[#allocation17 + $0x70] ss:$8 sps:$4 sm:$0xff]   ;;  %v20219_v63 = vld [vmem:[#allocation17 + $0x80] ss:$8 sps:$4 sm:$0xff]  }
0x143a   : > { %9585 = vst.msk [vmem:[#allocation2 + $0x20] sm:$0x3] %vm9584_vm8, %v9579_v0  ;;  %v20224_v0 = vld [vmem:[#allocation17 + $0x94] ss:$8 sps:$4 sm:$0xff]  }
0x143e   : > { %v9586_v16 = vld [vmem:[#allocation2] sm:$0xff] }
0x143f   : > { %9762 = vst [vmem:[#allocation2] sm:$0x1] %v21875_v31 }
0x1441   : > { %v9587_v1 = vld [vmem:[#allocation2 + $0x20] sm:$0x7] }
0x1442   : > { %v9588_v2 = vpack.c.bf16 %v9587_v1, %v9586_v16  ;;  %v20222_v16 = vld [vmem:[#allocation17 + $0x90] ss:$8 sps:$4 sm:$0xff]   ;;  %v20227_v1 = vld [vmem:[#allocation17 + $0xa4] ss:$8 sps:$4 sm:$0xff]  }
0x1444   : > { %18478 = vmatmul.mubr.msk.bf16.vlgmr.msra.gmra.mrb[68].mxu1 %vm8222_vm10, %v9588_v2  ;;  %v9608_v3 = vshll.u32 %v9588_v2, 16  ;;  %v9606_v4 = vshrl.u32 %v9588_v2, 16  ;;  %v20225_v2 = vld [vmem:[#allocation17 + $0xa0] ss:$8 sps:$4 sm:$0xff]  }
0x1445   : > { %10489 = vmatpush1.bf16.msra.mxu1 %v20195_v19  ;;  %v20242_v19 = vld [vmem:[#allocation17 + $0xf4] ss:$8 sps:$4 sm:$0xff]  }
0x1446   : > { %v9610_v40 = vrot.slane %v9608_v3, 1  ;;  %10490 = vmatprep.subr.bf16.mxu1 %v20200_v17  ;;  %v20245_v17 = vld [vmem:[#allocation17 + $0x104] ss:$8 sps:$4 sm:$0xff]  }
0x1448   : > { %v9611_v6 = vor.u32 %v9610_v40, %v9606_v4 }
0x1449   : > { %10491 = vmatpush1.bf16.msra.mxu1 %v20198_v50  ;;  %v20291_v50 = vld [vmem:[#allocation18] ss:$8 sps:$4 sm:$0xff]  }
0x144a   : > { %18466 = vmatmul.mubr.msk.bf16.vlgmr.msra.gmra.mrb[52].mxu0 %vm8222_vm10, %v9611_v6  ;;  %10492 = vmatprep.subr.bf16.mxu1 %v20203_v32  ;;  %v20293_v32 = vld [vmem:[#allocation18 + $0x4] ss:$8 sps:$4 sm:$0xff]  }
0x144b   : > { %9989 = vmatpush1.bf16.msra.mxu0 %v20147_v5 }
0x144c   : > { %9990 = vmatprep.subr.bf16.mxu0 %v20152_v7  ;;  %v17359_v7 = vld [vmem:[%s23255_s22] ss:$0 sm:$0xff]  ;;  %s23256_s22 = sld [smem:[#allocation70_spill]] }
0x144d   : > { %10493 = vmatpush1.bf16.msra.mxu1 %v20201_v51  ;;  %v20296_v51 = vld [vmem:[#allocation18 + $0x14] ss:$8 sps:$4 sm:$0xff]  }
0x144e   : > { %10494 = vmatprep.subr.bf16.mxu1 %v20206_v52  ;;  %v20294_v52 = vld [vmem:[#allocation18 + $0x10] ss:$8 sps:$4 sm:$0xff]  }
0x144f   : > { %9991 = vmatpush1.bf16.msra.mxu0 %v20150_v8 }
0x1450   : > { %9992 = vmatprep.subr.bf16.mxu0 %v20155_v9 }
0x1451   : > { %10495 = vmatpush1.bf16.msra.mxu1 %v20204_v53  ;;  %v20299_v53 = vld [vmem:[#allocation18 + $0x24] ss:$8 sps:$4 sm:$0xff]  }
0x1452   : > { %10496 = vmatprep.subr.bf16.mxu1 %v20209_v54  ;;  %v20297_v54 = vld [vmem:[#allocation18 + $0x20] ss:$8 sps:$4 sm:$0xff]  }
0x1453   : > { %9993 = vmatpush1.bf16.msra.mxu0 %v20153_v10 }
0x1454   : > { %9994 = vmatprep.subr.bf16.mxu0 %v20158_v36 }
0x1455   : > { %10497 = vmatpush1.bf16.msra.mxu1 %v20207_v55  ;;  %v20302_v55 = vld [vmem:[#allocation18 + $0x34] ss:$8 sps:$4 sm:$0xff]  }
0x1456   : > { %10498 = vmatprep.subr.bf16.mxu1 %v20212_v56  ;;  %v20300_v56 = vld [vmem:[#allocation18 + $0x30] ss:$8 sps:$4 sm:$0xff]  }
0x1457   : > { %9995 = vmatpush1.bf16.msra.mxu0 %v20156_v11 }
0x1458   : > { %9996 = vmatprep.subr.bf16.mxu0 %v20161_v12 }
0x1459   : > { %10499 = vmatpush1.bf16.msra.mxu1 %v20210_v57  ;;  %v20305_v57 = vld [vmem:[#allocation18 + $0x44] ss:$8 sps:$4 sm:$0xff]  }
0x145a   : > { %10500 = vmatprep.subr.bf16.mxu1 %v20215_v58  ;;  %v20303_v58 = vld [vmem:[#allocation18 + $0x40] ss:$8 sps:$4 sm:$0xff]  }
0x145b   : > { %9997 = vmatpush1.bf16.msra.mxu0 %v20159_v35 }
0x145c   : > { %9998 = vmatprep.subr.bf16.mxu0 %v20164_v13 }
0x145d   : > { %10501 = vmatpush1.bf16.msra.mxu1 %v20213_v59  ;;  %v20308_v59 = vld [vmem:[#allocation18 + $0x54] ss:$8 sps:$4 sm:$0xff]  }
0x145e   : > { %10502 = vmatprep.subr.bf16.mxu1 %v20218_v60  ;;  %v20306_v60 = vld [vmem:[#allocation18 + $0x50] ss:$8 sps:$4 sm:$0xff]  }
0x145f   : > { %9999 = vmatpush1.bf16.msra.mxu0 %v20162_v46 }
0x1460   : > { %10000 = vmatprep.subr.bf16.mxu0 %v20167_v15 }
0x1461   : > { %10503 = vmatpush1.bf16.msra.mxu1 %v20216_v61  ;;  %v20311_v61 = vld [vmem:[#allocation18 + $0x64] ss:$8 sps:$4 sm:$0xff]  }
0x1462   : > { %10504 = vmatprep.subr.bf16.mxu1 %v20221_v62  ;;  %v20309_v62 = vld [vmem:[#allocation18 + $0x60] ss:$8 sps:$4 sm:$0xff]  }
0x1463   : > { %10001 = vmatpush1.bf16.msra.mxu0 %v20165_v18 }
0x1464   : > { %10002 = vmatprep.subr.bf16.mxu0 %v20170_v21 }
0x1465   : > { %10505 = vmatpush1.bf16.msra.mxu1 %v20219_v63  ;;  %v20314_v63 = vld [vmem:[#allocation18 + $0x74] ss:$8 sps:$4 sm:$0xff]  }
0x1466   : > { %10506 = vmatprep.subr.bf16.mxu1 %v20224_v0  ;;  %v20312_v0 = vld [vmem:[#allocation18 + $0x70] ss:$8 sps:$4 sm:$0xff]  }
0x1467   : > { %10003 = vmatpush1.bf16.msra.mxu0 %v20168_v22 }
0x1468   : > { %10004 = vmatprep.subr.bf16.mxu0 %v20173_v49 }
0x1469   : > { %10507 = vmatpush1.bf16.msra.mxu1 %v20222_v16  ;;  %v20317_v16 = vld [vmem:[#allocation18 + $0x84] ss:$8 sps:$4 sm:$0xff]  }
0x146a   : > { %10508 = vmatprep.subr.bf16.mxu1 %v20227_v1  ;;  %v20315_v1 = vld [vmem:[#allocation18 + $0x80] ss:$8 sps:$4 sm:$0xff]  }
0x146b   : > { %10005 = vmatpush1.bf16.msra.mxu0 %v20171_v14 }
0x146c   : > { %10006 = vmatprep.subr.bf16.mxu0 %v20176_v23 }
0x146d   : > { %10509 = vmatpush1.bf16.msra.mxu1 %v20225_v2  ;;  %v20320_v2 = vld [vmem:[#allocation18 + $0x94] ss:$8 sps:$4 sm:$0xff]  }
0x146f   : > { %10007 = vmatpush1.bf16.msra.mxu0 %v20174_v20 }
0x1470   : > { %10008 = vmatprep.subr.bf16.mxu0 %v20179_v24 }
0x1473   : > { %10009 = vmatpush1.bf16.msra.mxu0 %v20177_v25 }
0x1474   : > { %10010 = vmatprep.subr.bf16.mxu0 %v20182_v26 }
0x1477   : > { %10011 = vmatpush1.bf16.msra.mxu0 %v20180_v34 }
0x1478   : > { %10012 = vmatprep.subr.bf16.mxu0 %v20185_v27  ;;  %v20230_v27 = vld [vmem:[#allocation17 + $0xb4] ss:$8 sps:$4 sm:$0xff]  }
0x1479   : > { %10510 = vmatprep.subr.bf16.mxu1 %v20230_v27 }
0x147b   : > { %10013 = vmatpush1.bf16.msra.mxu0 %v20183_v48  ;;  %v20228_v48 = vld [vmem:[#allocation17 + $0xb0] ss:$8 sps:$4 sm:$0xff]  }
0x147c   : > { %10014 = vmatprep.subr.bf16.mxu0 %v20188_v33  ;;  %10511 = vmatpush1.bf16.msra.mxu1 %v20228_v48  ;;  %v20231_v33 = vld [vmem:[#allocation17 + $0xc0] ss:$8 sps:$4 sm:$0xff]  }
0x147f   : > { %10015 = vmatpush1.bf16.msra.mxu0 %v20186_v28  ;;  %v20233_v28 = vld [vmem:[#allocation17 + $0xc4] ss:$8 sps:$4 sm:$0xff]  }
0x1480   : > { %10016 = vmatprep.subr.bf16.mxu0 %v20191_v37  ;;  %10512 = vmatprep.subr.bf16.mxu1 %v20233_v28  ;;  %v20236_v37 = vld [vmem:[#allocation17 + $0xd4] ss:$8 sps:$4 sm:$0xff]  }
0x1481   : > { %10513 = vmatpush1.bf16.msra.mxu1 %v20231_v33 }
0x1482   : > { %10514 = vmatprep.subr.bf16.mxu1 %v20236_v37 }
0x1483   : > { %10017 = vmatpush1.bf16.msra.mxu0 %v20189_v38  ;;  %v20234_v38 = vld [vmem:[#allocation17 + $0xd0] ss:$8 sps:$4 sm:$0xff]  }
0x1484   : > { %10018 = vmatprep.subr.bf16.mxu0 %v20194_v39  ;;  %v20237_v39 = vld [vmem:[#allocation17 + $0xe0] ss:$8 sps:$4 sm:$0xff]  }
0x1485   : > { %10515 = vmatpush1.bf16.msra.mxu1 %v20234_v38 }
0x1487   : > { %10019 = vmatpush1.bf16.msra.mxu0 %v20192_v41  ;;  %v20239_v41 = vld [vmem:[#allocation17 + $0xe4] ss:$8 sps:$4 sm:$0xff]  }
0x1488   : > { %10516 = vmatprep.subr.bf16.mxu1 %v20239_v41  ;;  %11027 = vmatprep.subr.bf16.mxu0 %v20293_v32 }
0x1489   : > { %10517 = vmatpush1.bf16.msra.mxu1 %v20237_v39  ;;  %v20243_v39 = vld [vmem:[#allocation17 + $0x100] ss:$8 sps:$4 sm:$0xff]  }
0x148a   : > { %10518 = vmatprep.subr.bf16.mxu1 %v20242_v19 }
0x148d   : > { %10519 = vmatpush1.bf16.msra.mxu1 %v20240_v47 }
0x148e   : > { %10531 = vmatprep.subr.bf16.mxu1 %v20245_v17  ;;  %v20248_v17 = vld [vmem:[#allocation17 + $0x114] ss:$8 sps:$4 sm:$0xff]  }
0x1517   : > { %v9740_v3 = vpop.f32.mrb[68].mxu1 }
0x1518   : > { %v18479_v4 = vpop.f32.mrb[69].mxu1 }
0x1519   : > { %v9743_v40 = vpop.f32.mrb[70].mxu1  ;;  %v20318_v4 = vld [vmem:[#allocation18 + $0x90] ss:$8 sps:$4 sm:$0xff]  }
0x151a   : > { %v18480_v5 = vpop.f32.mrb[71].mxu1 }
0x151d   : > { %v9673_v6 = vpop.f32.mrb[52].mxu0 }
0x151e   : > { %v9741_v8 = vadd.f32 %v9740_v3, %v9673_v6  ;;  %v18467_v9 = vpop.f32.mrb[53].mxu0  ;;  %v9816_v3 = vld [vmem:[%s23256_s22] sm:$0x3]  ;;  %s23257_s22 = sld [smem:[#allocation71_spill]] }
0x151f   : > { %v9676_v10 = vpop.f32.mrb[54].mxu0  ;;  %v9821_v5 = vrot.slane %v9816_v3, %v22525_v42  ;;  %v9825_v6 = vrot.slane %v9816_v3, %v22529_v44  ;;  %v20275_v3 = vld [vmem:[#allocation17 + $0x1a4] ss:$8 sps:$4 sm:$0xff]  }
0x1520   : > { %v9754_v36 = vadd.f32 %v17359_v7, %v9741_v8  ;;  %v9744_v11 = vadd.f32 %v9743_v40, %v9676_v10  ;;  %v18468_v12 = vpop.f32.mrb[55].mxu0  ;;  %v20323_v40 = vld [vmem:[#allocation18 + $0xa4] ss:$8 sps:$4 sm:$0xff]  }
0x1522   : > { %vm9756_vm10 = vcmp.gt.f32.partialorder %v9754_v36, 0.0  ;;  %v9758_v35 = vmul.f32 0.01, %v9754_v36  ;;  %v9755_v13 = vadd.f32 %v17359_v7, %v9744_v11  ;;  %v20321_v7 = vld [vmem:[#allocation18 + $0xa0] ss:$8 sps:$4 sm:$0xff]  }
0x1524   : > { %v9760_v46 = vsel %vm9756_vm10, %v9754_v36, %v9758_v35  ;;  %vm9757_vm9 = vcmp.gt.f32.partialorder %v9755_v13, 0.0  ;;  %v9759_v15 = vmul.f32 0.01, %v9755_v13 }
0x1525   : > { %v9766_v18 = vrot.slane %v9760_v46, 7 }
0x1526   : > { %v9761_v21 = vsel %vm9757_vm9, %v9755_v13, %v9759_v15 }
0x1527   : > { %9771 = vst [vmem:[#allocation2] sm:$0xfe] %v9766_v18  ;;  %v9767_v22 = vrot.slane %v9761_v21, 7 }
0x1529   : > { %v9768_v49 = vsel %vm9576_vm6, %v9766_v18, %v9767_v22 }
0x152a   : > { %9772 = vst [vmem:[#allocation2 + $0x20] sm:$0x7] %v9768_v49 }
0x152e   : > { %v9773_v14 = vld [vmem:[#allocation2] sm:$0xff] }
0x152f   : > { %10047 = vst.msk [vmem:[#allocation2] ss:$8 sm:$0x3] %vm22500_vm1, %v21875_v31  ;;  %v9777_v23 = vrot.slane %v9773_v14, 1 }
0x1531   : > { %v9774_v20 = vld [vmem:[#allocation2 + $0x20] sm:$0xf] }
0x1532   : > { %v9778_v24 = vrot.slane %v9774_v20, 1  ;;  %v9782_v34 = vpack.c.bf16 %v9774_v20, %v9773_v14 }
0x1534   : > { %v9779_v25 = vsel %vm1672_vm0, %v9777_v23, %v9778_v24 }
0x1535   : > { %v9783_v26 = vpack.c.bf16 %v9778_v24, %v9779_v25 }
0x1537   : > { %10020 = vmatprep.mubr.bf16.mxu0 %v9783_v26 }
0x1538   : > { %10021 = vmatmul.mubr.bf16.vlgmr.msra.gmra.mrb[56].mxu0 %v9782_v34 }
0x1539   : > { %11028 = vmatpush1.bf16.msra.mxu0 %v20291_v50 }
0x153a   : > { %11029 = vmatprep.subr.bf16.mxu0 %v20296_v51  ;;  %v20246_v51 = vld [vmem:[#allocation17 + $0x110] ss:$8 sps:$4 sm:$0xff]  }
0x153d   : > { %11030 = vmatpush1.bf16.msra.mxu0 %v20294_v52  ;;  %v20251_v52 = vld [vmem:[#allocation17 + $0x124] ss:$8 sps:$4 sm:$0xff]  }
0x153e   : > { %11031 = vmatprep.subr.bf16.mxu0 %v20299_v53  ;;  %v20249_v53 = vld [vmem:[#allocation17 + $0x120] ss:$8 sps:$4 sm:$0xff]  }
0x1541   : > { %11032 = vmatpush1.bf16.msra.mxu0 %v20297_v54  ;;  %v20254_v54 = vld [vmem:[#allocation17 + $0x134] ss:$8 sps:$4 sm:$0xff]  }
0x1542   : > { %11033 = vmatprep.subr.bf16.mxu0 %v20302_v55  ;;  %v20252_v55 = vld [vmem:[#allocation17 + $0x130] ss:$8 sps:$4 sm:$0xff]  }
0x1545   : > { %11034 = vmatpush1.bf16.msra.mxu0 %v20300_v56  ;;  %v20257_v56 = vld [vmem:[#allocation17 + $0x144] ss:$8 sps:$4 sm:$0xff]  }
0x1546   : > { %11035 = vmatprep.subr.bf16.mxu0 %v20305_v57  ;;  %v20255_v57 = vld [vmem:[#allocation17 + $0x140] ss:$8 sps:$4 sm:$0xff]  }
0x1549   : > { %11036 = vmatpush1.bf16.msra.mxu0 %v20303_v58  ;;  %v20260_v58 = vld [vmem:[#allocation17 + $0x154] ss:$8 sps:$4 sm:$0xff]  }
0x154a   : > { %11037 = vmatprep.subr.bf16.mxu0 %v20308_v59  ;;  %v20258_v59 = vld [vmem:[#allocation17 + $0x150] ss:$8 sps:$4 sm:$0xff]  }
0x154d   : > { %11038 = vmatpush1.bf16.msra.mxu0 %v20306_v60  ;;  %v20263_v60 = vld [vmem:[#allocation17 + $0x164] ss:$8 sps:$4 sm:$0xff]  }
0x154e   : > { %11039 = vmatprep.subr.bf16.mxu0 %v20311_v61  ;;  %v20261_v61 = vld [vmem:[#allocation17 + $0x160] ss:$8 sps:$4 sm:$0xff]  }
0x1551   : > { %11040 = vmatpush1.bf16.msra.mxu0 %v20309_v62  ;;  %v20266_v62 = vld [vmem:[#allocation17 + $0x174] ss:$8 sps:$4 sm:$0xff]  }
0x1552   : > { %11041 = vmatprep.subr.bf16.mxu0 %v20314_v63  ;;  %v20264_v63 = vld [vmem:[#allocation17 + $0x170] ss:$8 sps:$4 sm:$0xff]  }
0x1555   : > { %11042 = vmatpush1.bf16.msra.mxu0 %v20312_v0  ;;  %v20269_v0 = vld [vmem:[#allocation17 + $0x184] ss:$8 sps:$4 sm:$0xff]  }
0x1556   : > { %11043 = vmatprep.subr.bf16.mxu0 %v20317_v16  ;;  %v20267_v16 = vld [vmem:[#allocation17 + $0x180] ss:$8 sps:$4 sm:$0xff]  }
0x1559   : > { %11044 = vmatpush1.bf16.msra.mxu0 %v20315_v1  ;;  %v20272_v1 = vld [vmem:[#allocation17 + $0x194] ss:$8 sps:$4 sm:$0xff]  }
0x155a   : > { %11045 = vmatprep.subr.bf16.mxu0 %v20320_v2  ;;  %v20270_v2 = vld [vmem:[#allocation17 + $0x190] ss:$8 sps:$4 sm:$0xff]  }
0x155d   : > { %11046 = vmatpush1.bf16.msra.mxu0 %v20318_v4  ;;  %v20273_v4 = vld [vmem:[#allocation17 + $0x1a0] ss:$8 sps:$4 sm:$0xff]  }
0x155e   : > { %11047 = vmatprep.subr.bf16.mxu0 %v20323_v40  ;;  %v20278_v40 = vld [vmem:[#allocation17 + $0x1b4] ss:$8 sps:$4 sm:$0xff]  }
0x1561   : > { %11048 = vmatpush1.bf16.msra.mxu0 %v20321_v7  ;;  %v20279_v7 = vld [vmem:[#allocation17 + $0x1c0] ss:$8 sps:$4 sm:$0xff]  }
0x160b   : > { %v10022_v8 = vpop.f32.mrb[56].mxu0 }
0x160c   : > { %v10023_v9 = vadd.f32 %v10022_v8, %v9821_v5  ;;  %v10024_v10 = vpop.f32.mrb[57].mxu0  ;;  %v20284_v8 = vld [vmem:[#allocation17 + $0x1d4] ss:$8 sps:$4 sm:$0xff]  }
0x160d   : > { %v10025_v36 = vadd.f32 %v10024_v10, %v9825_v6  ;;  %v10026_v11 = vpop.f32.mrb[58].mxu0  ;;  %v20287_v10 = vld [vmem:[#allocation17 + $0x1e4] ss:$8 sps:$4 sm:$0xff]  }
0x160e   : > { %vm10031_vm11 = vcmp.gt.f32.partialorder %v10023_v9, 0.0  ;;  %v10035_v12 = vmul.f32 0.01, %v10023_v9  ;;  %v10027_v35 = vadd.f32 %v10026_v11, %v9821_v5  ;;  %v10028_v13 = vpop.f32.mrb[59].mxu0  ;;  %v20276_v5 = vld [vmem:[#allocation17 + $0x1b0] ss:$8 sps:$4 sm:$0xff]  }
0x160f   : > { %vm10032_vm13 = vcmp.gt.f32.partialorder %v10025_v36, 0.0  ;;  %v10036_v46 = vmul.f32 0.01, %v10025_v36  ;;  %v10029_v15 = vadd.f32 %v10028_v13, %v9825_v6  ;;  %v20281_v6 = vld [vmem:[#allocation17 + $0x1c4] ss:$8 sps:$4 sm:$0xff]  }
0x1610   : > { %v10039_v18 = vsel %vm10031_vm11, %v10023_v9, %v10035_v12  ;;  %vm10033_vm14 = vcmp.gt.f32.partialorder %v10027_v35, 0.0  ;;  %v10037_v21 = vmul.f32 0.01, %v10027_v35  ;;  %v20282_v9 = vld [vmem:[#allocation17 + $0x1d0] ss:$8 sps:$4 sm:$0xff]  }
0x1611   : > { %v10056_v22 = vrot.slane %v10039_v18, 7  ;;  %v10040_v49 = vsel %vm10032_vm13, %v10025_v36, %v10036_v46  ;;  %vm10034_vm15 = vcmp.gt.f32.partialorder %v10029_v15, 0.0  ;;  %v10038_v14 = vmul.f32 0.01, %v10029_v15  ;;  %v20285_v36 = vld [vmem:[#allocation17 + $0x1e0] ss:$8 sps:$4 sm:$0xff]  }
0x1612   : > { %v10057_v20 = vrot.slane %v10040_v49, 7  ;;  %v10041_v23 = vsel %vm10033_vm14, %v10027_v35, %v10037_v21  ;;  %v20290_v11 = vld [vmem:[#allocation17 + $0x1f4] ss:$8 sps:$4 sm:$0xff]   ;;  %v20288_v35 = vld [vmem:[#allocation17 + $0x1f0] ss:$8 sps:$4 sm:$0xff]  }
0x1613   : > { %10066 = vst [vmem:[#allocation2] sm:$0xfe] %v10056_v22  ;;  %v10058_v24 = vrot.slane %v10041_v23, 7  ;;  %v10042_v25 = vsel %vm10034_vm15, %v10029_v15, %v10038_v14  ;;  %v20326_v18 = vld [vmem:[#allocation18 + $0xb4] ss:$8 sps:$4 sm:$0xff]  }
0x1614   : > { %10067 = vst [vmem:[#allocation2 + $0x8] sm:$0xfe] %v10057_v20  ;;  %v10060_v26 = vrot.slane %v10042_v25, 7  ;;  %v20324_v21 = vld [vmem:[#allocation18 + $0xb0] ss:$8 sps:$4 sm:$0xff]   ;;  %11049 = vmatprep.subr.bf16.mxu0 %v20326_v18 }
0x1615   : > { %v10059_v34 = vsel %vm9576_vm6, %v10056_v22, %v10058_v24  ;;  %11050 = vmatpush1.bf16.msra.mxu0 %v20324_v21  ;;  %v20329_v22 = vld [vmem:[#allocation18 + $0xc4] ss:$8 sps:$4 sm:$0xff]   ;;  %v20327_v49 = vld [vmem:[#allocation18 + $0xc0] ss:$8 sps:$4 sm:$0xff]   ;;  %v20332_v14 = vld [vmem:[#allocation18 + $0xd4] ss:$8 sps:$4 sm:$0xff]  }
0x1616   : > { %10068 = vst [vmem:[#allocation2 + $0x20] sm:$0xf] %v10059_v34  ;;  %v10061_v27 = vsel %vm9576_vm6, %v10057_v20, %v10060_v26  ;;  %11051 = vmatprep.subr.bf16.mxu0 %v20329_v22  ;;  %v20330_v20 = vld [vmem:[#allocation18 + $0xd0] ss:$8 sps:$4 sm:$0xff]   ;;  %v20333_v23 = vld [vmem:[#allocation18 + $0xe0] ss:$8 sps:$4 sm:$0xff]  }
0x1617   : > { %10069 = vst [vmem:[#allocation2 + $0x28] sm:$0xf] %v10061_v27  ;;  %v20335_v24 = vld [vmem:[#allocation18 + $0xe4] ss:$8 sps:$4 sm:$0xff]   ;;  %v20338_v25 = vld [vmem:[#allocation18 + $0xf4] ss:$8 sps:$4 sm:$0xff]  }
0x1618   : > { %v20336_v26 = vld [vmem:[#allocation18 + $0xf0] ss:$8 sps:$4 sm:$0xff]   ;;  %v20341_v34 = vld [vmem:[#allocation18 + $0x104] ss:$8 sps:$4 sm:$0xff]  }
0x1619   : > { %11052 = vmatpush1.bf16.msra.mxu0 %v20327_v49  ;;  %v20387_v27 = vld [vmem:[#allocation20] ss:$16 sps:$4 sm:$0xff]  }
0x161a   : > { %v22904_v28 = vld [vmem:[#allocation2] sm:$0xff]  ;;  %11053 = vmatprep.subr.bf16.mxu0 %v20332_v14 }
0x161b   : > { %v10071_v48 = vld [vmem:[#allocation2 + $0x8] sm:$0xff]  ;;  %v10078_v13 = vrot.slane %v22904_v28, 1 }
0x161c   : > { %10586 = vst.msk [vmem:[#allocation2] ss:$8 sm:$0x3] %vm22500_vm1, %v21875_v31  ;;  %v10081_v41 = vrot.slane %v10071_v48, 1 }
0x161d   : > { %v22909_v33 = vld [vmem:[#allocation2 + $0x20] sm:$0x1f]  ;;  %11054 = vmatpush1.bf16.msra.mxu0 %v20330_v20 }
0x161e   : > { %v10073_v37 = vld [vmem:[#allocation2 + $0x28] sm:$0x1f]  ;;  %v10088_v47 = vpack.c.bf16 %v22909_v33, %v22904_v28  ;;  %v10079_v12 = vrot.slane %v22909_v33, 1  ;;  %11055 = vmatprep.subr.bf16.mxu0 %v20335_v24  ;;  %v20395_v28 = vld [vmem:[#allocation20 + $0x24] ss:$16 sps:$4 sm:$0xff]  }
0x161f   : > { %v10089_v38 = vpack.c.bf16 %v10073_v37, %v10071_v48  ;;  %v10082_v19 = vrot.slane %v10073_v37, 1  ;;  %v20389_v48 = vld [vmem:[#allocation20 + $0x4] ss:$16 sps:$4 sm:$0xff]   ;;  %v20393_v33 = vld [vmem:[#allocation20 + $0x20] ss:$16 sps:$4 sm:$0xff]  }
0x1620   : > { %v10080_v46 = vsel %vm1672_vm0, %v10078_v13, %v10079_v12  ;;  %v20401_v37 = vld [vmem:[#allocation20 + $0x44] ss:$16 sps:$4 sm:$0xff]  }
0x1621   : > { %10520 = vmatprep.mubr.bf16.mxu1 %v10089_v38  ;;  %v10083_v50 = vsel %vm1672_vm0, %v10081_v41, %v10082_v19  ;;  %v10090_v15 = vpack.c.bf16 %v10079_v12, %v10080_v46  ;;  %11056 = vmatpush1.bf16.msra.mxu0 %v20333_v23  ;;  %v20399_v38 = vld [vmem:[#allocation20 + $0x40] ss:$16 sps:$4 sm:$0xff]  }
0x1622   : > { %10521 = vmatmul.mubr.bf16.vlgmr.msra.gmra.mrb[72].mxu1 %v10088_v47  ;;  %v10091_v32 = vpack.c.bf16 %v10082_v19, %v10083_v50  ;;  %11057 = vmatprep.subr.bf16.mxu0 %v20338_v25  ;;  %v20405_v41 = vld [vmem:[#allocation20 + $0x60] ss:$16 sps:$4 sm:$0xff]   ;;  %v20413_v19 = vld [vmem:[#allocation20 + $0x84] ss:$16 sps:$4 sm:$0xff]  }
0x1623   : > { %10532 = vmatpush1.bf16.msra.mxu1 %v20243_v39  ;;  %v20407_v39 = vld [vmem:[#allocation20 + $0x64] ss:$16 sps:$4 sm:$0xff]   ;;  %v20411_v47 = vld [vmem:[#allocation20 + $0x80] ss:$16 sps:$4 sm:$0xff]  }
0x1624   : > { %10563 = vmatprep.mubr.bf16.mxu1 %v10091_v32  ;;  %10533 = vmatprep.subr.bf16.mxu1 %v20248_v17  ;;  %v20419_v17 = vld [vmem:[#allocation20 + $0xa4] ss:$16 sps:$4 sm:$0xff]   ;;  %v20417_v50 = vld [vmem:[#allocation20 + $0xa0] ss:$16 sps:$4 sm:$0xff]  }
0x1625   : > { %11058 = vmatpush1.bf16.msra.mxu0 %v20336_v26  ;;  %v20425_v32 = vld [vmem:[#allocation20 + $0xc4] ss:$16 sps:$4 sm:$0xff]   ;;  %v20339_v23 = vld [vmem:[#allocation18 + $0x100] ss:$8 sps:$4 sm:$0xff]  }
0x1626   : > { %11070 = vmatprep.subr.bf16.mxu0 %v20341_v34  ;;  %v20344_v34 = vld [vmem:[#allocation18 + $0x114] ss:$8 sps:$4 sm:$0xff]  }
0x1627   : > { %10534 = vmatpush1.bf16.msra.mxu1 %v20246_v51  ;;  %v20423_v51 = vld [vmem:[#allocation20 + $0xc0] ss:$16 sps:$4 sm:$0xff]  }
0x1628   : > { %10535 = vmatprep.subr.bf16.mxu1 %v20251_v52  ;;  %v20431_v52 = vld [vmem:[#allocation20 + $0xe4] ss:$16 sps:$4 sm:$0xff]  }
0x162b   : > { %10536 = vmatpush1.bf16.msra.mxu1 %v20249_v53  ;;  %v20429_v53 = vld [vmem:[#allocation20 + $0xe0] ss:$16 sps:$4 sm:$0xff]  }
0x162c   : > { %10537 = vmatprep.subr.bf16.mxu1 %v20254_v54  ;;  %v20437_v54 = vld [vmem:[#allocation20 + $0x104] ss:$16 sps:$4 sm:$0xff]  }
0x162f   : > { %10538 = vmatpush1.bf16.msra.mxu1 %v20252_v55  ;;  %v20435_v55 = vld [vmem:[#allocation20 + $0x100] ss:$16 sps:$4 sm:$0xff]  }
0x1630   : > { %10539 = vmatprep.subr.bf16.mxu1 %v20257_v56  ;;  %v20443_v56 = vld [vmem:[#allocation20 + $0x124] ss:$16 sps:$4 sm:$0xff]  }
0x1633   : > { %10540 = vmatpush1.bf16.msra.mxu1 %v20255_v57  ;;  %v10156_v57 = vld [vmem:[%s23257_s22] sm:$0x3]  ;;  %s23258_s22 = sld [smem:[#allocation72_spill]] }
0x1634   : > { %10541 = vmatprep.subr.bf16.mxu1 %v20260_v58  ;;  %v20441_v58 = vld [vmem:[#allocation20 + $0x120] ss:$16 sps:$4 sm:$0xff]  }
0x1637   : > { %10542 = vmatpush1.bf16.msra.mxu1 %v20258_v59  ;;  %v20449_v59 = vld [vmem:[#allocation20 + $0x144] ss:$16 sps:$4 sm:$0xff]  }
0x1638   : > { %10543 = vmatprep.subr.bf16.mxu1 %v20263_v60  ;;  %v10161_v60 = vrot.slane %v10156_v57, %v22525_v42 }
0x163b   : > { %10544 = vmatpush1.bf16.msra.mxu1 %v20261_v61  ;;  %v10165_v61 = vrot.slane %v10156_v57, %v22529_v44  ;;  %v20369_v57 = vld [vmem:[#allocation18 + $0x1a0] ss:$8 sps:$4 sm:$0xff]  }
0x163c   : > { %10545 = vmatprep.subr.bf16.mxu1 %v20266_v62  ;;  %v20447_v62 = vld [vmem:[#allocation20 + $0x140] ss:$16 sps:$4 sm:$0xff]  }
0x163f   : > { %10546 = vmatpush1.bf16.msra.mxu1 %v20264_v63 }
0x1640   : > { %10547 = vmatprep.subr.bf16.mxu1 %v20269_v0 }
0x1643   : > { %10548 = vmatpush1.bf16.msra.mxu1 %v20267_v16 }
0x1644   : > { %10549 = vmatprep.subr.bf16.mxu1 %v20272_v1 }
0x1647   : > { %10550 = vmatpush1.bf16.msra.mxu1 %v20270_v2 }
0x1648   : > { %10551 = vmatprep.subr.bf16.mxu1 %v20275_v3 }
0x164b   : > { %10552 = vmatpush1.bf16.msra.mxu1 %v20273_v4 }
0x164c   : > { %10553 = vmatprep.subr.bf16.mxu1 %v20278_v40 }
0x164f   : > { %10554 = vmatpush1.bf16.msra.mxu1 %v20276_v5 }
0x1650   : > { %10555 = vmatprep.subr.bf16.mxu1 %v20281_v6 }
0x1653   : > { %10556 = vmatpush1.bf16.msra.mxu1 %v20279_v7 }
0x1654   : > { %10557 = vmatprep.subr.bf16.mxu1 %v20284_v8 }
0x1657   : > { %10558 = vmatpush1.bf16.msra.mxu1 %v20282_v9 }
0x1658   : > { %10559 = vmatprep.subr.bf16.mxu1 %v20287_v10 }
0x165b   : > { %10560 = vmatpush1.bf16.msra.mxu1 %v20285_v36 }
0x165c   : > { %10561 = vmatprep.subr.bf16.mxu1 %v20290_v11 }
0x165f   : > { %10562 = vmatpush1.bf16.msra.mxu1 %v20288_v35 }
0x1660   : > { %11960 = vmatprep.subr.bf16.mxu1 %v20389_v48 }
0x1662   : > { %10564 = vmatmul.mubr.bf16.vlgmr.msra.gmra.mrb[72].mxu1 %v10090_v15 }
0x1663   : > { %11961 = vmatpush1.bf16.msra.mxu1 %v20387_v27 }
0x1664   : > { %11962 = vmatprep.subr.bf16.mxu1 %v20395_v28  ;;  %v20342_v28 = vld [vmem:[#allocation18 + $0x110] ss:$8 sps:$4 sm:$0xff]  }
0x1667   : > { %11963 = vmatpush1.bf16.msra.mxu1 %v20393_v33  ;;  %v20345_v33 = vld [vmem:[#allocation18 + $0x120] ss:$8 sps:$4 sm:$0xff]  }
0x1668   : > { %11964 = vmatprep.subr.bf16.mxu1 %v20401_v37  ;;  %v20350_v37 = vld [vmem:[#allocation18 + $0x134] ss:$8 sps:$4 sm:$0xff]  }
0x166b   : > { %11965 = vmatpush1.bf16.msra.mxu1 %v20399_v38  ;;  %v20348_v38 = vld [vmem:[#allocation18 + $0x130] ss:$8 sps:$4 sm:$0xff]  }
0x166c   : > { %11966 = vmatprep.subr.bf16.mxu1 %v20407_v39  ;;  %v20353_v39 = vld [vmem:[#allocation18 + $0x144] ss:$8 sps:$4 sm:$0xff]  }
0x166f   : > { %11967 = vmatpush1.bf16.msra.mxu1 %v20405_v41  ;;  %v20351_v41 = vld [vmem:[#allocation18 + $0x140] ss:$8 sps:$4 sm:$0xff]  }
0x1670   : > { %11968 = vmatprep.subr.bf16.mxu1 %v20413_v19  ;;  %v20356_v19 = vld [vmem:[#allocation18 + $0x154] ss:$8 sps:$4 sm:$0xff]  }
0x1673   : > { %11969 = vmatpush1.bf16.msra.mxu1 %v20411_v47  ;;  %v20354_v47 = vld [vmem:[#allocation18 + $0x150] ss:$8 sps:$4 sm:$0xff]  }
0x1674   : > { %11970 = vmatprep.subr.bf16.mxu1 %v20419_v17  ;;  %v20359_v17 = vld [vmem:[#allocation18 + $0x164] ss:$8 sps:$4 sm:$0xff]  }
0x1677   : > { %11971 = vmatpush1.bf16.msra.mxu1 %v20417_v50  ;;  %v20357_v50 = vld [vmem:[#allocation18 + $0x160] ss:$8 sps:$4 sm:$0xff]  }
0x1678   : > { %11972 = vmatprep.subr.bf16.mxu1 %v20425_v32  ;;  %v20362_v32 = vld [vmem:[#allocation18 + $0x174] ss:$8 sps:$4 sm:$0xff]  }
0x167b   : > { %11973 = vmatpush1.bf16.msra.mxu1 %v20423_v51  ;;  %v20360_v51 = vld [vmem:[#allocation18 + $0x170] ss:$8 sps:$4 sm:$0xff]  }
0x167c   : > { %11974 = vmatprep.subr.bf16.mxu1 %v20431_v52  ;;  %v20365_v52 = vld [vmem:[#allocation18 + $0x184] ss:$8 sps:$4 sm:$0xff]  }
0x167f   : > { %11975 = vmatpush1.bf16.msra.mxu1 %v20429_v53  ;;  %v20363_v53 = vld [vmem:[#allocation18 + $0x180] ss:$8 sps:$4 sm:$0xff]  }
0x1680   : > { %11976 = vmatprep.subr.bf16.mxu1 %v20437_v54  ;;  %v20368_v54 = vld [vmem:[#allocation18 + $0x194] ss:$8 sps:$4 sm:$0xff]  }
0x1683   : > { %11977 = vmatpush1.bf16.msra.mxu1 %v20435_v55  ;;  %v20366_v55 = vld [vmem:[#allocation18 + $0x190] ss:$8 sps:$4 sm:$0xff]  }
0x1684   : > { %11978 = vmatprep.subr.bf16.mxu1 %v20443_v56  ;;  %v20371_v56 = vld [vmem:[#allocation18 + $0x1a4] ss:$8 sps:$4 sm:$0xff]  }
0x1687   : > { %11979 = vmatpush1.bf16.msra.mxu1 %v20441_v58  ;;  %v20374_v58 = vld [vmem:[#allocation18 + $0x1b4] ss:$8 sps:$4 sm:$0xff]  }
0x1688   : > { %11980 = vmatprep.subr.bf16.mxu1 %v20449_v59  ;;  %v20372_v59 = vld [vmem:[#allocation18 + $0x1b0] ss:$8 sps:$4 sm:$0xff]  }
0x168b   : > { %11981 = vmatpush1.bf16.msra.mxu1 %v20447_v62  ;;  %v20380_v62 = vld [vmem:[#allocation18 + $0x1d4] ss:$8 sps:$4 sm:$0xff]  }
0x1735   : > { %v10565_v63 = vpop.f32.mrb[72].mxu1 }
0x1736   : > { %v18509_v0 = vadd.f32 %v10565_v63, %v10161_v60  ;;  %v10567_v16 = vpop.f32.mrb[73].mxu1  ;;  %v20378_v63 = vld [vmem:[#allocation18 + $0x1d0] ss:$8 sps:$4 sm:$0xff]  }
0x1737   : > { %v18510_v1 = vadd.f32 %v10567_v16, %v10165_v61  ;;  %v10569_v2 = vpop.f32.mrb[74].mxu1  ;;  %v20381_v16 = vld [vmem:[#allocation18 + $0x1e0] ss:$8 sps:$4 sm:$0xff]  }
0x1738   : > { %vm10574_vm3 = vcmp.gt.f32.partialorder %v18509_v0, 0.0  ;;  %v10578_v3 = vmul.f32 0.01, %v18509_v0  ;;  %v18511_v4 = vadd.f32 %v10569_v2, %v10161_v60  ;;  %v10571_v40 = vpop.f32.mrb[75].mxu1  ;;  %v20377_v60 = vld [vmem:[#allocation18 + $0x1c4] ss:$8 sps:$4 sm:$0xff]  }
0x1739   : > { %vm10575_vm4 = vcmp.gt.f32.partialorder %v18510_v1, 0.0  ;;  %v10579_v5 = vmul.f32 0.01, %v18510_v1  ;;  %v18512_v6 = vadd.f32 %v10571_v40, %v10165_v61  ;;  %v20375_v61 = vld [vmem:[#allocation18 + $0x1c0] ss:$8 sps:$4 sm:$0xff]  }
0x173a   : > { %v10582_v7 = vsel %vm10574_vm3, %v18509_v0, %v10578_v3  ;;  %vm10576_vm7 = vcmp.gt.f32.partialorder %v18511_v4, 0.0  ;;  %v10580_v8 = vmul.f32 0.01, %v18511_v4  ;;  %v20383_v0 = vld [vmem:[#allocation18 + $0x1e4] ss:$8 sps:$4 sm:$0xff]  }
0x173b   : > { %v10595_v9 = vrot.slane %v10582_v7, 7  ;;  %v10583_v10 = vsel %vm10575_vm4, %v18510_v1, %v10579_v5  ;;  %vm10577_vm12 = vcmp.gt.f32.partialorder %v18512_v6, 0.0  ;;  %v10581_v36 = vmul.f32 0.01, %v18512_v6  ;;  %v20386_v1 = vld [vmem:[#allocation18 + $0x1f4] ss:$8 sps:$4 sm:$0xff]  }
0x173c   : > { %v10596_v11 = vrot.slane %v10583_v10, 7  ;;  %v10584_v12 = vsel %vm10576_vm7, %v18511_v4, %v10580_v8  ;;  %v20384_v3 = vld [vmem:[#allocation18 + $0x1f0] ss:$8 sps:$4 sm:$0xff]   ;;  %v20392_v40 = vld [vmem:[#allocation20 + $0xc] ss:$16 sps:$4 sm:$0xff]  }
0x173d   : > { %10605 = vst [vmem:[#allocation2] sm:$0xfe] %v10595_v9  ;;  %v10597_v35 = vrot.slane %v10584_v12, 7  ;;  %v10585_v13 = vsel %vm10577_vm12, %v18512_v6, %v10581_v36  ;;  %v20390_v6 = vld [vmem:[#allocation20 + $0x8] ss:$16 sps:$4 sm:$0xff]  }
0x173e   : > { %10606 = vst [vmem:[#allocation2 + $0x8] sm:$0xfe] %v10596_v11  ;;  %v10599_v46 = vrot.slane %v10585_v13, 7  ;;  %v20398_v8 = vld [vmem:[#allocation20 + $0x2c] ss:$16 sps:$4 sm:$0xff]  }
0x173f   : > { %v10598_v15 = vsel %vm9576_vm6, %v10595_v9, %v10597_v35  ;;  %v20396_v9 = vld [vmem:[#allocation20 + $0x28] ss:$16 sps:$4 sm:$0xff]   ;;  %v20404_v10 = vld [vmem:[#allocation20 + $0x4c] ss:$16 sps:$4 sm:$0xff]  }
0x1740   : > { %10607 = vst [vmem:[#allocation2 + $0x20] sm:$0x1f] %v10598_v15  ;;  %v10600_v18 = vsel %vm9576_vm6, %v10596_v11, %v10599_v46  ;;  %v20402_v36 = vld [vmem:[#allocation20 + $0x48] ss:$16 sps:$4 sm:$0xff]   ;;  %v20410_v11 = vld [vmem:[#allocation20 + $0x6c] ss:$16 sps:$4 sm:$0xff]  }
0x1741   : > { %10608 = vst [vmem:[#allocation2 + $0x28] sm:$0x1f] %v10600_v18  ;;  %v20408_v12 = vld [vmem:[#allocation20 + $0x68] ss:$16 sps:$4 sm:$0xff]   ;;  %v20416_v35 = vld [vmem:[#allocation20 + $0x8c] ss:$16 sps:$4 sm:$0xff]  }
0x1742   : > { %v20414_v13 = vld [vmem:[#allocation20 + $0x88] ss:$16 sps:$4 sm:$0xff]   ;;  %v20422_v46 = vld [vmem:[#allocation20 + $0xac] ss:$16 sps:$4 sm:$0xff]  }
0x1743   : > { %v20420_v15 = vld [vmem:[#allocation20 + $0xa8] ss:$16 sps:$4 sm:$0xff]   ;;  %v20428_v18 = vld [vmem:[#allocation20 + $0xcc] ss:$16 sps:$4 sm:$0xff]  }
0x1744   : > { %v22922_v22 = vld [vmem:[#allocation2] sm:$0xff] }
0x1745   : > { %v10610_v21 = vld [vmem:[#allocation2 + $0x8] sm:$0xff]  ;;  %v10617_v4 = vrot.slane %v22922_v22, 1 }
0x1746   : > { %11125 = vst.msk [vmem:[#allocation2] ss:$8 sm:$0x3] %vm22500_vm1, %v21875_v31  ;;  %v10620_v24 = vrot.slane %v10610_v21, 1 }
0x1747   : > { %v22927_v49 = vld [vmem:[#allocation2 + $0x20] sm:$0x3f] }
0x1748   : > { %v10612_v14 = vld [vmem:[#allocation2 + $0x28] sm:$0x3f]  ;;  %v10627_v26 = vpack.c.bf16 %v22927_v49, %v22922_v22  ;;  %v10618_v2 = vrot.slane %v22927_v49, 1 }
0x1749   : > { %v10628_v20 = vpack.c.bf16 %v10612_v14, %v10610_v21  ;;  %v10621_v25 = vrot.slane %v10612_v14, 1  ;;  %v20426_v21 = vld [vmem:[#allocation20 + $0xc8] ss:$16 sps:$4 sm:$0xff]   ;;  %v20434_v22 = vld [vmem:[#allocation20 + $0xec] ss:$16 sps:$4 sm:$0xff]  }
0x174a   : > { %v10619_v5 = vsel %vm1672_vm0, %v10617_v4, %v10618_v2  ;;  %v20432_v49 = vld [vmem:[#allocation20 + $0xe8] ss:$16 sps:$4 sm:$0xff]   ;;  %v20440_v14 = vld [vmem:[#allocation20 + $0x10c] ss:$16 sps:$4 sm:$0xff]  }
0x174b   : > { %11059 = vmatprep.mubr.bf16.mxu0 %v10628_v20  ;;  %v10622_v27 = vsel %vm1672_vm0, %v10620_v24, %v10621_v25  ;;  %v10629_v7 = vpack.c.bf16 %v10618_v2, %v10619_v5  ;;  %v20438_v20 = vld [vmem:[#allocation20 + $0x108] ss:$16 sps:$4 sm:$0xff]  }
0x174c   : > { %11060 = vmatmul.mubr.bf16.vlgmr.msra.gmra.mrb[60].mxu0 %v10627_v26  ;;  %v10630_v48 = vpack.c.bf16 %v10621_v25, %v10622_v27  ;;  %v20444_v24 = vld [vmem:[#allocation20 + $0x128] ss:$16 sps:$4 sm:$0xff]   ;;  %v20452_v25 = vld [vmem:[#allocation20 + $0x14c] ss:$16 sps:$4 sm:$0xff]  }
0x174d   : > { %11071 = vmatpush1.bf16.msra.mxu0 %v20339_v23  ;;  %v20446_v23 = vld [vmem:[#allocation20 + $0x12c] ss:$16 sps:$4 sm:$0xff]   ;;  %v20450_v26 = vld [vmem:[#allocation20 + $0x148] ss:$16 sps:$4 sm:$0xff]  }
0x174e   : > { %11102 = vmatprep.mubr.bf16.mxu0 %v10630_v48  ;;  %11072 = vmatprep.subr.bf16.mxu0 %v20344_v34  ;;  %v20455_v34 = vld [vmem:[#allocation20 + $0x164] ss:$16 sps:$4 sm:$0xff]   ;;  %v20458_v27 = vld [vmem:[#allocation20 + $0x16c] ss:$16 sps:$4 sm:$0xff]   ;;  %v20453_v48 = vld [vmem:[#allocation20 + $0x160] ss:$16 sps:$4 sm:$0xff]  }
0x174f   : > { %11982 = vmatprep.subr.bf16.mxu1 %v20455_v34  ;;  %v20491_v34 = vld [vmem:[#allocation20 + $0x224] ss:$16 sps:$4 sm:$0xff]  }
0x1750   : > { %11983 = vmatpush1.bf16.msra.mxu1 %v20453_v48 }
0x1751   : > { %11073 = vmatpush1.bf16.msra.mxu0 %v20342_v28  ;;  %v20456_v28 = vld [vmem:[#allocation20 + $0x168] ss:$16 sps:$4 sm:$0xff]  }
0x1752   : > { %11074 = vmatprep.subr.bf16.mxu0 %v20347_v29  ;;  %v20461_v29 = vld [vmem:[#allocation20 + $0x184] ss:$16 sps:$4 sm:$0xff]  }
0x1753   : > { %11984 = vmatprep.subr.bf16.mxu1 %v20461_v29  ;;  %v20492_v29 = vld [vmem:[#allocation20 + $0x228] ss:$16 sps:$4 sm:$0xff]  }
0x1755   : > { %11075 = vmatpush1.bf16.msra.mxu0 %v20345_v33  ;;  %v20464_v33 = vld [vmem:[#allocation20 + $0x18c] ss:$16 sps:$4 sm:$0xff]  }
0x1756   : > { %11076 = vmatprep.subr.bf16.mxu0 %v20350_v37  ;;  %v20459_v37 = vld [vmem:[#allocation20 + $0x180] ss:$16 sps:$4 sm:$0xff]  }
0x1757   : > { %11985 = vmatpush1.bf16.msra.mxu1 %v20459_v37  ;;  %v20500_v37 = vld [vmem:[#allocation20 + $0x24c] ss:$16 sps:$4 sm:$0xff]  }
0x1759   : > { %11077 = vmatpush1.bf16.msra.mxu0 %v20348_v38  ;;  %v20462_v38 = vld [vmem:[#allocation20 + $0x188] ss:$16 sps:$4 sm:$0xff]  }
0x175a   : > { %11078 = vmatprep.subr.bf16.mxu0 %v20353_v39  ;;  %v20467_v39 = vld [vmem:[#allocation20 + $0x1a4] ss:$16 sps:$4 sm:$0xff]  }
0x175b   : > { %11986 = vmatprep.subr.bf16.mxu1 %v20467_v39  ;;  %v20498_v39 = vld [vmem:[#allocation20 + $0x248] ss:$16 sps:$4 sm:$0xff]  }
0x175d   : > { %11079 = vmatpush1.bf16.msra.mxu0 %v20351_v41  ;;  %v20470_v41 = vld [vmem:[#allocation20 + $0x1ac] ss:$16 sps:$4 sm:$0xff]  }
0x175e   : > { %11080 = vmatprep.subr.bf16.mxu0 %v20356_v19  ;;  %v20465_v19 = vld [vmem:[#allocation20 + $0x1a0] ss:$16 sps:$4 sm:$0xff]  }
0x175f   : > { %11987 = vmatpush1.bf16.msra.mxu1 %v20465_v19  ;;  %v20506_v19 = vld [vmem:[#allocation20 + $0x26c] ss:$16 sps:$4 sm:$0xff]  }
0x1761   : > { %11081 = vmatpush1.bf16.msra.mxu0 %v20354_v47  ;;  %v20468_v47 = vld [vmem:[#allocation20 + $0x1a8] ss:$16 sps:$4 sm:$0xff]  }
0x1762   : > { %11082 = vmatprep.subr.bf16.mxu0 %v20359_v17  ;;  %v20471_v17 = vld [vmem:[#allocation20 + $0x1c0] ss:$16 sps:$4 sm:$0xff]  }
0x1765   : > { %11083 = vmatpush1.bf16.msra.mxu0 %v20357_v50  ;;  %v20473_v50 = vld [vmem:[#allocation20 + $0x1c4] ss:$16 sps:$4 sm:$0xff]  }
0x1766   : > { %11084 = vmatprep.subr.bf16.mxu0 %v20362_v32  ;;  %v20474_v32 = vld [vmem:[#allocation20 + $0x1c8] ss:$16 sps:$4 sm:$0xff]   ;;  %11988 = vmatprep.subr.bf16.mxu1 %v20473_v50  ;;  %v20509_v50 = vld [vmem:[#allocation20 + $0x284] ss:$16 sps:$4 sm:$0xff]  }
0x1767   : > { %11989 = vmatpush1.bf16.msra.mxu1 %v20471_v17  ;;  %v20504_v17 = vld [vmem:[#allocation20 + $0x268] ss:$16 sps:$4 sm:$0xff]  }
0x1769   : > { %11085 = vmatpush1.bf16.msra.mxu0 %v20360_v51  ;;  %v20476_v51 = vld [vmem:[#allocation20 + $0x1cc] ss:$16 sps:$4 sm:$0xff]  }
0x176a   : > { %11086 = vmatprep.subr.bf16.mxu0 %v20365_v52  ;;  %v20479_v52 = vld [vmem:[#allocation20 + $0x1e4] ss:$16 sps:$4 sm:$0xff]  }
0x176b   : > { %11990 = vmatprep.subr.bf16.mxu1 %v20479_v52  ;;  %v20510_v52 = vld [vmem:[#allocation20 + $0x288] ss:$16 sps:$4 sm:$0xff]  }
0x176d   : > { %11087 = vmatpush1.bf16.msra.mxu0 %v20363_v53  ;;  %v20482_v53 = vld [vmem:[#allocation20 + $0x1ec] ss:$16 sps:$4 sm:$0xff]  }
0x176e   : > { %11088 = vmatprep.subr.bf16.mxu0 %v20368_v54  ;;  %v20477_v54 = vld [vmem:[#allocation20 + $0x1e0] ss:$16 sps:$4 sm:$0xff]  }
0x176f   : > { %11991 = vmatpush1.bf16.msra.mxu1 %v20477_v54  ;;  %v20518_v54 = vld [vmem:[#allocation20 + $0x2ac] ss:$16 sps:$4 sm:$0xff]  }
0x1771   : > { %11089 = vmatpush1.bf16.msra.mxu0 %v20366_v55  ;;  %v20480_v55 = vld [vmem:[#allocation20 + $0x1e8] ss:$16 sps:$4 sm:$0xff]  }
0x1772   : > { %11090 = vmatprep.subr.bf16.mxu0 %v20371_v56  ;;  %v20485_v56 = vld [vmem:[#allocation20 + $0x204] ss:$16 sps:$4 sm:$0xff]  }
0x1773   : > { %12003 = vmatprep.subr.bf16.mxu1 %v20485_v56  ;;  %v20516_v56 = vld [vmem:[#allocation20 + $0x2a8] ss:$16 sps:$4 sm:$0xff]  }
0x1775   : > { %11091 = vmatpush1.bf16.msra.mxu0 %v20369_v57  ;;  %v20488_v57 = vld [vmem:[#allocation20 + $0x20c] ss:$16 sps:$4 sm:$0xff]  }
0x1776   : > { %11092 = vmatprep.subr.bf16.mxu0 %v20374_v58  ;;  %v10695_v58 = vld [vmem:[%s23258_s22] sm:$0x3]  ;;  %s23260_s22 = sld [smem:[#allocation74_spill]] }
0x1779   : > { %11093 = vmatpush1.bf16.msra.mxu0 %v20372_v59  ;;  %v10700_v59 = vrot.slane %v10695_v58, %v22525_v42 }
0x177a   : > { %11094 = vmatprep.subr.bf16.mxu0 %v20377_v60  ;;  %v10704_v60 = vrot.slane %v10695_v58, %v22529_v44  ;;  %v20524_v58 = vld [vmem:[#allocation20 + $0x2cc] ss:$16 sps:$4 sm:$0xff]  }
0x177d   : > { %11095 = vmatpush1.bf16.msra.mxu0 %v20375_v61 }
0x177e   : > { %11096 = vmatprep.subr.bf16.mxu0 %v20380_v62 }
0x1781   : > { %11097 = vmatpush1.bf16.msra.mxu0 %v20378_v63 }
0x1782   : > { %11098 = vmatprep.subr.bf16.mxu0 %v20383_v0 }
0x1785   : > { %11099 = vmatpush1.bf16.msra.mxu0 %v20381_v16 }
0x1786   : > { %11100 = vmatprep.subr.bf16.mxu0 %v20386_v1 }
0x1789   : > { %11101 = vmatpush1.bf16.msra.mxu0 %v20384_v3 }
0x178a   : > { %12046 = vmatprep.subr.bf16.mxu0 %v20392_v40 }
0x178c   : > { %11103 = vmatmul.mubr.bf16.vlgmr.msra.gmra.mrb[60].mxu0 %v10629_v7 }
0x178d   : > { %12047 = vmatpush1.bf16.msra.mxu0 %v20390_v6 }
0x178e   : > { %12048 = vmatprep.subr.bf16.mxu0 %v20398_v8 }
0x1791   : > { %12049 = vmatpush1.bf16.msra.mxu0 %v20396_v9 }
0x1792   : > { %12050 = vmatprep.subr.bf16.mxu0 %v20404_v10 }
0x1795   : > { %12051 = vmatpush1.bf16.msra.mxu0 %v20402_v36 }
0x1796   : > { %12052 = vmatprep.subr.bf16.mxu0 %v20410_v11 }
0x1799   : > { %12053 = vmatpush1.bf16.msra.mxu0 %v20408_v12 }
0x179a   : > { %12054 = vmatprep.subr.bf16.mxu0 %v20416_v35 }
0x179d   : > { %12055 = vmatpush1.bf16.msra.mxu0 %v20414_v13 }
0x179e   : > { %12056 = vmatprep.subr.bf16.mxu0 %v20422_v46 }
0x17a1   : > { %12057 = vmatpush1.bf16.msra.mxu0 %v20420_v15 }
0x17a2   : > { %12058 = vmatprep.subr.bf16.mxu0 %v20428_v18 }
0x17a5   : > { %12059 = vmatpush1.bf16.msra.mxu0 %v20426_v21 }
0x17a6   : > { %12060 = vmatprep.subr.bf16.mxu0 %v20434_v22 }
0x17a9   : > { %12061 = vmatpush1.bf16.msra.mxu0 %v20432_v49 }
0x17aa   : > { %12062 = vmatprep.subr.bf16.mxu0 %v20440_v14  ;;  %v20483_v14 = vld [vmem:[#allocation20 + $0x200] ss:$16 sps:$4 sm:$0xff]  }
0x17ad   : > { %12063 = vmatpush1.bf16.msra.mxu0 %v20438_v20  ;;  %v20486_v20 = vld [vmem:[#allocation20 + $0x208] ss:$16 sps:$4 sm:$0xff]  }
0x17ae   : > { %12064 = vmatprep.subr.bf16.mxu0 %v20446_v23 }
0x17b1   : > { %12065 = vmatpush1.bf16.msra.mxu0 %v20444_v24 }
0x17b2   : > { %12066 = vmatprep.subr.bf16.mxu0 %v20452_v25 }
0x17b5   : > { %12067 = vmatpush1.bf16.msra.mxu0 %v20450_v26 }
0x17b6   : > { %12068 = vmatprep.subr.bf16.mxu0 %v20458_v27  ;;  %v20494_v27 = vld [vmem:[#allocation20 + $0x22c] ss:$16 sps:$4 sm:$0xff]  }
0x17b9   : > { %12069 = vmatpush1.bf16.msra.mxu0 %v20456_v28  ;;  %v20489_v28 = vld [vmem:[#allocation20 + $0x220] ss:$16 sps:$4 sm:$0xff]  }
0x17ba   : > { %12070 = vmatprep.subr.bf16.mxu0 %v20464_v33  ;;  %v20497_v33 = vld [vmem:[#allocation20 + $0x244] ss:$16 sps:$4 sm:$0xff]  }
0x17bd   : > { %12071 = vmatpush1.bf16.msra.mxu0 %v20462_v38  ;;  %v20495_v38 = vld [vmem:[#allocation20 + $0x240] ss:$16 sps:$4 sm:$0xff]  }
0x17be   : > { %12072 = vmatprep.subr.bf16.mxu0 %v20470_v41  ;;  %v20503_v41 = vld [vmem:[#allocation20 + $0x264] ss:$16 sps:$4 sm:$0xff]  }
0x17c1   : > { %12073 = vmatpush1.bf16.msra.mxu0 %v20468_v47  ;;  %v20501_v47 = vld [vmem:[#allocation20 + $0x260] ss:$16 sps:$4 sm:$0xff]  }
0x17c2   : > { %12074 = vmatprep.subr.bf16.mxu0 %v20476_v51  ;;  %v20507_v51 = vld [vmem:[#allocation20 + $0x280] ss:$16 sps:$4 sm:$0xff]  }
0x17c5   : > { %12075 = vmatpush1.bf16.msra.mxu0 %v20474_v32  ;;  %v20512_v32 = vld [vmem:[#allocation20 + $0x28c] ss:$16 sps:$4 sm:$0xff]  }
0x17c6   : > { %12076 = vmatprep.subr.bf16.mxu0 %v20482_v53  ;;  %v20515_v53 = vld [vmem:[#allocation20 + $0x2a4] ss:$16 sps:$4 sm:$0xff]  }
0x17c9   : > { %12077 = vmatpush1.bf16.msra.mxu0 %v20480_v55  ;;  %v20513_v55 = vld [vmem:[#allocation20 + $0x2a0] ss:$16 sps:$4 sm:$0xff]  }
0x17ca   : > { %12089 = vmatprep.subr.bf16.mxu0 %v20488_v57  ;;  %v20521_v57 = vld [vmem:[#allocation20 + $0x2c4] ss:$16 sps:$4 sm:$0xff]  }
0x185f   : > { %v11104_v61 = vpop.f32.mrb[60].mxu0 }
0x1860   : > { %v18513_v62 = vadd.f32 %v11104_v61, %v10700_v59  ;;  %v11106_v63 = vpop.f32.mrb[61].mxu0  ;;  %v20527_v61 = vld [vmem:[#allocation20 + $0x2e4] ss:$16 sps:$4 sm:$0xff]  }
0x1861   : > { %v18514_v0 = vadd.f32 %v11106_v63, %v10704_v60  ;;  %v11108_v16 = vpop.f32.mrb[62].mxu0  ;;  %v20525_v63 = vld [vmem:[#allocation20 + $0x2e0] ss:$16 sps:$4 sm:$0xff]  }
0x1862   : > { %vm11113_vm1 = vcmp.gt.f32.partialorder %v18513_v62, 0.0  ;;  %v11117_v1 = vmul.f32 0.01, %v18513_v62  ;;  %v18515_v2 = vadd.f32 %v11108_v16, %v10700_v59  ;;  %v11110_v3 = vpop.f32.mrb[63].mxu0  ;;  %v20519_v59 = vld [vmem:[#allocation20 + $0x2c0] ss:$16 sps:$4 sm:$0xff]  }
0x1863   : > { %vm11114_vm5 = vcmp.gt.f32.partialorder %v18514_v0, 0.0  ;;  %v11118_v4 = vmul.f32 0.01, %v18514_v0  ;;  %v18516_v40 = vadd.f32 %v11110_v3, %v10704_v60  ;;  %v20522_v60 = vld [vmem:[#allocation20 + $0x2c8] ss:$16 sps:$4 sm:$0xff]  }
0x1864   : > { %v11121_v5 = vsel %vm11113_vm1, %v18513_v62, %v11117_v1  ;;  %vm11115_vm8 = vcmp.gt.f32.partialorder %v18515_v2, 0.0  ;;  %v11119_v6 = vmul.f32 0.01, %v18515_v2  ;;  %v20530_v62 = vld [vmem:[#allocation20 + $0x2ec] ss:$16 sps:$4 sm:$0xff]  }
0x1865   : > { %v11134_v7 = vrot.slane %v11121_v5, 7  ;;  %v11122_v8 = vsel %vm11114_vm5, %v18514_v0, %v11118_v4  ;;  %vm11116_vm10 = vcmp.gt.f32.partialorder %v18516_v40, 0.0  ;;  %v11120_v9 = vmul.f32 0.01, %v18516_v40  ;;  %v20528_v0 = vld [vmem:[#allocation20 + $0x2e8] ss:$16 sps:$4 sm:$0xff]  }
0x1866   : > { %v11135_v10 = vrot.slane %v11122_v8, 7  ;;  %v11123_v36 = vsel %vm11115_vm8, %v18515_v2, %v11119_v6  ;;  %v20533_v16 = vld [vmem:[#allocation20 + $0x304] ss:$16 sps:$4 sm:$0xff]   ;;  %v20536_v1 = vld [vmem:[#allocation20 + $0x30c] ss:$16 sps:$4 sm:$0xff]  }
0x1867   : > { %11144 = vst [vmem:[#allocation2] sm:$0xfe] %v11134_v7  ;;  %v11136_v11 = vrot.slane %v11123_v36, 7  ;;  %v11124_v12 = vsel %vm11116_vm10, %v18516_v40, %v11120_v9  ;;  %v20531_v2 = vld [vmem:[#allocation20 + $0x300] ss:$16 sps:$4 sm:$0xff]  }
0x1868   : > { %11145 = vst [vmem:[#allocation2 + $0x8] sm:$0xfe] %v11135_v10  ;;  %v11138_v35 = vrot.slane %v11124_v12, 7  ;;  %v20534_v3 = vld [vmem:[#allocation20 + $0x308] ss:$16 sps:$4 sm:$0xff]  }
0x1869   : > { %v11137_v13 = vsel %vm9576_vm6, %v11134_v7, %v11136_v11  ;;  %v20539_v4 = vld [vmem:[#allocation20 + $0x324] ss:$16 sps:$4 sm:$0xff]   ;;  %v20542_v40 = vld [vmem:[#allocation20 + $0x32c] ss:$16 sps:$4 sm:$0xff]   ;;  %v20537_v5 = vld [vmem:[#allocation20 + $0x320] ss:$16 sps:$4 sm:$0xff]  }
0x186a   : > { %11146 = vst [vmem:[#allocation2 + $0x20] sm:$0x3f] %v11137_v13  ;;  %v11139_v46 = vsel %vm9576_vm6, %v11135_v10, %v11138_v35  ;;  %v20540_v6 = vld [vmem:[#allocation20 + $0x328] ss:$16 sps:$4 sm:$0xff]   ;;  %v20545_v7 = vld [vmem:[#allocation20 + $0x344] ss:$16 sps:$4 sm:$0xff]  }
0x186b   : > { %11147 = vst [vmem:[#allocation2 + $0x28] sm:$0x3f] %v11139_v46  ;;  %v20548_v8 = vld [vmem:[#allocation20 + $0x34c] ss:$16 sps:$4 sm:$0xff]   ;;  %v20543_v9 = vld [vmem:[#allocation20 + $0x340] ss:$16 sps:$4 sm:$0xff]  }
0x186c   : > { %v20546_v10 = vld [vmem:[#allocation20 + $0x348] ss:$16 sps:$4 sm:$0xff]   ;;  %v20551_v36 = vld [vmem:[#allocation20 + $0x364] ss:$16 sps:$4 sm:$0xff]   ;;  %v20554_v11 = vld [vmem:[#allocation20 + $0x36c] ss:$16 sps:$4 sm:$0xff]  }
0x186d   : > { %v20549_v12 = vld [vmem:[#allocation20 + $0x360] ss:$16 sps:$4 sm:$0xff]   ;;  %v20552_v35 = vld [vmem:[#allocation20 + $0x368] ss:$16 sps:$4 sm:$0xff]   ;;  %v20557_v13 = vld [vmem:[#allocation20 + $0x384] ss:$16 sps:$4 sm:$0xff]  }
0x186e   : > { %v22940_v18 = vld [vmem:[#allocation2] sm:$0xff]  ;;  %v20560_v46 = vld [vmem:[#allocation20 + $0x38c] ss:$16 sps:$4 sm:$0xff]  }
0x186f   : > { %v11149_v15 = vld [vmem:[#allocation2 + $0x8] sm:$0xff] }
0x1870   : > { %12158 = vst.msk [vmem:[#allocation2] ss:$8 sm:$0xf] %vm22504_vm2, %v21875_v31  ;;  %v11159_v23 = vrot.slane %v11149_v15, 1 }
0x1871   : > { %v22945_v21 = vld [vmem:[#allocation2 + $0x20] sm:$0x7f] }
0x1872   : > { %v11151_v22 = vld [vmem:[#allocation2 + $0x28] sm:$0x7f]  ;;  %v11166_v25 = vpack.c.bf16 %v22945_v21, %v22940_v18 }
0x1873   : > { %v11167_v49 = vpack.c.bf16 %v11151_v22, %v11149_v15  ;;  %v11160_v24 = vrot.slane %v11151_v22, 1  ;;  %v20555_v15 = vld [vmem:[#allocation20 + $0x380] ss:$16 sps:$4 sm:$0xff]   ;;  %v20558_v22 = vld [vmem:[#allocation20 + $0x388] ss:$16 sps:$4 sm:$0xff]  }
0x1875   : > { %11992 = vmatprep.mubr.bf16.mxu1 %v11167_v49  ;;  %12078 = vmatprep.mubr.bf16.mxu0 %v11167_v49  ;;  %v11161_v26 = vsel %vm1672_vm0, %v11159_v23, %v11160_v24  ;;  %v20563_v49 = vld [vmem:[#allocation20 + $0x3a4] ss:$16 sps:$4 sm:$0xff]   ;;  %v20564_v23 = vld [vmem:[#allocation20 + $0x3a8] ss:$16 sps:$4 sm:$0xff]  }
0x1876   : > { %11993 = vmatmul.mubr.bf16.vlgmr.msra.gmra.mrb[76].mxu1 %v11166_v25  ;;  %12079 = vmatmul.mubr.bf16.vlgmr.msra.gmra.mrb[64].mxu0 %v11166_v25  ;;  %v11169_v48 = vpack.c.bf16 %v11160_v24, %v11161_v26  ;;  %v20569_v24 = vld [vmem:[#allocation20 + $0x3c4] ss:$16 sps:$4 sm:$0xff]   ;;  %v20572_v25 = vld [vmem:[#allocation20 + $0x3cc] ss:$16 sps:$4 sm:$0xff]   ;;  %v20567_v26 = vld [vmem:[#allocation20 + $0x3c0] ss:$16 sps:$4 sm:$0xff]  }
0x1877   : > { %12004 = vmatpush1.bf16.msra.mxu1 %v20483_v14  ;;  %12090 = vmatpush1.bf16.msra.mxu0 %v20486_v20  ;;  %v20566_v14 = vld [vmem:[#allocation20 + $0x3ac] ss:$16 sps:$4 sm:$0xff]   ;;  %v20561_v20 = vld [vmem:[#allocation20 + $0x3a0] ss:$16 sps:$4 sm:$0xff]  }
0x1878   : > { %12035 = vmatprep.mubr.bf16.mxu1 %v11169_v48  ;;  %12121 = vmatprep.mubr.bf16.mxu0 %v11169_v48  ;;  %v20578_v48 = vld [vmem:[#allocation20 + $0x3ec] ss:$16 sps:$4 sm:$0xff]  }
0x1879   : > { %12005 = vmatprep.subr.bf16.mxu1 %v20491_v34  ;;  %12091 = vmatprep.subr.bf16.mxu0 %v20494_v27  ;;  %v20570_v34 = vld [vmem:[#allocation20 + $0x3c8] ss:$16 sps:$4 sm:$0xff]   ;;  %v20575_v27 = vld [vmem:[#allocation20 + $0x3e4] ss:$16 sps:$4 sm:$0xff]  }
0x187b   : > { %12006 = vmatpush1.bf16.msra.mxu1 %v20489_v28  ;;  %12092 = vmatpush1.bf16.msra.mxu0 %v20492_v29  ;;  %v11157_v28 = vrot.slane %v22945_v21, 1  ;;  %v20573_v29 = vld [vmem:[#allocation20 + $0x3e0] ss:$16 sps:$4 sm:$0xff]   ;;  %v20587_v21 = vld [vmem:[#allocation21 + $0x24] ss:$16 sps:$4 sm:$0xff]  }
0x187c   : > { %12007 = vmatprep.subr.bf16.mxu1 %v20497_v33  ;;  %12093 = vmatprep.subr.bf16.mxu0 %v20500_v37  ;;  %v20576_v33 = vld [vmem:[#allocation20 + $0x3e8] ss:$16 sps:$4 sm:$0xff]   ;;  %v11156_v37 = vrot.slane %v22940_v18, 1  ;;  %v20585_v18 = vld [vmem:[#allocation21 + $0x20] ss:$16 sps:$4 sm:$0xff]  }
0x187f   : > { %12008 = vmatpush1.bf16.msra.mxu1 %v20495_v38  ;;  %12094 = vmatpush1.bf16.msra.mxu0 %v20498_v39  ;;  %v20581_v38 = vld [vmem:[#allocation21 + $0x4] ss:$16 sps:$4 sm:$0xff]   ;;  %v20584_v39 = vld [vmem:[#allocation21 + $0xc] ss:$16 sps:$4 sm:$0xff]  }
0x1880   : > { %12009 = vmatprep.subr.bf16.mxu1 %v20503_v41  ;;  %12095 = vmatprep.subr.bf16.mxu0 %v20506_v19  ;;  %v11158_v41 = vsel %vm1672_vm0, %v11156_v37, %v11157_v28  ;;  %v20579_v19 = vld [vmem:[#allocation21] ss:$16 sps:$4 sm:$0xff]   ;;  %v20660_v37 = vld [vmem:[#allocation21 + $0x1a8] ss:$16 sps:$4 sm:$0xff]  }
0x1883   : > { %12010 = vmatpush1.bf16.msra.mxu1 %v20501_v47  ;;  %12096 = vmatpush1.bf16.msra.mxu0 %v20504_v17  ;;  %v20582_v47 = vld [vmem:[#allocation21 + $0x8] ss:$16 sps:$4 sm:$0xff]   ;;  %v11168_v17 = vpack.c.bf16 %v11157_v28, %v11158_v41  ;;  %v20659_v28 = vld [vmem:[#allocation21 + $0x1a4] ss:$16 sps:$4 sm:$0xff]  }
0x1884   : > { %12011 = vmatprep.subr.bf16.mxu1 %v20509_v50  ;;  %12097 = vmatprep.subr.bf16.mxu0 %v20512_v32  ;;  %v20590_v50 = vld [vmem:[#allocation21 + $0x2c] ss:$16 sps:$4 sm:$0xff]   ;;  %v20588_v32 = vld [vmem:[#allocation21 + $0x28] ss:$16 sps:$4 sm:$0xff]  }
0x1885   : > { %v20666_v41 = vld [vmem:[#allocation21 + $0x1c8] ss:$16 sps:$4 sm:$0xff]  }
0x1887   : > { %12012 = vmatpush1.bf16.msra.mxu1 %v20507_v51  ;;  %12098 = vmatpush1.bf16.msra.mxu0 %v20510_v52  ;;  %v20593_v51 = vld [vmem:[#allocation21 + $0x44] ss:$16 sps:$4 sm:$0xff]   ;;  %v20596_v52 = vld [vmem:[#allocation21 + $0x4c] ss:$16 sps:$4 sm:$0xff]  }
0x1888   : > { %12013 = vmatprep.subr.bf16.mxu1 %v20515_v53  ;;  %12099 = vmatprep.subr.bf16.mxu0 %v20518_v54  ;;  %v20591_v53 = vld [vmem:[#allocation21 + $0x40] ss:$16 sps:$4 sm:$0xff]   ;;  %v20594_v54 = vld [vmem:[#allocation21 + $0x48] ss:$16 sps:$4 sm:$0xff]  }
0x188b   : > { %12014 = vmatpush1.bf16.msra.mxu1 %v20513_v55  ;;  %12100 = vmatpush1.bf16.msra.mxu0 %v20516_v56  ;;  %v20599_v55 = vld [vmem:[#allocation21 + $0x64] ss:$16 sps:$4 sm:$0xff]   ;;  %v20602_v56 = vld [vmem:[#allocation21 + $0x6c] ss:$16 sps:$4 sm:$0xff]  }
0x188c   : > { %12015 = vmatprep.subr.bf16.mxu1 %v20521_v57  ;;  %12101 = vmatprep.subr.bf16.mxu0 %v20524_v58  ;;  %v20597_v57 = vld [vmem:[#allocation21 + $0x60] ss:$16 sps:$4 sm:$0xff]   ;;  %v20600_v58 = vld [vmem:[#allocation21 + $0x68] ss:$16 sps:$4 sm:$0xff]  }
0x188f   : > { %12016 = vmatpush1.bf16.msra.mxu1 %v20519_v59  ;;  %12102 = vmatpush1.bf16.msra.mxu0 %v20522_v60  ;;  %v20605_v59 = vld [vmem:[#allocation21 + $0x84] ss:$16 sps:$4 sm:$0xff]   ;;  %v20608_v60 = vld [vmem:[#allocation21 + $0x8c] ss:$16 sps:$4 sm:$0xff]  }
0x1890   : > { %12017 = vmatprep.subr.bf16.mxu1 %v20527_v61  ;;  %12103 = vmatprep.subr.bf16.mxu0 %v20530_v62  ;;  %v20603_v61 = vld [vmem:[#allocation21 + $0x80] ss:$16 sps:$4 sm:$0xff]   ;;  %v20606_v62 = vld [vmem:[#allocation21 + $0x88] ss:$16 sps:$4 sm:$0xff]  }
0x1893   : > { %12018 = vmatpush1.bf16.msra.mxu1 %v20525_v63  ;;  %12104 = vmatpush1.bf16.msra.mxu0 %v20528_v0  ;;  %v20611_v63 = vld [vmem:[#allocation21 + $0xa4] ss:$16 sps:$4 sm:$0xff]   ;;  %v20614_v0 = vld [vmem:[#allocation21 + $0xac] ss:$16 sps:$4 sm:$0xff]  }
0x1894   : > { %12019 = vmatprep.subr.bf16.mxu1 %v20533_v16  ;;  %12105 = vmatprep.subr.bf16.mxu0 %v20536_v1  ;;  %v20609_v16 = vld [vmem:[#allocation21 + $0xa0] ss:$16 sps:$4 sm:$0xff]   ;;  %v20612_v1 = vld [vmem:[#allocation21 + $0xa8] ss:$16 sps:$4 sm:$0xff]  }
0x1897   : > { %12020 = vmatpush1.bf16.msra.mxu1 %v20531_v2  ;;  %12106 = vmatpush1.bf16.msra.mxu0 %v20534_v3  ;;  %v20617_v2 = vld [vmem:[#allocation21 + $0xc4] ss:$16 sps:$4 sm:$0xff]   ;;  %v20620_v3 = vld [vmem:[#allocation21 + $0xcc] ss:$16 sps:$4 sm:$0xff]  }
0x1898   : > { %12021 = vmatprep.subr.bf16.mxu1 %v20539_v4  ;;  %12107 = vmatprep.subr.bf16.mxu0 %v20542_v40  ;;  %v20615_v4 = vld [vmem:[#allocation21 + $0xc0] ss:$16 sps:$4 sm:$0xff]   ;;  %v20618_v40 = vld [vmem:[#allocation21 + $0xc8] ss:$16 sps:$4 sm:$0xff]  }
0x189b   : > { %12022 = vmatpush1.bf16.msra.mxu1 %v20537_v5  ;;  %12108 = vmatpush1.bf16.msra.mxu0 %v20540_v6  ;;  %v20623_v5 = vld [vmem:[#allocation21 + $0xe4] ss:$16 sps:$4 sm:$0xff]   ;;  %v20626_v6 = vld [vmem:[#allocation21 + $0xec] ss:$16 sps:$4 sm:$0xff]  }
0x189c   : > { %12023 = vmatprep.subr.bf16.mxu1 %v20545_v7  ;;  %12109 = vmatprep.subr.bf16.mxu0 %v20548_v8  ;;  %v20621_v7 = vld [vmem:[#allocation21 + $0xe0] ss:$16 sps:$4 sm:$0xff]   ;;  %v20624_v8 = vld [vmem:[#allocation21 + $0xe8] ss:$16 sps:$4 sm:$0xff]  }
0x189f   : > { %12024 = vmatpush1.bf16.msra.mxu1 %v20543_v9  ;;  %12110 = vmatpush1.bf16.msra.mxu0 %v20546_v10  ;;  %v20629_v9 = vld [vmem:[#allocation21 + $0x104] ss:$16 sps:$4 sm:$0xff]   ;;  %v20632_v10 = vld [vmem:[#allocation21 + $0x10c] ss:$16 sps:$4 sm:$0xff]  }
0x18a0   : > { %12025 = vmatprep.subr.bf16.mxu1 %v20551_v36  ;;  %12111 = vmatprep.subr.bf16.mxu0 %v20554_v11  ;;  %v20627_v36 = vld [vmem:[#allocation21 + $0x100] ss:$16 sps:$4 sm:$0xff]   ;;  %v20630_v11 = vld [vmem:[#allocation21 + $0x108] ss:$16 sps:$4 sm:$0xff]  }
0x18a3   : > { %12026 = vmatpush1.bf16.msra.mxu1 %v20549_v12  ;;  %12112 = vmatpush1.bf16.msra.mxu0 %v20552_v35  ;;  %v20635_v12 = vld [vmem:[#allocation21 + $0x124] ss:$16 sps:$4 sm:$0xff]   ;;  %v20638_v35 = vld [vmem:[#allocation21 + $0x12c] ss:$16 sps:$4 sm:$0xff]  }
0x18a4   : > { %12027 = vmatprep.subr.bf16.mxu1 %v20557_v13  ;;  %12113 = vmatprep.subr.bf16.mxu0 %v20560_v46  ;;  %v20633_v13 = vld [vmem:[#allocation21 + $0x120] ss:$16 sps:$4 sm:$0xff]   ;;  %v20636_v46 = vld [vmem:[#allocation21 + $0x128] ss:$16 sps:$4 sm:$0xff]  }
0x18a7   : > { %12028 = vmatpush1.bf16.msra.mxu1 %v20555_v15  ;;  %12114 = vmatpush1.bf16.msra.mxu0 %v20558_v22  ;;  %v20641_v15 = vld [vmem:[#allocation21 + $0x144] ss:$16 sps:$4 sm:$0xff]   ;;  %v20644_v22 = vld [vmem:[#allocation21 + $0x14c] ss:$16 sps:$4 sm:$0xff]  }
0x18a8   : > { %12029 = vmatprep.subr.bf16.mxu1 %v20563_v49  ;;  %12115 = vmatprep.subr.bf16.mxu0 %v20566_v14  ;;  %v20639_v49 = vld [vmem:[#allocation21 + $0x140] ss:$16 sps:$4 sm:$0xff]   ;;  %v20642_v14 = vld [vmem:[#allocation21 + $0x148] ss:$16 sps:$4 sm:$0xff]  }
0x18ab   : > { %12030 = vmatpush1.bf16.msra.mxu1 %v20561_v20  ;;  %12116 = vmatpush1.bf16.msra.mxu0 %v20564_v23  ;;  %v20647_v20 = vld [vmem:[#allocation21 + $0x164] ss:$16 sps:$4 sm:$0xff]   ;;  %v20650_v23 = vld [vmem:[#allocation21 + $0x16c] ss:$16 sps:$4 sm:$0xff]  }
0x18ac   : > { %12031 = vmatprep.subr.bf16.mxu1 %v20569_v24  ;;  %12117 = vmatprep.subr.bf16.mxu0 %v20572_v25  ;;  %v20645_v24 = vld [vmem:[#allocation21 + $0x160] ss:$16 sps:$4 sm:$0xff]   ;;  %v20648_v25 = vld [vmem:[#allocation21 + $0x168] ss:$16 sps:$4 sm:$0xff]  }
0x18af   : > { %12032 = vmatpush1.bf16.msra.mxu1 %v20567_v26  ;;  %12118 = vmatpush1.bf16.msra.mxu0 %v20570_v34  ;;  %v20653_v26 = vld [vmem:[#allocation21 + $0x184] ss:$16 sps:$4 sm:$0xff]   ;;  %v20656_v34 = vld [vmem:[#allocation21 + $0x18c] ss:$16 sps:$4 sm:$0xff]  }
0x18b0   : > { %12033 = vmatprep.subr.bf16.mxu1 %v20575_v27  ;;  %12119 = vmatprep.subr.bf16.mxu0 %v20578_v48  ;;  %v20651_v27 = vld [vmem:[#allocation21 + $0x180] ss:$16 sps:$4 sm:$0xff]   ;;  %v20654_v48 = vld [vmem:[#allocation21 + $0x188] ss:$16 sps:$4 sm:$0xff]  }
0x18b3   : > { %12034 = vmatpush1.bf16.msra.mxu1 %v20573_v29  ;;  %12120 = vmatpush1.bf16.msra.mxu0 %v20576_v33  ;;  %v20662_v29 = vld [vmem:[#allocation21 + $0x1ac] ss:$16 sps:$4 sm:$0xff]   ;;  %v20657_v33 = vld [vmem:[#allocation21 + $0x1a0] ss:$16 sps:$4 sm:$0xff]  }
0x18b4   : > { %13801 = vmatprep.subr.bf16.mxu1 %v20581_v38  ;;  %13973 = vmatprep.subr.bf16.mxu0 %v20584_v39  ;;  %v20663_v38 = vld [vmem:[#allocation21 + $0x1c0] ss:$16 sps:$4 sm:$0xff]   ;;  %v20665_v39 = vld [vmem:[#allocation21 + $0x1c4] ss:$16 sps:$4 sm:$0xff]  }
0x18b6   : > { %12036 = vmatmul.mubr.bf16.vlgmr.msra.gmra.mrb[76].mxu1 %v11168_v17  ;;  %12122 = vmatmul.mubr.bf16.vlgmr.msra.gmra.mrb[64].mxu0 %v11168_v17  ;;  %v20674_v17 = vld [vmem:[#allocation21 + $0x1ec] ss:$16 sps:$4 sm:$0xff]  }
0x18b7   : > { %13802 = vmatpush1.bf16.msra.mxu1 %v20579_v19  ;;  %13974 = vmatpush1.bf16.msra.mxu0 %v20582_v47  ;;  %v20668_v19 = vld [vmem:[#allocation21 + $0x1cc] ss:$16 sps:$4 sm:$0xff]   ;;  %v20671_v47 = vld [vmem:[#allocation21 + $0x1e4] ss:$16 sps:$4 sm:$0xff]  }
0x18b8   : > { %13803 = vmatprep.subr.bf16.mxu1 %v20587_v21  ;;  %13975 = vmatprep.subr.bf16.mxu0 %v20590_v50  ;;  %v20669_v21 = vld [vmem:[#allocation21 + $0x1e0] ss:$16 sps:$4 sm:$0xff]   ;;  %v20672_v50 = vld [vmem:[#allocation21 + $0x1e8] ss:$16 sps:$4 sm:$0xff]  }
0x18bb   : > { %13804 = vmatpush1.bf16.msra.mxu1 %v20585_v18  ;;  %13976 = vmatpush1.bf16.msra.mxu0 %v20588_v32  ;;  %v20677_v18 = vld [vmem:[#allocation21 + $0x204] ss:$16 sps:$4 sm:$0xff]   ;;  %v20680_v32 = vld [vmem:[#allocation21 + $0x20c] ss:$16 sps:$4 sm:$0xff]  }
0x18bc   : > { %13805 = vmatprep.subr.bf16.mxu1 %v20593_v51  ;;  %13977 = vmatprep.subr.bf16.mxu0 %v20596_v52  ;;  %v11298_v51 = vld [vmem:[%s22118_s14] sm:$0xf] }
0x18bd   : > { %v11303_v52 = vrot.slane %v11298_v51, %v22525_v42 }
0x18bf   : > { %13806 = vmatpush1.bf16.msra.mxu1 %v20591_v53  ;;  %13978 = vmatpush1.bf16.msra.mxu0 %v20594_v54  ;;  %v11311_v53 = vrot.slane %v11298_v51, %v22527_v43  ;;  %v11307_v54 = vrot.slane %v11298_v51, %v22529_v44 }
0x18c0   : > { %13807 = vmatprep.subr.bf16.mxu1 %v20599_v55  ;;  %13979 = vmatprep.subr.bf16.mxu0 %v20602_v56  ;;  %v11315_v55 = vrot.slane %v11298_v51, %v22531_v45 }
0x18c3   : > { %13808 = vmatpush1.bf16.msra.mxu1 %v20597_v57  ;;  %13980 = vmatpush1.bf16.msra.mxu0 %v20600_v58 }
0x18c4   : > { %13809 = vmatprep.subr.bf16.mxu1 %v20605_v59  ;;  %13981 = vmatprep.subr.bf16.mxu0 %v20608_v60 }
0x18c7   : > { %13810 = vmatpush1.bf16.msra.mxu1 %v20603_v61  ;;  %13982 = vmatpush1.bf16.msra.mxu0 %v20606_v62 }
0x18c8   : > { %13811 = vmatprep.subr.bf16.mxu1 %v20611_v63  ;;  %13983 = vmatprep.subr.bf16.mxu0 %v20614_v0 }
0x18cb   : > { %13812 = vmatpush1.bf16.msra.mxu1 %v20609_v16  ;;  %13984 = vmatpush1.bf16.msra.mxu0 %v20612_v1 }
0x18cc   : > { %13813 = vmatprep.subr.bf16.mxu1 %v20617_v2  ;;  %13985 = vmatprep.subr.bf16.mxu0 %v20620_v3 }
0x18cf   : > { %13814 = vmatpush1.bf16.msra.mxu1 %v20615_v4  ;;  %13986 = vmatpush1.bf16.msra.mxu0 %v20618_v40 }
0x18d0   : > { %13815 = vmatprep.subr.bf16.mxu1 %v20623_v5  ;;  %13987 = vmatprep.subr.bf16.mxu0 %v20626_v6 }
0x18d3   : > { %13816 = vmatpush1.bf16.msra.mxu1 %v20621_v7  ;;  %13988 = vmatpush1.bf16.msra.mxu0 %v20624_v8 }
0x18d4   : > { %13817 = vmatprep.subr.bf16.mxu1 %v20629_v9  ;;  %13989 = vmatprep.subr.bf16.mxu0 %v20632_v10 }
0x18d7   : > { %13818 = vmatpush1.bf16.msra.mxu1 %v20627_v36  ;;  %13990 = vmatpush1.bf16.msra.mxu0 %v20630_v11 }
0x18d8   : > { %13819 = vmatprep.subr.bf16.mxu1 %v20635_v12  ;;  %13991 = vmatprep.subr.bf16.mxu0 %v20638_v35 }
0x18db   : > { %13820 = vmatpush1.bf16.msra.mxu1 %v20633_v13  ;;  %13992 = vmatpush1.bf16.msra.mxu0 %v20636_v46 }
0x18dc   : > { %13821 = vmatprep.subr.bf16.mxu1 %v20641_v15  ;;  %13993 = vmatprep.subr.bf16.mxu0 %v20644_v22 }
0x18df   : > { %13822 = vmatpush1.bf16.msra.mxu1 %v20639_v49  ;;  %13994 = vmatpush1.bf16.msra.mxu0 %v20642_v14 }
0x18e0   : > { %13823 = vmatprep.subr.bf16.mxu1 %v20647_v20  ;;  %13995 = vmatprep.subr.bf16.mxu0 %v20650_v23 }
0x18e3   : > { %13824 = vmatpush1.bf16.msra.mxu1 %v20645_v24  ;;  %13996 = vmatpush1.bf16.msra.mxu0 %v20648_v25 }
0x18e4   : > { %13825 = vmatprep.subr.bf16.mxu1 %v20653_v26  ;;  %13997 = vmatprep.subr.bf16.mxu0 %v20656_v34 }
0x18e7   : > { %13826 = vmatpush1.bf16.msra.mxu1 %v20651_v27  ;;  %13998 = vmatpush1.bf16.msra.mxu0 %v20654_v48 }
0x18e8   : > { %13827 = vmatprep.subr.bf16.mxu1 %v20659_v28  ;;  %13999 = vmatprep.subr.bf16.mxu0 %v20662_v29 }
0x18eb   : > { %13828 = vmatpush1.bf16.msra.mxu1 %v20657_v33  ;;  %14000 = vmatpush1.bf16.msra.mxu0 %v20660_v37 }
0x18ec   : > { %13829 = vmatprep.subr.bf16.mxu1 %v20665_v39  ;;  %14001 = vmatprep.subr.bf16.mxu0 %v20668_v19 }
0x18ef   : > { %13830 = vmatpush1.bf16.msra.mxu1 %v20663_v38  ;;  %14002 = vmatpush1.bf16.msra.mxu0 %v20666_v41 }
0x18f0   : > { %13831 = vmatprep.subr.bf16.mxu1 %v20671_v47  ;;  %14003 = vmatprep.subr.bf16.mxu0 %v20674_v17 }
0x18f3   : > { %13832 = vmatpush1.bf16.msra.mxu1 %v20669_v21  ;;  %14004 = vmatpush1.bf16.msra.mxu0 %v20672_v50 }
0x18f4   : > { %13844 = vmatprep.subr.bf16.mxu1 %v20677_v18  ;;  %14016 = vmatprep.subr.bf16.mxu0 %v20680_v32  ;;  %v20675_v18 = vld [vmem:[#allocation21 + $0x200] ss:$16 sps:$4 sm:$0xff]   ;;  %v20678_v32 = vld [vmem:[#allocation21 + $0x208] ss:$16 sps:$4 sm:$0xff]  }
0x1989   : > { %v12037_v56 = vpop.f32.mrb[76].mxu1  ;;  %v12123_v57 = vpop.f32.mrb[64].mxu0 }
0x198a   : > { %v18517_v58 = vadd.f32 %v12037_v56, %v11303_v52  ;;  %v18521_v59 = vadd.f32 %v12123_v57, %v11311_v53  ;;  %v12039_v60 = vpop.f32.mrb[77].mxu1  ;;  %v12125_v61 = vpop.f32.mrb[65].mxu0  ;;  %v20689_v56 = vld [vmem:[#allocation21 + $0x244] ss:$16 sps:$4 sm:$0xff]   ;;  %v20692_v57 = vld [vmem:[#allocation21 + $0x24c] ss:$16 sps:$4 sm:$0xff]  }
0x198b   : > { %v18518_v62 = vadd.f32 %v12039_v60, %v11307_v54  ;;  %v18522_v63 = vadd.f32 %v12125_v61, %v11315_v55  ;;  %v12041_v0 = vpop.f32.mrb[78].mxu1  ;;  %v12127_v16 = vpop.f32.mrb[66].mxu0  ;;  %v20695_v60 = vld [vmem:[#allocation21 + $0x264] ss:$16 sps:$4 sm:$0xff]   ;;  %v20698_v61 = vld [vmem:[#allocation21 + $0x26c] ss:$16 sps:$4 sm:$0xff]  }
0x198c   : > { %vm12132_vm9 = vcmp.gt.f32.partialorder %v18517_v58, 0.0  ;;  %v12140_v1 = vmul.f32 0.01, %v18517_v58  ;;  %vm12134_vm11 = vcmp.gt.f32.partialorder %v18521_v59, 0.0  ;;  %v12142_v2 = vmul.f32 0.01, %v18521_v59 }
0x198d   : > { %vm12133_vm13 = vcmp.gt.f32.partialorder %v18518_v62, 0.0  ;;  %v12141_v3 = vmul.f32 0.01, %v18518_v62  ;;  %vm12135_vm14 = vcmp.gt.f32.partialorder %v18522_v63, 0.0  ;;  %v12143_v4 = vmul.f32 0.01, %v18522_v63 }
0x198e   : > { %v12148_v40 = vsel %vm12132_vm9, %v18517_v58, %v12140_v1  ;;  %v12150_v5 = vsel %vm12134_vm11, %v18521_v59, %v12142_v2  ;;  %v18519_v6 = vadd.f32 %v12041_v0, %v11303_v52  ;;  %v18523_v7 = vadd.f32 %v12127_v16, %v11311_v53  ;;  %v12043_v8 = vpop.f32.mrb[79].mxu1  ;;  %v12129_v9 = vpop.f32.mrb[67].mxu0  ;;  %v20683_v53 = vld [vmem:[#allocation21 + $0x224] ss:$16 sps:$4 sm:$0xff]   ;;  %v20687_v58 = vld [vmem:[#allocation21 + $0x240] ss:$16 sps:$4 sm:$0xff]  }
0x198f   : > { %v12171_v10 = vrot.slane %v12148_v40, 7  ;;  %v12173_v36 = vrot.slane %v12150_v5, 7  ;;  %v12149_v11 = vsel %vm12133_vm13, %v18518_v62, %v12141_v3  ;;  %v12151_v12 = vsel %vm12135_vm14, %v18522_v63, %v12143_v4  ;;  %v20690_v59 = vld [vmem:[#allocation21 + $0x248] ss:$16 sps:$4 sm:$0xff]   ;;  %v20693_v62 = vld [vmem:[#allocation21 + $0x260] ss:$16 sps:$4 sm:$0xff]  }
0x1990   : > { %v12172_v35 = vrot.slane %v12149_v11, 7  ;;  %v12174_v13 = vrot.slane %v12151_v12, 7  ;;  %vm12136_vm15 = vcmp.gt.f32.partialorder %v18519_v6, 0.0  ;;  %v12144_v46 = vmul.f32 0.01, %v18519_v6 }
0x1991   : > { %12191 = vst [vmem:[#allocation2] sm:$0xfe] %v12171_v10  ;;  %12193 = vst [vmem:[#allocation2 + $0x10] sm:$0xfe] %v12173_v36  ;;  %vm12138_vm3 = vcmp.gt.f32.partialorder %v18523_v7, 0.0  ;;  %v18520_v22 = vadd.f32 %v12043_v8, %v11307_v54  ;;  %v18524_v49 = vadd.f32 %v12129_v9, %v11315_v55 }
0x1992   : > { %v12146_v15 = vmul.f32 0.01, %v18523_v7  ;;  %12192 = vst [vmem:[#allocation2 + $0x8] sm:$0xfe] %v12172_v35  ;;  %12194 = vst [vmem:[#allocation2 + $0x18] sm:$0xfe] %v12174_v13  ;;  %v12152_v14 = vsel %vm12136_vm15, %v18519_v6, %v12144_v46 }
0x1993   : > { %v12175_v20 = vrot.slane %v12152_v14, 7  ;;  %vm12137_vm4 = vcmp.gt.f32.partialorder %v18520_v22, 0.0  ;;  %v12145_v24 = vmul.f32 0.01, %v18520_v22  ;;  %vm12139_vm7 = vcmp.gt.f32.partialorder %v18524_v49, 0.0 }
0x1994   : > { %v12154_v23 = vsel %vm12138_vm3, %v18523_v7, %v12146_v15  ;;  %v12147_v26 = vmul.f32 0.01, %v18524_v49  ;;  %v20686_v54 = vld [vmem:[#allocation21 + $0x22c] ss:$16 sps:$4 sm:$0xff]   ;;  %v20684_v55 = vld [vmem:[#allocation21 + $0x228] ss:$16 sps:$4 sm:$0xff]  }
0x1995   : > { %v12179_v25 = vrot.slane %v12154_v23, 7  ;;  %v12176_v34 = vsel %vm9576_vm6, %v12171_v10, %v12175_v20  ;;  %v12153_v27 = vsel %vm12137_vm4, %v18520_v22, %v12145_v24  ;;  %v20696_v63 = vld [vmem:[#allocation21 + $0x268] ss:$16 sps:$4 sm:$0xff]   ;;  %v20701_v0 = vld [vmem:[#allocation21 + $0x284] ss:$16 sps:$4 sm:$0xff]  }
0x1996   : > { %12195 = vst [vmem:[#allocation2 + $0x20] sm:$0x7f] %v12176_v34  ;;  %v12177_v28 = vrot.slane %v12153_v27, 7  ;;  %v12155_v29 = vsel %vm12139_vm7, %v18524_v49, %v12147_v26  ;;  %v20704_v16 = vld [vmem:[#allocation21 + $0x28c] ss:$16 sps:$4 sm:$0xff]  }
0x1997   : > { %v12180_v48 = vsel %vm9576_vm6, %v12173_v36, %v12179_v25  ;;  %v12181_v33 = vrot.slane %v12155_v29, 7  ;;  %v20699_v1 = vld [vmem:[#allocation21 + $0x280] ss:$16 sps:$4 sm:$0xff]   ;;  %v20702_v2 = vld [vmem:[#allocation21 + $0x288] ss:$16 sps:$4 sm:$0xff]  }
0x1998   : > { %12197 = vst [vmem:[#allocation2 + $0x30] sm:$0x7f] %v12180_v48  ;;  %v12178_v37 = vsel %vm9576_vm6, %v12172_v35, %v12177_v28  ;;  %v22961_v38 = vld [vmem:[#allocation2] sm:$0xff]  ;;  %v22968_v47 = vld [vmem:[#allocation2 + $0x10] sm:$0xff]  ;;  %v20710_v4 = vld [vmem:[#allocation21 + $0x2ac] ss:$16 sps:$4 sm:$0xff]  }
0x1999   : > { %12196 = vst [vmem:[#allocation2 + $0x28] sm:$0x7f] %v12178_v37  ;;  %v12182_v39 = vsel %vm9576_vm6, %v12174_v13, %v12181_v33  ;;  %v22964_v41 = vld [vmem:[#allocation2 + $0x8] sm:$0xff]  ;;  %v22966_v19 = vld [vmem:[#allocation2 + $0x18] sm:$0xff]  ;;  %v20707_v3 = vld [vmem:[#allocation21 + $0x2a4] ss:$16 sps:$4 sm:$0xff]  }
0x199a   : > { %12198 = vst [vmem:[#allocation2 + $0x38] sm:$0x7f] %v12182_v39  ;;  %14169 = vst.msk [vmem:[#allocation2] ss:$8 sm:$0xf] %vm22504_vm2, %v21875_v31 }
0x199b   : > { %v20681_v31 = vld [vmem:[#allocation21 + $0x220] ss:$16 sps:$4 sm:$0xff]   ;;  %v20708_v5 = vld [vmem:[#allocation21 + $0x2a8] ss:$16 sps:$4 sm:$0xff]   ;;  %v20713_v6 = vld [vmem:[#allocation21 + $0x2c4] ss:$16 sps:$4 sm:$0xff]  }
0x199c   : > { %v20705_v40 = vld [vmem:[#allocation21 + $0x2a0] ss:$16 sps:$4 sm:$0xff]   ;;  %v20716_v7 = vld [vmem:[#allocation21 + $0x2cc] ss:$16 sps:$4 sm:$0xff]   ;;  %v20714_v9 = vld [vmem:[#allocation21 + $0x2c8] ss:$16 sps:$4 sm:$0xff]  }
0x199d   : > { %v22973_v17 = vld [vmem:[#allocation2 + $0x20] sm:$0xff]  ;;  %v20722_v36 = vld [vmem:[#allocation21 + $0x2ec] ss:$16 sps:$4 sm:$0xff]   ;;  %v20720_v12 = vld [vmem:[#allocation21 + $0x2e8] ss:$16 sps:$4 sm:$0xff]  }
0x199e   : > { %v12235_v52 = vpack.c.bf16 %v22973_v17, %v22961_v38  ;;  %v20711_v8 = vld [vmem:[#allocation21 + $0x2c0] ss:$16 sps:$4 sm:$0xff]   ;;  %v20719_v10 = vld [vmem:[#allocation21 + $0x2e4] ss:$16 sps:$4 sm:$0xff]   ;;  %v20728_v13 = vld [vmem:[#allocation21 + $0x30c] ss:$16 sps:$4 sm:$0xff]  }
0x199f   : > { %v20717_v11 = vld [vmem:[#allocation21 + $0x2e0] ss:$16 sps:$4 sm:$0xff]   ;;  %v20725_v35 = vld [vmem:[#allocation21 + $0x304] ss:$16 sps:$4 sm:$0xff]   ;;  %v20726_v15 = vld [vmem:[#allocation21 + $0x308] ss:$16 sps:$4 sm:$0xff]  }
0x19a0   : > { %v22975_v21 = vld [vmem:[#allocation2 + $0x28] sm:$0xff]  ;;  %v20723_v46 = vld [vmem:[#allocation21 + $0x300] ss:$16 sps:$4 sm:$0xff]   ;;  %v20731_v22 = vld [vmem:[#allocation21 + $0x324] ss:$16 sps:$4 sm:$0xff]  }
0x19a1   : > { %v12236_v50 = vpack.c.bf16 %v22975_v21, %v22964_v41  ;;  %v22979_v51 = vld [vmem:[#allocation2 + $0x38] sm:$0xff]  ;;  %v20729_v14 = vld [vmem:[#allocation21 + $0x320] ss:$16 sps:$4 sm:$0xff]   ;;  %v20737_v23 = vld [vmem:[#allocation21 + $0x344] ss:$16 sps:$4 sm:$0xff]  }
0x19a2   : > { %v12238_v30 = vpack.c.bf16 %v22979_v51, %v22966_v19  ;;  %v20734_v49 = vld [vmem:[#allocation21 + $0x32c] ss:$16 sps:$4 sm:$0xff]   ;;  %v20732_v20 = vld [vmem:[#allocation21 + $0x328] ss:$16 sps:$4 sm:$0xff]   ;;  %v20735_v25 = vld [vmem:[#allocation21 + $0x340] ss:$16 sps:$4 sm:$0xff]  }
0x19a3   : > { %13833 = vmatprep.mubr.bf16.mxu1 %v12236_v50  ;;  %14005 = vmatprep.mubr.bf16.mxu0 %v12236_v50  ;;  %v20740_v24 = vld [vmem:[#allocation21 + $0x34c] ss:$16 sps:$4 sm:$0xff]   ;;  %v20738_v26 = vld [vmem:[#allocation21 + $0x348] ss:$16 sps:$4 sm:$0xff]   ;;  %v20743_v34 = vld [vmem:[#allocation21 + $0x364] ss:$16 sps:$4 sm:$0xff]  }
0x19a4   : > { %13834 = vmatmul.mubr.bf16.vlgmr.msra.gmra.mrb[80].mxu1 %v12235_v52  ;;  %14006 = vmatmul.mubr.bf16.vlgmr.msra.gmra.mrb[68].mxu0 %v12235_v52  ;;  %v20746_v27 = vld [vmem:[#allocation21 + $0x36c] ss:$16 sps:$4 sm:$0xff]   ;;  %v20741_v48 = vld [vmem:[#allocation21 + $0x360] ss:$16 sps:$4 sm:$0xff]   ;;  %v20744_v28 = vld [vmem:[#allocation21 + $0x368] ss:$16 sps:$4 sm:$0xff]  }
0x19a5   : > { %13845 = vmatpush1.bf16.msra.mxu1 %v20675_v18  ;;  %14017 = vmatpush1.bf16.msra.mxu0 %v20678_v32  ;;  %v20749_v29 = vld [vmem:[#allocation21 + $0x384] ss:$16 sps:$4 sm:$0xff]   ;;  %v20752_v33 = vld [vmem:[#allocation21 + $0x38c] ss:$16 sps:$4 sm:$0xff]   ;;  %v20747_v37 = vld [vmem:[#allocation21 + $0x380] ss:$16 sps:$4 sm:$0xff]  }
0x19a6   : > { %13876 = vmatprep.mubr.bf16.mxu1 %v12238_v30  ;;  %14048 = vmatprep.mubr.bf16.mxu0 %v12238_v30  ;;  %v20750_v39 = vld [vmem:[#allocation21 + $0x388] ss:$16 sps:$4 sm:$0xff]   ;;  %v20755_v50 = vld [vmem:[#allocation21 + $0x3a4] ss:$16 sps:$4 sm:$0xff]   ;;  %v20758_v18 = vld [vmem:[#allocation21 + $0x3ac] ss:$16 sps:$4 sm:$0xff]  }
0x19a7   : > { %13846 = vmatprep.subr.bf16.mxu1 %v20683_v53  ;;  %14018 = vmatprep.subr.bf16.mxu0 %v20686_v54  ;;  %v20753_v32 = vld [vmem:[#allocation21 + $0x3a0] ss:$16 sps:$4 sm:$0xff]   ;;  %v20756_v52 = vld [vmem:[#allocation21 + $0x3a8] ss:$16 sps:$4 sm:$0xff]   ;;  %v20761_v53 = vld [vmem:[#allocation21 + $0x3c4] ss:$16 sps:$4 sm:$0xff]  }
0x19a8   : > { %v20764_v54 = vld [vmem:[#allocation21 + $0x3cc] ss:$16 sps:$4 sm:$0xff]   ;;  %v20759_v30 = vld [vmem:[#allocation21 + $0x3c0] ss:$16 sps:$4 sm:$0xff]  }
0x19a9   : > { %13847 = vmatpush1.bf16.msra.mxu1 %v20681_v31  ;;  %14019 = vmatpush1.bf16.msra.mxu0 %v20684_v55  ;;  %v20762_v31 = vld [vmem:[#allocation21 + $0x3c8] ss:$16 sps:$4 sm:$0xff]   ;;  %v20767_v55 = vld [vmem:[#allocation21 + $0x3e4] ss:$16 sps:$4 sm:$0xff]  }
0x19aa   : > { %13848 = vmatprep.subr.bf16.mxu1 %v20689_v56  ;;  %14020 = vmatprep.subr.bf16.mxu0 %v20692_v57  ;;  %v20770_v56 = vld [vmem:[#allocation21 + $0x3ec] ss:$16 sps:$4 sm:$0xff]   ;;  %v12219_v57 = vrot.slane %v22975_v21, 1 }
0x19ad   : > { %13849 = vmatpush1.bf16.msra.mxu1 %v20687_v58  ;;  %14021 = vmatpush1.bf16.msra.mxu0 %v20690_v59  ;;  %v20765_v58 = vld [vmem:[#allocation21 + $0x3e0] ss:$16 sps:$4 sm:$0xff]   ;;  %v20768_v59 = vld [vmem:[#allocation21 + $0x3e8] ss:$16 sps:$4 sm:$0xff]  }
0x19ae   : > { %13850 = vmatprep.subr.bf16.mxu1 %v20695_v60  ;;  %14022 = vmatprep.subr.bf16.mxu0 %v20698_v61  ;;  %v20773_v60 = vld [vmem:[#allocation21 + $0x404] ss:$16 sps:$4 sm:$0xff]   ;;  %v20776_v61 = vld [vmem:[#allocation21 + $0x40c] ss:$16 sps:$4 sm:$0xff]  }
0x19b1   : > { %13851 = vmatpush1.bf16.msra.mxu1 %v20693_v62  ;;  %14023 = vmatpush1.bf16.msra.mxu0 %v20696_v63  ;;  %v12218_v62 = vrot.slane %v22964_v41, 1  ;;  %v22987_v63 = vld [vmem:[#allocation2 + $0x30] sm:$0xff] }
0x19b2   : > { %13852 = vmatprep.subr.bf16.mxu1 %v20701_v0  ;;  %14024 = vmatprep.subr.bf16.mxu0 %v20704_v16  ;;  %v20771_v16 = vld [vmem:[#allocation21 + $0x400] ss:$16 sps:$4 sm:$0xff]   ;;  %v12237_v21 = vpack.c.bf16 %v22987_v63, %v22968_v47 }
0x19b3   : > { %v12220_v0 = vsel %vm1672_vm0, %v12218_v62, %v12219_v57  ;;  %v20777_v41 = vld [vmem:[#allocation21 + $0x420] ss:$16 sps:$4 sm:$0xff]   ;;  %v20851_v62 = vld [vmem:[#allocation21 + $0x5a4] ss:$16 sps:$4 sm:$0xff]  }
0x19b5   : > { %13853 = vmatpush1.bf16.msra.mxu1 %v20699_v1  ;;  %14025 = vmatpush1.bf16.msra.mxu0 %v20702_v2  ;;  %v20774_v1 = vld [vmem:[#allocation21 + $0x408] ss:$16 sps:$4 sm:$0xff]   ;;  %v12240_v2 = vpack.c.bf16 %v12219_v57, %v12220_v0  ;;  %v20854_v0 = vld [vmem:[#allocation21 + $0x5ac] ss:$16 sps:$4 sm:$0xff]  }
0x19b6   : > { %13854 = vmatprep.subr.bf16.mxu1 %v20707_v3  ;;  %14026 = vmatprep.subr.bf16.mxu0 %v20710_v4  ;;  %v20779_v3 = vld [vmem:[#allocation21 + $0x424] ss:$16 sps:$4 sm:$0xff]   ;;  %v20782_v4 = vld [vmem:[#allocation21 + $0x42c] ss:$16 sps:$4 sm:$0xff]   ;;  %v20840_v57 = vld [vmem:[#allocation21 + $0x568] ss:$16 sps:$4 sm:$0xff]  }
0x19b9   : > { %13855 = vmatpush1.bf16.msra.mxu1 %v20705_v40  ;;  %14027 = vmatpush1.bf16.msra.mxu0 %v20708_v5  ;;  %v20780_v40 = vld [vmem:[#allocation21 + $0x428] ss:$16 sps:$4 sm:$0xff]   ;;  %v20785_v5 = vld [vmem:[#allocation21 + $0x444] ss:$16 sps:$4 sm:$0xff]  }
0x19ba   : > { %13856 = vmatprep.subr.bf16.mxu1 %v20713_v6  ;;  %14028 = vmatprep.subr.bf16.mxu0 %v20716_v7  ;;  %v20788_v6 = vld [vmem:[#allocation21 + $0x44c] ss:$16 sps:$4 sm:$0xff]   ;;  %v20783_v7 = vld [vmem:[#allocation21 + $0x440] ss:$16 sps:$4 sm:$0xff]  }
0x19bd   : > { %13857 = vmatpush1.bf16.msra.mxu1 %v20711_v8  ;;  %14029 = vmatpush1.bf16.msra.mxu0 %v20714_v9  ;;  %v20786_v8 = vld [vmem:[#allocation21 + $0x448] ss:$16 sps:$4 sm:$0xff]   ;;  %v20791_v9 = vld [vmem:[#allocation21 + $0x464] ss:$16 sps:$4 sm:$0xff]  }
0x19be   : > { %13858 = vmatprep.subr.bf16.mxu1 %v20719_v10  ;;  %14030 = vmatprep.subr.bf16.mxu0 %v20722_v36  ;;  %v20794_v10 = vld [vmem:[#allocation21 + $0x46c] ss:$16 sps:$4 sm:$0xff]   ;;  %v20789_v36 = vld [vmem:[#allocation21 + $0x460] ss:$16 sps:$4 sm:$0xff]  }
0x19c1   : > { %13859 = vmatpush1.bf16.msra.mxu1 %v20717_v11  ;;  %14031 = vmatpush1.bf16.msra.mxu0 %v20720_v12  ;;  %v20792_v11 = vld [vmem:[#allocation21 + $0x468] ss:$16 sps:$4 sm:$0xff]   ;;  %v20797_v12 = vld [vmem:[#allocation21 + $0x484] ss:$16 sps:$4 sm:$0xff]  }
0x19c2   : > { %13860 = vmatprep.subr.bf16.mxu1 %v20725_v35  ;;  %14032 = vmatprep.subr.bf16.mxu0 %v20728_v13  ;;  %v20800_v35 = vld [vmem:[#allocation21 + $0x48c] ss:$16 sps:$4 sm:$0xff]   ;;  %v20795_v13 = vld [vmem:[#allocation21 + $0x480] ss:$16 sps:$4 sm:$0xff]  }
0x19c5   : > { %13861 = vmatpush1.bf16.msra.mxu1 %v20723_v46  ;;  %14033 = vmatpush1.bf16.msra.mxu0 %v20726_v15  ;;  %v20798_v46 = vld [vmem:[#allocation21 + $0x488] ss:$16 sps:$4 sm:$0xff]   ;;  %v20803_v15 = vld [vmem:[#allocation21 + $0x4a4] ss:$16 sps:$4 sm:$0xff]  }
0x19c6   : > { %13862 = vmatprep.subr.bf16.mxu1 %v20731_v22  ;;  %14034 = vmatprep.subr.bf16.mxu0 %v20734_v49  ;;  %v20806_v22 = vld [vmem:[#allocation21 + $0x4ac] ss:$16 sps:$4 sm:$0xff]   ;;  %v20801_v49 = vld [vmem:[#allocation21 + $0x4a0] ss:$16 sps:$4 sm:$0xff]  }
0x19c9   : > { %13863 = vmatpush1.bf16.msra.mxu1 %v20729_v14  ;;  %14035 = vmatpush1.bf16.msra.mxu0 %v20732_v20  ;;  %v20804_v14 = vld [vmem:[#allocation21 + $0x4a8] ss:$16 sps:$4 sm:$0xff]   ;;  %v20809_v20 = vld [vmem:[#allocation21 + $0x4c4] ss:$16 sps:$4 sm:$0xff]  }
0x19ca   : > { %13864 = vmatprep.subr.bf16.mxu1 %v20737_v23  ;;  %14036 = vmatprep.subr.bf16.mxu0 %v20740_v24  ;;  %v20812_v23 = vld [vmem:[#allocation21 + $0x4cc] ss:$16 sps:$4 sm:$0xff]   ;;  %v20807_v24 = vld [vmem:[#allocation21 + $0x4c0] ss:$16 sps:$4 sm:$0xff]  }
0x19cd   : > { %13865 = vmatpush1.bf16.msra.mxu1 %v20735_v25  ;;  %14037 = vmatpush1.bf16.msra.mxu0 %v20738_v26  ;;  %v20810_v25 = vld [vmem:[#allocation21 + $0x4c8] ss:$16 sps:$4 sm:$0xff]   ;;  %v20815_v26 = vld [vmem:[#allocation21 + $0x4e4] ss:$16 sps:$4 sm:$0xff]  }
0x19ce   : > { %13866 = vmatprep.subr.bf16.mxu1 %v20743_v34  ;;  %14038 = vmatprep.subr.bf16.mxu0 %v20746_v27  ;;  %v20818_v34 = vld [vmem:[#allocation21 + $0x4ec] ss:$16 sps:$4 sm:$0xff]   ;;  %v20813_v27 = vld [vmem:[#allocation21 + $0x4e0] ss:$16 sps:$4 sm:$0xff]  }
0x19d1   : > { %13867 = vmatpush1.bf16.msra.mxu1 %v20741_v48  ;;  %14039 = vmatpush1.bf16.msra.mxu0 %v20744_v28  ;;  %v20816_v48 = vld [vmem:[#allocation21 + $0x4e8] ss:$16 sps:$4 sm:$0xff]   ;;  %v20821_v28 = vld [vmem:[#allocation21 + $0x504] ss:$16 sps:$4 sm:$0xff]  }
0x19d2   : > { %13868 = vmatprep.subr.bf16.mxu1 %v20749_v29  ;;  %14040 = vmatprep.subr.bf16.mxu0 %v20752_v33  ;;  %v20824_v29 = vld [vmem:[#allocation21 + $0x50c] ss:$16 sps:$4 sm:$0xff]   ;;  %v20819_v33 = vld [vmem:[#allocation21 + $0x500] ss:$16 sps:$4 sm:$0xff]  }
0x19d5   : > { %13869 = vmatpush1.bf16.msra.mxu1 %v20747_v37  ;;  %14041 = vmatpush1.bf16.msra.mxu0 %v20750_v39  ;;  %v20822_v37 = vld [vmem:[#allocation21 + $0x508] ss:$16 sps:$4 sm:$0xff]   ;;  %v20827_v39 = vld [vmem:[#allocation21 + $0x524] ss:$16 sps:$4 sm:$0xff]  }
0x19d6   : > { %13870 = vmatprep.subr.bf16.mxu1 %v20755_v50  ;;  %14042 = vmatprep.subr.bf16.mxu0 %v20758_v18  ;;  %v20830_v50 = vld [vmem:[#allocation21 + $0x52c] ss:$16 sps:$4 sm:$0xff]   ;;  %v20825_v18 = vld [vmem:[#allocation21 + $0x520] ss:$16 sps:$4 sm:$0xff]  }
0x19d9   : > { %13871 = vmatpush1.bf16.msra.mxu1 %v20753_v32  ;;  %14043 = vmatpush1.bf16.msra.mxu0 %v20756_v52  ;;  %v20828_v32 = vld [vmem:[#allocation21 + $0x528] ss:$16 sps:$4 sm:$0xff]   ;;  %v20833_v52 = vld [vmem:[#allocation21 + $0x544] ss:$16 sps:$4 sm:$0xff]  }
0x19da   : > { %13872 = vmatprep.subr.bf16.mxu1 %v20761_v53  ;;  %14044 = vmatprep.subr.bf16.mxu0 %v20764_v54  ;;  %v20836_v53 = vld [vmem:[#allocation21 + $0x54c] ss:$16 sps:$4 sm:$0xff]   ;;  %v20831_v54 = vld [vmem:[#allocation21 + $0x540] ss:$16 sps:$4 sm:$0xff]  }
0x19dd   : > { %13873 = vmatpush1.bf16.msra.mxu1 %v20759_v30  ;;  %14045 = vmatpush1.bf16.msra.mxu0 %v20762_v31  ;;  %v20834_v30 = vld [vmem:[#allocation21 + $0x548] ss:$16 sps:$4 sm:$0xff]   ;;  %v20839_v31 = vld [vmem:[#allocation21 + $0x564] ss:$16 sps:$4 sm:$0xff]  }
0x19de   : > { %13874 = vmatprep.subr.bf16.mxu1 %v20767_v55  ;;  %14046 = vmatprep.subr.bf16.mxu0 %v20770_v56  ;;  %v20842_v55 = vld [vmem:[#allocation21 + $0x56c] ss:$16 sps:$4 sm:$0xff]   ;;  %v20837_v56 = vld [vmem:[#allocation21 + $0x560] ss:$16 sps:$4 sm:$0xff]  }
0x19e1   : > { %13875 = vmatpush1.bf16.msra.mxu1 %v20765_v58  ;;  %14047 = vmatpush1.bf16.msra.mxu0 %v20768_v59  ;;  %v20845_v58 = vld [vmem:[#allocation21 + $0x584] ss:$16 sps:$4 sm:$0xff]   ;;  %v20848_v59 = vld [vmem:[#allocation21 + $0x58c] ss:$16 sps:$4 sm:$0xff]  }
0x19e2   : > { %13887 = vmatprep.subr.bf16.mxu1 %v20773_v60  ;;  %14059 = vmatprep.subr.bf16.mxu0 %v20776_v61  ;;  %v20843_v60 = vld [vmem:[#allocation21 + $0x580] ss:$16 sps:$4 sm:$0xff]   ;;  %v20846_v61 = vld [vmem:[#allocation21 + $0x588] ss:$16 sps:$4 sm:$0xff]  }
0x19e4   : > { %13877 = vmatmul.mubr.bf16.vlgmr.msra.gmra.mrb[80].mxu1 %v12237_v21  ;;  %14049 = vmatmul.mubr.bf16.vlgmr.msra.gmra.mrb[68].mxu0 %v12237_v21  ;;  %v20852_v21 = vld [vmem:[#allocation21 + $0x5a8] ss:$16 sps:$4 sm:$0xff]  }
0x19e5   : > { %13888 = vmatpush1.bf16.msra.mxu1 %v20771_v16  ;;  %13919 = vmatprep.mubr.bf16.mxu1 %v12240_v2  ;;  %v20849_v16 = vld [vmem:[#allocation21 + $0x5a0] ss:$16 sps:$4 sm:$0xff]  }
0x19e6   : > { %14060 = vmatpush1.bf16.msra.mxu0 %v20774_v1  ;;  %14091 = vmatprep.mubr.bf16.mxu0 %v12240_v2  ;;  %v20857_v1 = vld [vmem:[#allocation21 + $0x5c4] ss:$16 sps:$4 sm:$0xff]   ;;  %v20860_v2 = vld [vmem:[#allocation21 + $0x5cc] ss:$16 sps:$4 sm:$0xff]  }
0x19e7   : > { %13889 = vmatprep.subr.bf16.mxu1 %v20779_v3  ;;  %14061 = vmatprep.subr.bf16.mxu0 %v20782_v4  ;;  %v20855_v3 = vld [vmem:[#allocation21 + $0x5c0] ss:$16 sps:$4 sm:$0xff]   ;;  %v20858_v4 = vld [vmem:[#allocation21 + $0x5c8] ss:$16 sps:$4 sm:$0xff]  }
0x19e9   : > { %13890 = vmatpush1.bf16.msra.mxu1 %v20777_v41  ;;  %v20863_v41 = vld [vmem:[#allocation21 + $0x5e4] ss:$16 sps:$4 sm:$0xff]  }
0x19ea   : > { %14062 = vmatpush1.bf16.msra.mxu0 %v20780_v40  ;;  %13891 = vmatprep.subr.bf16.mxu1 %v20785_v5  ;;  %v20866_v40 = vld [vmem:[#allocation21 + $0x5ec] ss:$16 sps:$4 sm:$0xff]   ;;  %v12216_v5 = vrot.slane %v22973_v17, 1 }
0x19eb   : > { %14063 = vmatprep.subr.bf16.mxu0 %v20788_v6  ;;  %v20861_v6 = vld [vmem:[#allocation21 + $0x5e0] ss:$16 sps:$4 sm:$0xff]  }
0x19ed   : > { %13892 = vmatpush1.bf16.msra.mxu1 %v20783_v7  ;;  %v12215_v7 = vrot.slane %v22961_v38, 1  ;;  %v20870_v38 = vld [vmem:[#allocation21 + $0x608] ss:$16 sps:$4 sm:$0xff]  }
0x19ee   : > { %14064 = vmatpush1.bf16.msra.mxu0 %v20786_v8  ;;  %13893 = vmatprep.subr.bf16.mxu1 %v20791_v9  ;;  %v12225_v8 = vrot.slane %v22979_v51, 1  ;;  %v20864_v9 = vld [vmem:[#allocation21 + $0x5e8] ss:$16 sps:$4 sm:$0xff]   ;;  %v20875_v51 = vld [vmem:[#allocation21 + $0x624] ss:$16 sps:$4 sm:$0xff]  }
0x19ef   : > { %14065 = vmatprep.subr.bf16.mxu0 %v20794_v10  ;;  %v20869_v10 = vld [vmem:[#allocation21 + $0x604] ss:$16 sps:$4 sm:$0xff]  }
0x19f1   : > { %13894 = vmatpush1.bf16.msra.mxu1 %v20789_v36  ;;  %v12217_v36 = vsel %vm1672_vm0, %v12215_v7, %v12216_v5  ;;  %v20939_v7 = vld [vmem:[#allocation21 + $0x780] ss:$16 sps:$4 sm:$0xff]  }
0x19f2   : > { %14066 = vmatpush1.bf16.msra.mxu0 %v20792_v11  ;;  %13895 = vmatprep.subr.bf16.mxu1 %v20797_v12  ;;  %v20872_v11 = vld [vmem:[#allocation21 + $0x60c] ss:$16 sps:$4 sm:$0xff]   ;;  %v12224_v12 = vrot.slane %v22966_v19, 1  ;;  %v20881_v19 = vld [vmem:[#allocation21 + $0x644] ss:$16 sps:$4 sm:$0xff]  }
0x19f3   : > { %14067 = vmatprep.subr.bf16.mxu0 %v20800_v35  ;;  %v20867_v35 = vld [vmem:[#allocation21 + $0x600] ss:$16 sps:$4 sm:$0xff]  }
0x19f4   : > { %v12226_v17 = vsel %vm1672_vm0, %v12224_v12, %v12225_v8  ;;  %v20953_v12 = vld [vmem:[#allocation21 + $0x7c4] ss:$16 sps:$4 sm:$0xff]  }
0x19f5   : > { %13896 = vmatpush1.bf16.msra.mxu1 %v20795_v13  ;;  %v12239_v13 = vpack.c.bf16 %v12216_v5, %v12217_v36  ;;  %v20941_v5 = vld [vmem:[#allocation21 + $0x784] ss:$16 sps:$4 sm:$0xff]   ;;  %v20945_v36 = vld [vmem:[#allocation21 + $0x7a0] ss:$16 sps:$4 sm:$0xff]  }
0x19f6   : > { %14068 = vmatpush1.bf16.msra.mxu0 %v20798_v46  ;;  %13897 = vmatprep.subr.bf16.mxu1 %v20803_v15  ;;  %v12242_v46 = vpack.c.bf16 %v12225_v8, %v12226_v17  ;;  %v20878_v15 = vld [vmem:[#allocation21 + $0x62c] ss:$16 sps:$4 sm:$0xff]   ;;  %v20942_v8 = vld [vmem:[#allocation21 + $0x788] ss:$16 sps:$4 sm:$0xff]   ;;  %v20951_v17 = vld [vmem:[#allocation21 + $0x7c0] ss:$16 sps:$4 sm:$0xff]  }
0x19f7   : > { %14069 = vmatprep.subr.bf16.mxu0 %v20806_v22  ;;  %v20873_v22 = vld [vmem:[#allocation21 + $0x620] ss:$16 sps:$4 sm:$0xff]  }
0x19f9   : > { %13898 = vmatpush1.bf16.msra.mxu1 %v20801_v49  ;;  %v20876_v49 = vld [vmem:[#allocation21 + $0x628] ss:$16 sps:$4 sm:$0xff]  }
0x19fa   : > { %14070 = vmatpush1.bf16.msra.mxu0 %v20804_v14  ;;  %13899 = vmatprep.subr.bf16.mxu1 %v20809_v20  ;;  %v20884_v14 = vld [vmem:[#allocation21 + $0x64c] ss:$16 sps:$4 sm:$0xff]   ;;  %v20879_v20 = vld [vmem:[#allocation21 + $0x640] ss:$16 sps:$4 sm:$0xff]  }
0x19fb   : > { %14071 = vmatprep.subr.bf16.mxu0 %v20812_v23  ;;  %v20882_v23 = vld [vmem:[#allocation21 + $0x648] ss:$16 sps:$4 sm:$0xff]  }
0x19fd   : > { %13900 = vmatpush1.bf16.msra.mxu1 %v20807_v24  ;;  %v20887_v24 = vld [vmem:[#allocation21 + $0x664] ss:$16 sps:$4 sm:$0xff]  }
0x19fe   : > { %14072 = vmatpush1.bf16.msra.mxu0 %v20810_v25  ;;  %13901 = vmatprep.subr.bf16.mxu1 %v20815_v26  ;;  %v20890_v25 = vld [vmem:[#allocation21 + $0x66c] ss:$16 sps:$4 sm:$0xff]   ;;  %v20885_v26 = vld [vmem:[#allocation21 + $0x660] ss:$16 sps:$4 sm:$0xff]  }
0x19ff   : > { %14073 = vmatprep.subr.bf16.mxu0 %v20818_v34  ;;  %v20888_v34 = vld [vmem:[#allocation21 + $0x668] ss:$16 sps:$4 sm:$0xff]  }
0x1a01   : > { %13902 = vmatpush1.bf16.msra.mxu1 %v20813_v27  ;;  %v20893_v27 = vld [vmem:[#allocation21 + $0x684] ss:$16 sps:$4 sm:$0xff]  }
0x1a02   : > { %14074 = vmatpush1.bf16.msra.mxu0 %v20816_v48  ;;  %13903 = vmatprep.subr.bf16.mxu1 %v20821_v28  ;;  %v20896_v48 = vld [vmem:[#allocation21 + $0x68c] ss:$16 sps:$4 sm:$0xff]   ;;  %v20891_v28 = vld [vmem:[#allocation21 + $0x680] ss:$16 sps:$4 sm:$0xff]  }
0x1a03   : > { %14075 = vmatprep.subr.bf16.mxu0 %v20824_v29  ;;  %v20894_v29 = vld [vmem:[#allocation21 + $0x688] ss:$16 sps:$4 sm:$0xff]  }
0x1a05   : > { %13904 = vmatpush1.bf16.msra.mxu1 %v20819_v33  ;;  %v20899_v33 = vld [vmem:[#allocation21 + $0x6a4] ss:$16 sps:$4 sm:$0xff]  }
0x1a06   : > { %14076 = vmatpush1.bf16.msra.mxu0 %v20822_v37  ;;  %13905 = vmatprep.subr.bf16.mxu1 %v20827_v39  ;;  %v20902_v37 = vld [vmem:[#allocation21 + $0x6ac] ss:$16 sps:$4 sm:$0xff]   ;;  %v20897_v39 = vld [vmem:[#allocation21 + $0x6a0] ss:$16 sps:$4 sm:$0xff]  }
0x1a07   : > { %14077 = vmatprep.subr.bf16.mxu0 %v20830_v50  ;;  %v20900_v50 = vld [vmem:[#allocation21 + $0x6a8] ss:$16 sps:$4 sm:$0xff]  }
0x1a09   : > { %13906 = vmatpush1.bf16.msra.mxu1 %v20825_v18  ;;  %v20905_v18 = vld [vmem:[#allocation21 + $0x6c4] ss:$16 sps:$4 sm:$0xff]  }
0x1a0a   : > { %14078 = vmatpush1.bf16.msra.mxu0 %v20828_v32  ;;  %13907 = vmatprep.subr.bf16.mxu1 %v20833_v52  ;;  %v20908_v32 = vld [vmem:[#allocation21 + $0x6cc] ss:$16 sps:$4 sm:$0xff]   ;;  %v20903_v52 = vld [vmem:[#allocation21 + $0x6c0] ss:$16 sps:$4 sm:$0xff]  }
0x1a0b   : > { %14079 = vmatprep.subr.bf16.mxu0 %v20836_v53  ;;  %v20906_v53 = vld [vmem:[#allocation21 + $0x6c8] ss:$16 sps:$4 sm:$0xff]  }
0x1a0d   : > { %13908 = vmatpush1.bf16.msra.mxu1 %v20831_v54  ;;  %v20911_v54 = vld [vmem:[#allocation21 + $0x6e4] ss:$16 sps:$4 sm:$0xff]  }
0x1a0e   : > { %14080 = vmatpush1.bf16.msra.mxu0 %v20834_v30  ;;  %13909 = vmatprep.subr.bf16.mxu1 %v20839_v31  ;;  %v20914_v30 = vld [vmem:[#allocation21 + $0x6ec] ss:$16 sps:$4 sm:$0xff]   ;;  %v20909_v31 = vld [vmem:[#allocation21 + $0x6e0] ss:$16 sps:$4 sm:$0xff]  }
0x1a0f   : > { %14081 = vmatprep.subr.bf16.mxu0 %v20842_v55  ;;  %v20912_v55 = vld [vmem:[#allocation21 + $0x6e8] ss:$16 sps:$4 sm:$0xff]  }
0x1a11   : > { %13910 = vmatpush1.bf16.msra.mxu1 %v20837_v56  ;;  %v20917_v56 = vld [vmem:[#allocation21 + $0x704] ss:$16 sps:$4 sm:$0xff]  }
0x1a12   : > { %14082 = vmatpush1.bf16.msra.mxu0 %v20840_v57  ;;  %13911 = vmatprep.subr.bf16.mxu1 %v20845_v58  ;;  %v20920_v57 = vld [vmem:[#allocation21 + $0x70c] ss:$16 sps:$4 sm:$0xff]   ;;  %v20915_v58 = vld [vmem:[#allocation21 + $0x700] ss:$16 sps:$4 sm:$0xff]  }
0x1a13   : > { %14083 = vmatprep.subr.bf16.mxu0 %v20848_v59  ;;  %v20918_v59 = vld [vmem:[#allocation21 + $0x708] ss:$16 sps:$4 sm:$0xff]  }
0x1a15   : > { %13912 = vmatpush1.bf16.msra.mxu1 %v20843_v60  ;;  %v20923_v60 = vld [vmem:[#allocation21 + $0x724] ss:$16 sps:$4 sm:$0xff]  }
0x1a16   : > { %14084 = vmatpush1.bf16.msra.mxu0 %v20846_v61  ;;  %13913 = vmatprep.subr.bf16.mxu1 %v20851_v62  ;;  %v20926_v61 = vld [vmem:[#allocation21 + $0x72c] ss:$16 sps:$4 sm:$0xff]   ;;  %v20921_v62 = vld [vmem:[#allocation21 + $0x720] ss:$16 sps:$4 sm:$0xff]  }
0x1a17   : > { %14085 = vmatprep.subr.bf16.mxu0 %v20854_v0  ;;  %v20924_v0 = vld [vmem:[#allocation21 + $0x728] ss:$16 sps:$4 sm:$0xff]  }
0x1a19   : > { %13914 = vmatpush1.bf16.msra.mxu1 %v20849_v16  ;;  %v20929_v16 = vld [vmem:[#allocation21 + $0x744] ss:$16 sps:$4 sm:$0xff]  }
0x1a1a   : > { %14086 = vmatpush1.bf16.msra.mxu0 %v20852_v21  ;;  %13915 = vmatprep.subr.bf16.mxu1 %v20857_v1  ;;  %v20932_v21 = vld [vmem:[#allocation21 + $0x74c] ss:$16 sps:$4 sm:$0xff]   ;;  %v20927_v1 = vld [vmem:[#allocation21 + $0x740] ss:$16 sps:$4 sm:$0xff]  }
0x1a1b   : > { %14087 = vmatprep.subr.bf16.mxu0 %v20860_v2  ;;  %v20930_v2 = vld [vmem:[#allocation21 + $0x748] ss:$16 sps:$4 sm:$0xff]  }
0x1a1d   : > { %13916 = vmatpush1.bf16.msra.mxu1 %v20855_v3  ;;  %v20935_v3 = vld [vmem:[#allocation21 + $0x764] ss:$16 sps:$4 sm:$0xff]  }
0x1a1e   : > { %14088 = vmatpush1.bf16.msra.mxu0 %v20858_v4  ;;  %13917 = vmatprep.subr.bf16.mxu1 %v20863_v41  ;;  %v20938_v4 = vld [vmem:[#allocation21 + $0x76c] ss:$16 sps:$4 sm:$0xff]   ;;  %v20933_v41 = vld [vmem:[#allocation21 + $0x760] ss:$16 sps:$4 sm:$0xff]  }
0x1a1f   : > { %14089 = vmatprep.subr.bf16.mxu0 %v20866_v40  ;;  %v20936_v40 = vld [vmem:[#allocation21 + $0x768] ss:$16 sps:$4 sm:$0xff]  }
0x1a21   : > { %13918 = vmatpush1.bf16.msra.mxu1 %v20861_v6  ;;  %v20944_v6 = vld [vmem:[#allocation21 + $0x78c] ss:$16 sps:$4 sm:$0xff]  }
0x1a22   : > { %14090 = vmatpush1.bf16.msra.mxu0 %v20864_v9  ;;  %13930 = vmatprep.subr.bf16.mxu1 %v20869_v10  ;;  %v20947_v9 = vld [vmem:[#allocation21 + $0x7a4] ss:$16 sps:$4 sm:$0xff]   ;;  %v20950_v10 = vld [vmem:[#allocation21 + $0x7ac] ss:$16 sps:$4 sm:$0xff]  }
0x1a23   : > { %14102 = vmatprep.subr.bf16.mxu0 %v20872_v11  ;;  %v20948_v11 = vld [vmem:[#allocation21 + $0x7a8] ss:$16 sps:$4 sm:$0xff]  }
0x1a24   : > { %13920 = vmatmul.mubr.bf16.vlgmr.msra.gmra.mrb[80].mxu1 %v12239_v13 }
0x1a25   : > { %14092 = vmatmul.mubr.bf16.vlgmr.msra.gmra.mrb[68].mxu0 %v12239_v13  ;;  %13931 = vmatpush1.bf16.msra.mxu1 %v20867_v35  ;;  %v20956_v35 = vld [vmem:[#allocation21 + $0x7cc] ss:$16 sps:$4 sm:$0xff]   ;;  %v20954_v13 = vld [vmem:[#allocation21 + $0x7c8] ss:$16 sps:$4 sm:$0xff]  }
0x1a26   : > { %13962 = vmatprep.mubr.bf16.mxu1 %v12242_v46  ;;  %14103 = vmatpush1.bf16.msra.mxu0 %v20870_v38  ;;  %v20959_v38 = vld [vmem:[#allocation21 + $0x7e4] ss:$16 sps:$4 sm:$0xff]  }
0x1a27   : > { %14134 = vmatprep.mubr.bf16.mxu0 %v12242_v46  ;;  %13932 = vmatprep.subr.bf16.mxu1 %v20875_v51  ;;  %v20962_v51 = vld [vmem:[#allocation21 + $0x7ec] ss:$16 sps:$4 sm:$0xff]   ;;  %v12222_v46 = vrot.slane %v22987_v63, 1 }
0x1a28   : > { %14104 = vmatprep.subr.bf16.mxu0 %v20878_v15  ;;  %v20957_v15 = vld [vmem:[#allocation21 + $0x7e0] ss:$16 sps:$4 sm:$0xff]   ;;  %v20974_v63 = vld [vmem:[#allocation23 + $0x2c] ss:$16 sps:$4 sm:$0xff]  }
0x1a29   : > { %13933 = vmatpush1.bf16.msra.mxu1 %v20873_v22  ;;  %v12221_v22 = vrot.slane %v22968_v47, 1  ;;  %v20969_v47 = vld [vmem:[#allocation23 + $0x20] ss:$16 sps:$4 sm:$0xff]  }
0x1a2a   : > { %14105 = vmatpush1.bf16.msra.mxu0 %v20876_v49  ;;  %13934 = vmatprep.subr.bf16.mxu1 %v20881_v19  ;;  %v20960_v49 = vld [vmem:[#allocation21 + $0x7e8] ss:$16 sps:$4 sm:$0xff]   ;;  %v20965_v19 = vld [vmem:[#allocation23 + $0x4] ss:$16 sps:$4 sm:$0xff]  }
0x1a2b   : > { %14106 = vmatprep.subr.bf16.mxu0 %v20884_v14  ;;  %v12223_v14 = vsel %vm1672_vm0, %v12221_v22, %v12222_v46  ;;  %v21049_v22 = vld [vmem:[#allocation23 + $0x1c4] ss:$16 sps:$4 sm:$0xff]  }
0x1a2d   : > { %13935 = vmatpush1.bf16.msra.mxu1 %v20879_v20  ;;  %v20968_v20 = vld [vmem:[#allocation23 + $0xc] ss:$16 sps:$4 sm:$0xff]  }
0x1a2e   : > { %14107 = vmatpush1.bf16.msra.mxu0 %v20882_v23  ;;  %13936 = vmatprep.subr.bf16.mxu1 %v20887_v24  ;;  %v20963_v23 = vld [vmem:[#allocation23] ss:$16 sps:$4 sm:$0xff]   ;;  %v12241_v24 = vpack.c.bf16 %v12222_v46, %v12223_v14  ;;  %v21050_v14 = vld [vmem:[#allocation23 + $0x1c8] ss:$16 sps:$4 sm:$0xff]  }
0x1a2f   : > { %14108 = vmatprep.subr.bf16.mxu0 %v20890_v25  ;;  %v20966_v25 = vld [vmem:[#allocation23 + $0x8] ss:$16 sps:$4 sm:$0xff]   ;;  %v21041_v46 = vld [vmem:[#allocation23 + $0x1a0] ss:$16 sps:$4 sm:$0xff]  }
0x1a31   : > { %13937 = vmatpush1.bf16.msra.mxu1 %v20885_v26  ;;  %v20971_v26 = vld [vmem:[#allocation23 + $0x24] ss:$16 sps:$4 sm:$0xff]  }
0x1a32   : > { %14109 = vmatpush1.bf16.msra.mxu0 %v20888_v34  ;;  %13938 = vmatprep.subr.bf16.mxu1 %v20893_v27  ;;  %v20972_v34 = vld [vmem:[#allocation23 + $0x28] ss:$16 sps:$4 sm:$0xff]   ;;  %v20977_v27 = vld [vmem:[#allocation23 + $0x44] ss:$16 sps:$4 sm:$0xff]  }
0x1a33   : > { %14110 = vmatprep.subr.bf16.mxu0 %v20896_v48  ;;  %v20980_v48 = vld [vmem:[#allocation23 + $0x4c] ss:$16 sps:$4 sm:$0xff]  }
0x1a35   : > { %13939 = vmatpush1.bf16.msra.mxu1 %v20891_v28  ;;  %v20975_v28 = vld [vmem:[#allocation23 + $0x40] ss:$16 sps:$4 sm:$0xff]  }
0x1a36   : > { %14111 = vmatpush1.bf16.msra.mxu0 %v20894_v29  ;;  %13940 = vmatprep.subr.bf16.mxu1 %v20899_v33  ;;  %v20978_v29 = vld [vmem:[#allocation23 + $0x48] ss:$16 sps:$4 sm:$0xff]   ;;  %v20983_v33 = vld [vmem:[#allocation23 + $0x64] ss:$16 sps:$4 sm:$0xff]  }
0x1a37   : > { %14112 = vmatprep.subr.bf16.mxu0 %v20902_v37  ;;  %v20986_v37 = vld [vmem:[#allocation23 + $0x6c] ss:$16 sps:$4 sm:$0xff]  }
0x1a39   : > { %13941 = vmatpush1.bf16.msra.mxu1 %v20897_v39  ;;  %v20981_v39 = vld [vmem:[#allocation23 + $0x60] ss:$16 sps:$4 sm:$0xff]  }
0x1a3a   : > { %14113 = vmatpush1.bf16.msra.mxu0 %v20900_v50  ;;  %13942 = vmatprep.subr.bf16.mxu1 %v20905_v18  ;;  %v20984_v50 = vld [vmem:[#allocation23 + $0x68] ss:$16 sps:$4 sm:$0xff]   ;;  %v20989_v18 = vld [vmem:[#allocation23 + $0x84] ss:$16 sps:$4 sm:$0xff]  }
0x1a3b   : > { %14114 = vmatprep.subr.bf16.mxu0 %v20908_v32  ;;  %v20992_v32 = vld [vmem:[#allocation23 + $0x8c] ss:$16 sps:$4 sm:$0xff]  }
0x1a3d   : > { %13943 = vmatpush1.bf16.msra.mxu1 %v20903_v52  ;;  %v20987_v52 = vld [vmem:[#allocation23 + $0x80] ss:$16 sps:$4 sm:$0xff]  }
0x1a3e   : > { %14115 = vmatpush1.bf16.msra.mxu0 %v20906_v53  ;;  %13944 = vmatprep.subr.bf16.mxu1 %v20911_v54  ;;  %v20990_v53 = vld [vmem:[#allocation23 + $0x88] ss:$16 sps:$4 sm:$0xff]   ;;  %v20995_v54 = vld [vmem:[#allocation23 + $0xa4] ss:$16 sps:$4 sm:$0xff]  }
0x1a3f   : > { %14116 = vmatprep.subr.bf16.mxu0 %v20914_v30  ;;  %v20998_v30 = vld [vmem:[#allocation23 + $0xac] ss:$16 sps:$4 sm:$0xff]  }
0x1a41   : > { %13945 = vmatpush1.bf16.msra.mxu1 %v20909_v31  ;;  %v20993_v31 = vld [vmem:[#allocation23 + $0xa0] ss:$16 sps:$4 sm:$0xff]  }
0x1a42   : > { %14117 = vmatpush1.bf16.msra.mxu0 %v20912_v55  ;;  %13946 = vmatprep.subr.bf16.mxu1 %v20917_v56  ;;  %v20996_v55 = vld [vmem:[#allocation23 + $0xa8] ss:$16 sps:$4 sm:$0xff]   ;;  %v21001_v56 = vld [vmem:[#allocation23 + $0xc4] ss:$16 sps:$4 sm:$0xff]  }
0x1a43   : > { %14118 = vmatprep.subr.bf16.mxu0 %v20920_v57  ;;  %v21004_v57 = vld [vmem:[#allocation23 + $0xcc] ss:$16 sps:$4 sm:$0xff]  }
0x1a45   : > { %13947 = vmatpush1.bf16.msra.mxu1 %v20915_v58  ;;  %v20999_v58 = vld [vmem:[#allocation23 + $0xc0] ss:$16 sps:$4 sm:$0xff]  }
0x1a46   : > { %14119 = vmatpush1.bf16.msra.mxu0 %v20918_v59  ;;  %13948 = vmatprep.subr.bf16.mxu1 %v20923_v60  ;;  %v21002_v59 = vld [vmem:[#allocation23 + $0xc8] ss:$16 sps:$4 sm:$0xff]   ;;  %v21007_v60 = vld [vmem:[#allocation23 + $0xe4] ss:$16 sps:$4 sm:$0xff]  }
0x1a47   : > { %14120 = vmatprep.subr.bf16.mxu0 %v20926_v61  ;;  %v21010_v61 = vld [vmem:[#allocation23 + $0xec] ss:$16 sps:$4 sm:$0xff]  }
0x1a49   : > { %13949 = vmatpush1.bf16.msra.mxu1 %v20921_v62  ;;  %v21005_v62 = vld [vmem:[#allocation23 + $0xe0] ss:$16 sps:$4 sm:$0xff]  }
0x1a4a   : > { %14121 = vmatpush1.bf16.msra.mxu0 %v20924_v0  ;;  %13950 = vmatprep.subr.bf16.mxu1 %v20929_v16  ;;  %v21008_v0 = vld [vmem:[#allocation23 + $0xe8] ss:$16 sps:$4 sm:$0xff]   ;;  %v21013_v16 = vld [vmem:[#allocation23 + $0x104] ss:$16 sps:$4 sm:$0xff]  }
0x1a4b   : > { %14122 = vmatprep.subr.bf16.mxu0 %v20932_v21  ;;  %v21016_v21 = vld [vmem:[#allocation23 + $0x10c] ss:$16 sps:$4 sm:$0xff]  }
0x1a4d   : > { %13951 = vmatpush1.bf16.msra.mxu1 %v20927_v1  ;;  %v21011_v1 = vld [vmem:[#allocation23 + $0x100] ss:$16 sps:$4 sm:$0xff]  }
0x1a4e   : > { %14123 = vmatpush1.bf16.msra.mxu0 %v20930_v2  ;;  %13952 = vmatprep.subr.bf16.mxu1 %v20935_v3  ;;  %v21014_v2 = vld [vmem:[#allocation23 + $0x108] ss:$16 sps:$4 sm:$0xff]   ;;  %v21019_v3 = vld [vmem:[#allocation23 + $0x124] ss:$16 sps:$4 sm:$0xff]  }
0x1a4f   : > { %14124 = vmatprep.subr.bf16.mxu0 %v20938_v4  ;;  %v21022_v4 = vld [vmem:[#allocation23 + $0x12c] ss:$16 sps:$4 sm:$0xff]  }
0x1a51   : > { %13953 = vmatpush1.bf16.msra.mxu1 %v20933_v41  ;;  %v21017_v41 = vld [vmem:[#allocation23 + $0x120] ss:$16 sps:$4 sm:$0xff]  }
0x1a52   : > { %14125 = vmatpush1.bf16.msra.mxu0 %v20936_v40  ;;  %13954 = vmatprep.subr.bf16.mxu1 %v20941_v5  ;;  %v21020_v40 = vld [vmem:[#allocation23 + $0x128] ss:$16 sps:$4 sm:$0xff]   ;;  %v21025_v5 = vld [vmem:[#allocation23 + $0x144] ss:$16 sps:$4 sm:$0xff]  }
0x1a53   : > { %14126 = vmatprep.subr.bf16.mxu0 %v20944_v6  ;;  %v21028_v6 = vld [vmem:[#allocation23 + $0x14c] ss:$16 sps:$4 sm:$0xff]  }
0x1a55   : > { %13955 = vmatpush1.bf16.msra.mxu1 %v20939_v7  ;;  %v21023_v7 = vld [vmem:[#allocation23 + $0x140] ss:$16 sps:$4 sm:$0xff]  }
0x1a56   : > { %14127 = vmatpush1.bf16.msra.mxu0 %v20942_v8  ;;  %13956 = vmatprep.subr.bf16.mxu1 %v20947_v9  ;;  %v21026_v8 = vld [vmem:[#allocation23 + $0x148] ss:$16 sps:$4 sm:$0xff]   ;;  %v21031_v9 = vld [vmem:[#allocation23 + $0x164] ss:$16 sps:$4 sm:$0xff]  }
0x1a57   : > { %14128 = vmatprep.subr.bf16.mxu0 %v20950_v10  ;;  %v21034_v10 = vld [vmem:[#allocation23 + $0x16c] ss:$16 sps:$4 sm:$0xff]  }
0x1a59   : > { %13957 = vmatpush1.bf16.msra.mxu1 %v20945_v36  ;;  %v21029_v36 = vld [vmem:[#allocation23 + $0x160] ss:$16 sps:$4 sm:$0xff]  }
0x1a5a   : > { %14129 = vmatpush1.bf16.msra.mxu0 %v20948_v11  ;;  %13958 = vmatprep.subr.bf16.mxu1 %v20953_v12  ;;  %v21032_v11 = vld [vmem:[#allocation23 + $0x168] ss:$16 sps:$4 sm:$0xff]   ;;  %v21037_v12 = vld [vmem:[#allocation23 + $0x184] ss:$16 sps:$4 sm:$0xff]  }
0x1a5b   : > { %14130 = vmatprep.subr.bf16.mxu0 %v20956_v35  ;;  %v21040_v35 = vld [vmem:[#allocation23 + $0x18c] ss:$16 sps:$4 sm:$0xff]  }
0x1a5d   : > { %13959 = vmatpush1.bf16.msra.mxu1 %v20951_v17  ;;  %v21035_v17 = vld [vmem:[#allocation23 + $0x180] ss:$16 sps:$4 sm:$0xff]  }
0x1a5e   : > { %14131 = vmatpush1.bf16.msra.mxu0 %v20954_v13  ;;  %13960 = vmatprep.subr.bf16.mxu1 %v20959_v38  ;;  %v21038_v13 = vld [vmem:[#allocation23 + $0x188] ss:$16 sps:$4 sm:$0xff]   ;;  %v21043_v38 = vld [vmem:[#allocation23 + $0x1a4] ss:$16 sps:$4 sm:$0xff]  }
0x1a5f   : > { %14132 = vmatprep.subr.bf16.mxu0 %v20962_v51  ;;  %v21046_v51 = vld [vmem:[#allocation23 + $0x1ac] ss:$16 sps:$4 sm:$0xff]  }
0x1a61   : > { %13961 = vmatpush1.bf16.msra.mxu1 %v20957_v15  ;;  %v21044_v15 = vld [vmem:[#allocation23 + $0x1a8] ss:$16 sps:$4 sm:$0xff]  }
0x1a62   : > { %14133 = vmatpush1.bf16.msra.mxu0 %v20960_v49  ;;  %15828 = vmatprep.subr.bf16.mxu1 %v20965_v19  ;;  %v21052_v49 = vld [vmem:[#allocation23 + $0x1cc] ss:$16 sps:$4 sm:$0xff]   ;;  %v21047_v19 = vld [vmem:[#allocation23 + $0x1c0] ss:$16 sps:$4 sm:$0xff]  }
0x1a63   : > { %16000 = vmatprep.subr.bf16.mxu0 %v20968_v20  ;;  %v21053_v20 = vld [vmem:[#allocation23 + $0x1e0] ss:$16 sps:$4 sm:$0xff]  }
0x1a64   : > { %13963 = vmatmul.mubr.bf16.vlgmr.msra.gmra.mrb[80].mxu1 %v12241_v24 }
0x1a65   : > { %14135 = vmatmul.mubr.bf16.vlgmr.msra.gmra.mrb[68].mxu0 %v12241_v24  ;;  %15829 = vmatpush1.bf16.msra.mxu1 %v20963_v23  ;;  %v21055_v23 = vld [vmem:[#allocation23 + $0x1e4] ss:$16 sps:$4 sm:$0xff]   ;;  %v21056_v24 = vld [vmem:[#allocation23 + $0x1e8] ss:$16 sps:$4 sm:$0xff]  }
0x1a66   : > { %16001 = vmatpush1.bf16.msra.mxu0 %v20966_v25  ;;  %15830 = vmatprep.subr.bf16.mxu1 %v20971_v26  ;;  %v21058_v25 = vld [vmem:[#allocation23 + $0x1ec] ss:$16 sps:$4 sm:$0xff]   ;;  %v21061_v26 = vld [vmem:[#allocation23 + $0x204] ss:$16 sps:$4 sm:$0xff]  }
0x1a67   : > { %16002 = vmatprep.subr.bf16.mxu0 %v20974_v63  ;;  %v21064_v63 = vld [vmem:[#allocation23 + $0x20c] ss:$16 sps:$4 sm:$0xff]  }
0x1a69   : > { %15831 = vmatpush1.bf16.msra.mxu1 %v20969_v47  ;;  %v12499_v47 = vld [vmem:[%s23259_s8] sm:$0xf]  ;;  %s21717_s8 = sshll.u32 %s21877_s6, 4  ;;  %s21718_s8 = int_to_ptr.vmem [resolvable:$false] %s21717_s8 }
0x1a6a   : > { %16003 = vmatpush1.bf16.msra.mxu0 %v20972_v34  ;;  %15832 = vmatprep.subr.bf16.mxu1 %v20977_v27  ;;  %v12504_v34 = vrot.slane %v12499_v47, %v22525_v42  ;;  %v12512_v27 = vrot.slane %v12499_v47, %v22527_v43  ;;  %s21719_s9 = scalar_lea.vmem %s21718_s8, 2048  ;;  %p21720_p8 = scmp.lt.s32.totalorder %s23056_s2, %s21718_s8 }
0x1a6b   : > { %16004 = vmatprep.subr.bf16.mxu0 %v20980_v48  ;;  %v12508_v48 = vrot.slane %v12499_v47, %v22529_v44 }
0x1a6d   : > { %15833 = vmatpush1.bf16.msra.mxu1 %v20975_v28  ;;  %v12516_v28 = vrot.slane %v12499_v47, %v22531_v45 }
0x1a6e   : > { %16005 = vmatpush1.bf16.msra.mxu0 %v20978_v29  ;;  %15834 = vmatprep.subr.bf16.mxu1 %v20983_v33 }
0x1a6f   : > { %16006 = vmatprep.subr.bf16.mxu0 %v20986_v37 }
0x1a71   : > { %15835 = vmatpush1.bf16.msra.mxu1 %v20981_v39 }
0x1a72   : > { %16007 = vmatpush1.bf16.msra.mxu0 %v20984_v50  ;;  %15836 = vmatprep.subr.bf16.mxu1 %v20989_v18 }
0x1a73   : > { %16008 = vmatprep.subr.bf16.mxu0 %v20992_v32 }
0x1a75   : > { %15837 = vmatpush1.bf16.msra.mxu1 %v20987_v52 }
0x1a76   : > { %16009 = vmatpush1.bf16.msra.mxu0 %v20990_v53  ;;  %15838 = vmatprep.subr.bf16.mxu1 %v20995_v54 }
0x1a77   : > { %16010 = vmatprep.subr.bf16.mxu0 %v20998_v30 }
0x1a79   : > { %15839 = vmatpush1.bf16.msra.mxu1 %v20993_v31 }
0x1a7a   : > { %16011 = vmatpush1.bf16.msra.mxu0 %v20996_v55  ;;  %15840 = vmatprep.subr.bf16.mxu1 %v21001_v56 }
0x1a7b   : > { %16012 = vmatprep.subr.bf16.mxu0 %v21004_v57 }
0x1a7d   : > { %15841 = vmatpush1.bf16.msra.mxu1 %v20999_v58 }
0x1a7e   : > { %16013 = vmatpush1.bf16.msra.mxu0 %v21002_v59  ;;  %15842 = vmatprep.subr.bf16.mxu1 %v21007_v60 }
0x1a7f   : > { %16014 = vmatprep.subr.bf16.mxu0 %v21010_v61 }
0x1a81   : > { %15843 = vmatpush1.bf16.msra.mxu1 %v21005_v62 }
0x1a82   : > { %16015 = vmatpush1.bf16.msra.mxu0 %v21008_v0  ;;  %15844 = vmatprep.subr.bf16.mxu1 %v21013_v16 }
0x1a83   : > { %16016 = vmatprep.subr.bf16.mxu0 %v21016_v21 }
0x1a85   : > { %15845 = vmatpush1.bf16.msra.mxu1 %v21011_v1 }
0x1a86   : > { %16017 = vmatpush1.bf16.msra.mxu0 %v21014_v2  ;;  %15846 = vmatprep.subr.bf16.mxu1 %v21019_v3 }
0x1a87   : > { %16018 = vmatprep.subr.bf16.mxu0 %v21022_v4 }
0x1a89   : > { %15847 = vmatpush1.bf16.msra.mxu1 %v21017_v41 }
0x1a8a   : > { %16019 = vmatpush1.bf16.msra.mxu0 %v21020_v40  ;;  %15848 = vmatprep.subr.bf16.mxu1 %v21025_v5 }
0x1a8b   : > { %16020 = vmatprep.subr.bf16.mxu0 %v21028_v6 }
0x1a8d   : > { %15849 = vmatpush1.bf16.msra.mxu1 %v21023_v7 }
0x1a8e   : > { %16021 = vmatpush1.bf16.msra.mxu0 %v21026_v8  ;;  %15850 = vmatprep.subr.bf16.mxu1 %v21031_v9 }
0x1a8f   : > { %16022 = vmatprep.subr.bf16.mxu0 %v21034_v10 }
0x1a91   : > { %15851 = vmatpush1.bf16.msra.mxu1 %v21029_v36 }
0x1a92   : > { %16023 = vmatpush1.bf16.msra.mxu0 %v21032_v11  ;;  %15852 = vmatprep.subr.bf16.mxu1 %v21037_v12  ;;  %v14218_v11 = vld [vmem:[#allocation2 + $0x40] sm:$0x1] }
0x1a93   : > { %16024 = vmatprep.subr.bf16.mxu0 %v21040_v35 }
0x1a95   : > { %15853 = vmatpush1.bf16.msra.mxu1 %v21035_v17 }
0x1a96   : > { %16025 = vmatpush1.bf16.msra.mxu0 %v21038_v13  ;;  %15854 = vmatprep.subr.bf16.mxu1 %v21043_v38  ;;  %v14221_v13 = vld [vmem:[#allocation2 + $0x58] sm:$0x1] }
0x1a97   : > { %16026 = vmatprep.subr.bf16.mxu0 %v21046_v51 }
0x1a99   : > { %15855 = vmatpush1.bf16.msra.mxu1 %v21041_v46 }
0x1a9a   : > { %16027 = vmatpush1.bf16.msra.mxu0 %v21044_v15  ;;  %15856 = vmatprep.subr.bf16.mxu1 %v21049_v22  ;;  %v14246_v22 = vrot.slane %v14218_v11, 1  ;;  %v21095_v11 = vld [vmem:[#allocation23 + $0x2c0] ss:$16 sps:$4 sm:$0xff]  }
0x1a9b   : > { %16028 = vmatprep.subr.bf16.mxu0 %v21052_v49  ;;  %v14220_v49 = vld [vmem:[#allocation2 + $0x50] sm:$0x1] }
0x1a9d   : > { %15857 = vmatpush1.bf16.msra.mxu1 %v21047_v19 }
0x1a9e   : > { %16029 = vmatpush1.bf16.msra.mxu0 %v21050_v14  ;;  %15858 = vmatprep.subr.bf16.mxu1 %v21055_v23  ;;  %v14252_v23 = vrot.slane %v14221_v13, 1  ;;  %v21101_v13 = vld [vmem:[#allocation23 + $0x2e0] ss:$16 sps:$4 sm:$0xff]  }
0x1a9f   : > { %16030 = vmatprep.subr.bf16.mxu0 %v21058_v25  ;;  %v21059_v25 = vld [vmem:[#allocation23 + $0x200] ss:$16 sps:$4 sm:$0xff]  }
0x1aa1   : > { %15859 = vmatpush1.bf16.msra.mxu1 %v21053_v20 }
0x1aa2   : > { %16031 = vmatpush1.bf16.msra.mxu0 %v21056_v24  ;;  %15871 = vmatprep.subr.bf16.mxu1 %v21061_v26 }
0x1aa3   : > { %16043 = vmatprep.subr.bf16.mxu0 %v21064_v63 }
0x1b37   : > { %v13964_v29 = vpop.f32.mrb[80].mxu1 }
0x1b38   : > { %v18525_v33 = vadd.f32 %v13964_v29, %v12504_v34  ;;  %v14136_v37 = vpop.f32.mrb[68].mxu0  ;;  %v13966_v39 = vpop.f32.mrb[81].mxu1 }
0x1b39   : > { %v18529_v50 = vadd.f32 %v14136_v37, %v12512_v27  ;;  %v18526_v18 = vadd.f32 %v13966_v39, %v12508_v48  ;;  %v14138_v32 = vpop.f32.mrb[69].mxu0  ;;  %v13968_v52 = vpop.f32.mrb[82].mxu1 }
0x1b3a   : > { %vm14145_vm2 = vcmp.gt.f32.partialorder %v18525_v33, 0.0  ;;  %v14153_v53 = vmul.f32 0.01, %v18525_v33  ;;  %v18530_v54 = vadd.f32 %v14138_v32, %v12516_v28  ;;  %v18527_v30 = vadd.f32 %v13968_v52, %v12504_v34  ;;  %v14140_v31 = vpop.f32.mrb[70].mxu0  ;;  %v13970_v55 = vpop.f32.mrb[83].mxu1 }
0x1b3b   : > { %vm14147_vm12 = vcmp.gt.f32.partialorder %v18529_v50, 0.0  ;;  %v14155_v56 = vmul.f32 0.01, %v18529_v50  ;;  %vm14146_vm1 = vcmp.gt.f32.partialorder %v18526_v18, 0.0  ;;  %v14154_v57 = vmul.f32 0.01, %v18526_v18 }
0x1b3c   : > { %v14161_v58 = vsel %vm14145_vm2, %v18525_v33, %v14153_v53  ;;  %vm14148_vm5 = vcmp.gt.f32.partialorder %v18530_v54, 0.0  ;;  %v14156_v59 = vmul.f32 0.01, %v18530_v54  ;;  %vm14149_vm8 = vcmp.gt.f32.partialorder %v18527_v30, 0.0  ;;  %v14142_v60 = vpop.f32.mrb[71].mxu0 }
0x1b3d   : > { %v14182_v61 = vrot.slane %v14161_v58, 7  ;;  %v14163_v62 = vsel %vm14147_vm12, %v18529_v50, %v14155_v56  ;;  %v14162_v0 = vsel %vm14146_vm1, %v18526_v18, %v14154_v57  ;;  %v14157_v16 = vmul.f32 0.01, %v18527_v30  ;;  %v21067_v52 = vld [vmem:[#allocation23 + $0x224] ss:$16 sps:$4 sm:$0xff]  }
0x1b3e   : > { %v14184_v21 = vrot.slane %v14163_v62, 7  ;;  %v14183_v1 = vrot.slane %v14162_v0, 7  ;;  %v14164_v2 = vsel %vm14148_vm5, %v18530_v54, %v14156_v59  ;;  %v18531_v3 = vadd.f32 %v14140_v31, %v12512_v27  ;;  %v21062_v27 = vld [vmem:[#allocation23 + $0x208] ss:$16 sps:$4 sm:$0xff]   ;;  %v21070_v53 = vld [vmem:[#allocation23 + $0x22c] ss:$16 sps:$4 sm:$0xff]  }
0x1b3f   : > { %14202 = vst [vmem:[#allocation2] sm:$0xfe] %v14182_v61  ;;  %v14185_v4 = vrot.slane %v14164_v2, 7  ;;  %v14165_v41 = vsel %vm14149_vm8, %v18527_v30, %v14157_v16  ;;  %v18528_v40 = vadd.f32 %v13970_v55, %v12508_v48  ;;  %v18532_v5 = vadd.f32 %v14142_v60, %v12516_v28  ;;  %v21065_v56 = vld [vmem:[#allocation23 + $0x220] ss:$16 sps:$4 sm:$0xff]  }
0x1b40   : > { %14204 = vst [vmem:[#allocation2 + $0x10] sm:$0xfe] %v14184_v21  ;;  %14203 = vst [vmem:[#allocation2 + $0x8] sm:$0xfe] %v14183_v1  ;;  %v14186_v6 = vrot.slane %v14165_v41, 7  ;;  %vm14151_vm10 = vcmp.gt.f32.partialorder %v18531_v3, 0.0 }
0x1b41   : > { %v14159_v7 = vmul.f32 0.01, %v18531_v3  ;;  %14205 = vst [vmem:[#allocation2 + $0x18] sm:$0xfe] %v14185_v4  ;;  %vm14150_vm9 = vcmp.gt.f32.partialorder %v18528_v40, 0.0  ;;  %vm14152_vm11 = vcmp.gt.f32.partialorder %v18532_v5, 0.0 }
0x1b42   : > { %v14158_v8 = vmul.f32 0.01, %v18528_v40  ;;  %v14160_v9 = vmul.f32 0.01, %v18532_v5  ;;  %v14187_v10 = vsel %vm9576_vm6, %v14182_v61, %v14186_v6  ;;  %v14250_v33 = vrot.slane %v14220_v49, 1 }
0x1b43   : > { %v14167_v36 = vsel %vm14151_vm10, %v18531_v3, %v14159_v7  ;;  %14206 = vst [vmem:[#allocation2 + $0x20] sm:$0xff] %v14187_v10  ;;  %v14235_v15 = vrot.slane %v14187_v10, 1  ;;  %v21068_v57 = vld [vmem:[#allocation23 + $0x228] ss:$16 sps:$4 sm:$0xff]   ;;  %v21073_v60 = vld [vmem:[#allocation23 + $0x244] ss:$16 sps:$4 sm:$0xff]  }
0x1b44   : > { %v14190_v12 = vrot.slane %v14167_v36, 7  ;;  %v14166_v35 = vsel %vm14150_vm9, %v18528_v40, %v14158_v8  ;;  %v14168_v17 = vsel %vm14152_vm11, %v18532_v5, %v14160_v9  ;;  %v21076_v61 = vld [vmem:[#allocation23 + $0x24c] ss:$16 sps:$4 sm:$0xff]   ;;  %v21071_v0 = vld [vmem:[#allocation23 + $0x240] ss:$16 sps:$4 sm:$0xff]  }
0x1b45   : > { %v14188_v38 = vrot.slane %v14166_v35, 7  ;;  %v14192_v51 = vrot.slane %v14168_v17, 7  ;;  %v14247_v18 = vsel %vm1672_vm0, %v14235_v15, %v14246_v22  ;;  %v21074_v16 = vld [vmem:[#allocation23 + $0x248] ss:$16 sps:$4 sm:$0xff]   ;;  %v21077_v2 = vld [vmem:[#allocation23 + $0x260] ss:$16 sps:$4 sm:$0xff]  }
0x1b46   : > { %v23008_v46 = vsel %vm9576_vm6, %v14184_v21, %v14190_v12  ;;  %v14210_v20 = vld [vmem:[#allocation2] sm:$0xff]  ;;  %v21080_v3 = vld [vmem:[#allocation23 + $0x268] ss:$16 sps:$4 sm:$0xff]   ;;  %v21088_v41 = vld [vmem:[#allocation23 + $0x28c] ss:$16 sps:$4 sm:$0xff]  }
0x1b47   : > { %14208 = vst [vmem:[#allocation2 + $0x30] sm:$0xff] %v23008_v46  ;;  %v23012_v19 = vsel %vm9576_vm6, %v14183_v1, %v14188_v38  ;;  %v14193_v14 = vsel %vm9576_vm6, %v14185_v4, %v14192_v51  ;;  %v23016_v24 = vld [vmem:[#allocation2 + $0x8] sm:$0xff]  ;;  %v14234_v26 = vrot.slane %v14210_v20, 1  ;;  %v23018_v47 = vld [vmem:[#allocation2 + $0x10] sm:$0xff]  ;;  %v14241_v29 = vrot.slane %v23008_v46, 1 }
0x1b48   : > { %14207 = vst [vmem:[#allocation2 + $0x28] sm:$0xff] %v23012_v19  ;;  %14209 = vst [vmem:[#allocation2 + $0x38] sm:$0xff] %v14193_v14  ;;  %v14244_v63 = vrot.slane %v14193_v14, 1  ;;  %v14263_v34 = vpack.c.bf16 %v23012_v19, %v23016_v24  ;;  %v14213_v48 = vld [vmem:[#allocation2 + $0x18] sm:$0xff]  ;;  %v14240_v28 = vrot.slane %v23018_v47, 1  ;;  %v14262_v37 = vpack.c.bf16 %v14187_v10, %v14210_v20 }
0x1b49   : > { %v14243_v39 = vrot.slane %v14213_v48, 1  ;;  %v14236_v50 = vsel %vm1672_vm0, %v14234_v26, %v14235_v15  ;;  %v14265_v32 = vpack.c.bf16 %v14193_v14, %v14213_v48  ;;  %v14251_v59 = vsel %vm1672_vm0, %v14241_v29, %v14250_v33  ;;  %v21079_v21 = vld [vmem:[#allocation23 + $0x264] ss:$16 sps:$4 sm:$0xff]   ;;  %v21082_v1 = vld [vmem:[#allocation23 + $0x26c] ss:$16 sps:$4 sm:$0xff]  }
0x1b4a   : > { %15860 = vmatprep.mubr.bf16.mxu1 %v14263_v34  ;;  %16032 = vmatprep.mubr.bf16.mxu0 %v14263_v34  ;;  %v23026_v54 = vpack.c.bf16 %v14247_v18, %v14236_v50  ;;  %v14253_v31 = vsel %vm1672_vm0, %v14244_v63, %v14252_v23  ;;  %v14242_v55 = vsel %vm1672_vm0, %v14240_v28, %v14241_v29  ;;  %v21085_v4 = vld [vmem:[#allocation23 + $0x284] ss:$16 sps:$4 sm:$0xff]   ;;  %v21083_v40 = vld [vmem:[#allocation23 + $0x280] ss:$16 sps:$4 sm:$0xff]   ;;  %v21086_v5 = vld [vmem:[#allocation23 + $0x288] ss:$16 sps:$4 sm:$0xff]  }
0x1b4b   : > { %15861 = vmatmul.mubr.bf16.vlgmr.msra.gmra.mrb[84].mxu1 %v14262_v37  ;;  %16033 = vmatmul.mubr.bf16.vlgmr.msra.gmra.mrb[72].mxu0 %v14262_v37  ;;  %v14245_v30 = vsel %vm1672_vm0, %v14243_v39, %v14244_v63  ;;  %v23034_v62 = vpack.c.bf16 %v14251_v59, %v14242_v55  ;;  %v21091_v6 = vld [vmem:[#allocation23 + $0x2a4] ss:$16 sps:$4 sm:$0xff]   ;;  %v21094_v7 = vld [vmem:[#allocation23 + $0x2ac] ss:$16 sps:$4 sm:$0xff]   ;;  %v21089_v8 = vld [vmem:[#allocation23 + $0x2a0] ss:$16 sps:$4 sm:$0xff]  }
0x1b4c   : > { %15872 = vmatpush1.bf16.msra.mxu1 %v21059_v25  ;;  %16044 = vmatpush1.bf16.msra.mxu0 %v21062_v27  ;;  %v23031_v58 = vpack.c.bf16 %v14253_v31, %v14245_v30  ;;  %v21092_v9 = vld [vmem:[#allocation23 + $0x2a8] ss:$16 sps:$4 sm:$0xff]   ;;  %v21097_v10 = vld [vmem:[#allocation23 + $0x2c4] ss:$16 sps:$4 sm:$0xff]   ;;  %v21100_v36 = vld [vmem:[#allocation23 + $0x2cc] ss:$16 sps:$4 sm:$0xff]  }
0x1b4d   : > { %15903 = vmatprep.mubr.bf16.mxu1 %v14265_v32  ;;  %16075 = vmatprep.mubr.bf16.mxu0 %v14265_v32  ;;  %v21098_v12 = vld [vmem:[#allocation23 + $0x2c8] ss:$16 sps:$4 sm:$0xff]   ;;  %v21103_v35 = vld [vmem:[#allocation23 + $0x2e4] ss:$16 sps:$4 sm:$0xff]   ;;  %v21106_v17 = vld [vmem:[#allocation23 + $0x2ec] ss:$16 sps:$4 sm:$0xff]  }
0x1b4e   : > { %15873 = vmatprep.subr.bf16.mxu1 %v21067_v52  ;;  %16045 = vmatprep.subr.bf16.mxu0 %v21070_v53  ;;  %v21104_v38 = vld [vmem:[#allocation23 + $0x2e8] ss:$16 sps:$4 sm:$0xff]   ;;  %v21109_v51 = vld [vmem:[#allocation23 + $0x304] ss:$16 sps:$4 sm:$0xff]   ;;  %v21112_v15 = vld [vmem:[#allocation23 + $0x30c] ss:$16 sps:$4 sm:$0xff]  }
0x1b4f   : > { %v21107_v22 = vld [vmem:[#allocation23 + $0x300] ss:$16 sps:$4 sm:$0xff]   ;;  %v21110_v49 = vld [vmem:[#allocation23 + $0x308] ss:$16 sps:$4 sm:$0xff]   ;;  %v21115_v14 = vld [vmem:[#allocation23 + $0x324] ss:$16 sps:$4 sm:$0xff]  }
0x1b50   : > { %15874 = vmatpush1.bf16.msra.mxu1 %v21065_v56  ;;  %16046 = vmatpush1.bf16.msra.mxu0 %v21068_v57  ;;  %v21118_v20 = vld [vmem:[#allocation23 + $0x32c] ss:$16 sps:$4 sm:$0xff]   ;;  %v21113_v23 = vld [vmem:[#allocation23 + $0x320] ss:$16 sps:$4 sm:$0xff]   ;;  %v21116_v25 = vld [vmem:[#allocation23 + $0x328] ss:$16 sps:$4 sm:$0xff]  }
0x1b51   : > { %15875 = vmatprep.subr.bf16.mxu1 %v21073_v60  ;;  %16047 = vmatprep.subr.bf16.mxu0 %v21076_v61  ;;  %v21121_v26 = vld [vmem:[#allocation23 + $0x344] ss:$16 sps:$4 sm:$0xff]   ;;  %v21124_v63 = vld [vmem:[#allocation23 + $0x34c] ss:$16 sps:$4 sm:$0xff]   ;;  %v21119_v34 = vld [vmem:[#allocation23 + $0x340] ss:$16 sps:$4 sm:$0xff]  }
0x1b52   : > { %v21122_v27 = vld [vmem:[#allocation23 + $0x348] ss:$16 sps:$4 sm:$0xff]   ;;  %v21127_v48 = vld [vmem:[#allocation23 + $0x364] ss:$16 sps:$4 sm:$0xff]   ;;  %v21130_v28 = vld [vmem:[#allocation23 + $0x36c] ss:$16 sps:$4 sm:$0xff]  }
0x1b53   : > { %v21125_v29 = vld [vmem:[#allocation23 + $0x360] ss:$16 sps:$4 sm:$0xff]   ;;  %v21128_v33 = vld [vmem:[#allocation23 + $0x368] ss:$16 sps:$4 sm:$0xff]   ;;  %v21133_v37 = vld [vmem:[#allocation23 + $0x384] ss:$16 sps:$4 sm:$0xff]  }
0x1b54   : > { %15876 = vmatpush1.bf16.msra.mxu1 %v21071_v0  ;;  %16048 = vmatpush1.bf16.msra.mxu0 %v21074_v16  ;;  %v21136_v39 = vld [vmem:[#allocation23 + $0x38c] ss:$16 sps:$4 sm:$0xff]   ;;  %v21131_v50 = vld [vmem:[#allocation23 + $0x380] ss:$16 sps:$4 sm:$0xff]   ;;  %v21134_v18 = vld [vmem:[#allocation23 + $0x388] ss:$16 sps:$4 sm:$0xff]  }
0x1b55   : > { %15877 = vmatprep.subr.bf16.mxu1 %v21079_v21  ;;  %16049 = vmatprep.subr.bf16.mxu0 %v21082_v1  ;;  %v21139_v32 = vld [vmem:[#allocation23 + $0x3a4] ss:$16 sps:$4 sm:$0xff]   ;;  %v21142_v52 = vld [vmem:[#allocation23 + $0x3ac] ss:$16 sps:$4 sm:$0xff]   ;;  %v21137_v53 = vld [vmem:[#allocation23 + $0x3a0] ss:$16 sps:$4 sm:$0xff]  }
0x1b56   : > { %v21140_v30 = vld [vmem:[#allocation23 + $0x3a8] ss:$16 sps:$4 sm:$0xff]   ;;  %v21145_v31 = vld [vmem:[#allocation23 + $0x3c4] ss:$16 sps:$4 sm:$0xff]   ;;  %v21148_v55 = vld [vmem:[#allocation23 + $0x3cc] ss:$16 sps:$4 sm:$0xff]  }
0x1b57   : > { %v21143_v56 = vld [vmem:[#allocation23 + $0x3c0] ss:$16 sps:$4 sm:$0xff]   ;;  %v21146_v57 = vld [vmem:[#allocation23 + $0x3c8] ss:$16 sps:$4 sm:$0xff]   ;;  %v21151_v59 = vld [vmem:[#allocation23 + $0x3e4] ss:$16 sps:$4 sm:$0xff]  }
0x1b58   : > { %15878 = vmatpush1.bf16.msra.mxu1 %v21077_v2  ;;  %16050 = vmatpush1.bf16.msra.mxu0 %v21080_v3  ;;  %v21154_v60 = vld [vmem:[#allocation23 + $0x3ec] ss:$16 sps:$4 sm:$0xff]   ;;  %v14219_v61 = vld [vmem:[#allocation2 + $0x48] sm:$0x1]  ;;  %v14237_v0 = vrot.slane %v23016_v24, 1  ;;  %v14238_v1 = vrot.slane %v23012_v19, 1 }
0x1b59   : > { %15879 = vmatprep.subr.bf16.mxu1 %v21085_v4  ;;  %16051 = vmatprep.subr.bf16.mxu0 %v21088_v41  ;;  %v21149_v16 = vld [vmem:[#allocation23 + $0x3e0] ss:$16 sps:$4 sm:$0xff]   ;;  %v21152_v21 = vld [vmem:[#allocation23 + $0x3e8] ss:$16 sps:$4 sm:$0xff]   ;;  %v21157_v2 = vld [vmem:[#allocation23 + $0x404] ss:$16 sps:$4 sm:$0xff]  }
0x1b5a   : > { %v21160_v3 = vld [vmem:[#allocation23 + $0x40c] ss:$16 sps:$4 sm:$0xff]   ;;  %v14248_v4 = vrot.slane %v14219_v61, 1  ;;  %v14239_v41 = vsel %vm1672_vm0, %v14237_v0, %v14238_v1  ;;  %v21158_v24 = vld [vmem:[#allocation23 + $0x408] ss:$16 sps:$4 sm:$0xff]  }
0x1b5b   : > { %v21163_v19 = vld [vmem:[#allocation23 + $0x424] ss:$16 sps:$4 sm:$0xff]   ;;  %v21224_v61 = vld [vmem:[#allocation23 + $0x568] ss:$16 sps:$4 sm:$0xff]  }
0x1b5c   : > { %15880 = vmatpush1.bf16.msra.mxu1 %v21083_v40  ;;  %16052 = vmatpush1.bf16.msra.mxu0 %v21086_v5  ;;  %v21155_v40 = vld [vmem:[#allocation23 + $0x400] ss:$16 sps:$4 sm:$0xff]   ;;  %v14264_v5 = vpack.c.bf16 %v23008_v46, %v23018_v47  ;;  %v21172_v46 = vld [vmem:[#allocation23 + $0x44c] ss:$16 sps:$4 sm:$0xff]   ;;  %v21229_v0 = vld [vmem:[#allocation23 + $0x584] ss:$16 sps:$4 sm:$0xff]  }
0x1b5d   : > { %15881 = vmatprep.subr.bf16.mxu1 %v21091_v6  ;;  %16053 = vmatprep.subr.bf16.mxu0 %v21094_v7  ;;  %v14249_v6 = vsel %vm1672_vm0, %v14238_v1, %v14248_v4  ;;  %v21167_v47 = vld [vmem:[#allocation23 + $0x440] ss:$16 sps:$4 sm:$0xff]   ;;  %v21230_v1 = vld [vmem:[#allocation23 + $0x588] ss:$16 sps:$4 sm:$0xff]  }
0x1b5e   : > { %v14267_v7 = vpack.c.bf16 %v14249_v6, %v14239_v41  ;;  %v21233_v4 = vld [vmem:[#allocation23 + $0x5a0] ss:$16 sps:$4 sm:$0xff]   ;;  %v21236_v41 = vld [vmem:[#allocation23 + $0x5a8] ss:$16 sps:$4 sm:$0xff]  }
0x1b5f   : > { %v21242_v6 = vld [vmem:[#allocation23 + $0x5c8] ss:$16 sps:$4 sm:$0xff]  }
0x1b60   : > { %15882 = vmatpush1.bf16.msra.mxu1 %v21089_v8  ;;  %16054 = vmatpush1.bf16.msra.mxu0 %v21092_v9  ;;  %v21166_v8 = vld [vmem:[#allocation23 + $0x42c] ss:$16 sps:$4 sm:$0xff]   ;;  %v21161_v9 = vld [vmem:[#allocation23 + $0x420] ss:$16 sps:$4 sm:$0xff]  }
0x1b61   : > { %15883 = vmatprep.subr.bf16.mxu1 %v21097_v10  ;;  %16055 = vmatprep.subr.bf16.mxu0 %v21100_v36  ;;  %v21164_v10 = vld [vmem:[#allocation23 + $0x428] ss:$16 sps:$4 sm:$0xff]   ;;  %v21169_v36 = vld [vmem:[#allocation23 + $0x444] ss:$16 sps:$4 sm:$0xff]  }
0x1b64   : > { %15884 = vmatpush1.bf16.msra.mxu1 %v21095_v11  ;;  %16056 = vmatpush1.bf16.msra.mxu0 %v21098_v12  ;;  %v21170_v11 = vld [vmem:[#allocation23 + $0x448] ss:$16 sps:$4 sm:$0xff]   ;;  %v21175_v12 = vld [vmem:[#allocation23 + $0x464] ss:$16 sps:$4 sm:$0xff]  }
0x1b65   : > { %15885 = vmatprep.subr.bf16.mxu1 %v21103_v35  ;;  %16057 = vmatprep.subr.bf16.mxu0 %v21106_v17  ;;  %v21178_v35 = vld [vmem:[#allocation23 + $0x46c] ss:$16 sps:$4 sm:$0xff]   ;;  %v21173_v17 = vld [vmem:[#allocation23 + $0x460] ss:$16 sps:$4 sm:$0xff]  }
0x1b68   : > { %15886 = vmatpush1.bf16.msra.mxu1 %v21101_v13  ;;  %16058 = vmatpush1.bf16.msra.mxu0 %v21104_v38  ;;  %v21176_v13 = vld [vmem:[#allocation23 + $0x468] ss:$16 sps:$4 sm:$0xff]   ;;  %v21181_v38 = vld [vmem:[#allocation23 + $0x484] ss:$16 sps:$4 sm:$0xff]  }
0x1b69   : > { %15887 = vmatprep.subr.bf16.mxu1 %v21109_v51  ;;  %16059 = vmatprep.subr.bf16.mxu0 %v21112_v15  ;;  %v21184_v51 = vld [vmem:[#allocation23 + $0x48c] ss:$16 sps:$4 sm:$0xff]   ;;  %v21179_v15 = vld [vmem:[#allocation23 + $0x480] ss:$16 sps:$4 sm:$0xff]  }
0x1b6c   : > { %15888 = vmatpush1.bf16.msra.mxu1 %v21107_v22  ;;  %16060 = vmatpush1.bf16.msra.mxu0 %v21110_v49  ;;  %v21182_v22 = vld [vmem:[#allocation23 + $0x488] ss:$16 sps:$4 sm:$0xff]   ;;  %v21187_v49 = vld [vmem:[#allocation23 + $0x4a4] ss:$16 sps:$4 sm:$0xff]  }
0x1b6d   : > { %15889 = vmatprep.subr.bf16.mxu1 %v21115_v14  ;;  %16061 = vmatprep.subr.bf16.mxu0 %v21118_v20  ;;  %v21190_v14 = vld [vmem:[#allocation23 + $0x4ac] ss:$16 sps:$4 sm:$0xff]   ;;  %v21185_v20 = vld [vmem:[#allocation23 + $0x4a0] ss:$16 sps:$4 sm:$0xff]  }
0x1b70   : > { %15890 = vmatpush1.bf16.msra.mxu1 %v21113_v23  ;;  %16062 = vmatpush1.bf16.msra.mxu0 %v21116_v25  ;;  %v21188_v23 = vld [vmem:[#allocation23 + $0x4a8] ss:$16 sps:$4 sm:$0xff]   ;;  %v21193_v25 = vld [vmem:[#allocation23 + $0x4c4] ss:$16 sps:$4 sm:$0xff]  }
0x1b71   : > { %15891 = vmatprep.subr.bf16.mxu1 %v21121_v26  ;;  %16063 = vmatprep.subr.bf16.mxu0 %v21124_v63  ;;  %v21196_v26 = vld [vmem:[#allocation23 + $0x4cc] ss:$16 sps:$4 sm:$0xff]   ;;  %v21191_v63 = vld [vmem:[#allocation23 + $0x4c0] ss:$16 sps:$4 sm:$0xff]  }
0x1b74   : > { %15892 = vmatpush1.bf16.msra.mxu1 %v21119_v34  ;;  %16064 = vmatpush1.bf16.msra.mxu0 %v21122_v27  ;;  %v21194_v34 = vld [vmem:[#allocation23 + $0x4c8] ss:$16 sps:$4 sm:$0xff]   ;;  %v21199_v27 = vld [vmem:[#allocation23 + $0x4e4] ss:$16 sps:$4 sm:$0xff]  }
0x1b75   : > { %15893 = vmatprep.subr.bf16.mxu1 %v21127_v48  ;;  %16065 = vmatprep.subr.bf16.mxu0 %v21130_v28  ;;  %v21202_v48 = vld [vmem:[#allocation23 + $0x4ec] ss:$16 sps:$4 sm:$0xff]   ;;  %v21197_v28 = vld [vmem:[#allocation23 + $0x4e0] ss:$16 sps:$4 sm:$0xff]  }
0x1b78   : > { %15894 = vmatpush1.bf16.msra.mxu1 %v21125_v29  ;;  %16066 = vmatpush1.bf16.msra.mxu0 %v21128_v33  ;;  %v21200_v29 = vld [vmem:[#allocation23 + $0x4e8] ss:$16 sps:$4 sm:$0xff]   ;;  %v21205_v33 = vld [vmem:[#allocation23 + $0x504] ss:$16 sps:$4 sm:$0xff]  }
0x1b79   : > { %15895 = vmatprep.subr.bf16.mxu1 %v21133_v37  ;;  %16067 = vmatprep.subr.bf16.mxu0 %v21136_v39  ;;  %v21208_v37 = vld [vmem:[#allocation23 + $0x50c] ss:$16 sps:$4 sm:$0xff]   ;;  %v21203_v39 = vld [vmem:[#allocation23 + $0x500] ss:$16 sps:$4 sm:$0xff]  }
0x1b7c   : > { %15896 = vmatpush1.bf16.msra.mxu1 %v21131_v50  ;;  %16068 = vmatpush1.bf16.msra.mxu0 %v21134_v18  ;;  %v21206_v50 = vld [vmem:[#allocation23 + $0x508] ss:$16 sps:$4 sm:$0xff]   ;;  %v21211_v18 = vld [vmem:[#allocation23 + $0x524] ss:$16 sps:$4 sm:$0xff]  }
0x1b7d   : > { %15897 = vmatprep.subr.bf16.mxu1 %v21139_v32  ;;  %16069 = vmatprep.subr.bf16.mxu0 %v21142_v52  ;;  %v21214_v32 = vld [vmem:[#allocation23 + $0x52c] ss:$16 sps:$4 sm:$0xff]   ;;  %v21209_v52 = vld [vmem:[#allocation23 + $0x520] ss:$16 sps:$4 sm:$0xff]  }
0x1b80   : > { %15898 = vmatpush1.bf16.msra.mxu1 %v21137_v53  ;;  %16070 = vmatpush1.bf16.msra.mxu0 %v21140_v30  ;;  %v21212_v53 = vld [vmem:[#allocation23 + $0x528] ss:$16 sps:$4 sm:$0xff]   ;;  %v21217_v30 = vld [vmem:[#allocation23 + $0x544] ss:$16 sps:$4 sm:$0xff]  }
0x1b81   : > { %15899 = vmatprep.subr.bf16.mxu1 %v21145_v31  ;;  %16071 = vmatprep.subr.bf16.mxu0 %v21148_v55  ;;  %v21220_v31 = vld [vmem:[#allocation23 + $0x54c] ss:$16 sps:$4 sm:$0xff]   ;;  %v21215_v55 = vld [vmem:[#allocation23 + $0x540] ss:$16 sps:$4 sm:$0xff]  }
0x1b84   : > { %15900 = vmatpush1.bf16.msra.mxu1 %v21143_v56  ;;  %16072 = vmatpush1.bf16.msra.mxu0 %v21146_v57  ;;  %v21218_v56 = vld [vmem:[#allocation23 + $0x548] ss:$16 sps:$4 sm:$0xff]   ;;  %v21223_v57 = vld [vmem:[#allocation23 + $0x564] ss:$16 sps:$4 sm:$0xff]  }
0x1b85   : > { %15901 = vmatprep.subr.bf16.mxu1 %v21151_v59  ;;  %16073 = vmatprep.subr.bf16.mxu0 %v21154_v60  ;;  %v21226_v59 = vld [vmem:[#allocation23 + $0x56c] ss:$16 sps:$4 sm:$0xff]   ;;  %v21221_v60 = vld [vmem:[#allocation23 + $0x560] ss:$16 sps:$4 sm:$0xff]  }
0x1b88   : > { %15902 = vmatpush1.bf16.msra.mxu1 %v21149_v16  ;;  %16074 = vmatpush1.bf16.msra.mxu0 %v21152_v21  ;;  %v21232_v16 = vld [vmem:[#allocation23 + $0x58c] ss:$16 sps:$4 sm:$0xff]   ;;  %v21227_v21 = vld [vmem:[#allocation23 + $0x580] ss:$16 sps:$4 sm:$0xff]  }
0x1b89   : > { %15914 = vmatprep.subr.bf16.mxu1 %v21157_v2  ;;  %16086 = vmatprep.subr.bf16.mxu0 %v21160_v3  ;;  %v21235_v2 = vld [vmem:[#allocation23 + $0x5a4] ss:$16 sps:$4 sm:$0xff]   ;;  %v21238_v3 = vld [vmem:[#allocation23 + $0x5ac] ss:$16 sps:$4 sm:$0xff]  }
0x1b8b   : > { %15904 = vmatmul.mubr.bf16.vlgmr.msra.gmra.mrb[84].mxu1 %v14264_v5  ;;  %16076 = vmatmul.mubr.bf16.vlgmr.msra.gmra.mrb[72].mxu0 %v14264_v5  ;;  %v21244_v5 = vld [vmem:[#allocation23 + $0x5cc] ss:$16 sps:$4 sm:$0xff]  }
0x1b8c   : > { %15915 = vmatpush1.bf16.msra.mxu1 %v21155_v40  ;;  %15946 = vmatprep.mubr.bf16.mxu1 %v14267_v7  ;;  %v21241_v40 = vld [vmem:[#allocation23 + $0x5c4] ss:$16 sps:$4 sm:$0xff]  }
0x1b8d   : > { %16087 = vmatpush1.bf16.msra.mxu0 %v21158_v24  ;;  %16118 = vmatprep.mubr.bf16.mxu0 %v14267_v7  ;;  %v21239_v24 = vld [vmem:[#allocation23 + $0x5c0] ss:$16 sps:$4 sm:$0xff]   ;;  %v21247_v7 = vld [vmem:[#allocation23 + $0x5e4] ss:$16 sps:$4 sm:$0xff]  }
0x1b8e   : > { %15916 = vmatprep.subr.bf16.mxu1 %v21163_v19  ;;  %16088 = vmatprep.subr.bf16.mxu0 %v21166_v8  ;;  %v21250_v19 = vld [vmem:[#allocation23 + $0x5ec] ss:$16 sps:$4 sm:$0xff]   ;;  %v21245_v8 = vld [vmem:[#allocation23 + $0x5e0] ss:$16 sps:$4 sm:$0xff]  }
0x1b90   : > { %15917 = vmatpush1.bf16.msra.mxu1 %v21161_v9  ;;  %v21248_v9 = vld [vmem:[#allocation23 + $0x5e8] ss:$16 sps:$4 sm:$0xff]  }
0x1b91   : > { %16089 = vmatpush1.bf16.msra.mxu0 %v21164_v10  ;;  %15918 = vmatprep.subr.bf16.mxu1 %v21169_v36  ;;  %v21253_v10 = vld [vmem:[#allocation23 + $0x604] ss:$16 sps:$4 sm:$0xff]   ;;  %v21256_v36 = vld [vmem:[#allocation23 + $0x60c] ss:$16 sps:$4 sm:$0xff]  }
0x1b92   : > { %16090 = vmatprep.subr.bf16.mxu0 %v21172_v46  ;;  %v21251_v46 = vld [vmem:[#allocation23 + $0x600] ss:$16 sps:$4 sm:$0xff]  }
0x1b94   : > { %15919 = vmatpush1.bf16.msra.mxu1 %v21167_v47  ;;  %v21254_v47 = vld [vmem:[#allocation23 + $0x608] ss:$16 sps:$4 sm:$0xff]  }
0x1b95   : > { %16091 = vmatpush1.bf16.msra.mxu0 %v21170_v11  ;;  %15920 = vmatprep.subr.bf16.mxu1 %v21175_v12  ;;  %v21259_v11 = vld [vmem:[#allocation23 + $0x624] ss:$16 sps:$4 sm:$0xff]   ;;  %v21262_v12 = vld [vmem:[#allocation23 + $0x62c] ss:$16 sps:$4 sm:$0xff]  }
0x1b96   : > { %16092 = vmatprep.subr.bf16.mxu0 %v21178_v35  ;;  %v21257_v35 = vld [vmem:[#allocation23 + $0x620] ss:$16 sps:$4 sm:$0xff]  }
0x1b98   : > { %15921 = vmatpush1.bf16.msra.mxu1 %v21173_v17  ;;  %v21260_v17 = vld [vmem:[#allocation23 + $0x628] ss:$16 sps:$4 sm:$0xff]  }
0x1b99   : > { %16093 = vmatpush1.bf16.msra.mxu0 %v21176_v13  ;;  %15922 = vmatprep.subr.bf16.mxu1 %v21181_v38  ;;  %v21265_v13 = vld [vmem:[#allocation23 + $0x644] ss:$16 sps:$4 sm:$0xff]   ;;  %v21268_v38 = vld [vmem:[#allocation23 + $0x64c] ss:$16 sps:$4 sm:$0xff]  }
0x1b9a   : > { %16094 = vmatprep.subr.bf16.mxu0 %v21184_v51  ;;  %v21263_v51 = vld [vmem:[#allocation23 + $0x640] ss:$16 sps:$4 sm:$0xff]  }
0x1b9c   : > { %15923 = vmatpush1.bf16.msra.mxu1 %v21179_v15  ;;  %v21266_v15 = vld [vmem:[#allocation23 + $0x648] ss:$16 sps:$4 sm:$0xff]  }
0x1b9d   : > { %16095 = vmatpush1.bf16.msra.mxu0 %v21182_v22  ;;  %15924 = vmatprep.subr.bf16.mxu1 %v21187_v49  ;;  %v21271_v22 = vld [vmem:[#allocation23 + $0x664] ss:$16 sps:$4 sm:$0xff]   ;;  %v21269_v49 = vld [vmem:[#allocation23 + $0x660] ss:$16 sps:$4 sm:$0xff]  }
0x1b9e   : > { %16096 = vmatprep.subr.bf16.mxu0 %v21190_v14  ;;  %v21272_v14 = vld [vmem:[#allocation23 + $0x668] ss:$16 sps:$4 sm:$0xff]  }
0x1ba0   : > { %15925 = vmatpush1.bf16.msra.mxu1 %v21185_v20  ;;  %v21277_v20 = vld [vmem:[#allocation23 + $0x684] ss:$16 sps:$4 sm:$0xff]  }
0x1ba1   : > { %16097 = vmatpush1.bf16.msra.mxu0 %v21188_v23  ;;  %15926 = vmatprep.subr.bf16.mxu1 %v21193_v25  ;;  %v21280_v23 = vld [vmem:[#allocation23 + $0x68c] ss:$16 sps:$4 sm:$0xff]   ;;  %v21278_v25 = vld [vmem:[#allocation23 + $0x688] ss:$16 sps:$4 sm:$0xff]  }
0x1ba2   : > { %16098 = vmatprep.subr.bf16.mxu0 %v21196_v26  ;;  %v21283_v26 = vld [vmem:[#allocation23 + $0x6a4] ss:$16 sps:$4 sm:$0xff]  }
0x1ba4   : > { %15927 = vmatpush1.bf16.msra.mxu1 %v21191_v63  ;;  %v21286_v63 = vld [vmem:[#allocation23 + $0x6ac] ss:$16 sps:$4 sm:$0xff]  }
0x1ba5   : > { %16099 = vmatpush1.bf16.msra.mxu0 %v21194_v34  ;;  %15928 = vmatprep.subr.bf16.mxu1 %v21199_v27  ;;  %v21281_v34 = vld [vmem:[#allocation23 + $0x6a0] ss:$16 sps:$4 sm:$0xff]   ;;  %v21284_v27 = vld [vmem:[#allocation23 + $0x6a8] ss:$16 sps:$4 sm:$0xff]  }
0x1ba6   : > { %16100 = vmatprep.subr.bf16.mxu0 %v21202_v48  ;;  %v21289_v48 = vld [vmem:[#allocation23 + $0x6c4] ss:$16 sps:$4 sm:$0xff]  }
0x1ba8   : > { %15929 = vmatpush1.bf16.msra.mxu1 %v21197_v28  ;;  %v21292_v28 = vld [vmem:[#allocation23 + $0x6cc] ss:$16 sps:$4 sm:$0xff]  }
0x1ba9   : > { %16101 = vmatpush1.bf16.msra.mxu0 %v21200_v29  ;;  %15930 = vmatprep.subr.bf16.mxu1 %v21205_v33  ;;  %v21287_v29 = vld [vmem:[#allocation23 + $0x6c0] ss:$16 sps:$4 sm:$0xff]   ;;  %v21290_v33 = vld [vmem:[#allocation23 + $0x6c8] ss:$16 sps:$4 sm:$0xff]  }
0x1baa   : > { %16102 = vmatprep.subr.bf16.mxu0 %v21208_v37  ;;  %v21295_v37 = vld [vmem:[#allocation23 + $0x6e4] ss:$16 sps:$4 sm:$0xff]  }
0x1bac   : > { %15931 = vmatpush1.bf16.msra.mxu1 %v21203_v39  ;;  %v21298_v39 = vld [vmem:[#allocation23 + $0x6ec] ss:$16 sps:$4 sm:$0xff]  }
0x1bad   : > { %16103 = vmatpush1.bf16.msra.mxu0 %v21206_v50  ;;  %15932 = vmatprep.subr.bf16.mxu1 %v21211_v18  ;;  %v21293_v50 = vld [vmem:[#allocation23 + $0x6e0] ss:$16 sps:$4 sm:$0xff]   ;;  %v21296_v18 = vld [vmem:[#allocation23 + $0x6e8] ss:$16 sps:$4 sm:$0xff]  }
0x1bae   : > { %16104 = vmatprep.subr.bf16.mxu0 %v21214_v32  ;;  %v21301_v32 = vld [vmem:[#allocation23 + $0x704] ss:$16 sps:$4 sm:$0xff]  }
0x1bb0   : > { %15933 = vmatpush1.bf16.msra.mxu1 %v21209_v52  ;;  %v21304_v52 = vld [vmem:[#allocation23 + $0x70c] ss:$16 sps:$4 sm:$0xff]  }
0x1bb1   : > { %16105 = vmatpush1.bf16.msra.mxu0 %v21212_v53  ;;  %15934 = vmatprep.subr.bf16.mxu1 %v21217_v30  ;;  %v21299_v53 = vld [vmem:[#allocation23 + $0x700] ss:$16 sps:$4 sm:$0xff]   ;;  %v21302_v30 = vld [vmem:[#allocation23 + $0x708] ss:$16 sps:$4 sm:$0xff]  }
0x1bb2   : > { %16106 = vmatprep.subr.bf16.mxu0 %v21220_v31  ;;  %v21307_v31 = vld [vmem:[#allocation23 + $0x724] ss:$16 sps:$4 sm:$0xff]  }
0x1bb4   : > { %15935 = vmatpush1.bf16.msra.mxu1 %v21215_v55  ;;  %v21310_v55 = vld [vmem:[#allocation23 + $0x72c] ss:$16 sps:$4 sm:$0xff]  }
0x1bb5   : > { %16107 = vmatpush1.bf16.msra.mxu0 %v21218_v56  ;;  %15936 = vmatprep.subr.bf16.mxu1 %v21223_v57  ;;  %v21305_v56 = vld [vmem:[#allocation23 + $0x720] ss:$16 sps:$4 sm:$0xff]   ;;  %v21308_v57 = vld [vmem:[#allocation23 + $0x728] ss:$16 sps:$4 sm:$0xff]  }
0x1bb6   : > { %16108 = vmatprep.subr.bf16.mxu0 %v21226_v59  ;;  %v21313_v59 = vld [vmem:[#allocation23 + $0x744] ss:$16 sps:$4 sm:$0xff]  }
0x1bb8   : > { %15937 = vmatpush1.bf16.msra.mxu1 %v21221_v60  ;;  %v21316_v60 = vld [vmem:[#allocation23 + $0x74c] ss:$16 sps:$4 sm:$0xff]  }
0x1bb9   : > { %16109 = vmatpush1.bf16.msra.mxu0 %v21224_v61  ;;  %15938 = vmatprep.subr.bf16.mxu1 %v21229_v0  ;;  %v21311_v61 = vld [vmem:[#allocation23 + $0x740] ss:$16 sps:$4 sm:$0xff]   ;;  %v21314_v0 = vld [vmem:[#allocation23 + $0x748] ss:$16 sps:$4 sm:$0xff]  }
0x1bba   : > { %16110 = vmatprep.subr.bf16.mxu0 %v21232_v16  ;;  %v21319_v16 = vld [vmem:[#allocation23 + $0x764] ss:$16 sps:$4 sm:$0xff]  }
0x1bbc   : > { %15939 = vmatpush1.bf16.msra.mxu1 %v21227_v21  ;;  %v21322_v21 = vld [vmem:[#allocation23 + $0x76c] ss:$16 sps:$4 sm:$0xff]  }
0x1bbd   : > { %16111 = vmatpush1.bf16.msra.mxu0 %v21230_v1  ;;  %15940 = vmatprep.subr.bf16.mxu1 %v21235_v2  ;;  %v21317_v1 = vld [vmem:[#allocation23 + $0x760] ss:$16 sps:$4 sm:$0xff]   ;;  %v21320_v2 = vld [vmem:[#allocation23 + $0x768] ss:$16 sps:$4 sm:$0xff]  }
0x1bbe   : > { %16112 = vmatprep.subr.bf16.mxu0 %v21238_v3  ;;  %v21325_v3 = vld [vmem:[#allocation23 + $0x784] ss:$16 sps:$4 sm:$0xff]  }
0x1bc0   : > { %15941 = vmatpush1.bf16.msra.mxu1 %v21233_v4  ;;  %v21328_v4 = vld [vmem:[#allocation23 + $0x78c] ss:$16 sps:$4 sm:$0xff]  }
0x1bc1   : > { %16113 = vmatpush1.bf16.msra.mxu0 %v21236_v41  ;;  %15942 = vmatprep.subr.bf16.mxu1 %v21241_v40  ;;  %v21323_v41 = vld [vmem:[#allocation23 + $0x780] ss:$16 sps:$4 sm:$0xff]   ;;  %v21326_v40 = vld [vmem:[#allocation23 + $0x788] ss:$16 sps:$4 sm:$0xff]  }
0x1bc2   : > { %16114 = vmatprep.subr.bf16.mxu0 %v21244_v5  ;;  %v21331_v5 = vld [vmem:[#allocation23 + $0x7a4] ss:$16 sps:$4 sm:$0xff]  }
0x1bc4   : > { %15943 = vmatpush1.bf16.msra.mxu1 %v21239_v24  ;;  %v21334_v24 = vld [vmem:[#allocation23 + $0x7ac] ss:$16 sps:$4 sm:$0xff]  }
0x1bc5   : > { %16115 = vmatpush1.bf16.msra.mxu0 %v21242_v6  ;;  %15944 = vmatprep.subr.bf16.mxu1 %v21247_v7  ;;  %v21329_v6 = vld [vmem:[#allocation23 + $0x7a0] ss:$16 sps:$4 sm:$0xff]   ;;  %v21332_v7 = vld [vmem:[#allocation23 + $0x7a8] ss:$16 sps:$4 sm:$0xff]  }
0x1bc6   : > { %16116 = vmatprep.subr.bf16.mxu0 %v21250_v19  ;;  %v21337_v19 = vld [vmem:[#allocation23 + $0x7c4] ss:$16 sps:$4 sm:$0xff]  }
0x1bc8   : > { %15945 = vmatpush1.bf16.msra.mxu1 %v21245_v8  ;;  %v21340_v8 = vld [vmem:[#allocation23 + $0x7cc] ss:$16 sps:$4 sm:$0xff]  }
0x1bc9   : > { %16117 = vmatpush1.bf16.msra.mxu0 %v21248_v9  ;;  %15957 = vmatprep.subr.bf16.mxu1 %v21253_v10  ;;  %v21335_v9 = vld [vmem:[#allocation23 + $0x7c0] ss:$16 sps:$4 sm:$0xff]   ;;  %v21338_v10 = vld [vmem:[#allocation23 + $0x7c8] ss:$16 sps:$4 sm:$0xff]  }
0x1bca   : > { %16129 = vmatprep.subr.bf16.mxu0 %v21256_v36  ;;  %v21343_v36 = vld [vmem:[#allocation23 + $0x7e4] ss:$16 sps:$4 sm:$0xff]  }
0x1bcb   : > { %15947 = vmatmul.mubr.bf16.vlgmr.msra.gmra.mrb[84].mxu1 %v23026_v54 }
0x1bcc   : > { %16119 = vmatmul.mubr.bf16.vlgmr.msra.gmra.mrb[72].mxu0 %v23026_v54  ;;  %15958 = vmatpush1.bf16.msra.mxu1 %v21251_v46  ;;  %v21274_v54 = vld [vmem:[#allocation23 + $0x66c] ss:$16 sps:$4 sm:$0xff]  }
0x1bcd   : > { %15989 = vmatprep.mubr.bf16.mxu1 %v23031_v58  ;;  %16130 = vmatpush1.bf16.msra.mxu0 %v21254_v47  ;;  %v21346_v46 = vld [vmem:[#allocation23 + $0x7ec] ss:$16 sps:$4 sm:$0xff]   ;;  %v21341_v47 = vld [vmem:[#allocation23 + $0x7e0] ss:$16 sps:$4 sm:$0xff]  }
0x1bce   : > { %16161 = vmatprep.mubr.bf16.mxu0 %v23031_v58  ;;  %15959 = vmatprep.subr.bf16.mxu1 %v21259_v11  ;;  %v21275_v58 = vld [vmem:[#allocation23 + $0x680] ss:$16 sps:$4 sm:$0xff]   ;;  %v21344_v11 = vld [vmem:[#allocation23 + $0x7e8] ss:$16 sps:$4 sm:$0xff]  }
0x1bcf   : > { %16131 = vmatprep.subr.bf16.mxu0 %v21262_v12  ;;  %v14526_v12 = vld [vmem:[%s23260_s22] sm:$0xf]  ;;  %s21713_s22 = scalar_lea.vmem %s23056_s2, 1024 }
0x1bd0   : > { %15960 = vmatpush1.bf16.msra.mxu1 %v21257_v35  ;;  %v14531_v35 = vrot.slane %v14526_v12, %v22525_v42  ;;  %p21714_p0 = scmp.ne.s32.totalorder %s23056_s2, %s21713_s22  ;;  %p21721_p4 = scmp.lt.s32.totalorder %s21719_s9, %s21713_s22 }
0x1bd1   : > { %16132 = vmatpush1.bf16.msra.mxu0 %v21260_v17  ;;  %15961 = vmatprep.subr.bf16.mxu1 %v21265_v13  ;;  %v14539_v17 = vrot.slane %v14526_v12, %v22527_v43  ;;  %v14535_v13 = vrot.slane %v14526_v12, %v22529_v44 }
0x1bd2   : > { %16133 = vmatprep.subr.bf16.mxu0 %v21268_v38  ;;  %v14543_v38 = vrot.slane %v14526_v12, %v22531_v45  ;;  %p21715_p13 = pnand %p21714_p0, %p23263_p6  ;;  %p21722_p10 = por %p21721_p4, %p21720_p8 }
0x1bd4   : > { %15962 = vmatpush1.bf16.msra.mxu1 %v21263_v51  ;;  %p21716_p2 = pneg %p21715_p13 }
0x1bd5   : > { %16134 = vmatpush1.bf16.msra.mxu0 %v21266_v15  ;;  %15963 = vmatprep.subr.bf16.mxu1 %v21271_v22 }
0x1bd6   : > { %16135 = vmatprep.subr.bf16.mxu0 %v21274_v54  ;;  %p21723_p3 = pnand %p21722_p10, %p21716_p2 }
0x1bd8   : > { %15964 = vmatpush1.bf16.msra.mxu1 %v21269_v49 }
0x1bd9   : > { %16136 = vmatpush1.bf16.msra.mxu0 %v21272_v14  ;;  %15965 = vmatprep.subr.bf16.mxu1 %v21277_v20 }
0x1bda   : > { %16137 = vmatprep.subr.bf16.mxu0 %v21280_v23 }
0x1bdc   : > { %15966 = vmatpush1.bf16.msra.mxu1 %v21275_v58 }
0x1bdd   : > { %16138 = vmatpush1.bf16.msra.mxu0 %v21278_v25  ;;  %15967 = vmatprep.subr.bf16.mxu1 %v21283_v26 }
0x1bde   : > { %16139 = vmatprep.subr.bf16.mxu0 %v21286_v63 }
0x1be0   : > { %15968 = vmatpush1.bf16.msra.mxu1 %v21281_v34 }
0x1be1   : > { %16140 = vmatpush1.bf16.msra.mxu0 %v21284_v27  ;;  %15969 = vmatprep.subr.bf16.mxu1 %v21289_v48 }
0x1be2   : > { %16141 = vmatprep.subr.bf16.mxu0 %v21292_v28 }
0x1be4   : > { %15970 = vmatpush1.bf16.msra.mxu1 %v21287_v29 }
0x1be5   : > { %16142 = vmatpush1.bf16.msra.mxu0 %v21290_v33  ;;  %15971 = vmatprep.subr.bf16.mxu1 %v21295_v37 }
0x1be6   : > { %16143 = vmatprep.subr.bf16.mxu0 %v21298_v39 }
0x1be8   : > { %15972 = vmatpush1.bf16.msra.mxu1 %v21293_v50 }
0x1be9   : > { %16144 = vmatpush1.bf16.msra.mxu0 %v21296_v18  ;;  %15973 = vmatprep.subr.bf16.mxu1 %v21301_v32 }
0x1bea   : > { %16145 = vmatprep.subr.bf16.mxu0 %v21304_v52 }
0x1bec   : > { %15974 = vmatpush1.bf16.msra.mxu1 %v21299_v53 }
0x1bed   : > { %16146 = vmatpush1.bf16.msra.mxu0 %v21302_v30  ;;  %15975 = vmatprep.subr.bf16.mxu1 %v21307_v31 }
0x1bee   : > { %16147 = vmatprep.subr.bf16.mxu0 %v21310_v55 }
0x1bf0   : > { %15976 = vmatpush1.bf16.msra.mxu1 %v21305_v56 }
0x1bf1   : > { %16148 = vmatpush1.bf16.msra.mxu0 %v21308_v57  ;;  %15977 = vmatprep.subr.bf16.mxu1 %v21313_v59 }
0x1bf2   : > { %16149 = vmatprep.subr.bf16.mxu0 %v21316_v60 }
0x1bf4   : > { %15978 = vmatpush1.bf16.msra.mxu1 %v21311_v61 }
0x1bf5   : > { %16150 = vmatpush1.bf16.msra.mxu0 %v21314_v0  ;;  %15979 = vmatprep.subr.bf16.mxu1 %v21319_v16 }
0x1bf6   : > { %16151 = vmatprep.subr.bf16.mxu0 %v21322_v21 }
0x1bf8   : > { %15980 = vmatpush1.bf16.msra.mxu1 %v21317_v1 }
0x1bf9   : > { %16152 = vmatpush1.bf16.msra.mxu0 %v21320_v2  ;;  %15981 = vmatprep.subr.bf16.mxu1 %v21325_v3 }
0x1bfa   : > { %16153 = vmatprep.subr.bf16.mxu0 %v21328_v4 }
0x1bfc   : > { %15982 = vmatpush1.bf16.msra.mxu1 %v21323_v41 }
0x1bfd   : > { %16154 = vmatpush1.bf16.msra.mxu0 %v21326_v40  ;;  %15983 = vmatprep.subr.bf16.mxu1 %v21331_v5 }
0x1bfe   : > { %16155 = vmatprep.subr.bf16.mxu0 %v21334_v24 }
0x1c00   : > { %15984 = vmatpush1.bf16.msra.mxu1 %v21329_v6 }
0x1c01   : > { %16156 = vmatpush1.bf16.msra.mxu0 %v21332_v7  ;;  %15985 = vmatprep.subr.bf16.mxu1 %v21337_v19 }
0x1c02   : > { %16157 = vmatprep.subr.bf16.mxu0 %v21340_v8 }
0x1c04   : > { %15986 = vmatpush1.bf16.msra.mxu1 %v21335_v9 }
0x1c05   : > { %16158 = vmatpush1.bf16.msra.mxu0 %v21338_v10  ;;  %15987 = vmatprep.subr.bf16.mxu1 %v21343_v36 }
0x1c06   : > { %16159 = vmatprep.subr.bf16.mxu0 %v21346_v46 }
0x1c08   : > { %15988 = vmatpush1.bf16.msra.mxu1 %v21341_v47 }
0x1c09   : > { %16160 = vmatpush1.bf16.msra.mxu0 %v21344_v11 }
0x1c0b   : > { %15990 = vmatmul.mubr.bf16.vlgmr.msra.gmra.mrb[84].mxu1 %v23034_v62 }
0x1c0c   : > { %16162 = vmatmul.mubr.bf16.vlgmr.msra.gmra.mrb[72].mxu0 %v23034_v62 }
0x1cde   : > { %v15991_v51 = vpop.f32.mrb[84].mxu1 }
0x1cdf   : > { %v18533_v15 = vadd.f32 %v15991_v51, %v14531_v35  ;;  %v16163_v22 = vpop.f32.mrb[72].mxu0  ;;  %v15993_v54 = vpop.f32.mrb[85].mxu1 }
0x1ce0   : > { %v18537_v49 = vadd.f32 %v16163_v22, %v14539_v17  ;;  %v18534_v62 = vadd.f32 %v15993_v54, %v14535_v13  ;;  %v16165_v14 = vpop.f32.mrb[73].mxu0  ;;  %v15995_v20 = vpop.f32.mrb[86].mxu1 }
0x1ce1   : > { %16172 = vst [vmem:[%s1654_s1] sm:$0xff] %v18533_v15  ;;  %v18538_v42 = vadd.f32 %v16165_v14, %v14543_v38  ;;  %v18535_v43 = vadd.f32 %v15995_v20, %v14531_v35  ;;  %v16167_v44 = vpop.f32.mrb[74].mxu0  ;;  %v15997_v45 = vpop.f32.mrb[87].mxu1 }
0x1ce2   : > { %16174 = vst [vmem:[%s1654_s1 + $0x10] sm:$0xff] %v18537_v49  ;;  %16173 = vst [vmem:[%s1654_s1 + $0x8] sm:$0xff] %v18534_v62  ;;  %v18539_v23 = vadd.f32 %v16167_v44, %v14539_v17  ;;  %v18536_v58 = vadd.f32 %v15997_v45, %v14535_v13  ;;  %v16169_v25 = vpop.f32.mrb[75].mxu0 }
0x1ce3   : > { %16175 = vst [vmem:[%s1654_s1 + $0x18] sm:$0xff] %v18538_v42  ;;  %16176 = vst [vmem:[%s1654_s1 + $0x20] sm:$0xff] %v18535_v43  ;;  %v18540_v26 = vadd.f32 %v16169_v25, %v14543_v38 }
0x1ce4   : > { %16178 = vst [vmem:[%s1654_s1 + $0x30] sm:$0xff] %v18539_v23  ;;  %16177 = vst [vmem:[%s1654_s1 + $0x28] sm:$0xff] %v18536_v58 }
0x1ce5   : > { %16179 = vst [vmem:[%s1654_s1 + $0x38] sm:$0xff] %v18540_v26 }
0x1ce6   : > { %21726 = shalt.err (!%p21723_p3)
}
0x1ce7   : > { %s21727_s3 = scalar_lea.hbm %s23059_s18, 1024  ;;  %s21731_s6 = scalar_lea.hbm %s23262_s5, 2048 }
0x1ce8   : > { %p21728_p11 = scmp.ne.s32.totalorder %s23059_s18, %s21727_s3  ;;  %p21732_p7 = scmp.lt.u32.totalorder %s23059_s18, %s23262_s5 }
0x1ce9   : > { %p21733_p1 = scmp.lt.u32.totalorder %s21731_s6, %s21727_s3  ;;  %p21735_p0 = scmp.lt.u32.totalorder %s21727_s3, %s23059_s18 }
0x1cea   : > { %p21729_p12 = pnand %p21728_p11, %p23263_p6 }
0x1ceb   : > { %p21734_p9 = por %p21733_p1, %p21732_p7 }
0x1cec   : > { %p21730_p5 = pneg %p21729_p12 }
0x1ced   : > { %p21736_p13 = por %p21735_p0, %p21734_p9 }
0x1cef   : > { %p21737_p2 = pnand %p21736_p13, %p21730_p5 }
0x1cf1   : > { %21740 = shalt.err (!%p21737_p2)
}
0x1cf2   : > { %s21878_s8 = smov 512   ;;  %s21879_s1 = smov 32  }
0x1cf3   : > { %18723 = dma.vmem_to_hbm [thread:$0]  (%p23263_p6), %s23056_s2, 1024, %s23059_s18, %s16181_s0, %s21878_s8, %s21878_s8, %s21879_s1  }
0x1cf4 PF: > { %s16209_s9 = sand.u32 1, %s21791_s7   ;;  %p23264_p8 = scmp.ne.s32.totalorder %s23207_s4, 0 }
0x1cf5   : > { %p23265_p4 = scmp.ge.s32.totalorder %s21803_s15, 2  ;;  %s16210_s22 = scalar_lea.sflag [#allocation5], %s16209_s9 }
0x1cf7   : > { %p18767_p10 = pnand %p23265_p4, %p23264_p8 }
0x1cf9   : > { %21786 = dma.done.wait (!%p18767_p10), %s16210_s22, 1024  }
0x1cfa   : > { %21788 = vsyncadd (!%p18767_p10), %s16210_s22, 4294966272  ;;  %p118_p3 = scmp.ge.s32.totalorder %s22355_s21, 4   ;;  %s23266_s7 = smov %s21795_s10 }
0x1cfb   : > { %s23267_s10 = smov %s21799_s11  ;;  %s23268_s11 = smov %s22366_s23 }
0x1cfc   : > { %s23269_s15 = smov %s22355_s21  ;;  %120 = sbr.rel (!%p118_p3) target bundleno = 119 (0x77), region = 363 }
0x1d03   :  { %16215 = vsyncpa [#allocation4], 1 }
0x1d04   :  { %16217 = vsyncpa [#allocation4 + $0x1], 1 }
0x1d05   :  { %16218 = vsyncpa [#allocation7], 1 }
0x1d06   :  { %16219 = vsyncpa [#allocation10], 1 }
0x1d07   :  { %16220 = vsyncpa [#allocation13], 1 }
0x1d08   :  { %16221 = vsyncpa [#allocation16], 1 }
0x1d09   :  { %16222 = vsyncpa [#allocation19], 1 }
0x1d0a   :  { %16223 = vsyncpa [#allocation22], 1 }
0x1d0b   :  { %16224 = vsyncpa [#allocation5], 1 }
0x1d0c   :  { %16226 = vsyncpa [#allocation5 + $0x1], 1 }

</bundles_post_ra>
